<compile_context>
chip_gen: v5e
topology: v5e:2x2
jax: 0.10.0
libtpu: 0.0.40
codegen_flags: <defaults>
</compile_context>

<pallas_src>
import math
import functools

import numpy as np
import jax
import jax.numpy as jnp
from jax.experimental import pallas as pl
from jax.experimental.pallas import tpu as pltpu


# ----------------------------- BlockSpec / misc helpers ------------------------

def _batch_spec(shape):
    """Per-batch-element block: leading (batch) dim squeezed, rest full."""
    rest = (0,) * (len(shape) - 1)
    return pl.BlockSpec((None,) + tuple(shape[1:]), lambda b, r=rest: (b,) + r)


def _const_spec(shape):
    """Whole-array block, same for every grid step (weights / tables)."""
    zeros = (0,) * len(shape)
    return pl.BlockSpec(tuple(shape), lambda b, z=zeros: z)


_PARAMS = pltpu.CompilerParams(dimension_semantics=("parallel",),
                               vmem_limit_bytes=64 * 1024 * 1024)


def _cost(flops, bytes_accessed):
    return pl.CostEstimate(flops=int(flops), transcendentals=0,
                           bytes_accessed=int(bytes_accessed))


def _wbytes(ws):
    return sum(int(np.prod(w.shape)) * w.dtype.itemsize for w in ws)


# ----------------------------- Pallas kernels ---------------------------------
#
# Stride-2 3x3 convs: the caller passes the four stride-2 "phase planes" of the
# zero-padded input,  ph[py][px][i, j, :] = padded[2i+py, 2j+px, :]  (each (Ho+1, Wo+1, C)).
# Tap (dy, dx) of the conv is the static window
#   ph[dy&1][dx&1][dy//2 : dy//2+Ho, dx//2 : dx//2+Wo, :]
# so no strided access is needed inside the kernel.


def _stem_kernel(p00, p01, p10, p11, w_ref, b_ref, o_ref, *, Ho, Wo, Cin):
    """Dense 3x3/s2 conv + folded BN + ReLU as ONE K=9*Cin MXU contraction."""
    phases = (p00, p01, p10, p11)
    hw = Ho * Wo
    taps = []
    for dy in range(3):
        for dx in range(3):
            tap = phases[(dy & 1) * 2 + (dx & 1)][dy // 2:dy // 2 + Ho,
                                                  dx // 2:dx // 2 + Wo, :]
            taps.append(tap.reshape(hw, Cin))
    x27 = jnp.concatenate(taps, axis=-1).astype(jnp.bfloat16)        # (hw, 9*Cin)
    y = jnp.dot(x27, w_ref[...], preferred_element_type=jnp.float32)
    o_ref[...] = jnp.maximum(y + b_ref[...], 0.0)


def _block1_kernel(p00, p01, p10, p11,
                   w1dw_ref, w1pl_ref, b1pl_ref,
                   w2a_ref, b2a_ref, w2dw_ref, w2bpl_ref, b2pl_ref,
                   o_ref, mpad, *, Ho, Wo, Cin, Cb):
    """Fused stride-2 InvertedResidual.  Output stored UN-shuffled as [branch1;branch2];
    the channel shuffle is deferred (folded into downstream weight rows)."""
    phases = (p00, p01, p10, p11)
    hw = Ho * Wo

    # ---- branch 1: depthwise 3x3/s2 (f32 VPU MAC, BN scale folded) + 1x1 + ReLU ----
    w1dw = w1dw_ref[...]                                             # (9, Cin) f32
    acc1 = None
    for dy in range(3):
        for dx in range(3):
            tap = phases[(dy & 1) * 2 + (dx & 1)][dy // 2:dy // 2 + Ho,
                                                  dx // 2:dx // 2 + Wo, :]
            term = tap * w1dw[dy * 3 + dx]
            acc1 = term if acc1 is None else acc1 + term
    b1 = jnp.maximum(
        jnp.dot(acc1.reshape(hw, Cin).astype(jnp.bfloat16), w1pl_ref[...],
                preferred_element_type=jnp.float32) + b1pl_ref[...], 0.0)

    # ---- branch 2: 1x1+BN+ReLU per stride-2 phase into a padded phase-plane scratch,
    #      then depthwise 3x3/s2 from in-VMEM taps, then 1x1+BN+ReLU. ----
    # Zero only the 1-wide halo strip of each phase plane (interior is overwritten).
    for py in range(2):
        for px in range(2):
            ph = py * 2 + px
            hr = 0 if py == 0 else Ho
            hc = 0 if px == 0 else Wo
            mpad[ph, hr:hr + 1, :, :] = jnp.zeros((1, Wo + 1, Cb), jnp.float32)
            mpad[ph, :, hc:hc + 1, :] = jnp.zeros((Ho + 1, 1, Cb), jnp.float32)

    w2a = w2a_ref[...]
    b2a = b2a_ref[...]
    for py in range(2):
        for px in range(2):
            r0, c0 = 1 - py, 1 - px
            win = phases[py * 2 + px][r0:r0 + Ho, c0:c0 + Wo, :]
            m = jnp.maximum(
                jnp.dot(win.reshape(hw, Cin).astype(jnp.bfloat16), w2a,
                        preferred_element_type=jnp.float32) + b2a, 0.0)
            mpad[py * 2 + px, r0:r0 + Ho, c0:c0 + Wo, :] = m.reshape(Ho, Wo, Cb)

    w2dw = w2dw_ref[...]                                             # (9, Cb) f32
    acc2 = None
    for dy in range(3):
        for dx in range(3):
            tap = mpad[(dy & 1) * 2 + (dx & 1),
                       dy // 2:dy // 2 + Ho, dx // 2:dx // 2 + Wo, :]
            term = tap * w2dw[dy * 3 + dx]
            acc2 = term if acc2 is None else acc2 + term
    b2 = jnp.maximum(
        jnp.dot(acc2.reshape(hw, Cb).astype(jnp.bfloat16), w2bpl_ref[...],
                preferred_element_type=jnp.float32) + b2pl_ref[...], 0.0)

    o_ref[...] = jnp.concatenate([b1, b2], axis=-1)                  # un-shuffled store


def _s1_stack_kernel(x_ref, *refs, Ho, Wo, Cb, splits_per_stage):
    """All stride-1 InvertedResiduals fused; activation never leaves VMEM.
    Channel split / shuffle handled as trace-time fragment bookkeeping (no data
    movement beyond cheap lane slices/concats; permutations folded into weights)."""
    n_stages = len(splits_per_stage)
    wrefs = refs[:5 * n_stages]
    o_ref = refs[5 * n_stages]
    mpad = refs[5 * n_stages + 1]                    # shared (Ho+2, Wo+2, Cb) scratch
    hw = Ho * Wo

    # Zero only the 1-wide halo ring once per invocation (interior overwritten each stage).
    mpad[0:1, :, :] = jnp.zeros((1, Wo + 2, Cb), jnp.float32)
    mpad[Ho + 1:Ho + 2, :, :] = jnp.zeros((1, Wo + 2, Cb), jnp.float32)
    mpad[:, 0:1, :] = jnp.zeros((Ho + 2, 1, Cb), jnp.float32)
    mpad[:, Wo + 1:Wo + 2, :] = jnp.zeros((Ho + 2, 1, Cb), jnp.float32)

    x = x_ref[...]                                   # (hw, 2*Cb) f32, [b1 ; b2] layout
    frag_vals = [x[:, :Cb], x[:, Cb:]]

    for t in range(n_stages):
        w2a = wrefs[5 * t + 0][...]                  # (Cb, Cb) bf16, rows pre-permuted
        b2a = wrefs[5 * t + 1][...]
        w2dw = wrefs[5 * t + 2][...]                 # (9, Cb) f32
        w2b = wrefs[5 * t + 3][...]                  # (Cb, Cb) bf16
        b2p = wrefs[5 * t + 4][...]
        splits = splits_per_stage[t]
        assert len(splits) == len(frag_vals)

        # branch-2 first 1x1 over the x2 channels only (K = Cb, no zero rows)
        x2_parts = [v[:, s:] for v, s in zip(frag_vals, splits) if s < v.shape[1]]
        x2 = x2_parts[0] if len(x2_parts) == 1 else jnp.concatenate(x2_parts, axis=-1)
        mid = jnp.maximum(
            jnp.dot(x2.astype(jnp.bfloat16), w2a,
                    preferred_element_type=jnp.float32) + b2a, 0.0)

        # depthwise 3x3 / s1 on the zero-padded intermediate (taps from VMEM scratch)
        mpad[1:Ho + 1, 1:Wo + 1, :] = mid.reshape(Ho, Wo, Cb)
        acc = None
        for dy in range(3):
            for dx in range(3):
                tap = mpad[dy:dy + Ho, dx:dx + Wo, :]
                term = tap * w2dw[dy * 3 + dx]
                acc = term if acc is None else acc + term
        out2 = jnp.maximum(
            jnp.dot(acc.reshape(hw, Cb).astype(jnp.bfloat16), w2b,
                    preferred_element_type=jnp.float32) + b2p, 0.0)

        # pass-through half keeps its value fragments untouched (no routing matmul)
        frag_vals = [v[:, :s] for v, s in zip(frag_vals, splits) if s > 0] + [out2]

    out = frag_vals[0] if len(frag_vals) == 1 else jnp.concatenate(frag_vals, axis=-1)
    o_ref[...] = out


def _patch_embed_kernel(x_ref, w_ref, b_ref, pos_ref, tok_ref, o_ref):
    """patch2emb Linear (+patch2emb_norm & channel-perm folded) + pos-emb + human token,
    assembled and stored as ONE aligned block."""
    y = jnp.dot(x_ref[...].astype(jnp.bfloat16), w_ref[...],
                preferred_element_type=jnp.float32) + b_ref[...] + pos_ref[...]
    o_ref[...] = jnp.concatenate([tok_ref[...], y], axis=0)


# ----------------------------- pallas_call wrappers ----------------------------

def stem_conv_call(phases, w27, bias):
    B, Hh, Wh, Cin = phases[0].shape
    Ho, Wo = Hh - 1, Wh - 1
    Cout = w27.shape[-1]
    kern = functools.partial(_stem_kernel, Ho=Ho, Wo=Wo, Cin=Cin)
    flops = 2 * B * Ho * Wo * 9 * Cin * Cout
    bytes_acc = 4 * (4 * B * Hh * Wh * Cin + B * Ho * Wo * Cout) + _wbytes([w27, bias])
    return pl.pallas_call(
        kern,
        out_shape=jax.ShapeDtypeStruct((B, Ho * Wo, Cout), jnp.float32),
        grid=(B,),
        in_specs=([_batch_spec(p.shape) for p in phases]
                  + [_const_spec(w27.shape), _const_spec(bias.shape)]),
        out_specs=_batch_spec((B, Ho * Wo, Cout)),
        compiler_params=_PARAMS,
        cost_estimate=_cost(flops, bytes_acc),
    )(*phases, w27, bias)


def block1_call(phases, wts, Ho, Wo):
    B = phases[0].shape[0]
    Cin = phases[0].shape[-1]
    Cb = wts['w2a'].shape[-1]
    Cout = 2 * Cb
    kern = functools.partial(_block1_kernel, Ho=Ho, Wo=Wo, Cin=Cin, Cb=Cb)
    weight_list = [wts['w1dw'], wts['w1pl'], wts['b1pl'],
                   wts['w2a'], wts['b2a'], wts['w2dw'], wts['w2bpl'], wts['b2pl']]
    hw = Ho * Wo
    flops = 2 * B * (hw * Cin * Cb + 4 * hw * Cin * Cb + hw * Cb * Cb
                     + 9 * hw * (Cin + Cb))
    bytes_acc = (4 * (4 * B * (Ho + 1) * (Wo + 1) * Cin + B * hw * Cout)
                 + _wbytes(weight_list))
    return pl.pallas_call(
        kern,
        out_shape=jax.ShapeDtypeStruct((B, hw, Cout), jnp.float32),
        grid=(B,),
        in_specs=([_batch_spec(p.shape) for p in phases]
                  + [_const_spec(w.shape) for w in weight_list]),
        out_specs=_batch_spec((B, hw, Cout)),
        scratch_shapes=[pltpu.VMEM((4, Ho + 1, Wo + 1, Cb), jnp.float32)],
        compiler_params=_PARAMS,
        cost_estimate=_cost(flops, bytes_acc),
    )(*phases, *weight_list)


def s1_stack_call(x, stage_weights, splits_per_stage, Ho, Wo, Cb):
    B, hw, C = x.shape
    flat = [w for stage in stage_weights for w in stage]
    n_stages = len(stage_weights)
    kern = functools.partial(_s1_stack_kernel, Ho=Ho, Wo=Wo, Cb=Cb,
                             splits_per_stage=splits_per_stage)
    flops = 2 * B * n_stages * (2 * hw * Cb * Cb + 9 * hw * Cb)
    bytes_acc = 4 * 2 * B * hw * C + _wbytes(flat)
    return pl.pallas_call(
        kern,
        out_shape=jax.ShapeDtypeStruct((B, hw, C), jnp.float32),
        grid=(B,),
        in_specs=([_batch_spec(x.shape)] + [_const_spec(w.shape) for w in flat]),
        out_specs=_batch_spec((B, hw, C)),
        scratch_shapes=[pltpu.VMEM((Ho + 2, Wo + 2, Cb), jnp.float32)],
        compiler_params=_PARAMS,
        cost_estimate=_cost(flops, bytes_acc),
    )(x, *flat)


def patch_embed_call(xr, w, b, pos, tok, n, dim):
    B = xr.shape[0]
    pd = xr.shape[-1]
    flops = 2 * B * n * pd * dim
    bytes_acc = 4 * (B * n * pd + B * (n + 1) * dim + n * dim) + _wbytes([w, b, tok])
    return pl.pallas_call(
        _patch_embed_kernel,
        out_shape=jax.ShapeDtypeStruct((B, n + 1, dim), jnp.float32),
        grid=(B,),
        in_specs=[_batch_spec(xr.shape), _const_spec(w.shape), _const_spec(b.shape),
                  _const_spec(pos.shape), _const_spec(tok.shape)],
        out_specs=_batch_spec((B, n + 1, dim)),
        compiler_params=_PARAMS,
        cost_estimate=_cost(flops, bytes_acc),
    )(xr, w, b, pos, tok)


# ----------------------------- trace-time parameter folding --------------------

def fold_bn(conv_bias, gamma, beta, mean, var, eps=1e-5):
    scale = gamma / jnp.sqrt(var + eps)
    shift = (conv_bias - mean) * scale + beta
    return scale, shift


def prep_stem(params):
    s, t = fold_bn(params['conv1_b'], *params['conv1_bn'])
    w = params['conv1_w'] * s                                   # (3,3,Cin,Cout)
    w27 = w.reshape(9 * w.shape[2], w.shape[3]).astype(jnp.bfloat16)
    return w27, t.reshape(1, -1)


def prep_block1(bp):
    s1, t1 = fold_bn(bp['b1_dw_b'], *bp['b1_dw_bn'])
    w1dw = (bp['b1_dw_w'] * s1).reshape(9, -1)
    s2, t2 = fold_bn(bp['b1_pw_b'], *bp['b1_pw_bn'])
    w1f = bp['b1_pw_w'] * s2[None, :]
    b1pl = (t1 @ w1f) + t2                                      # dw-BN shift folded here

    s3, t3 = fold_bn(bp['b2_pw1_b'], *bp['b2_pw1_bn'])
    w2a = bp['b2_pw1_w'] * s3[None, :]
    s4, t4 = fold_bn(bp['b2_dw_b'], *bp['b2_dw_bn'])
    w2dw = (bp['b2_dw_w'] * s4).reshape(9, -1)
    s5, t5 = fold_bn(bp['b2_pw2_b'], *bp['b2_pw2_bn'])
    w2bf = bp['b2_pw2_w'] * s5[None, :]
    b2pl = (t4 @ w2bf) + t5
    return dict(w1dw=w1dw, w1pl=w1f.astype(jnp.bfloat16), b1pl=b1pl.reshape(1, -1),
                w2a=w2a.astype(jnp.bfloat16), b2a=t3.reshape(1, -1), w2dw=w2dw,
                w2bpl=w2bf.astype(jnp.bfloat16), b2pl=b2pl.reshape(1, -1))


def plan_s1_stack(cb, n_stages):
    """Trace-time bookkeeping of the deferred channel shuffles for the fused stride-1
    stack.  The stored activation is tracked as an ordered list of channel fragments
    (each holding an increasing set of logical channel ids).  Returns, per stage, the
    per-fragment split points (pass-through prefix / branch-2 suffix), the logical row
    order of that stage's first 1x1 weight, and the final storage->logical map."""
    frag_ids = [np.arange(0, 2 * cb, 2), np.arange(1, 2 * cb, 2)]   # block1 [b1;b2] layout
    splits_per_stage = []
    x2_rows_per_stage = []
    for _ in range(n_stages):
        splits = tuple(int(np.searchsorted(ids, cb)) for ids in frag_ids)
        x2_rows = np.concatenate(
            [ids[s:] - cb for ids, s in zip(frag_ids, splits) if s < len(ids)])
        splits_per_stage.append(splits)
        x2_rows_per_stage.append(x2_rows)
        frag_ids = ([2 * ids[:s] for ids, s in zip(frag_ids, splits) if s > 0]
                    + [np.arange(1, 2 * cb, 2)])
    final_ids = np.concatenate(frag_ids)
    return tuple(splits_per_stage), x2_rows_per_stage, final_ids


def prep_s1_stage(bp, x2_rows):
    s3, t3 = fold_bn(bp['b2_pw1_b'], *bp['b2_pw1_bn'])
    w2a = (bp['b2_pw1_w'] * s3[None, :])[x2_rows, :]            # rows in fragment order
    s4, t4 = fold_bn(bp['b2_dw_b'], *bp['b2_dw_bn'])
    w2dw = (bp['b2_dw_w'] * s4).reshape(9, -1)
    s5, t5 = fold_bn(bp['b2_pw2_b'], *bp['b2_pw2_bn'])
    w2bf = bp['b2_pw2_w'] * s5[None, :]
    b2pl = (t4 @ w2bf) + t5
    return [w2a.astype(jnp.bfloat16), t3.reshape(1, -1), w2dw,
            w2bf.astype(jnp.bfloat16), b2pl.reshape(1, -1)]


def prep_patch_embed(params, n, p1sz, p2sz, C, final_ids, dim):
    # patch2emb_norm (BN, zero "conv bias") folded into the Linear weights/bias.
    s, t = fold_bn(jnp.zeros((C,), jnp.float32), *params['p2e_bn'])
    s_t = jnp.tile(s, p1sz * p2sz)
    t_t = jnp.tile(t, p1sz * p2sz)
    w = params['p2e_w'] * s_t[:, None]                          # rows: (p1, p2, logical c)
    b = (params['p2e_b'] + t_t @ params['p2e_w']).reshape(1, -1)
    # fold the cumulative (deferred) channel permutation into the weight rows
    w = w.reshape(p1sz * p2sz, C, dim)[:, final_ids, :].reshape(p1sz * p2sz * C, dim)
    pos = params['pos_embedding'][0, :n]                        # (n, dim)
    tok = params['human_token'][0]                              # (1, dim)
    return w.astype(jnp.bfloat16), b, pos, tok


def _stride2_phases(x_nhwc):
    """Zero-pad by 1 and split into the four stride-2 phase planes (pure layout)."""
    xp = jnp.pad(x_nhwc, ((0, 0), (1, 1), (1, 1), (0, 0)))
    return [xp[:, py::2, px::2, :] for py in (0, 1) for px in (0, 1)]


# ----------------------------- sine positional embedding -----------------------

def make_sine_pos_embedding(h, w, d_model, temperature=10000.0, scale=2 * math.pi):
    area = jnp.ones((1, h, w), jnp.float32)
    y_embed = jnp.cumsum(area, axis=1)
    x_embed = jnp.cumsum(area, axis=2)
    one_dir = d_model // 2
    eps = 1e-6
    y_embed = y_embed / (y_embed[:, -1:, :] + eps) * scale
    x_embed = x_embed / (x_embed[:, :, -1:] + eps) * scale
    dim_t = jnp.arange(one_dir, dtype=jnp.float32)
    dim_t = temperature ** (2.0 * jnp.floor(dim_t / 2.0) / one_dir)
    pos_x = x_embed[:, :, :, None] / dim_t
    pos_y = y_embed[:, :, :, None] / dim_t
    pos_x = jnp.stack((jnp.sin(pos_x[:, :, :, 0::2]), jnp.cos(pos_x[:, :, :, 1::2])),
                      axis=4).reshape(1, h, w, -1)
    pos_y = jnp.stack((jnp.sin(pos_y[:, :, :, 0::2]), jnp.cos(pos_y[:, :, :, 1::2])),
                      axis=4).reshape(1, h, w, -1)
    pos = jnp.concatenate((pos_y, pos_x), axis=3)
    return pos.reshape(1, h * w, d_model)


# ----------------------------- forward pass ------------------------------------

def tokenpose_forward(params, img_nchw, patch_size, dim):
    x = jnp.transpose(img_nchw, (0, 2, 3, 1)).astype(jnp.float32)   # NCHW -> NHWC
    B, H, W, _ = x.shape

    # ---- ShuffleNetV2 stem conv1: 3x3/s2 + BN + ReLU (one K=27 contraction) ----
    w27, b27 = prep_stem(params)
    H1, W1 = H // 2, W // 2
    y = stem_conv_call(_stride2_phases(x), w27, b27)                 # (B, H1*W1, 64)

    cb = params['blocks'][0]['b2_pw1_w'].shape[1]
    C = 2 * cb
    n_s1 = len(params['blocks']) - 1
    splits_per_stage, x2_rows_per_stage, final_ids = plan_s1_stack(cb, n_s1)

    # ---- stride-2 InvertedResidual (one fused kernel, un-shuffled output) ----
    y4 = y.reshape(B, H1, W1, -1)
    H2, W2 = H1 // 2, W1 // 2
    y = block1_call(_stride2_phases(y4), prep_block1(params['blocks'][0]), H2, W2)

    # ---- all stride-1 InvertedResiduals fused in ONE kernel ----
    stage_weights = [prep_s1_stage(bp, rows)
                     for bp, rows in zip(params['blocks'][1:], x2_rows_per_stage)]
    y = s1_stack_call(y, stage_weights, splits_per_stage, H2, W2, cb)

    # ---- patch2emb_norm folded into patch2emb_mlp, + pos-emb + human token ----
    p1sz, p2sz = patch_size
    hh, ww = H2 // p1sz, W2 // p2sz
    n = hh * ww
    y4 = y.reshape(B, H2, W2, C)
    xr = y4.reshape(B, hh, p1sz, ww, p2sz, C).transpose(0, 1, 3, 2, 4, 5)
    xr = xr.reshape(B, n, p1sz * p2sz * C)                           # 'b (h w) (p1 p2 c)'
    wpe, bpe, pos, tok = prep_patch_embed(params, n, p1sz, p2sz, C, final_ids, dim)
    out = patch_embed_call(xr, wpe, bpe, pos, tok, n, dim)           # (B, n+1, dim)

    kp = jnp.broadcast_to(params['keypoint_token'],
                          (B, params['keypoint_token'].shape[1], dim))
    return out, kp


# ----------------------------- parameter init ----------------------------------

def init_params(key, image_size, patch_size, num_keypoints, dim, channels):
    keys = iter(jax.random.split(key, 256))

    def conv_w(shape):
        fan_in = 1
        for s in shape[:-1]:
            fan_in *= s
        return jax.random.normal(next(keys), shape, jnp.float32) / math.sqrt(fan_in)

    def bias(c):
        return 0.05 * jax.random.normal(next(keys), (c,), jnp.float32)

    def bn(c):
        gamma = 1.0 + 0.1 * jax.random.normal(next(keys), (c,), jnp.float32)
        beta = 0.1 * jax.random.normal(next(keys), (c,), jnp.float32)
        mean = 0.1 * jax.random.normal(next(keys), (c,), jnp.float32)
        var = 1.0 + 0.1 * jax.random.uniform(next(keys), (c,), jnp.float32)
        return (gamma, beta, mean, var)

    params = {}
    stem_in = 64
    params['conv1_w'] = conv_w((3, 3, 3, stem_in))
    params['conv1_b'] = bias(stem_in)
    params['conv1_bn'] = bn(stem_in)

    blocks = []
    in_c = stem_in
    out_c = channels
    bf = out_c // 2
    for i in range(4):
        stride = 2 if i == 0 else 1
        bp = {}
        if stride > 1:
            bp['b1_dw_w'] = conv_w((3, 3, in_c))
            bp['b1_dw_b'] = bias(in_c)
            bp['b1_dw_bn'] = bn(in_c)
            bp['b1_pw_w'] = conv_w((in_c, bf))
            bp['b1_pw_b'] = bias(bf)
            bp['b1_pw_bn'] = bn(bf)
            b2_in = in_c
        else:
            b2_in = bf
        bp['b2_pw1_w'] = conv_w((b2_in, bf))
        bp['b2_pw1_b'] = bias(bf)
        bp['b2_pw1_bn'] = bn(bf)
        bp['b2_dw_w'] = conv_w((3, 3, bf))
        bp['b2_dw_b'] = bias(bf)
        bp['b2_dw_bn'] = bn(bf)
        bp['b2_pw2_w'] = conv_w((bf, bf))
        bp['b2_pw2_b'] = bias(bf)
        bp['b2_pw2_bn'] = bn(bf)
        blocks.append(bp)
        in_c = out_c
    params['blocks'] = blocks

    patch_dim = channels * patch_size[0] * patch_size[1]
    params['p2e_bn'] = bn(channels)
    params['p2e_w'] = conv_w((patch_dim, dim))
    params['p2e_b'] = bias(dim)
    params['human_token'] = 0.02 * jax.random.normal(next(keys), (1, 1, dim), jnp.float32)
    params['keypoint_token'] = 0.02 * jax.random.normal(next(keys), (1, num_keypoints, dim),
                                                        jnp.float32)

    pe_h = image_size[0] // (4 * patch_size[0])
    pe_w = image_size[1] // (4 * patch_size[1])
    params['pos_embedding'] = make_sine_pos_embedding(pe_h, pe_w, dim)
    return params


# ----------------------------- main ---------------------------------------------

if __name__ == "__main__":
    cfg = dict(image_size=[32, 32], patch_size=[2, 2], num_keypoints=6, dim=32, channels=8)
    key = jax.random.PRNGKey(0)
    pkey, xkey = jax.random.split(key)
    params = init_params(pkey, **cfg)

    B = 2
    img = jax.random.normal(xkey, (B, 3, cfg['image_size'][0], cfg['image_size'][1]),
                            jnp.float32)    # NCHW like the PyTorch module

    fwd = jax.jit(functools.partial(tokenpose_forward,
                                    patch_size=tuple(cfg['patch_size']),
                                    dim=cfg['dim']))
    x_out, kp_tokens = fwd(params, img)
    jax.block_until_ready((x_out, kp_tokens))

    num_patches = (cfg['image_size'][0] // (4 * cfg['patch_size'][0])) * \
                  (cfg['image_size'][1] // (4 * cfg['patch_size'][1]))
    assert x_out.shape == (B, 1 + num_patches, cfg['dim']), x_out.shape
    assert kp_tokens.shape == (B, cfg['num_keypoints'], cfg['dim']), kp_tokens.shape
    assert bool(jnp.all(jnp.isfinite(x_out)))
    assert bool(jnp.all(jnp.isfinite(kp_tokens)))
    print("KERNEL_OK")
</pallas_src>

<mosaic_0001>
module attributes {stable_mosaic.version = 11 : i64} {
  func.func @_stem_kernel(%arg0: i32, %arg1: memref<1x17x17x3xf32, #tpu.memory_space<vmem>>, %arg2: memref<1x17x17x3xf32, #tpu.memory_space<vmem>>, %arg3: memref<1x17x17x3xf32, #tpu.memory_space<vmem>>, %arg4: memref<1x17x17x3xf32, #tpu.memory_space<vmem>>, %arg5: memref<27x64xbf16, #tpu.memory_space<vmem>>, %arg6: memref<1x64xf32, #tpu.memory_space<vmem>>, %arg7: memref<1x256x64xf32, #tpu.memory_space<vmem>>) attributes {dimension_semantics = [#tpu.dimension_semantics<parallel>], iteration_bounds = array<i64: 2>, scalar_prefetch = 0 : i64, scratch_operands = 0 : i64, tpu.core_type = #tpu.core_type<tc>, window_params = [{transform_indices = @transform_0, window_bounds = array<i64: 1, 17, 17, 3>}, {transform_indices = @transform_1, window_bounds = array<i64: 1, 17, 17, 3>}, {transform_indices = @transform_2, window_bounds = array<i64: 1, 17, 17, 3>}, {transform_indices = @transform_3, window_bounds = array<i64: 1, 17, 17, 3>}, {pipeline_mode = #tpu.pipeline_mode<synchronous>, transform_indices = @transform_4, window_bounds = array<i64: 27, 64>}, {pipeline_mode = #tpu.pipeline_mode<synchronous>, transform_indices = @transform_5, window_bounds = array<i64: 1, 64>}, {transform_indices = @transform_6, window_bounds = array<i64: 1, 256, 64>}]} {
    %c0 = arith.constant 0 : index
    %c0_0 = arith.constant 0 : index
    %c0_1 = arith.constant 0 : index
    %c0_2 = arith.constant 0 : index
    %0 = vector.load %arg1[%c0, %c0_0, %c0_1, %c0_2] : memref<1x17x17x3xf32, #tpu.memory_space<vmem>>, vector<1x16x16x3xf32>
    %1 = vector.shape_cast %0 : vector<1x16x16x3xf32> to vector<16x16x3xf32>
    %2 = vector.shape_cast %1 : vector<16x16x3xf32> to vector<256x3xf32>
    %c0_3 = arith.constant 0 : index
    %c0_4 = arith.constant 0 : index
    %c0_5 = arith.constant 0 : index
    %c0_6 = arith.constant 0 : index
    %3 = vector.load %arg2[%c0_3, %c0_4, %c0_5, %c0_6] : memref<1x17x17x3xf32, #tpu.memory_space<vmem>>, vector<1x16x16x3xf32>
    %4 = vector.shape_cast %3 : vector<1x16x16x3xf32> to vector<16x16x3xf32>
    %5 = vector.shape_cast %4 : vector<16x16x3xf32> to vector<256x3xf32>
    %c0_7 = arith.constant 0 : index
    %c0_8 = arith.constant 0 : index
    %c1 = arith.constant 1 : index
    %c0_9 = arith.constant 0 : index
    %6 = vector.load %arg1[%c0_7, %c0_8, %c1, %c0_9] : memref<1x17x17x3xf32, #tpu.memory_space<vmem>>, vector<1x16x16x3xf32>
    %7 = vector.shape_cast %6 : vector<1x16x16x3xf32> to vector<16x16x3xf32>
    %8 = vector.shape_cast %7 : vector<16x16x3xf32> to vector<256x3xf32>
    %c0_10 = arith.constant 0 : index
    %c0_11 = arith.constant 0 : index
    %c0_12 = arith.constant 0 : index
    %c0_13 = arith.constant 0 : index
    %9 = vector.load %arg3[%c0_10, %c0_11, %c0_12, %c0_13] : memref<1x17x17x3xf32, #tpu.memory_space<vmem>>, vector<1x16x16x3xf32>
    %10 = vector.shape_cast %9 : vector<1x16x16x3xf32> to vector<16x16x3xf32>
    %11 = vector.shape_cast %10 : vector<16x16x3xf32> to vector<256x3xf32>
    %c0_14 = arith.constant 0 : index
    %c0_15 = arith.constant 0 : index
    %c0_16 = arith.constant 0 : index
    %c0_17 = arith.constant 0 : index
    %12 = vector.load %arg4[%c0_14, %c0_15, %c0_16, %c0_17] : memref<1x17x17x3xf32, #tpu.memory_space<vmem>>, vector<1x16x16x3xf32>
    %13 = vector.shape_cast %12 : vector<1x16x16x3xf32> to vector<16x16x3xf32>
    %14 = vector.shape_cast %13 : vector<16x16x3xf32> to vector<256x3xf32>
    %c0_18 = arith.constant 0 : index
    %c0_19 = arith.constant 0 : index
    %c1_20 = arith.constant 1 : index
    %c0_21 = arith.constant 0 : index
    %15 = vector.load %arg3[%c0_18, %c0_19, %c1_20, %c0_21] : memref<1x17x17x3xf32, #tpu.memory_space<vmem>>, vector<1x16x16x3xf32>
    %16 = vector.shape_cast %15 : vector<1x16x16x3xf32> to vector<16x16x3xf32>
    %17 = vector.shape_cast %16 : vector<16x16x3xf32> to vector<256x3xf32>
    %c0_22 = arith.constant 0 : index
    %c1_23 = arith.constant 1 : index
    %c0_24 = arith.constant 0 : index
    %c0_25 = arith.constant 0 : index
    %18 = vector.load %arg1[%c0_22, %c1_23, %c0_24, %c0_25] : memref<1x17x17x3xf32, #tpu.memory_space<vmem>>, vector<1x16x16x3xf32>
    %19 = vector.shape_cast %18 : vector<1x16x16x3xf32> to vector<16x16x3xf32>
    %20 = vector.shape_cast %19 : vector<16x16x3xf32> to vector<256x3xf32>
    %c0_26 = arith.constant 0 : index
    %c1_27 = arith.constant 1 : index
    %c0_28 = arith.constant 0 : index
    %c0_29 = arith.constant 0 : index
    %21 = vector.load %arg2[%c0_26, %c1_27, %c0_28, %c0_29] : memref<1x17x17x3xf32, #tpu.memory_space<vmem>>, vector<1x16x16x3xf32>
    %22 = vector.shape_cast %21 : vector<1x16x16x3xf32> to vector<16x16x3xf32>
    %23 = vector.shape_cast %22 : vector<16x16x3xf32> to vector<256x3xf32>
    %c0_30 = arith.constant 0 : index
    %c1_31 = arith.constant 1 : index
    %c1_32 = arith.constant 1 : index
    %c0_33 = arith.constant 0 : index
    %24 = vector.load %arg1[%c0_30, %c1_31, %c1_32, %c0_33] : memref<1x17x17x3xf32, #tpu.memory_space<vmem>>, vector<1x16x16x3xf32>
    %25 = vector.shape_cast %24 : vector<1x16x16x3xf32> to vector<16x16x3xf32>
    %26 = vector.shape_cast %25 : vector<16x16x3xf32> to vector<256x3xf32>
    %27 = tpu.concatenate %2, %5, %8, %11, %14, %17, %20, %23, %26 in 1 : vector<256x3xf32>, vector<256x3xf32>, vector<256x3xf32>, vector<256x3xf32>, vector<256x3xf32>, vector<256x3xf32>, vector<256x3xf32>, vector<256x3xf32>, vector<256x3xf32> -> vector<256x27xf32>
    %28 = arith.truncf %27 : vector<256x27xf32> to vector<256x27xbf16>
    %c0_34 = arith.constant 0 : index
    %c0_35 = arith.constant 0 : index
    %29 = vector.load %arg5[%c0_34, %c0_35] : memref<27x64xbf16, #tpu.memory_space<vmem>>, vector<27x64xbf16>
    %cst = arith.constant dense<0.000000e+00> : vector<256x64xf32>
    %30 = tpu.matmul %28, %29, %cst {dimension_numbers = #tpu.dot_dimension_numbers<[1], [0], [0], [1], [0, 0, 1, 1], [], []>} : vector<256x27xbf16>, vector<27x64xbf16>, vector<256x64xf32> -> vector<256x64xf32>
    %c0_36 = arith.constant 0 : index
    %c0_37 = arith.constant 0 : index
    %31 = vector.load %arg6[%c0_36, %c0_37] : memref<1x64xf32, #tpu.memory_space<vmem>>, vector<1x64xf32>
    %32 = vector.broadcast %31 : vector<1x64xf32> to vector<256x64xf32>
    %33 = arith.addf %30, %32 : vector<256x64xf32>
    %cst_38 = arith.constant 0.000000e+00 : f32
    %34 = vector.broadcast %cst_38 : f32 to vector<256x64xf32>
    %35 = arith.maximumf %33, %34 : vector<256x64xf32>
    %c0_39 = arith.constant 0 : index
    %c0_40 = arith.constant 0 : index
    %c0_41 = arith.constant 0 : index
    %36 = vector.load %arg7[%c0_39, %c0_40, %c0_41] : memref<1x256x64xf32, #tpu.memory_space<vmem>>, vector<1x256x64xf32>
    %37 = vector.shape_cast %36 : vector<1x256x64xf32> to vector<256x64xf32>
    %38 = vector.shape_cast %35 : vector<256x64xf32> to vector<1x256x64xf32>
    tpu.vector_store %arg7[%c0_39, %c0_40, %c0_41], %38 {strides = array<i32>} : memref<1x256x64xf32, #tpu.memory_space<vmem>>, vector<1x256x64xf32>,
    return
  }
  func.func @transform_0(%arg0: i32) -> (i32, i32, i32, i32) {
    %c0_i32 = arith.constant 0 : i32
    %c0_i32_0 = arith.constant 0 : i32
    %c0_i32_1 = arith.constant 0 : i32
    %c0_i32_2 = arith.constant 0 : i32
    return %arg0, %c0_i32, %c0_i32_0, %c0_i32_1 : i32, i32, i32, i32
  }
  func.func @transform_1(%arg0: i32) -> (i32, i32, i32, i32) {
    %c0_i32 = arith.constant 0 : i32
    %c0_i32_0 = arith.constant 0 : i32
    %c0_i32_1 = arith.constant 0 : i32
    %c0_i32_2 = arith.constant 0 : i32
    return %arg0, %c0_i32, %c0_i32_0, %c0_i32_1 : i32, i32, i32, i32
  }
  func.func @transform_2(%arg0: i32) -> (i32, i32, i32, i32) {
    %c0_i32 = arith.constant 0 : i32
    %c0_i32_0 = arith.constant 0 : i32
    %c0_i32_1 = arith.constant 0 : i32
    %c0_i32_2 = arith.constant 0 : i32
    return %arg0, %c0_i32, %c0_i32_0, %c0_i32_1 : i32, i32, i32, i32
  }
  func.func @transform_3(%arg0: i32) -> (i32, i32, i32, i32) {
    %c0_i32 = arith.constant 0 : i32
    %c0_i32_0 = arith.constant 0 : i32
    %c0_i32_1 = arith.constant 0 : i32
    %c0_i32_2 = arith.constant 0 : i32
    return %arg0, %c0_i32, %c0_i32_0, %c0_i32_1 : i32, i32, i32, i32
  }
  func.func @transform_4(%arg0: i32) -> (i32, i32) {
    %c0_i32 = arith.constant 0 : i32
    %c0_i32_0 = arith.constant 0 : i32
    %c0_i32_1 = arith.constant 0 : i32
    return %c0_i32, %c0_i32_0 : i32, i32
  }
  func.func @transform_5(%arg0: i32) -> (i32, i32) {
    %c0_i32 = arith.constant 0 : i32
    %c0_i32_0 = arith.constant 0 : i32
    %c0_i32_1 = arith.constant 0 : i32
    return %c0_i32, %c0_i32_0 : i32, i32
  }
  func.func @transform_6(%arg0: i32) -> (i32, i32, i32) {
    %c0_i32 = arith.constant 0 : i32
    %c0_i32_0 = arith.constant 0 : i32
    %c0_i32_1 = arith.constant 0 : i32
    return %arg0, %c0_i32, %c0_i32_0 : i32, i32, i32
  }
}

module attributes {stable_mosaic.version = 11 : i64} {
  func.func @_block1_kernel(%arg0: i32, %arg1: memref<1x9x9x64xf32, #tpu.memory_space<vmem>>, %arg2: memref<1x9x9x64xf32, #tpu.memory_space<vmem>>, %arg3: memref<1x9x9x64xf32, #tpu.memory_space<vmem>>, %arg4: memref<1x9x9x64xf32, #tpu.memory_space<vmem>>, %arg5: memref<9x64xf32, #tpu.memory_space<vmem>>, %arg6: memref<64x4xbf16, #tpu.memory_space<vmem>>, %arg7: memref<1x4xf32, #tpu.memory_space<vmem>>, %arg8: memref<64x4xbf16, #tpu.memory_space<vmem>>, %arg9: memref<1x4xf32, #tpu.memory_space<vmem>>, %arg10: memref<9x4xf32, #tpu.memory_space<vmem>>, %arg11: memref<4x4xbf16, #tpu.memory_space<vmem>>, %arg12: memref<1x4xf32, #tpu.memory_space<vmem>>, %arg13: memref<1x64x8xf32, #tpu.memory_space<vmem>>, %arg14: memref<4x9x9x4xf32, #tpu.memory_space<vmem>>) attributes {dimension_semantics = [#tpu.dimension_semantics<parallel>], iteration_bounds = array<i64: 2>, scalar_prefetch = 0 : i64, scratch_operands = 1 : i64, tpu.core_type = #tpu.core_type<tc>, window_params = [{transform_indices = @transform_0, window_bounds = array<i64: 1, 9, 9, 64>}, {transform_indices = @transform_1, window_bounds = array<i64: 1, 9, 9, 64>}, {transform_indices = @transform_2, window_bounds = array<i64: 1, 9, 9, 64>}, {transform_indices = @transform_3, window_bounds = array<i64: 1, 9, 9, 64>}, {pipeline_mode = #tpu.pipeline_mode<synchronous>, transform_indices = @transform_4, window_bounds = array<i64: 9, 64>}, {pipeline_mode = #tpu.pipeline_mode<synchronous>, transform_indices = @transform_5, window_bounds = array<i64: 64, 4>}, {pipeline_mode = #tpu.pipeline_mode<synchronous>, transform_indices = @transform_6, window_bounds = array<i64: 1, 4>}, {pipeline_mode = #tpu.pipeline_mode<synchronous>, transform_indices = @transform_7, window_bounds = array<i64: 64, 4>}, {pipeline_mode = #tpu.pipeline_mode<synchronous>, transform_indices = @transform_8, window_bounds = array<i64: 1, 4>}, {pipeline_mode = #tpu.pipeline_mode<synchronous>, transform_indices = @transform_9, window_bounds = array<i64: 9, 4>}, {pipeline_mode = #tpu.pipeline_mode<synchronous>, transform_indices = @transform_10, window_bounds = array<i64: 4, 4>}, {pipeline_mode = #tpu.pipeline_mode<synchronous>, transform_indices = @transform_11, window_bounds = array<i64: 1, 4>}, {transform_indices = @transform_12, window_bounds = array<i64: 1, 64, 8>}]} {
    %c0 = arith.constant 0 : index
    %c0_0 = arith.constant 0 : index
    %0 = vector.load %arg5[%c0, %c0_0] : memref<9x64xf32, #tpu.memory_space<vmem>>, vector<9x64xf32>
    %c0_1 = arith.constant 0 : index
    %c0_2 = arith.constant 0 : index
    %c0_3 = arith.constant 0 : index
    %c0_4 = arith.constant 0 : index
    %1 = vector.load %arg1[%c0_1, %c0_2, %c0_3, %c0_4] : memref<1x9x9x64xf32, #tpu.memory_space<vmem>>, vector<1x8x8x64xf32>
    %2 = vector.shape_cast %1 : vector<1x8x8x64xf32> to vector<8x8x64xf32>
    %3 = vector.extract_strided_slice %0 {offsets = [0, 0], sizes = [1, 64], strides = [1, 1]} : vector<9x64xf32> to vector<1x64xf32>
    %4 = vector.shape_cast %3 : vector<1x64xf32> to vector<64xf32>
    %5 = vector.shape_cast %4 : vector<64xf32> to vector<1x1x64xf32>
    %6 = vector.broadcast %5 : vector<1x1x64xf32> to vector<8x8x64xf32>
    %7 = arith.mulf %2, %6 : vector<8x8x64xf32>
    %c0_5 = arith.constant 0 : index
    %c0_6 = arith.constant 0 : index
    %c0_7 = arith.constant 0 : index
    %c0_8 = arith.constant 0 : index
    %8 = vector.load %arg2[%c0_5, %c0_6, %c0_7, %c0_8] : memref<1x9x9x64xf32, #tpu.memory_space<vmem>>, vector<1x8x8x64xf32>
    %9 = vector.shape_cast %8 : vector<1x8x8x64xf32> to vector<8x8x64xf32>
    %10 = vector.extract_strided_slice %0 {offsets = [1, 0], sizes = [1, 64], strides = [1, 1]} : vector<9x64xf32> to vector<1x64xf32>
    %11 = vector.shape_cast %10 : vector<1x64xf32> to vector<64xf32>
    %12 = vector.shape_cast %11 : vector<64xf32> to vector<1x1x64xf32>
    %13 = vector.broadcast %12 : vector<1x1x64xf32> to vector<8x8x64xf32>
    %14 = arith.mulf %9, %13 : vector<8x8x64xf32>
    %15 = arith.addf %7, %14 : vector<8x8x64xf32>
    %c0_9 = arith.constant 0 : index
    %c0_10 = arith.constant 0 : index
    %c1 = arith.constant 1 : index
    %c0_11 = arith.constant 0 : index
    %16 = vector.load %arg1[%c0_9, %c0_10, %c1, %c0_11] : memref<1x9x9x64xf32, #tpu.memory_space<vmem>>, vector<1x8x8x64xf32>
    %17 = vector.shape_cast %16 : vector<1x8x8x64xf32> to vector<8x8x64xf32>
    %18 = vector.extract_strided_slice %0 {offsets = [2, 0], sizes = [1, 64], strides = [1, 1]} : vector<9x64xf32> to vector<1x64xf32>
    %19 = vector.shape_cast %18 : vector<1x64xf32> to vector<64xf32>
    %20 = vector.shape_cast %19 : vector<64xf32> to vector<1x1x64xf32>
    %21 = vector.broadcast %20 : vector<1x1x64xf32> to vector<8x8x64xf32>
    %22 = arith.mulf %17, %21 : vector<8x8x64xf32>
    %23 = arith.addf %15, %22 : vector<8x8x64xf32>
    %c0_12 = arith.constant 0 : index
    %c0_13 = arith.constant 0 : index
    %c0_14 = arith.constant 0 : index
    %c0_15 = arith.constant 0 : index
    %24 = vector.load %arg3[%c0_12, %c0_13, %c0_14, %c0_15] : memref<1x9x9x64xf32, #tpu.memory_space<vmem>>, vector<1x8x8x64xf32>
    %25 = vector.shape_cast %24 : vector<1x8x8x64xf32> to vector<8x8x64xf32>
    %26 = vector.extract_strided_slice %0 {offsets = [3, 0], sizes = [1, 64], strides = [1, 1]} : vector<9x64xf32> to vector<1x64xf32>
    %27 = vector.shape_cast %26 : vector<1x64xf32> to vector<64xf32>
    %28 = vector.shape_cast %27 : vector<64xf32> to vector<1x1x64xf32>
    %29 = vector.broadcast %28 : vector<1x1x64xf32> to vector<8x8x64xf32>
    %30 = arith.mulf %25, %29 : vector<8x8x64xf32>
    %31 = arith.addf %23, %30 : vector<8x8x64xf32>
    %c0_16 = arith.constant 0 : index
    %c0_17 = arith.constant 0 : index
    %c0_18 = arith.constant 0 : index
    %c0_19 = arith.constant 0 : index
    %32 = vector.load %arg4[%c0_16, %c0_17, %c0_18, %c0_19] : memref<1x9x9x64xf32, #tpu.memory_space<vmem>>, vector<1x8x8x64xf32>
    %33 = vector.shape_cast %32 : vector<1x8x8x64xf32> to vector<8x8x64xf32>
    %34 = vector.extract_strided_slice %0 {offsets = [4, 0], sizes = [1, 64], strides = [1, 1]} : vector<9x64xf32> to vector<1x64xf32>
    %35 = vector.shape_cast %34 : vector<1x64xf32> to vector<64xf32>
    %36 = vector.shape_cast %35 : vector<64xf32> to vector<1x1x64xf32>
    %37 = vector.broadcast %36 : vector<1x1x64xf32> to vector<8x8x64xf32>
    %38 = arith.mulf %33, %37 : vector<8x8x64xf32>
    %39 = arith.addf %31, %38 : vector<8x8x64xf32>
    %c0_20 = arith.constant 0 : index
    %c0_21 = arith.constant 0 : index
    %c1_22 = arith.constant 1 : index
    %c0_23 = arith.constant 0 : index
    %40 = vector.load %arg3[%c0_20, %c0_21, %c1_22, %c0_23] : memref<1x9x9x64xf32, #tpu.memory_space<vmem>>, vector<1x8x8x64xf32>
    %41 = vector.shape_cast %40 : vector<1x8x8x64xf32> to vector<8x8x64xf32>
    %42 = vector.extract_strided_slice %0 {offsets = [5, 0], sizes = [1, 64], strides = [1, 1]} : vector<9x64xf32> to vector<1x64xf32>
    %43 = vector.shape_cast %42 : vector<1x64xf32> to vector<64xf32>
    %44 = vector.shape_cast %43 : vector<64xf32> to vector<1x1x64xf32>
    %45 = vector.broadcast %44 : vector<1x1x64xf32> to vector<8x8x64xf32>
    %46 = arith.mulf %41, %45 : vector<8x8x64xf32>
    %47 = arith.addf %39, %46 : vector<8x8x64xf32>
    %c0_24 = arith.constant 0 : index
    %c1_25 = arith.constant 1 : index
    %c0_26 = arith.constant 0 : index
    %c0_27 = arith.constant 0 : index
    %48 = vector.load %arg1[%c0_24, %c1_25, %c0_26, %c0_27] : memref<1x9x9x64xf32, #tpu.memory_space<vmem>>, vector<1x8x8x64xf32>
    %49 = vector.shape_cast %48 : vector<1x8x8x64xf32> to vector<8x8x64xf32>
    %50 = vector.extract_strided_slice %0 {offsets = [6, 0], sizes = [1, 64], strides = [1, 1]} : vector<9x64xf32> to vector<1x64xf32>
    %51 = vector.shape_cast %50 : vector<1x64xf32> to vector<64xf32>
    %52 = vector.shape_cast %51 : vector<64xf32> to vector<1x1x64xf32>
    %53 = vector.broadcast %52 : vector<1x1x64xf32> to vector<8x8x64xf32>
    %54 = arith.mulf %49, %53 : vector<8x8x64xf32>
    %55 = arith.addf %47, %54 : vector<8x8x64xf32>
    %c0_28 = arith.constant 0 : index
    %c1_29 = arith.constant 1 : index
    %c0_30 = arith.constant 0 : index
    %c0_31 = arith.constant 0 : index
    %56 = vector.load %arg2[%c0_28, %c1_29, %c0_30, %c0_31] : memref<1x9x9x64xf32, #tpu.memory_space<vmem>>, vector<1x8x8x64xf32>
    %57 = vector.shape_cast %56 : vector<1x8x8x64xf32> to vector<8x8x64xf32>
    %58 = vector.extract_strided_slice %0 {offsets = [7, 0], sizes = [1, 64], strides = [1, 1]} : vector<9x64xf32> to vector<1x64xf32>
    %59 = vector.shape_cast %58 : vector<1x64xf32> to vector<64xf32>
    %60 = vector.shape_cast %59 : vector<64xf32> to vector<1x1x64xf32>
    %61 = vector.broadcast %60 : vector<1x1x64xf32> to vector<8x8x64xf32>
    %62 = arith.mulf %57, %61 : vector<8x8x64xf32>
    %63 = arith.addf %55, %62 : vector<8x8x64xf32>
    %c0_32 = arith.constant 0 : index
    %c1_33 = arith.constant 1 : index
    %c1_34 = arith.constant 1 : index
    %c0_35 = arith.constant 0 : index
    %64 = vector.load %arg1[%c0_32, %c1_33, %c1_34, %c0_35] : memref<1x9x9x64xf32, #tpu.memory_space<vmem>>, vector<1x8x8x64xf32>
    %65 = vector.shape_cast %64 : vector<1x8x8x64xf32> to vector<8x8x64xf32>
    %66 = vector.extract_strided_slice %0 {offsets = [8, 0], sizes = [1, 64], strides = [1, 1]} : vector<9x64xf32> to vector<1x64xf32>
    %67 = vector.shape_cast %66 : vector<1x64xf32> to vector<64xf32>
    %68 = vector.shape_cast %67 : vector<64xf32> to vector<1x1x64xf32>
    %69 = vector.broadcast %68 : vector<1x1x64xf32> to vector<8x8x64xf32>
    %70 = arith.mulf %65, %69 : vector<8x8x64xf32>
    %71 = arith.addf %63, %70 : vector<8x8x64xf32>
    %72 = vector.shape_cast %71 : vector<8x8x64xf32> to vector<64x64xf32>
    %73 = arith.truncf %72 : vector<64x64xf32> to vector<64x64xbf16>
    %c0_36 = arith.constant 0 : index
    %c0_37 = arith.constant 0 : index
    %74 = vector.load %arg6[%c0_36, %c0_37] : memref<64x4xbf16, #tpu.memory_space<vmem>>, vector<64x4xbf16>
    %cst = arith.constant dense<0.000000e+00> : vector<64x4xf32>
    %75 = tpu.matmul %73, %74, %cst {dimension_numbers = #tpu.dot_dimension_numbers<[1], [0], [0], [1], [0, 0, 1, 1], [], []>} : vector<64x64xbf16>, vector<64x4xbf16>, vector<64x4xf32> -> vector<64x4xf32>
    %c0_38 = arith.constant 0 : index
    %c0_39 = arith.constant 0 : index
    %76 = vector.load %arg7[%c0_38, %c0_39] : memref<1x4xf32, #tpu.memory_space<vmem>>, vector<1x4xf32>
    %77 = vector.broadcast %76 : vector<1x4xf32> to vector<64x4xf32>
    %78 = arith.addf %75, %77 : vector<64x4xf32>
    %cst_40 = arith.constant 0.000000e+00 : f32
    %79 = vector.broadcast %cst_40 : f32 to vector<64x4xf32>
    %80 = arith.maximumf %78, %79 : vector<64x4xf32>
    %cst_41 = arith.constant 0.000000e+00 : f32
    %81 = vector.broadcast %cst_41 : f32 to vector<1x9x4xf32>
    %c0_42 = arith.constant 0 : index
    %c0_43 = arith.constant 0 : index
    %c0_44 = arith.constant 0 : index
    %c0_45 = arith.constant 0 : index
    %82 = vector.load %arg14[%c0_42, %c0_43, %c0_44, %c0_45] : memref<4x9x9x4xf32, #tpu.memory_space<vmem>>, vector<1x1x9x4xf32>
    %83 = vector.shape_cast %82 : vector<1x1x9x4xf32> to vector<1x9x4xf32>
    %84 = vector.shape_cast %81 : vector<1x9x4xf32> to vector<1x1x9x4xf32>
    tpu.vector_store %arg14[%c0_42, %c0_43, %c0_44, %c0_45], %84 {strides = array<i32>} : memref<4x9x9x4xf32, #tpu.memory_space<vmem>>, vector<1x1x9x4xf32>,
    %cst_46 = arith.constant 0.000000e+00 : f32
    %85 = vector.broadcast %cst_46 : f32 to vector<9x1x4xf32>
    %c0_47 = arith.constant 0 : index
    %c0_48 = arith.constant 0 : index
    %c0_49 = arith.constant 0 : index
    %c0_50 = arith.constant 0 : index
    %86 = vector.load %arg14[%c0_47, %c0_48, %c0_49, %c0_50] : memref<4x9x9x4xf32, #tpu.memory_space<vmem>>, vector<1x9x1x4xf32>
    %87 = vector.shape_cast %86 : vector<1x9x1x4xf32> to vector<9x1x4xf32>
    %88 = vector.shape_cast %85 : vector<9x1x4xf32> to vector<1x9x1x4xf32>
    tpu.vector_store %arg14[%c0_47, %c0_48, %c0_49, %c0_50], %88 {strides = array<i32>} : memref<4x9x9x4xf32, #tpu.memory_space<vmem>>, vector<1x9x1x4xf32>,
    %cst_51 = arith.constant 0.000000e+00 : f32
    %89 = vector.broadcast %cst_51 : f32 to vector<1x9x4xf32>
    %c1_52 = arith.constant 1 : index
    %c0_53 = arith.constant 0 : index
    %c0_54 = arith.constant 0 : index
    %c0_55 = arith.constant 0 : index
    %90 = vector.load %arg14[%c1_52, %c0_53, %c0_54, %c0_55] : memref<4x9x9x4xf32, #tpu.memory_space<vmem>>, vector<1x1x9x4xf32>
    %91 = vector.shape_cast %90 : vector<1x1x9x4xf32> to vector<1x9x4xf32>
    %92 = vector.shape_cast %89 : vector<1x9x4xf32> to vector<1x1x9x4xf32>
    tpu.vector_store %arg14[%c1_52, %c0_53, %c0_54, %c0_55], %92 {strides = array<i32>} : memref<4x9x9x4xf32, #tpu.memory_space<vmem>>, vector<1x1x9x4xf32>,
    %cst_56 = arith.constant 0.000000e+00 : f32
    %93 = vector.broadcast %cst_56 : f32 to vector<9x1x4xf32>
    %c1_57 = arith.constant 1 : index
    %c0_58 = arith.constant 0 : index
    %c8 = arith.constant 8 : index
    %c0_59 = arith.constant 0 : index
    %94 = vector.load %arg14[%c1_57, %c0_58, %c8, %c0_59] : memref<4x9x9x4xf32, #tpu.memory_space<vmem>>, vector<1x9x1x4xf32>
    %95 = vector.shape_cast %94 : vector<1x9x1x4xf32> to vector<9x1x4xf32>
    %96 = vector.shape_cast %93 : vector<9x1x4xf32> to vector<1x9x1x4xf32>
    tpu.vector_store %arg14[%c1_57, %c0_58, %c8, %c0_59], %96 {strides = array<i32>} : memref<4x9x9x4xf32, #tpu.memory_space<vmem>>, vector<1x9x1x4xf32>,
    %cst_60 = arith.constant 0.000000e+00 : f32
    %97 = vector.broadcast %cst_60 : f32 to vector<1x9x4xf32>
    %c2 = arith.constant 2 : index
    %c8_61 = arith.constant 8 : index
    %c0_62 = arith.constant 0 : index
    %c0_63 = arith.constant 0 : index
    %98 = vector.load %arg14[%c2, %c8_61, %c0_62, %c0_63] : memref<4x9x9x4xf32, #tpu.memory_space<vmem>>, vector<1x1x9x4xf32>
    %99 = vector.shape_cast %98 : vector<1x1x9x4xf32> to vector<1x9x4xf32>
    %100 = vector.shape_cast %97 : vector<1x9x4xf32> to vector<1x1x9x4xf32>
    tpu.vector_store %arg14[%c2, %c8_61, %c0_62, %c0_63], %100 {strides = array<i32>} : memref<4x9x9x4xf32, #tpu.memory_space<vmem>>, vector<1x1x9x4xf32>,
    %cst_64 = arith.constant 0.000000e+00 : f32
    %101 = vector.broadcast %cst_64 : f32 to vector<9x1x4xf32>
    %c2_65 = arith.constant 2 : index
    %c0_66 = arith.constant 0 : index
    %c0_67 = arith.constant 0 : index
    %c0_68 = arith.constant 0 : index
    %102 = vector.load %arg14[%c2_65, %c0_66, %c0_67, %c0_68] : memref<4x9x9x4xf32, #tpu.memory_space<vmem>>, vector<1x9x1x4xf32>
    %103 = vector.shape_cast %102 : vector<1x9x1x4xf32> to vector<9x1x4xf32>
    %104 = vector.shape_cast %101 : vector<9x1x4xf32> to vector<1x9x1x4xf32>
    tpu.vector_store %arg14[%c2_65, %c0_66, %c0_67, %c0_68], %104 {strides = array<i32>} : memref<4x9x9x4xf32, #tpu.memory_space<vmem>>, vector<1x9x1x4xf32>,
    %cst_69 = arith.constant 0.000000e+00 : f32
    %105 = vector.broadcast %cst_69 : f32 to vector<1x9x4xf32>
    %c3 = arith.constant 3 : index
    %c8_70 = arith.constant 8 : index
    %c0_71 = arith.constant 0 : index
    %c0_72 = arith.constant 0 : index
    %106 = vector.load %arg14[%c3, %c8_70, %c0_71, %c0_72] : memref<4x9x9x4xf32, #tpu.memory_space<vmem>>, vector<1x1x9x4xf32>
    %107 = vector.shape_cast %106 : vector<1x1x9x4xf32> to vector<1x9x4xf32>
    %108 = vector.shape_cast %105 : vector<1x9x4xf32> to vector<1x1x9x4xf32>
    tpu.vector_store %arg14[%c3, %c8_70, %c0_71, %c0_72], %108 {strides = array<i32>} : memref<4x9x9x4xf32, #tpu.memory_space<vmem>>, vector<1x1x9x4xf32>,
    %cst_73 = arith.constant 0.000000e+00 : f32
    %109 = vector.broadcast %cst_73 : f32 to vector<9x1x4xf32>
    %c3_74 = arith.constant 3 : index
    %c0_75 = arith.constant 0 : index
    %c8_76 = arith.constant 8 : index
    %c0_77 = arith.constant 0 : index
    %110 = vector.load %arg14[%c3_74, %c0_75, %c8_76, %c0_77] : memref<4x9x9x4xf32, #tpu.memory_space<vmem>>, vector<1x9x1x4xf32>
    %111 = vector.shape_cast %110 : vector<1x9x1x4xf32> to vector<9x1x4xf32>
    %112 = vector.shape_cast %109 : vector<9x1x4xf32> to vector<1x9x1x4xf32>
    tpu.vector_store %arg14[%c3_74, %c0_75, %c8_76, %c0_77], %112 {strides = array<i32>} : memref<4x9x9x4xf32, #tpu.memory_space<vmem>>, vector<1x9x1x4xf32>,
    %c0_78 = arith.constant 0 : index
    %c0_79 = arith.constant 0 : index
    %113 = vector.load %arg8[%c0_78, %c0_79] : memref<64x4xbf16, #tpu.memory_space<vmem>>, vector<64x4xbf16>
    %c0_80 = arith.constant 0 : index
    %c0_81 = arith.constant 0 : index
    %114 = vector.load %arg9[%c0_80, %c0_81] : memref<1x4xf32, #tpu.memory_space<vmem>>, vector<1x4xf32>
    %c0_82 = arith.constant 0 : index
    %c1_83 = arith.constant 1 : index
    %c1_84 = arith.constant 1 : index
    %c0_85 = arith.constant 0 : index
    %115 = vector.load %arg1[%c0_82, %c1_83, %c1_84, %c0_85] : memref<1x9x9x64xf32, #tpu.memory_space<vmem>>, vector<1x8x8x64xf32>
    %116 = vector.shape_cast %115 : vector<1x8x8x64xf32> to vector<8x8x64xf32>
    %117 = vector.shape_cast %116 : vector<8x8x64xf32> to vector<64x64xf32>
    %118 = arith.truncf %117 : vector<64x64xf32> to vector<64x64xbf16>
    %cst_86 = arith.constant dense<0.000000e+00> : vector<64x4xf32>
    %119 = tpu.matmul %118, %113, %cst_86 {dimension_numbers = #tpu.dot_dimension_numbers<[1], [0], [0], [1], [0, 0, 1, 1], [], []>} : vector<64x64xbf16>, vector<64x4xbf16>, vector<64x4xf32> -> vector<64x4xf32>
    %120 = vector.broadcast %114 : vector<1x4xf32> to vector<64x4xf32>
    %121 = arith.addf %119, %120 : vector<64x4xf32>
    %cst_87 = arith.constant 0.000000e+00 : f32
    %122 = vector.broadcast %cst_87 : f32 to vector<64x4xf32>
    %123 = arith.maximumf %121, %122 : vector<64x4xf32>
    %124 = vector.shape_cast %123 : vector<64x4xf32> to vector<8x8x4xf32>
    %c0_88 = arith.constant 0 : index
    %c1_89 = arith.constant 1 : index
    %c1_90 = arith.constant 1 : index
    %c0_91 = arith.constant 0 : index
    %125 = vector.load %arg14[%c0_88, %c1_89, %c1_90, %c0_91] : memref<4x9x9x4xf32, #tpu.memory_space<vmem>>, vector<1x8x8x4xf32>
    %126 = vector.shape_cast %125 : vector<1x8x8x4xf32> to vector<8x8x4xf32>
    %127 = vector.shape_cast %124 : vector<8x8x4xf32> to vector<1x8x8x4xf32>
    tpu.vector_store %arg14[%c0_88, %c1_89, %c1_90, %c0_91], %127 {strides = array<i32>} : memref<4x9x9x4xf32, #tpu.memory_space<vmem>>, vector<1x8x8x4xf32>,
    %c0_92 = arith.constant 0 : index
    %c1_93 = arith.constant 1 : index
    %c0_94 = arith.constant 0 : index
    %c0_95 = arith.constant 0 : index
    %128 = vector.load %arg2[%c0_92, %c1_93, %c0_94, %c0_95] : memref<1x9x9x64xf32, #tpu.memory_space<vmem>>, vector<1x8x8x64xf32>
    %129 = vector.shape_cast %128 : vector<1x8x8x64xf32> to vector<8x8x64xf32>
    %130 = vector.shape_cast %129 : vector<8x8x64xf32> to vector<64x64xf32>
    %131 = arith.truncf %130 : vector<64x64xf32> to vector<64x64xbf16>
    %cst_96 = arith.constant dense<0.000000e+00> : vector<64x4xf32>
    %132 = tpu.matmul %131, %113, %cst_96 {dimension_numbers = #tpu.dot_dimension_numbers<[1], [0], [0], [1], [0, 0, 1, 1], [], []>} : vector<64x64xbf16>, vector<64x4xbf16>, vector<64x4xf32> -> vector<64x4xf32>
    %133 = vector.broadcast %114 : vector<1x4xf32> to vector<64x4xf32>
    %134 = arith.addf %132, %133 : vector<64x4xf32>
    %cst_97 = arith.constant 0.000000e+00 : f32
    %135 = vector.broadcast %cst_97 : f32 to vector<64x4xf32>
    %136 = arith.maximumf %134, %135 : vector<64x4xf32>
    %137 = vector.shape_cast %136 : vector<64x4xf32> to vector<8x8x4xf32>
    %c1_98 = arith.constant 1 : index
    %c1_99 = arith.constant 1 : index
    %c0_100 = arith.constant 0 : index
    %c0_101 = arith.constant 0 : index
    %138 = vector.load %arg14[%c1_98, %c1_99, %c0_100, %c0_101] : memref<4x9x9x4xf32, #tpu.memory_space<vmem>>, vector<1x8x8x4xf32>
    %139 = vector.shape_cast %138 : vector<1x8x8x4xf32> to vector<8x8x4xf32>
    %140 = vector.shape_cast %137 : vector<8x8x4xf32> to vector<1x8x8x4xf32>
    tpu.vector_store %arg14[%c1_98, %c1_99, %c0_100, %c0_101], %140 {strides = array<i32>} : memref<4x9x9x4xf32, #tpu.memory_space<vmem>>, vector<1x8x8x4xf32>,
    %c0_102 = arith.constant 0 : index
    %c0_103 = arith.constant 0 : index
    %c1_104 = arith.constant 1 : index
    %c0_105 = arith.constant 0 : index
    %141 = vector.load %arg3[%c0_102, %c0_103, %c1_104, %c0_105] : memref<1x9x9x64xf32, #tpu.memory_space<vmem>>, vector<1x8x8x64xf32>
    %142 = vector.shape_cast %141 : vector<1x8x8x64xf32> to vector<8x8x64xf32>
    %143 = vector.shape_cast %142 : vector<8x8x64xf32> to vector<64x64xf32>
    %144 = arith.truncf %143 : vector<64x64xf32> to vector<64x64xbf16>
    %cst_106 = arith.constant dense<0.000000e+00> : vector<64x4xf32>
    %145 = tpu.matmul %144, %113, %cst_106 {dimension_numbers = #tpu.dot_dimension_numbers<[1], [0], [0], [1], [0, 0, 1, 1], [], []>} : vector<64x64xbf16>, vector<64x4xbf16>, vector<64x4xf32> -> vector<64x4xf32>
    %146 = vector.broadcast %114 : vector<1x4xf32> to vector<64x4xf32>
    %147 = arith.addf %145, %146 : vector<64x4xf32>
    %cst_107 = arith.constant 0.000000e+00 : f32
    %148 = vector.broadcast %cst_107 : f32 to vector<64x4xf32>
    %149 = arith.maximumf %147, %148 : vector<64x4xf32>
    %150 = vector.shape_cast %149 : vector<64x4xf32> to vector<8x8x4xf32>
    %c2_108 = arith.constant 2 : index
    %c0_109 = arith.constant 0 : index
    %c1_110 = arith.constant 1 : index
    %c0_111 = arith.constant 0 : index
    %151 = vector.load %arg14[%c2_108, %c0_109, %c1_110, %c0_111] : memref<4x9x9x4xf32, #tpu.memory_space<vmem>>, vector<1x8x8x4xf32>
    %152 = vector.shape_cast %151 : vector<1x8x8x4xf32> to vector<8x8x4xf32>
    %153 = vector.shape_cast %150 : vector<8x8x4xf32> to vector<1x8x8x4xf32>
    tpu.vector_store %arg14[%c2_108, %c0_109, %c1_110, %c0_111], %153 {strides = array<i32>} : memref<4x9x9x4xf32, #tpu.memory_space<vmem>>, vector<1x8x8x4xf32>,
    %c0_112 = arith.constant 0 : index
    %c0_113 = arith.constant 0 : index
    %c0_114 = arith.constant 0 : index
    %c0_115 = arith.constant 0 : index
    %154 = vector.load %arg4[%c0_112, %c0_113, %c0_114, %c0_115] : memref<1x9x9x64xf32, #tpu.memory_space<vmem>>, vector<1x8x8x64xf32>
    %155 = vector.shape_cast %154 : vector<1x8x8x64xf32> to vector<8x8x64xf32>
    %156 = vector.shape_cast %155 : vector<8x8x64xf32> to vector<64x64xf32>
    %157 = arith.truncf %156 : vector<64x64xf32> to vector<64x64xbf16>
    %cst_116 = arith.constant dense<0.000000e+00> : vector<64x4xf32>
    %158 = tpu.matmul %157, %113, %cst_116 {dimension_numbers = #tpu.dot_dimension_numbers<[1], [0], [0], [1], [0, 0, 1, 1], [], []>} : vector<64x64xbf16>, vector<64x4xbf16>, vector<64x4xf32> -> vector<64x4xf32>
    %159 = vector.broadcast %114 : vector<1x4xf32> to vector<64x4xf32>
    %160 = arith.addf %158, %159 : vector<64x4xf32>
    %cst_117 = arith.constant 0.000000e+00 : f32
    %161 = vector.broadcast %cst_117 : f32 to vector<64x4xf32>
    %162 = arith.maximumf %160, %161 : vector<64x4xf32>
    %163 = vector.shape_cast %162 : vector<64x4xf32> to vector<8x8x4xf32>
    %c3_118 = arith.constant 3 : index
    %c0_119 = arith.constant 0 : index
    %c0_120 = arith.constant 0 : index
    %c0_121 = arith.constant 0 : index
    %164 = vector.load %arg14[%c3_118, %c0_119, %c0_120, %c0_121] : memref<4x9x9x4xf32, #tpu.memory_space<vmem>>, vector<1x8x8x4xf32>
    %165 = vector.shape_cast %164 : vector<1x8x8x4xf32> to vector<8x8x4xf32>
    %166 = vector.shape_cast %163 : vector<8x8x4xf32> to vector<1x8x8x4xf32>
    tpu.vector_store %arg14[%c3_118, %c0_119, %c0_120, %c0_121], %166 {strides = array<i32>} : memref<4x9x9x4xf32, #tpu.memory_space<vmem>>, vector<1x8x8x4xf32>,
    %c0_122 = arith.constant 0 : index
    %c0_123 = arith.constant 0 : index
    %167 = vector.load %arg10[%c0_122, %c0_123] : memref<9x4xf32, #tpu.memory_space<vmem>>, vector<9x4xf32>
    %c0_124 = arith.constant 0 : index
    %c0_125 = arith.constant 0 : index
    %c0_126 = arith.constant 0 : index
    %c0_127 = arith.constant 0 : index
    %168 = vector.load %arg14[%c0_124, %c0_125, %c0_126, %c0_127] : memref<4x9x9x4xf32, #tpu.memory_space<vmem>>, vector<1x8x8x4xf32>
    %169 = vector.shape_cast %168 : vector<1x8x8x4xf32> to vector<8x8x4xf32>
    %170 = vector.extract_strided_slice %167 {offsets = [0, 0], sizes = [1, 4], strides = [1, 1]} : vector<9x4xf32> to vector<1x4xf32>
    %171 = vector.shape_cast %170 : vector<1x4xf32> to vector<4xf32>
    %172 = vector.shape_cast %171 : vector<4xf32> to vector<1x1x4xf32>
    %173 = vector.broadcast %172 : vector<1x1x4xf32> to vector<8x8x4xf32>
    %174 = arith.mulf %169, %173 : vector<8x8x4xf32>
    %c1_128 = arith.constant 1 : index
    %c0_129 = arith.constant 0 : index
    %c0_130 = arith.constant 0 : index
    %c0_131 = arith.constant 0 : index
    %175 = vector.load %arg14[%c1_128, %c0_129, %c0_130, %c0_131] : memref<4x9x9x4xf32, #tpu.memory_space<vmem>>, vector<1x8x8x4xf32>
    %176 = vector.shape_cast %175 : vector<1x8x8x4xf32> to vector<8x8x4xf32>
    %177 = vector.extract_strided_slice %167 {offsets = [1, 0], sizes = [1, 4], strides = [1, 1]} : vector<9x4xf32> to vector<1x4xf32>
    %178 = vector.shape_cast %177 : vector<1x4xf32> to vector<4xf32>
    %179 = vector.shape_cast %178 : vector<4xf32> to vector<1x1x4xf32>
    %180 = vector.broadcast %179 : vector<1x1x4xf32> to vector<8x8x4xf32>
    %181 = arith.mulf %176, %180 : vector<8x8x4xf32>
    %182 = arith.addf %174, %181 : vector<8x8x4xf32>
    %c0_132 = arith.constant 0 : index
    %c0_133 = arith.constant 0 : index
    %c1_134 = arith.constant 1 : index
    %c0_135 = arith.constant 0 : index
    %183 = vector.load %arg14[%c0_132, %c0_133, %c1_134, %c0_135] : memref<4x9x9x4xf32, #tpu.memory_space<vmem>>, vector<1x8x8x4xf32>
    %184 = vector.shape_cast %183 : vector<1x8x8x4xf32> to vector<8x8x4xf32>
    %185 = vector.extract_strided_slice %167 {offsets = [2, 0], sizes = [1, 4], strides = [1, 1]} : vector<9x4xf32> to vector<1x4xf32>
    %186 = vector.shape_cast %185 : vector<1x4xf32> to vector<4xf32>
    %187 = vector.shape_cast %186 : vector<4xf32> to vector<1x1x4xf32>
    %188 = vector.broadcast %187 : vector<1x1x4xf32> to vector<8x8x4xf32>
    %189 = arith.mulf %184, %188 : vector<8x8x4xf32>
    %190 = arith.addf %182, %189 : vector<8x8x4xf32>
    %c2_136 = arith.constant 2 : index
    %c0_137 = arith.constant 0 : index
    %c0_138 = arith.constant 0 : index
    %c0_139 = arith.constant 0 : index
    %191 = vector.load %arg14[%c2_136, %c0_137, %c0_138, %c0_139] : memref<4x9x9x4xf32, #tpu.memory_space<vmem>>, vector<1x8x8x4xf32>
    %192 = vector.shape_cast %191 : vector<1x8x8x4xf32> to vector<8x8x4xf32>
    %193 = vector.extract_strided_slice %167 {offsets = [3, 0], sizes = [1, 4], strides = [1, 1]} : vector<9x4xf32> to vector<1x4xf32>
    %194 = vector.shape_cast %193 : vector<1x4xf32> to vector<4xf32>
    %195 = vector.shape_cast %194 : vector<4xf32> to vector<1x1x4xf32>
    %196 = vector.broadcast %195 : vector<1x1x4xf32> to vector<8x8x4xf32>
    %197 = arith.mulf %192, %196 : vector<8x8x4xf32>
    %198 = arith.addf %190, %197 : vector<8x8x4xf32>
    %c3_140 = arith.constant 3 : index
    %c0_141 = arith.constant 0 : index
    %c0_142 = arith.constant 0 : index
    %c0_143 = arith.constant 0 : index
    %199 = vector.load %arg14[%c3_140, %c0_141, %c0_142, %c0_143] : memref<4x9x9x4xf32, #tpu.memory_space<vmem>>, vector<1x8x8x4xf32>
    %200 = vector.shape_cast %199 : vector<1x8x8x4xf32> to vector<8x8x4xf32>
    %201 = vector.extract_strided_slice %167 {offsets = [4, 0], sizes = [1, 4], strides = [1, 1]} : vector<9x4xf32> to vector<1x4xf32>
    %202 = vector.shape_cast %201 : vector<1x4xf32> to vector<4xf32>
    %203 = vector.shape_cast %202 : vector<4xf32> to vector<1x1x4xf32>
    %204 = vector.broadcast %203 : vector<1x1x4xf32> to vector<8x8x4xf32>
    %205 = arith.mulf %200, %204 : vector<8x8x4xf32>
    %206 = arith.addf %198, %205 : vector<8x8x4xf32>
    %c2_144 = arith.constant 2 : index
    %c0_145 = arith.constant 0 : index
    %c1_146 = arith.constant 1 : index
    %c0_147 = arith.constant 0 : index
    %207 = vector.load %arg14[%c2_144, %c0_145, %c1_146, %c0_147] : memref<4x9x9x4xf32, #tpu.memory_space<vmem>>, vector<1x8x8x4xf32>
    %208 = vector.shape_cast %207 : vector<1x8x8x4xf32> to vector<8x8x4xf32>
    %209 = vector.extract_strided_slice %167 {offsets = [5, 0], sizes = [1, 4], strides = [1, 1]} : vector<9x4xf32> to vector<1x4xf32>
    %210 = vector.shape_cast %209 : vector<1x4xf32> to vector<4xf32>
    %211 = vector.shape_cast %210 : vector<4xf32> to vector<1x1x4xf32>
    %212 = vector.broadcast %211 : vector<1x1x4xf32> to vector<8x8x4xf32>
    %213 = arith.mulf %208, %212 : vector<8x8x4xf32>
    %214 = arith.addf %206, %213 : vector<8x8x4xf32>
    %c0_148 = arith.constant 0 : index
    %c1_149 = arith.constant 1 : index
    %c0_150 = arith.constant 0 : index
    %c0_151 = arith.constant 0 : index
    %215 = vector.load %arg14[%c0_148, %c1_149, %c0_150, %c0_151] : memref<4x9x9x4xf32, #tpu.memory_space<vmem>>, vector<1x8x8x4xf32>
    %216 = vector.shape_cast %215 : vector<1x8x8x4xf32> to vector<8x8x4xf32>
    %217 = vector.extract_strided_slice %167 {offsets = [6, 0], sizes = [1, 4], strides = [1, 1]} : vector<9x4xf32> to vector<1x4xf32>
    %218 = vector.shape_cast %217 : vector<1x4xf32> to vector<4xf32>
    %219 = vector.shape_cast %218 : vector<4xf32> to vector<1x1x4xf32>
    %220 = vector.broadcast %219 : vector<1x1x4xf32> to vector<8x8x4xf32>
    %221 = arith.mulf %216, %220 : vector<8x8x4xf32>
    %222 = arith.addf %214, %221 : vector<8x8x4xf32>
    %c1_152 = arith.constant 1 : index
    %c1_153 = arith.constant 1 : index
    %c0_154 = arith.constant 0 : index
    %c0_155 = arith.constant 0 : index
    %223 = vector.load %arg14[%c1_152, %c1_153, %c0_154, %c0_155] : memref<4x9x9x4xf32, #tpu.memory_space<vmem>>, vector<1x8x8x4xf32>
    %224 = vector.shape_cast %223 : vector<1x8x8x4xf32> to vector<8x8x4xf32>
    %225 = vector.extract_strided_slice %167 {offsets = [7, 0], sizes = [1, 4], strides = [1, 1]} : vector<9x4xf32> to vector<1x4xf32>
    %226 = vector.shape_cast %225 : vector<1x4xf32> to vector<4xf32>
    %227 = vector.shape_cast %226 : vector<4xf32> to vector<1x1x4xf32>
    %228 = vector.broadcast %227 : vector<1x1x4xf32> to vector<8x8x4xf32>
    %229 = arith.mulf %224, %228 : vector<8x8x4xf32>
    %230 = arith.addf %222, %229 : vector<8x8x4xf32>
    %c0_156 = arith.constant 0 : index
    %c1_157 = arith.constant 1 : index
    %c1_158 = arith.constant 1 : index
    %c0_159 = arith.constant 0 : index
    %231 = vector.load %arg14[%c0_156, %c1_157, %c1_158, %c0_159] : memref<4x9x9x4xf32, #tpu.memory_space<vmem>>, vector<1x8x8x4xf32>
    %232 = vector.shape_cast %231 : vector<1x8x8x4xf32> to vector<8x8x4xf32>
    %233 = vector.extract_strided_slice %167 {offsets = [8, 0], sizes = [1, 4], strides = [1, 1]} : vector<9x4xf32> to vector<1x4xf32>
    %234 = vector.shape_cast %233 : vector<1x4xf32> to vector<4xf32>
    %235 = vector.shape_cast %234 : vector<4xf32> to vector<1x1x4xf32>
    %236 = vector.broadcast %235 : vector<1x1x4xf32> to vector<8x8x4xf32>
    %237 = arith.mulf %232, %236 : vector<8x8x4xf32>
    %238 = arith.addf %230, %237 : vector<8x8x4xf32>
    %239 = vector.shape_cast %238 : vector<8x8x4xf32> to vector<64x4xf32>
    %240 = arith.truncf %239 : vector<64x4xf32> to vector<64x4xbf16>
    %c0_160 = arith.constant 0 : index
    %c0_161 = arith.constant 0 : index
    %241 = vector.load %arg11[%c0_160, %c0_161] : memref<4x4xbf16, #tpu.memory_space<vmem>>, vector<4x4xbf16>
    %cst_162 = arith.constant dense<0.000000e+00> : vector<64x4xf32>
    %242 = tpu.matmul %240, %241, %cst_162 {dimension_numbers = #tpu.dot_dimension_numbers<[1], [0], [0], [1], [0, 0, 1, 1], [], []>} : vector<64x4xbf16>, vector<4x4xbf16>, vector<64x4xf32> -> vector<64x4xf32>
    %c0_163 = arith.constant 0 : index
    %c0_164 = arith.constant 0 : index
    %243 = vector.load %arg12[%c0_163, %c0_164] : memref<1x4xf32, #tpu.memory_space<vmem>>, vector<1x4xf32>
    %244 = vector.broadcast %243 : vector<1x4xf32> to vector<64x4xf32>
    %245 = arith.addf %242, %244 : vector<64x4xf32>
    %cst_165 = arith.constant 0.000000e+00 : f32
    %246 = vector.broadcast %cst_165 : f32 to vector<64x4xf32>
    %247 = arith.maximumf %245, %246 : vector<64x4xf32>
    %248 = tpu.concatenate %80, %247 in 1 : vector<64x4xf32>, vector<64x4xf32> -> vector<64x8xf32>
    %c0_166 = arith.constant 0 : index
    %c0_167 = arith.constant 0 : index
    %c0_168 = arith.constant 0 : index
    %249 = vector.load %arg13[%c0_166, %c0_167, %c0_168] : memref<1x64x8xf32, #tpu.memory_space<vmem>>, vector<1x64x8xf32>
    %250 = vector.shape_cast %249 : vector<1x64x8xf32> to vector<64x8xf32>
    %251 = vector.shape_cast %248 : vector<64x8xf32> to vector<1x64x8xf32>
    tpu.vector_store %arg13[%c0_166, %c0_167, %c0_168], %251 {strides = array<i32>} : memref<1x64x8xf32, #tpu.memory_space<vmem>>, vector<1x64x8xf32>,
    return
  }
  func.func @transform_0(%arg0: i32) -> (i32, i32, i32, i32) {
    %c0_i32 = arith.constant 0 : i32
    %c0_i32_0 = arith.constant 0 : i32
    %c0_i32_1 = arith.constant 0 : i32
    %c0_i32_2 = arith.constant 0 : i32
    return %arg0, %c0_i32, %c0_i32_0, %c0_i32_1 : i32, i32, i32, i32
  }
  func.func @transform_1(%arg0: i32) -> (i32, i32, i32, i32) {
    %c0_i32 = arith.constant 0 : i32
    %c0_i32_0 = arith.constant 0 : i32
    %c0_i32_1 = arith.constant 0 : i32
    %c0_i32_2 = arith.constant 0 : i32
    return %arg0, %c0_i32, %c0_i32_0, %c0_i32_1 : i32, i32, i32, i32
  }
  func.func @transform_2(%arg0: i32) -> (i32, i32, i32, i32) {
    %c0_i32 = arith.constant 0 : i32
    %c0_i32_0 = arith.constant 0 : i32
    %c0_i32_1 = arith.constant 0 : i32
    %c0_i32_2 = arith.constant 0 : i32
    return %arg0, %c0_i32, %c0_i32_0, %c0_i32_1 : i32, i32, i32, i32
  }
  func.func @transform_3(%arg0: i32) -> (i32, i32, i32, i32) {
    %c0_i32 = arith.constant 0 : i32
    %c0_i32_0 = arith.constant 0 : i32
    %c0_i32_1 = arith.constant 0 : i32
    %c0_i32_2 = arith.constant 0 : i32
    return %arg0, %c0_i32, %c0_i32_0, %c0_i32_1 : i32, i32, i32, i32
  }
  func.func @transform_4(%arg0: i32) -> (i32, i32) {
    %c0_i32 = arith.constant 0 : i32
    %c0_i32_0 = arith.constant 0 : i32
    %c0_i32_1 = arith.constant 0 : i32
    return %c0_i32, %c0_i32_0 : i32, i32
  }
  func.func @transform_5(%arg0: i32) -> (i32, i32) {
    %c0_i32 = arith.constant 0 : i32
    %c0_i32_0 = arith.constant 0 : i32
    %c0_i32_1 = arith.constant 0 : i32
    return %c0_i32, %c0_i32_0 : i32, i32
  }
  func.func @transform_6(%arg0: i32) -> (i32, i32) {
    %c0_i32 = arith.constant 0 : i32
    %c0_i32_0 = arith.constant 0 : i32
    %c0_i32_1 = arith.constant 0 : i32
    return %c0_i32, %c0_i32_0 : i32, i32
  }
  func.func @transform_7(%arg0: i32) -> (i32, i32) {
    %c0_i32 = arith.constant 0 : i32
    %c0_i32_0 = arith.constant 0 : i32
    %c0_i32_1 = arith.constant 0 : i32
    return %c0_i32, %c0_i32_0 : i32, i32
  }
  func.func @transform_8(%arg0: i32) -> (i32, i32) {
    %c0_i32 = arith.constant 0 : i32
    %c0_i32_0 = arith.constant 0 : i32
    %c0_i32_1 = arith.constant 0 : i32
    return %c0_i32, %c0_i32_0 : i32, i32
  }
  func.func @transform_9(%arg0: i32) -> (i32, i32) {
    %c0_i32 = arith.constant 0 : i32
    %c0_i32_0 = arith.constant 0 : i32
    %c0_i32_1 = arith.constant 0 : i32
    return %c0_i32, %c0_i32_0 : i32, i32
  }
  func.func @transform_10(%arg0: i32) -> (i32, i32) {
    %c0_i32 = arith.constant 0 : i32
    %c0_i32_0 = arith.constant 0 : i32
    %c0_i32_1 = arith.constant 0 : i32
    return %c0_i32, %c0_i32_0 : i32, i32
  }
  func.func @transform_11(%arg0: i32) -> (i32, i32) {
    %c0_i32 = arith.constant 0 : i32
    %c0_i32_0 = arith.constant 0 : i32
    %c0_i32_1 = arith.constant 0 : i32
    return %c0_i32, %c0_i32_0 : i32, i32
  }
  func.func @transform_12(%arg0: i32) -> (i32, i32, i32) {
    %c0_i32 = arith.constant 0 : i32
    %c0_i32_0 = arith.constant 0 : i32
    %c0_i32_1 = arith.constant 0 : i32
    return %arg0, %c0_i32, %c0_i32_0 : i32, i32, i32
  }
}

module attributes {stable_mosaic.version = 11 : i64} {
  func.func @_s1_stack_kernel(%arg0: i32, %arg1: memref<1x64x8xf32, #tpu.memory_space<vmem>>, %arg2: memref<4x4xbf16, #tpu.memory_space<vmem>>, %arg3: memref<1x4xf32, #tpu.memory_space<vmem>>, %arg4: memref<9x4xf32, #tpu.memory_space<vmem>>, %arg5: memref<4x4xbf16, #tpu.memory_space<vmem>>, %arg6: memref<1x4xf32, #tpu.memory_space<vmem>>, %arg7: memref<4x4xbf16, #tpu.memory_space<vmem>>, %arg8: memref<1x4xf32, #tpu.memory_space<vmem>>, %arg9: memref<9x4xf32, #tpu.memory_space<vmem>>, %arg10: memref<4x4xbf16, #tpu.memory_space<vmem>>, %arg11: memref<1x4xf32, #tpu.memory_space<vmem>>, %arg12: memref<4x4xbf16, #tpu.memory_space<vmem>>, %arg13: memref<1x4xf32, #tpu.memory_space<vmem>>, %arg14: memref<9x4xf32, #tpu.memory_space<vmem>>, %arg15: memref<4x4xbf16, #tpu.memory_space<vmem>>, %arg16: memref<1x4xf32, #tpu.memory_space<vmem>>, %arg17: memref<1x64x8xf32, #tpu.memory_space<vmem>>, %arg18: memref<10x10x4xf32, #tpu.memory_space<vmem>>) attributes {dimension_semantics = [#tpu.dimension_semantics<parallel>], iteration_bounds = array<i64: 2>, scalar_prefetch = 0 : i64, scratch_operands = 1 : i64, tpu.core_type = #tpu.core_type<tc>, window_params = [{transform_indices = @transform_0, window_bounds = array<i64: 1, 64, 8>}, {pipeline_mode = #tpu.pipeline_mode<synchronous>, transform_indices = @transform_1, window_bounds = array<i64: 4, 4>}, {pipeline_mode = #tpu.pipeline_mode<synchronous>, transform_indices = @transform_2, window_bounds = array<i64: 1, 4>}, {pipeline_mode = #tpu.pipeline_mode<synchronous>, transform_indices = @transform_3, window_bounds = array<i64: 9, 4>}, {pipeline_mode = #tpu.pipeline_mode<synchronous>, transform_indices = @transform_4, window_bounds = array<i64: 4, 4>}, {pipeline_mode = #tpu.pipeline_mode<synchronous>, transform_indices = @transform_5, window_bounds = array<i64: 1, 4>}, {pipeline_mode = #tpu.pipeline_mode<synchronous>, transform_indices = @transform_6, window_bounds = array<i64: 4, 4>}, {pipeline_mode = #tpu.pipeline_mode<synchronous>, transform_indices = @transform_7, window_bounds = array<i64: 1, 4>}, {pipeline_mode = #tpu.pipeline_mode<synchronous>, transform_indices = @transform_8, window_bounds = array<i64: 9, 4>}, {pipeline_mode = #tpu.pipeline_mode<synchronous>, transform_indices = @transform_9, window_bounds = array<i64: 4, 4>}, {pipeline_mode = #tpu.pipeline_mode<synchronous>, transform_indices = @transform_10, window_bounds = array<i64: 1, 4>}, {pipeline_mode = #tpu.pipeline_mode<synchronous>, transform_indices = @transform_11, window_bounds = array<i64: 4, 4>}, {pipeline_mode = #tpu.pipeline_mode<synchronous>, transform_indices = @transform_12, window_bounds = array<i64: 1, 4>}, {pipeline_mode = #tpu.pipeline_mode<synchronous>, transform_indices = @transform_13, window_bounds = array<i64: 9, 4>}, {pipeline_mode = #tpu.pipeline_mode<synchronous>, transform_indices = @transform_14, window_bounds = array<i64: 4, 4>}, {pipeline_mode = #tpu.pipeline_mode<synchronous>, transform_indices = @transform_15, window_bounds = array<i64: 1, 4>}, {transform_indices = @transform_16, window_bounds = array<i64: 1, 64, 8>}]} {
    %cst = arith.constant 0.000000e+00 : f32
    %0 = vector.broadcast %cst : f32 to vector<1x10x4xf32>
    %c0 = arith.constant 0 : index
    %c0_0 = arith.constant 0 : index
    %c0_1 = arith.constant 0 : index
    %1 = vector.load %arg18[%c0, %c0_0, %c0_1] : memref<10x10x4xf32, #tpu.memory_space<vmem>>, vector<1x10x4xf32>
    tpu.vector_store %arg18[%c0, %c0_0, %c0_1], %0 {strides = array<i32>} : memref<10x10x4xf32, #tpu.memory_space<vmem>>, vector<1x10x4xf32>,
    %cst_2 = arith.constant 0.000000e+00 : f32
    %2 = vector.broadcast %cst_2 : f32 to vector<1x10x4xf32>
    %c9 = arith.constant 9 : index
    %c0_3 = arith.constant 0 : index
    %c0_4 = arith.constant 0 : index
    %3 = vector.load %arg18[%c9, %c0_3, %c0_4] : memref<10x10x4xf32, #tpu.memory_space<vmem>>, vector<1x10x4xf32>
    tpu.vector_store %arg18[%c9, %c0_3, %c0_4], %2 {strides = array<i32>} : memref<10x10x4xf32, #tpu.memory_space<vmem>>, vector<1x10x4xf32>,
    %cst_5 = arith.constant 0.000000e+00 : f32
    %4 = vector.broadcast %cst_5 : f32 to vector<10x1x4xf32>
    %c0_6 = arith.constant 0 : index
    %c0_7 = arith.constant 0 : index
    %c0_8 = arith.constant 0 : index
    %5 = vector.load %arg18[%c0_6, %c0_7, %c0_8] : memref<10x10x4xf32, #tpu.memory_space<vmem>>, vector<10x1x4xf32>
    tpu.vector_store %arg18[%c0_6, %c0_7, %c0_8], %4 {strides = array<i32>} : memref<10x10x4xf32, #tpu.memory_space<vmem>>, vector<10x1x4xf32>,
    %cst_9 = arith.constant 0.000000e+00 : f32
    %6 = vector.broadcast %cst_9 : f32 to vector<10x1x4xf32>
    %c0_10 = arith.constant 0 : index
    %c9_11 = arith.constant 9 : index
    %c0_12 = arith.constant 0 : index
    %7 = vector.load %arg18[%c0_10, %c9_11, %c0_12] : memref<10x10x4xf32, #tpu.memory_space<vmem>>, vector<10x1x4xf32>
    tpu.vector_store %arg18[%c0_10, %c9_11, %c0_12], %6 {strides = array<i32>} : memref<10x10x4xf32, #tpu.memory_space<vmem>>, vector<10x1x4xf32>,
    %c0_13 = arith.constant 0 : index
    %c0_14 = arith.constant 0 : index
    %c0_15 = arith.constant 0 : index
    %8 = vector.load %arg1[%c0_13, %c0_14, %c0_15] : memref<1x64x8xf32, #tpu.memory_space<vmem>>, vector<1x64x8xf32>
    %9 = vector.shape_cast %8 : vector<1x64x8xf32> to vector<64x8xf32>
    %10 = vector.extract_strided_slice %9 {offsets = [0, 0], sizes = [64, 4], strides = [1, 1]} : vector<64x8xf32> to vector<64x4xf32>
    %11 = vector.extract_strided_slice %9 {offsets = [0, 4], sizes = [64, 4], strides = [1, 1]} : vector<64x8xf32> to vector<64x4xf32>
    %c0_16 = arith.constant 0 : index
    %c0_17 = arith.constant 0 : index
    %12 = vector.load %arg2[%c0_16, %c0_17] : memref<4x4xbf16, #tpu.memory_space<vmem>>, vector<4x4xbf16>
    %c0_18 = arith.constant 0 : index
    %c0_19 = arith.constant 0 : index
    %13 = vector.load %arg3[%c0_18, %c0_19] : memref<1x4xf32, #tpu.memory_space<vmem>>, vector<1x4xf32>
    %c0_20 = arith.constant 0 : index
    %c0_21 = arith.constant 0 : index
    %14 = vector.load %arg4[%c0_20, %c0_21] : memref<9x4xf32, #tpu.memory_space<vmem>>, vector<9x4xf32>
    %c0_22 = arith.constant 0 : index
    %c0_23 = arith.constant 0 : index
    %15 = vector.load %arg5[%c0_22, %c0_23] : memref<4x4xbf16, #tpu.memory_space<vmem>>, vector<4x4xbf16>
    %c0_24 = arith.constant 0 : index
    %c0_25 = arith.constant 0 : index
    %16 = vector.load %arg6[%c0_24, %c0_25] : memref<1x4xf32, #tpu.memory_space<vmem>>, vector<1x4xf32>
    %17 = vector.extract_strided_slice %10 {offsets = [0, 2], sizes = [64, 2], strides = [1, 1]} : vector<64x4xf32> to vector<64x2xf32>
    %18 = vector.extract_strided_slice %11 {offsets = [0, 2], sizes = [64, 2], strides = [1, 1]} : vector<64x4xf32> to vector<64x2xf32>
    %19 = tpu.concatenate %17, %18 in 1 : vector<64x2xf32>, vector<64x2xf32> -> vector<64x4xf32>
    %20 = arith.truncf %19 : vector<64x4xf32> to vector<64x4xbf16>
    %cst_26 = arith.constant dense<0.000000e+00> : vector<64x4xf32>
    %21 = tpu.matmul %20, %12, %cst_26 {dimension_numbers = #tpu.dot_dimension_numbers<[1], [0], [0], [1], [0, 0, 1, 1], [], []>} : vector<64x4xbf16>, vector<4x4xbf16>, vector<64x4xf32> -> vector<64x4xf32>
    %22 = vector.broadcast %13 : vector<1x4xf32> to vector<64x4xf32>
    %23 = arith.addf %21, %22 : vector<64x4xf32>
    %cst_27 = arith.constant 0.000000e+00 : f32
    %24 = vector.broadcast %cst_27 : f32 to vector<64x4xf32>
    %25 = arith.maximumf %23, %24 : vector<64x4xf32>
    %26 = vector.shape_cast %25 : vector<64x4xf32> to vector<8x8x4xf32>
    %c1 = arith.constant 1 : index
    %c1_28 = arith.constant 1 : index
    %c0_29 = arith.constant 0 : index
    %27 = vector.load %arg18[%c1, %c1_28, %c0_29] : memref<10x10x4xf32, #tpu.memory_space<vmem>>, vector<8x8x4xf32>
    tpu.vector_store %arg18[%c1, %c1_28, %c0_29], %26 {strides = array<i32>} : memref<10x10x4xf32, #tpu.memory_space<vmem>>, vector<8x8x4xf32>,
    %c0_30 = arith.constant 0 : index
    %c0_31 = arith.constant 0 : index
    %c0_32 = arith.constant 0 : index
    %28 = vector.load %arg18[%c0_30, %c0_31, %c0_32] : memref<10x10x4xf32, #tpu.memory_space<vmem>>, vector<8x8x4xf32>
    %29 = vector.extract_strided_slice %14 {offsets = [0, 0], sizes = [1, 4], strides = [1, 1]} : vector<9x4xf32> to vector<1x4xf32>
    %30 = vector.shape_cast %29 : vector<1x4xf32> to vector<4xf32>
    %31 = vector.shape_cast %30 : vector<4xf32> to vector<1x1x4xf32>
    %32 = vector.broadcast %31 : vector<1x1x4xf32> to vector<8x8x4xf32>
    %33 = arith.mulf %28, %32 : vector<8x8x4xf32>
    %c0_33 = arith.constant 0 : index
    %c1_34 = arith.constant 1 : index
    %c0_35 = arith.constant 0 : index
    %34 = vector.load %arg18[%c0_33, %c1_34, %c0_35] : memref<10x10x4xf32, #tpu.memory_space<vmem>>, vector<8x8x4xf32>
    %35 = vector.extract_strided_slice %14 {offsets = [1, 0], sizes = [1, 4], strides = [1, 1]} : vector<9x4xf32> to vector<1x4xf32>
    %36 = vector.shape_cast %35 : vector<1x4xf32> to vector<4xf32>
    %37 = vector.shape_cast %36 : vector<4xf32> to vector<1x1x4xf32>
    %38 = vector.broadcast %37 : vector<1x1x4xf32> to vector<8x8x4xf32>
    %39 = arith.mulf %34, %38 : vector<8x8x4xf32>
    %40 = arith.addf %33, %39 : vector<8x8x4xf32>
    %c0_36 = arith.constant 0 : index
    %c2 = arith.constant 2 : index
    %c0_37 = arith.constant 0 : index
    %41 = vector.load %arg18[%c0_36, %c2, %c0_37] : memref<10x10x4xf32, #tpu.memory_space<vmem>>, vector<8x8x4xf32>
    %42 = vector.extract_strided_slice %14 {offsets = [2, 0], sizes = [1, 4], strides = [1, 1]} : vector<9x4xf32> to vector<1x4xf32>
    %43 = vector.shape_cast %42 : vector<1x4xf32> to vector<4xf32>
    %44 = vector.shape_cast %43 : vector<4xf32> to vector<1x1x4xf32>
    %45 = vector.broadcast %44 : vector<1x1x4xf32> to vector<8x8x4xf32>
    %46 = arith.mulf %41, %45 : vector<8x8x4xf32>
    %47 = arith.addf %40, %46 : vector<8x8x4xf32>
    %c1_38 = arith.constant 1 : index
    %c0_39 = arith.constant 0 : index
    %c0_40 = arith.constant 0 : index
    %48 = vector.load %arg18[%c1_38, %c0_39, %c0_40] : memref<10x10x4xf32, #tpu.memory_space<vmem>>, vector<8x8x4xf32>
    %49 = vector.extract_strided_slice %14 {offsets = [3, 0], sizes = [1, 4], strides = [1, 1]} : vector<9x4xf32> to vector<1x4xf32>
    %50 = vector.shape_cast %49 : vector<1x4xf32> to vector<4xf32>
    %51 = vector.shape_cast %50 : vector<4xf32> to vector<1x1x4xf32>
    %52 = vector.broadcast %51 : vector<1x1x4xf32> to vector<8x8x4xf32>
    %53 = arith.mulf %48, %52 : vector<8x8x4xf32>
    %54 = arith.addf %47, %53 : vector<8x8x4xf32>
    %c1_41 = arith.constant 1 : index
    %c1_42 = arith.constant 1 : index
    %c0_43 = arith.constant 0 : index
    %55 = vector.load %arg18[%c1_41, %c1_42, %c0_43] : memref<10x10x4xf32, #tpu.memory_space<vmem>>, vector<8x8x4xf32>
    %56 = vector.extract_strided_slice %14 {offsets = [4, 0], sizes = [1, 4], strides = [1, 1]} : vector<9x4xf32> to vector<1x4xf32>
    %57 = vector.shape_cast %56 : vector<1x4xf32> to vector<4xf32>
    %58 = vector.shape_cast %57 : vector<4xf32> to vector<1x1x4xf32>
    %59 = vector.broadcast %58 : vector<1x1x4xf32> to vector<8x8x4xf32>
    %60 = arith.mulf %55, %59 : vector<8x8x4xf32>
    %61 = arith.addf %54, %60 : vector<8x8x4xf32>
    %c1_44 = arith.constant 1 : index
    %c2_45 = arith.constant 2 : index
    %c0_46 = arith.constant 0 : index
    %62 = vector.load %arg18[%c1_44, %c2_45, %c0_46] : memref<10x10x4xf32, #tpu.memory_space<vmem>>, vector<8x8x4xf32>
    %63 = vector.extract_strided_slice %14 {offsets = [5, 0], sizes = [1, 4], strides = [1, 1]} : vector<9x4xf32> to vector<1x4xf32>
    %64 = vector.shape_cast %63 : vector<1x4xf32> to vector<4xf32>
    %65 = vector.shape_cast %64 : vector<4xf32> to vector<1x1x4xf32>
    %66 = vector.broadcast %65 : vector<1x1x4xf32> to vector<8x8x4xf32>
    %67 = arith.mulf %62, %66 : vector<8x8x4xf32>
    %68 = arith.addf %61, %67 : vector<8x8x4xf32>
    %c2_47 = arith.constant 2 : index
    %c0_48 = arith.constant 0 : index
    %c0_49 = arith.constant 0 : index
    %69 = vector.load %arg18[%c2_47, %c0_48, %c0_49] : memref<10x10x4xf32, #tpu.memory_space<vmem>>, vector<8x8x4xf32>
    %70 = vector.extract_strided_slice %14 {offsets = [6, 0], sizes = [1, 4], strides = [1, 1]} : vector<9x4xf32> to vector<1x4xf32>
    %71 = vector.shape_cast %70 : vector<1x4xf32> to vector<4xf32>
    %72 = vector.shape_cast %71 : vector<4xf32> to vector<1x1x4xf32>
    %73 = vector.broadcast %72 : vector<1x1x4xf32> to vector<8x8x4xf32>
    %74 = arith.mulf %69, %73 : vector<8x8x4xf32>
    %75 = arith.addf %68, %74 : vector<8x8x4xf32>
    %c2_50 = arith.constant 2 : index
    %c1_51 = arith.constant 1 : index
    %c0_52 = arith.constant 0 : index
    %76 = vector.load %arg18[%c2_50, %c1_51, %c0_52] : memref<10x10x4xf32, #tpu.memory_space<vmem>>, vector<8x8x4xf32>
    %77 = vector.extract_strided_slice %14 {offsets = [7, 0], sizes = [1, 4], strides = [1, 1]} : vector<9x4xf32> to vector<1x4xf32>
    %78 = vector.shape_cast %77 : vector<1x4xf32> to vector<4xf32>
    %79 = vector.shape_cast %78 : vector<4xf32> to vector<1x1x4xf32>
    %80 = vector.broadcast %79 : vector<1x1x4xf32> to vector<8x8x4xf32>
    %81 = arith.mulf %76, %80 : vector<8x8x4xf32>
    %82 = arith.addf %75, %81 : vector<8x8x4xf32>
    %c2_53 = arith.constant 2 : index
    %c2_54 = arith.constant 2 : index
    %c0_55 = arith.constant 0 : index
    %83 = vector.load %arg18[%c2_53, %c2_54, %c0_55] : memref<10x10x4xf32, #tpu.memory_space<vmem>>, vector<8x8x4xf32>
    %84 = vector.extract_strided_slice %14 {offsets = [8, 0], sizes = [1, 4], strides = [1, 1]} : vector<9x4xf32> to vector<1x4xf32>
    %85 = vector.shape_cast %84 : vector<1x4xf32> to vector<4xf32>
    %86 = vector.shape_cast %85 : vector<4xf32> to vector<1x1x4xf32>
    %87 = vector.broadcast %86 : vector<1x1x4xf32> to vector<8x8x4xf32>
    %88 = arith.mulf %83, %87 : vector<8x8x4xf32>
    %89 = arith.addf %82, %88 : vector<8x8x4xf32>
    %90 = vector.shape_cast %89 : vector<8x8x4xf32> to vector<64x4xf32>
    %91 = arith.truncf %90 : vector<64x4xf32> to vector<64x4xbf16>
    %cst_56 = arith.constant dense<0.000000e+00> : vector<64x4xf32>
    %92 = tpu.matmul %91, %15, %cst_56 {dimension_numbers = #tpu.dot_dimension_numbers<[1], [0], [0], [1], [0, 0, 1, 1], [], []>} : vector<64x4xbf16>, vector<4x4xbf16>, vector<64x4xf32> -> vector<64x4xf32>
    %93 = vector.broadcast %16 : vector<1x4xf32> to vector<64x4xf32>
    %94 = arith.addf %92, %93 : vector<64x4xf32>
    %cst_57 = arith.constant 0.000000e+00 : f32
    %95 = vector.broadcast %cst_57 : f32 to vector<64x4xf32>
    %96 = arith.maximumf %94, %95 : vector<64x4xf32>
    %97 = vector.extract_strided_slice %10 {offsets = [0, 0], sizes = [64, 2], strides = [1, 1]} : vector<64x4xf32> to vector<64x2xf32>
    %98 = vector.extract_strided_slice %11 {offsets = [0, 0], sizes = [64, 2], strides = [1, 1]} : vector<64x4xf32> to vector<64x2xf32>
    %c0_58 = arith.constant 0 : index
    %c0_59 = arith.constant 0 : index
    %99 = vector.load %arg7[%c0_58, %c0_59] : memref<4x4xbf16, #tpu.memory_space<vmem>>, vector<4x4xbf16>
    %c0_60 = arith.constant 0 : index
    %c0_61 = arith.constant 0 : index
    %100 = vector.load %arg8[%c0_60, %c0_61] : memref<1x4xf32, #tpu.memory_space<vmem>>, vector<1x4xf32>
    %c0_62 = arith.constant 0 : index
    %c0_63 = arith.constant 0 : index
    %101 = vector.load %arg9[%c0_62, %c0_63] : memref<9x4xf32, #tpu.memory_space<vmem>>, vector<9x4xf32>
    %c0_64 = arith.constant 0 : index
    %c0_65 = arith.constant 0 : index
    %102 = vector.load %arg10[%c0_64, %c0_65] : memref<4x4xbf16, #tpu.memory_space<vmem>>, vector<4x4xbf16>
    %c0_66 = arith.constant 0 : index
    %c0_67 = arith.constant 0 : index
    %103 = vector.load %arg11[%c0_66, %c0_67] : memref<1x4xf32, #tpu.memory_space<vmem>>, vector<1x4xf32>
    %104 = vector.extract_strided_slice %97 {offsets = [0, 1], sizes = [64, 1], strides = [1, 1]} : vector<64x2xf32> to vector<64x1xf32>
    %105 = vector.extract_strided_slice %98 {offsets = [0, 1], sizes = [64, 1], strides = [1, 1]} : vector<64x2xf32> to vector<64x1xf32>
    %106 = vector.extract_strided_slice %96 {offsets = [0, 2], sizes = [64, 2], strides = [1, 1]} : vector<64x4xf32> to vector<64x2xf32>
    %107 = tpu.concatenate %104, %105, %106 in 1 : vector<64x1xf32>, vector<64x1xf32>, vector<64x2xf32> -> vector<64x4xf32>
    %108 = arith.truncf %107 : vector<64x4xf32> to vector<64x4xbf16>
    %cst_68 = arith.constant dense<0.000000e+00> : vector<64x4xf32>
    %109 = tpu.matmul %108, %99, %cst_68 {dimension_numbers = #tpu.dot_dimension_numbers<[1], [0], [0], [1], [0, 0, 1, 1], [], []>} : vector<64x4xbf16>, vector<4x4xbf16>, vector<64x4xf32> -> vector<64x4xf32>
    %110 = vector.broadcast %100 : vector<1x4xf32> to vector<64x4xf32>
    %111 = arith.addf %109, %110 : vector<64x4xf32>
    %cst_69 = arith.constant 0.000000e+00 : f32
    %112 = vector.broadcast %cst_69 : f32 to vector<64x4xf32>
    %113 = arith.maximumf %111, %112 : vector<64x4xf32>
    %114 = vector.shape_cast %113 : vector<64x4xf32> to vector<8x8x4xf32>
    %c1_70 = arith.constant 1 : index
    %c1_71 = arith.constant 1 : index
    %c0_72 = arith.constant 0 : index
    %115 = vector.load %arg18[%c1_70, %c1_71, %c0_72] : memref<10x10x4xf32, #tpu.memory_space<vmem>>, vector<8x8x4xf32>
    tpu.vector_store %arg18[%c1_70, %c1_71, %c0_72], %114 {strides = array<i32>} : memref<10x10x4xf32, #tpu.memory_space<vmem>>, vector<8x8x4xf32>,
    %c0_73 = arith.constant 0 : index
    %c0_74 = arith.constant 0 : index
    %c0_75 = arith.constant 0 : index
    %116 = vector.load %arg18[%c0_73, %c0_74, %c0_75] : memref<10x10x4xf32, #tpu.memory_space<vmem>>, vector<8x8x4xf32>
    %117 = vector.extract_strided_slice %101 {offsets = [0, 0], sizes = [1, 4], strides = [1, 1]} : vector<9x4xf32> to vector<1x4xf32>
    %118 = vector.shape_cast %117 : vector<1x4xf32> to vector<4xf32>
    %119 = vector.shape_cast %118 : vector<4xf32> to vector<1x1x4xf32>
    %120 = vector.broadcast %119 : vector<1x1x4xf32> to vector<8x8x4xf32>
    %121 = arith.mulf %116, %120 : vector<8x8x4xf32>
    %c0_76 = arith.constant 0 : index
    %c1_77 = arith.constant 1 : index
    %c0_78 = arith.constant 0 : index
    %122 = vector.load %arg18[%c0_76, %c1_77, %c0_78] : memref<10x10x4xf32, #tpu.memory_space<vmem>>, vector<8x8x4xf32>
    %123 = vector.extract_strided_slice %101 {offsets = [1, 0], sizes = [1, 4], strides = [1, 1]} : vector<9x4xf32> to vector<1x4xf32>
    %124 = vector.shape_cast %123 : vector<1x4xf32> to vector<4xf32>
    %125 = vector.shape_cast %124 : vector<4xf32> to vector<1x1x4xf32>
    %126 = vector.broadcast %125 : vector<1x1x4xf32> to vector<8x8x4xf32>
    %127 = arith.mulf %122, %126 : vector<8x8x4xf32>
    %128 = arith.addf %121, %127 : vector<8x8x4xf32>
    %c0_79 = arith.constant 0 : index
    %c2_80 = arith.constant 2 : index
    %c0_81 = arith.constant 0 : index
    %129 = vector.load %arg18[%c0_79, %c2_80, %c0_81] : memref<10x10x4xf32, #tpu.memory_space<vmem>>, vector<8x8x4xf32>
    %130 = vector.extract_strided_slice %101 {offsets = [2, 0], sizes = [1, 4], strides = [1, 1]} : vector<9x4xf32> to vector<1x4xf32>
    %131 = vector.shape_cast %130 : vector<1x4xf32> to vector<4xf32>
    %132 = vector.shape_cast %131 : vector<4xf32> to vector<1x1x4xf32>
    %133 = vector.broadcast %132 : vector<1x1x4xf32> to vector<8x8x4xf32>
    %134 = arith.mulf %129, %133 : vector<8x8x4xf32>
    %135 = arith.addf %128, %134 : vector<8x8x4xf32>
    %c1_82 = arith.constant 1 : index
    %c0_83 = arith.constant 0 : index
    %c0_84 = arith.constant 0 : index
    %136 = vector.load %arg18[%c1_82, %c0_83, %c0_84] : memref<10x10x4xf32, #tpu.memory_space<vmem>>, vector<8x8x4xf32>
    %137 = vector.extract_strided_slice %101 {offsets = [3, 0], sizes = [1, 4], strides = [1, 1]} : vector<9x4xf32> to vector<1x4xf32>
    %138 = vector.shape_cast %137 : vector<1x4xf32> to vector<4xf32>
    %139 = vector.shape_cast %138 : vector<4xf32> to vector<1x1x4xf32>
    %140 = vector.broadcast %139 : vector<1x1x4xf32> to vector<8x8x4xf32>
    %141 = arith.mulf %136, %140 : vector<8x8x4xf32>
    %142 = arith.addf %135, %141 : vector<8x8x4xf32>
    %c1_85 = arith.constant 1 : index
    %c1_86 = arith.constant 1 : index
    %c0_87 = arith.constant 0 : index
    %143 = vector.load %arg18[%c1_85, %c1_86, %c0_87] : memref<10x10x4xf32, #tpu.memory_space<vmem>>, vector<8x8x4xf32>
    %144 = vector.extract_strided_slice %101 {offsets = [4, 0], sizes = [1, 4], strides = [1, 1]} : vector<9x4xf32> to vector<1x4xf32>
    %145 = vector.shape_cast %144 : vector<1x4xf32> to vector<4xf32>
    %146 = vector.shape_cast %145 : vector<4xf32> to vector<1x1x4xf32>
    %147 = vector.broadcast %146 : vector<1x1x4xf32> to vector<8x8x4xf32>
    %148 = arith.mulf %143, %147 : vector<8x8x4xf32>
    %149 = arith.addf %142, %148 : vector<8x8x4xf32>
    %c1_88 = arith.constant 1 : index
    %c2_89 = arith.constant 2 : index
    %c0_90 = arith.constant 0 : index
    %150 = vector.load %arg18[%c1_88, %c2_89, %c0_90] : memref<10x10x4xf32, #tpu.memory_space<vmem>>, vector<8x8x4xf32>
    %151 = vector.extract_strided_slice %101 {offsets = [5, 0], sizes = [1, 4], strides = [1, 1]} : vector<9x4xf32> to vector<1x4xf32>
    %152 = vector.shape_cast %151 : vector<1x4xf32> to vector<4xf32>
    %153 = vector.shape_cast %152 : vector<4xf32> to vector<1x1x4xf32>
    %154 = vector.broadcast %153 : vector<1x1x4xf32> to vector<8x8x4xf32>
    %155 = arith.mulf %150, %154 : vector<8x8x4xf32>
    %156 = arith.addf %149, %155 : vector<8x8x4xf32>
    %c2_91 = arith.constant 2 : index
    %c0_92 = arith.constant 0 : index
    %c0_93 = arith.constant 0 : index
    %157 = vector.load %arg18[%c2_91, %c0_92, %c0_93] : memref<10x10x4xf32, #tpu.memory_space<vmem>>, vector<8x8x4xf32>
    %158 = vector.extract_strided_slice %101 {offsets = [6, 0], sizes = [1, 4], strides = [1, 1]} : vector<9x4xf32> to vector<1x4xf32>
    %159 = vector.shape_cast %158 : vector<1x4xf32> to vector<4xf32>
    %160 = vector.shape_cast %159 : vector<4xf32> to vector<1x1x4xf32>
    %161 = vector.broadcast %160 : vector<1x1x4xf32> to vector<8x8x4xf32>
    %162 = arith.mulf %157, %161 : vector<8x8x4xf32>
    %163 = arith.addf %156, %162 : vector<8x8x4xf32>
    %c2_94 = arith.constant 2 : index
    %c1_95 = arith.constant 1 : index
    %c0_96 = arith.constant 0 : index
    %164 = vector.load %arg18[%c2_94, %c1_95, %c0_96] : memref<10x10x4xf32, #tpu.memory_space<vmem>>, vector<8x8x4xf32>
    %165 = vector.extract_strided_slice %101 {offsets = [7, 0], sizes = [1, 4], strides = [1, 1]} : vector<9x4xf32> to vector<1x4xf32>
    %166 = vector.shape_cast %165 : vector<1x4xf32> to vector<4xf32>
    %167 = vector.shape_cast %166 : vector<4xf32> to vector<1x1x4xf32>
    %168 = vector.broadcast %167 : vector<1x1x4xf32> to vector<8x8x4xf32>
    %169 = arith.mulf %164, %168 : vector<8x8x4xf32>
    %170 = arith.addf %163, %169 : vector<8x8x4xf32>
    %c2_97 = arith.constant 2 : index
    %c2_98 = arith.constant 2 : index
    %c0_99 = arith.constant 0 : index
    %171 = vector.load %arg18[%c2_97, %c2_98, %c0_99] : memref<10x10x4xf32, #tpu.memory_space<vmem>>, vector<8x8x4xf32>
    %172 = vector.extract_strided_slice %101 {offsets = [8, 0], sizes = [1, 4], strides = [1, 1]} : vector<9x4xf32> to vector<1x4xf32>
    %173 = vector.shape_cast %172 : vector<1x4xf32> to vector<4xf32>
    %174 = vector.shape_cast %173 : vector<4xf32> to vector<1x1x4xf32>
    %175 = vector.broadcast %174 : vector<1x1x4xf32> to vector<8x8x4xf32>
    %176 = arith.mulf %171, %175 : vector<8x8x4xf32>
    %177 = arith.addf %170, %176 : vector<8x8x4xf32>
    %178 = vector.shape_cast %177 : vector<8x8x4xf32> to vector<64x4xf32>
    %179 = arith.truncf %178 : vector<64x4xf32> to vector<64x4xbf16>
    %cst_100 = arith.constant dense<0.000000e+00> : vector<64x4xf32>
    %180 = tpu.matmul %179, %102, %cst_100 {dimension_numbers = #tpu.dot_dimension_numbers<[1], [0], [0], [1], [0, 0, 1, 1], [], []>} : vector<64x4xbf16>, vector<4x4xbf16>, vector<64x4xf32> -> vector<64x4xf32>
    %181 = vector.broadcast %103 : vector<1x4xf32> to vector<64x4xf32>
    %182 = arith.addf %180, %181 : vector<64x4xf32>
    %cst_101 = arith.constant 0.000000e+00 : f32
    %183 = vector.broadcast %cst_101 : f32 to vector<64x4xf32>
    %184 = arith.maximumf %182, %183 : vector<64x4xf32>
    %185 = vector.extract_strided_slice %97 {offsets = [0, 0], sizes = [64, 1], strides = [1, 1]} : vector<64x2xf32> to vector<64x1xf32>
    %186 = vector.extract_strided_slice %98 {offsets = [0, 0], sizes = [64, 1], strides = [1, 1]} : vector<64x2xf32> to vector<64x1xf32>
    %187 = vector.extract_strided_slice %96 {offsets = [0, 0], sizes = [64, 2], strides = [1, 1]} : vector<64x4xf32> to vector<64x2xf32>
    %c0_102 = arith.constant 0 : index
    %c0_103 = arith.constant 0 : index
    %188 = vector.load %arg12[%c0_102, %c0_103] : memref<4x4xbf16, #tpu.memory_space<vmem>>, vector<4x4xbf16>
    %c0_104 = arith.constant 0 : index
    %c0_105 = arith.constant 0 : index
    %189 = vector.load %arg13[%c0_104, %c0_105] : memref<1x4xf32, #tpu.memory_space<vmem>>, vector<1x4xf32>
    %c0_106 = arith.constant 0 : index
    %c0_107 = arith.constant 0 : index
    %190 = vector.load %arg14[%c0_106, %c0_107] : memref<9x4xf32, #tpu.memory_space<vmem>>, vector<9x4xf32>
    %c0_108 = arith.constant 0 : index
    %c0_109 = arith.constant 0 : index
    %191 = vector.load %arg15[%c0_108, %c0_109] : memref<4x4xbf16, #tpu.memory_space<vmem>>, vector<4x4xbf16>
    %c0_110 = arith.constant 0 : index
    %c0_111 = arith.constant 0 : index
    %192 = vector.load %arg16[%c0_110, %c0_111] : memref<1x4xf32, #tpu.memory_space<vmem>>, vector<1x4xf32>
    %193 = vector.extract_strided_slice %187 {offsets = [0, 1], sizes = [64, 1], strides = [1, 1]} : vector<64x2xf32> to vector<64x1xf32>
    %194 = vector.extract_strided_slice %184 {offsets = [0, 2], sizes = [64, 2], strides = [1, 1]} : vector<64x4xf32> to vector<64x2xf32>
    %195 = tpu.concatenate %186, %193, %194 in 1 : vector<64x1xf32>, vector<64x1xf32>, vector<64x2xf32> -> vector<64x4xf32>
    %196 = arith.truncf %195 : vector<64x4xf32> to vector<64x4xbf16>
    %cst_112 = arith.constant dense<0.000000e+00> : vector<64x4xf32>
    %197 = tpu.matmul %196, %188, %cst_112 {dimension_numbers = #tpu.dot_dimension_numbers<[1], [0], [0], [1], [0, 0, 1, 1], [], []>} : vector<64x4xbf16>, vector<4x4xbf16>, vector<64x4xf32> -> vector<64x4xf32>
    %198 = vector.broadcast %189 : vector<1x4xf32> to vector<64x4xf32>
    %199 = arith.addf %197, %198 : vector<64x4xf32>
    %cst_113 = arith.constant 0.000000e+00 : f32
    %200 = vector.broadcast %cst_113 : f32 to vector<64x4xf32>
    %201 = arith.maximumf %199, %200 : vector<64x4xf32>
    %202 = vector.shape_cast %201 : vector<64x4xf32> to vector<8x8x4xf32>
    %c1_114 = arith.constant 1 : index
    %c1_115 = arith.constant 1 : index
    %c0_116 = arith.constant 0 : index
    %203 = vector.load %arg18[%c1_114, %c1_115, %c0_116] : memref<10x10x4xf32, #tpu.memory_space<vmem>>, vector<8x8x4xf32>
    tpu.vector_store %arg18[%c1_114, %c1_115, %c0_116], %202 {strides = array<i32>} : memref<10x10x4xf32, #tpu.memory_space<vmem>>, vector<8x8x4xf32>,
    %c0_117 = arith.constant 0 : index
    %c0_118 = arith.constant 0 : index
    %c0_119 = arith.constant 0 : index
    %204 = vector.load %arg18[%c0_117, %c0_118, %c0_119] : memref<10x10x4xf32, #tpu.memory_space<vmem>>, vector<8x8x4xf32>
    %205 = vector.extract_strided_slice %190 {offsets = [0, 0], sizes = [1, 4], strides = [1, 1]} : vector<9x4xf32> to vector<1x4xf32>
    %206 = vector.shape_cast %205 : vector<1x4xf32> to vector<4xf32>
    %207 = vector.shape_cast %206 : vector<4xf32> to vector<1x1x4xf32>
    %208 = vector.broadcast %207 : vector<1x1x4xf32> to vector<8x8x4xf32>
    %209 = arith.mulf %204, %208 : vector<8x8x4xf32>
    %c0_120 = arith.constant 0 : index
    %c1_121 = arith.constant 1 : index
    %c0_122 = arith.constant 0 : index
    %210 = vector.load %arg18[%c0_120, %c1_121, %c0_122] : memref<10x10x4xf32, #tpu.memory_space<vmem>>, vector<8x8x4xf32>
    %211 = vector.extract_strided_slice %190 {offsets = [1, 0], sizes = [1, 4], strides = [1, 1]} : vector<9x4xf32> to vector<1x4xf32>
    %212 = vector.shape_cast %211 : vector<1x4xf32> to vector<4xf32>
    %213 = vector.shape_cast %212 : vector<4xf32> to vector<1x1x4xf32>
    %214 = vector.broadcast %213 : vector<1x1x4xf32> to vector<8x8x4xf32>
    %215 = arith.mulf %210, %214 : vector<8x8x4xf32>
    %216 = arith.addf %209, %215 : vector<8x8x4xf32>
    %c0_123 = arith.constant 0 : index
    %c2_124 = arith.constant 2 : index
    %c0_125 = arith.constant 0 : index
    %217 = vector.load %arg18[%c0_123, %c2_124, %c0_125] : memref<10x10x4xf32, #tpu.memory_space<vmem>>, vector<8x8x4xf32>
    %218 = vector.extract_strided_slice %190 {offsets = [2, 0], sizes = [1, 4], strides = [1, 1]} : vector<9x4xf32> to vector<1x4xf32>
    %219 = vector.shape_cast %218 : vector<1x4xf32> to vector<4xf32>
    %220 = vector.shape_cast %219 : vector<4xf32> to vector<1x1x4xf32>
    %221 = vector.broadcast %220 : vector<1x1x4xf32> to vector<8x8x4xf32>
    %222 = arith.mulf %217, %221 : vector<8x8x4xf32>
    %223 = arith.addf %216, %222 : vector<8x8x4xf32>
    %c1_126 = arith.constant 1 : index
    %c0_127 = arith.constant 0 : index
    %c0_128 = arith.constant 0 : index
    %224 = vector.load %arg18[%c1_126, %c0_127, %c0_128] : memref<10x10x4xf32, #tpu.memory_space<vmem>>, vector<8x8x4xf32>
    %225 = vector.extract_strided_slice %190 {offsets = [3, 0], sizes = [1, 4], strides = [1, 1]} : vector<9x4xf32> to vector<1x4xf32>
    %226 = vector.shape_cast %225 : vector<1x4xf32> to vector<4xf32>
    %227 = vector.shape_cast %226 : vector<4xf32> to vector<1x1x4xf32>
    %228 = vector.broadcast %227 : vector<1x1x4xf32> to vector<8x8x4xf32>
    %229 = arith.mulf %224, %228 : vector<8x8x4xf32>
    %230 = arith.addf %223, %229 : vector<8x8x4xf32>
    %c1_129 = arith.constant 1 : index
    %c1_130 = arith.constant 1 : index
    %c0_131 = arith.constant 0 : index
    %231 = vector.load %arg18[%c1_129, %c1_130, %c0_131] : memref<10x10x4xf32, #tpu.memory_space<vmem>>, vector<8x8x4xf32>
    %232 = vector.extract_strided_slice %190 {offsets = [4, 0], sizes = [1, 4], strides = [1, 1]} : vector<9x4xf32> to vector<1x4xf32>
    %233 = vector.shape_cast %232 : vector<1x4xf32> to vector<4xf32>
    %234 = vector.shape_cast %233 : vector<4xf32> to vector<1x1x4xf32>
    %235 = vector.broadcast %234 : vector<1x1x4xf32> to vector<8x8x4xf32>
    %236 = arith.mulf %231, %235 : vector<8x8x4xf32>
    %237 = arith.addf %230, %236 : vector<8x8x4xf32>
    %c1_132 = arith.constant 1 : index
    %c2_133 = arith.constant 2 : index
    %c0_134 = arith.constant 0 : index
    %238 = vector.load %arg18[%c1_132, %c2_133, %c0_134] : memref<10x10x4xf32, #tpu.memory_space<vmem>>, vector<8x8x4xf32>
    %239 = vector.extract_strided_slice %190 {offsets = [5, 0], sizes = [1, 4], strides = [1, 1]} : vector<9x4xf32> to vector<1x4xf32>
    %240 = vector.shape_cast %239 : vector<1x4xf32> to vector<4xf32>
    %241 = vector.shape_cast %240 : vector<4xf32> to vector<1x1x4xf32>
    %242 = vector.broadcast %241 : vector<1x1x4xf32> to vector<8x8x4xf32>
    %243 = arith.mulf %238, %242 : vector<8x8x4xf32>
    %244 = arith.addf %237, %243 : vector<8x8x4xf32>
    %c2_135 = arith.constant 2 : index
    %c0_136 = arith.constant 0 : index
    %c0_137 = arith.constant 0 : index
    %245 = vector.load %arg18[%c2_135, %c0_136, %c0_137] : memref<10x10x4xf32, #tpu.memory_space<vmem>>, vector<8x8x4xf32>
    %246 = vector.extract_strided_slice %190 {offsets = [6, 0], sizes = [1, 4], strides = [1, 1]} : vector<9x4xf32> to vector<1x4xf32>
    %247 = vector.shape_cast %246 : vector<1x4xf32> to vector<4xf32>
    %248 = vector.shape_cast %247 : vector<4xf32> to vector<1x1x4xf32>
    %249 = vector.broadcast %248 : vector<1x1x4xf32> to vector<8x8x4xf32>
    %250 = arith.mulf %245, %249 : vector<8x8x4xf32>
    %251 = arith.addf %244, %250 : vector<8x8x4xf32>
    %c2_138 = arith.constant 2 : index
    %c1_139 = arith.constant 1 : index
    %c0_140 = arith.constant 0 : index
    %252 = vector.load %arg18[%c2_138, %c1_139, %c0_140] : memref<10x10x4xf32, #tpu.memory_space<vmem>>, vector<8x8x4xf32>
    %253 = vector.extract_strided_slice %190 {offsets = [7, 0], sizes = [1, 4], strides = [1, 1]} : vector<9x4xf32> to vector<1x4xf32>
    %254 = vector.shape_cast %253 : vector<1x4xf32> to vector<4xf32>
    %255 = vector.shape_cast %254 : vector<4xf32> to vector<1x1x4xf32>
    %256 = vector.broadcast %255 : vector<1x1x4xf32> to vector<8x8x4xf32>
    %257 = arith.mulf %252, %256 : vector<8x8x4xf32>
    %258 = arith.addf %251, %257 : vector<8x8x4xf32>
    %c2_141 = arith.constant 2 : index
    %c2_142 = arith.constant 2 : index
    %c0_143 = arith.constant 0 : index
    %259 = vector.load %arg18[%c2_141, %c2_142, %c0_143] : memref<10x10x4xf32, #tpu.memory_space<vmem>>, vector<8x8x4xf32>
    %260 = vector.extract_strided_slice %190 {offsets = [8, 0], sizes = [1, 4], strides = [1, 1]} : vector<9x4xf32> to vector<1x4xf32>
    %261 = vector.shape_cast %260 : vector<1x4xf32> to vector<4xf32>
    %262 = vector.shape_cast %261 : vector<4xf32> to vector<1x1x4xf32>
    %263 = vector.broadcast %262 : vector<1x1x4xf32> to vector<8x8x4xf32>
    %264 = arith.mulf %259, %263 : vector<8x8x4xf32>
    %265 = arith.addf %258, %264 : vector<8x8x4xf32>
    %266 = vector.shape_cast %265 : vector<8x8x4xf32> to vector<64x4xf32>
    %267 = arith.truncf %266 : vector<64x4xf32> to vector<64x4xbf16>
    %cst_144 = arith.constant dense<0.000000e+00> : vector<64x4xf32>
    %268 = tpu.matmul %267, %191, %cst_144 {dimension_numbers = #tpu.dot_dimension_numbers<[1], [0], [0], [1], [0, 0, 1, 1], [], []>} : vector<64x4xbf16>, vector<4x4xbf16>, vector<64x4xf32> -> vector<64x4xf32>
    %269 = vector.broadcast %192 : vector<1x4xf32> to vector<64x4xf32>
    %270 = arith.addf %268, %269 : vector<64x4xf32>
    %cst_145 = arith.constant 0.000000e+00 : f32
    %271 = vector.broadcast %cst_145 : f32 to vector<64x4xf32>
    %272 = arith.maximumf %270, %271 : vector<64x4xf32>
    %273 = vector.extract_strided_slice %187 {offsets = [0, 0], sizes = [64, 1], strides = [1, 1]} : vector<64x2xf32> to vector<64x1xf32>
    %274 = vector.extract_strided_slice %184 {offsets = [0, 0], sizes = [64, 2], strides = [1, 1]} : vector<64x4xf32> to vector<64x2xf32>
    %275 = tpu.concatenate %185, %273, %274, %272 in 1 : vector<64x1xf32>, vector<64x1xf32>, vector<64x2xf32>, vector<64x4xf32> -> vector<64x8xf32>
    %c0_146 = arith.constant 0 : index
    %c0_147 = arith.constant 0 : index
    %c0_148 = arith.constant 0 : index
    %276 = vector.load %arg17[%c0_146, %c0_147, %c0_148] : memref<1x64x8xf32, #tpu.memory_space<vmem>>, vector<1x64x8xf32>
    %277 = vector.shape_cast %276 : vector<1x64x8xf32> to vector<64x8xf32>
    %278 = vector.shape_cast %275 : vector<64x8xf32> to vector<1x64x8xf32>
    tpu.vector_store %arg17[%c0_146, %c0_147, %c0_148], %278 {strides = array<i32>} : memref<1x64x8xf32, #tpu.memory_space<vmem>>, vector<1x64x8xf32>,
    return
  }
  func.func @transform_0(%arg0: i32) -> (i32, i32, i32) {
    %c0_i32 = arith.constant 0 : i32
    %c0_i32_0 = arith.constant 0 : i32
    %c0_i32_1 = arith.constant 0 : i32
    return %arg0, %c0_i32, %c0_i32_0 : i32, i32, i32
  }
  func.func @transform_1(%arg0: i32) -> (i32, i32) {
    %c0_i32 = arith.constant 0 : i32
    %c0_i32_0 = arith.constant 0 : i32
    %c0_i32_1 = arith.constant 0 : i32
    return %c0_i32, %c0_i32_0 : i32, i32
  }
  func.func @transform_2(%arg0: i32) -> (i32, i32) {
    %c0_i32 = arith.constant 0 : i32
    %c0_i32_0 = arith.constant 0 : i32
    %c0_i32_1 = arith.constant 0 : i32
    return %c0_i32, %c0_i32_0 : i32, i32
  }
  func.func @transform_3(%arg0: i32) -> (i32, i32) {
    %c0_i32 = arith.constant 0 : i32
    %c0_i32_0 = arith.constant 0 : i32
    %c0_i32_1 = arith.constant 0 : i32
    return %c0_i32, %c0_i32_0 : i32, i32
  }
  func.func @transform_4(%arg0: i32) -> (i32, i32) {
    %c0_i32 = arith.constant 0 : i32
    %c0_i32_0 = arith.constant 0 : i32
    %c0_i32_1 = arith.constant 0 : i32
    return %c0_i32, %c0_i32_0 : i32, i32
  }
  func.func @transform_5(%arg0: i32) -> (i32, i32) {
    %c0_i32 = arith.constant 0 : i32
    %c0_i32_0 = arith.constant 0 : i32
    %c0_i32_1 = arith.constant 0 : i32
    return %c0_i32, %c0_i32_0 : i32, i32
  }
  func.func @transform_6(%arg0: i32) -> (i32, i32) {
    %c0_i32 = arith.constant 0 : i32
    %c0_i32_0 = arith.constant 0 : i32
    %c0_i32_1 = arith.constant 0 : i32
    return %c0_i32, %c0_i32_0 : i32, i32
  }
  func.func @transform_7(%arg0: i32) -> (i32, i32) {
    %c0_i32 = arith.constant 0 : i32
    %c0_i32_0 = arith.constant 0 : i32
    %c0_i32_1 = arith.constant 0 : i32
    return %c0_i32, %c0_i32_0 : i32, i32
  }
  func.func @transform_8(%arg0: i32) -> (i32, i32) {
    %c0_i32 = arith.constant 0 : i32
    %c0_i32_0 = arith.constant 0 : i32
    %c0_i32_1 = arith.constant 0 : i32
    return %c0_i32, %c0_i32_0 : i32, i32
  }
  func.func @transform_9(%arg0: i32) -> (i32, i32) {
    %c0_i32 = arith.constant 0 : i32
    %c0_i32_0 = arith.constant 0 : i32
    %c0_i32_1 = arith.constant 0 : i32
    return %c0_i32, %c0_i32_0 : i32, i32
  }
  func.func @transform_10(%arg0: i32) -> (i32, i32) {
    %c0_i32 = arith.constant 0 : i32
    %c0_i32_0 = arith.constant 0 : i32
    %c0_i32_1 = arith.constant 0 : i32
    return %c0_i32, %c0_i32_0 : i32, i32
  }
  func.func @transform_11(%arg0: i32) -> (i32, i32) {
    %c0_i32 = arith.constant 0 : i32
    %c0_i32_0 = arith.constant 0 : i32
    %c0_i32_1 = arith.constant 0 : i32
    return %c0_i32, %c0_i32_0 : i32, i32
  }
  func.func @transform_12(%arg0: i32) -> (i32, i32) {
    %c0_i32 = arith.constant 0 : i32
    %c0_i32_0 = arith.constant 0 : i32
    %c0_i32_1 = arith.constant 0 : i32
    return %c0_i32, %c0_i32_0 : i32, i32
  }
  func.func @transform_13(%arg0: i32) -> (i32, i32) {
    %c0_i32 = arith.constant 0 : i32
    %c0_i32_0 = arith.constant 0 : i32
    %c0_i32_1 = arith.constant 0 : i32
    return %c0_i32, %c0_i32_0 : i32, i32
  }
  func.func @transform_14(%arg0: i32) -> (i32, i32) {
    %c0_i32 = arith.constant 0 : i32
    %c0_i32_0 = arith.constant 0 : i32
    %c0_i32_1 = arith.constant 0 : i32
    return %c0_i32, %c0_i32_0 : i32, i32
  }
  func.func @transform_15(%arg0: i32) -> (i32, i32) {
    %c0_i32 = arith.constant 0 : i32
    %c0_i32_0 = arith.constant 0 : i32
    %c0_i32_1 = arith.constant 0 : i32
    return %c0_i32, %c0_i32_0 : i32, i32
  }
  func.func @transform_16(%arg0: i32) -> (i32, i32, i32) {
    %c0_i32 = arith.constant 0 : i32
    %c0_i32_0 = arith.constant 0 : i32
    %c0_i32_1 = arith.constant 0 : i32
    return %arg0, %c0_i32, %c0_i32_0 : i32, i32, i32
  }
}

module attributes {stable_mosaic.version = 11 : i64} {
  func.func @_patch_embed_kernel(%arg0: i32, %arg1: memref<1x16x32xf32, #tpu.memory_space<vmem>>, %arg2: memref<32x32xbf16, #tpu.memory_space<vmem>>, %arg3: memref<1x32xf32, #tpu.memory_space<vmem>>, %arg4: memref<16x32xf32, #tpu.memory_space<vmem>>, %arg5: memref<1x32xf32, #tpu.memory_space<vmem>>, %arg6: memref<1x17x32xf32, #tpu.memory_space<vmem>>) attributes {dimension_semantics = [#tpu.dimension_semantics<parallel>], iteration_bounds = array<i64: 2>, scalar_prefetch = 0 : i64, scratch_operands = 0 : i64, tpu.core_type = #tpu.core_type<tc>, window_params = [{transform_indices = @transform_0, window_bounds = array<i64: 1, 16, 32>}, {pipeline_mode = #tpu.pipeline_mode<synchronous>, transform_indices = @transform_1, window_bounds = array<i64: 32, 32>}, {pipeline_mode = #tpu.pipeline_mode<synchronous>, transform_indices = @transform_2, window_bounds = array<i64: 1, 32>}, {pipeline_mode = #tpu.pipeline_mode<synchronous>, transform_indices = @transform_3, window_bounds = array<i64: 16, 32>}, {pipeline_mode = #tpu.pipeline_mode<synchronous>, transform_indices = @transform_4, window_bounds = array<i64: 1, 32>}, {transform_indices = @transform_5, window_bounds = array<i64: 1, 17, 32>}]} {
    %c0 = arith.constant 0 : index
    %c0_0 = arith.constant 0 : index
    %c0_1 = arith.constant 0 : index
    %0 = vector.load %arg1[%c0, %c0_0, %c0_1] : memref<1x16x32xf32, #tpu.memory_space<vmem>>, vector<1x16x32xf32>
    %1 = vector.shape_cast %0 : vector<1x16x32xf32> to vector<16x32xf32>
    %2 = arith.truncf %1 : vector<16x32xf32> to vector<16x32xbf16>
    %c0_2 = arith.constant 0 : index
    %c0_3 = arith.constant 0 : index
    %3 = vector.load %arg2[%c0_2, %c0_3] : memref<32x32xbf16, #tpu.memory_space<vmem>>, vector<32x32xbf16>
    %cst = arith.constant dense<0.000000e+00> : vector<16x32xf32>
    %4 = tpu.matmul %2, %3, %cst {dimension_numbers = #tpu.dot_dimension_numbers<[1], [0], [0], [1], [0, 0, 1, 1], [], []>} : vector<16x32xbf16>, vector<32x32xbf16>, vector<16x32xf32> -> vector<16x32xf32>
    %c0_4 = arith.constant 0 : index
    %c0_5 = arith.constant 0 : index
    %5 = vector.load %arg3[%c0_4, %c0_5] : memref<1x32xf32, #tpu.memory_space<vmem>>, vector<1x32xf32>
    %6 = vector.broadcast %5 : vector<1x32xf32> to vector<16x32xf32>
    %7 = arith.addf %4, %6 : vector<16x32xf32>
    %c0_6 = arith.constant 0 : index
    %c0_7 = arith.constant 0 : index
    %8 = vector.load %arg4[%c0_6, %c0_7] : memref<16x32xf32, #tpu.memory_space<vmem>>, vector<16x32xf32>
    %9 = arith.addf %7, %8 : vector<16x32xf32>
    %c0_8 = arith.constant 0 : index
    %c0_9 = arith.constant 0 : index
    %10 = vector.load %arg5[%c0_8, %c0_9] : memref<1x32xf32, #tpu.memory_space<vmem>>, vector<1x32xf32>
    %11 = tpu.concatenate %10, %9 in 0 : vector<1x32xf32>, vector<16x32xf32> -> vector<17x32xf32>
    %c0_10 = arith.constant 0 : index
    %c0_11 = arith.constant 0 : index
    %c0_12 = arith.constant 0 : index
    %12 = vector.load %arg6[%c0_10, %c0_11, %c0_12] : memref<1x17x32xf32, #tpu.memory_space<vmem>>, vector<1x17x32xf32>
    %13 = vector.shape_cast %12 : vector<1x17x32xf32> to vector<17x32xf32>
    %14 = vector.shape_cast %11 : vector<17x32xf32> to vector<1x17x32xf32>
    tpu.vector_store %arg6[%c0_10, %c0_11, %c0_12], %14 {strides = array<i32>} : memref<1x17x32xf32, #tpu.memory_space<vmem>>, vector<1x17x32xf32>,
    return
  }
  func.func @transform_0(%arg0: i32) -> (i32, i32, i32) {
    %c0_i32 = arith.constant 0 : i32
    %c0_i32_0 = arith.constant 0 : i32
    %c0_i32_1 = arith.constant 0 : i32
    return %arg0, %c0_i32, %c0_i32_0 : i32, i32, i32
  }
  func.func @transform_1(%arg0: i32) -> (i32, i32) {
    %c0_i32 = arith.constant 0 : i32
    %c0_i32_0 = arith.constant 0 : i32
    %c0_i32_1 = arith.constant 0 : i32
    return %c0_i32, %c0_i32_0 : i32, i32
  }
  func.func @transform_2(%arg0: i32) -> (i32, i32) {
    %c0_i32 = arith.constant 0 : i32
    %c0_i32_0 = arith.constant 0 : i32
    %c0_i32_1 = arith.constant 0 : i32
    return %c0_i32, %c0_i32_0 : i32, i32
  }
  func.func @transform_3(%arg0: i32) -> (i32, i32) {
    %c0_i32 = arith.constant 0 : i32
    %c0_i32_0 = arith.constant 0 : i32
    %c0_i32_1 = arith.constant 0 : i32
    return %c0_i32, %c0_i32_0 : i32, i32
  }
  func.func @transform_4(%arg0: i32) -> (i32, i32) {
    %c0_i32 = arith.constant 0 : i32
    %c0_i32_0 = arith.constant 0 : i32
    %c0_i32_1 = arith.constant 0 : i32
    return %c0_i32, %c0_i32_0 : i32, i32
  }
  func.func @transform_5(%arg0: i32) -> (i32, i32, i32) {
    %c0_i32 = arith.constant 0 : i32
    %c0_i32_0 = arith.constant 0 : i32
    %c0_i32_1 = arith.constant 0 : i32
    return %arg0, %c0_i32, %c0_i32_0 : i32, i32, i32
  }
}

</mosaic_0001>

<bundles_post_ra>
// kernel: tile.13
= control target key start
LH: loop header
LB: loop body
LE: loop exit
PB: predicated region body
PF: predicated region fallthrough
CT: control target
= control target key end

     0   :  { %s22_s0 = inlined_call_operand.vmem [shape: f32[8], index: 0, kind: input, shape index: {}]   ;;  %s23_s1 = inlined_call_operand.vmem [shape: f32[4,8], index: 1, kind: output, shape index: {}]  }
   0x1   :  { %v4_v0 = vld [vmem:[%s22_s0] ss:$0 sm:$0xff] }
   0x2   :  { %5 = vst [vmem:[%s23_s1] sm:$0xf] %v4_v0 }

// kernel: mul.157
= control target key start
LH: loop header
LB: loop body
LE: loop exit
PB: predicated region body
PF: predicated region fallthrough
CT: control target
= control target key end

     0   :  { %s37_s8 = smov 8   ;;  %s38_s9 = smov 16   ;;  %vm7_vm0 = vcmask 64512   ;;  %vm13_vm1 = vcmask 261312   ;;  %vm19_vm2 = vcmask 195712   ;;  %vm25_vm3 = vcmask 130112   ;;  %s55_s0 = inlined_call_operand.vmem [shape: f32[4,8], index: 0, kind: input, shape index: {}]   ;;  %s56_s1 = inlined_call_operand.vmem [shape: f32[32], index: 1, kind: output, shape index: {}]  }
   0x1   :  { %v4_v0 = vld [vmem:[%s55_s0] sm:$0xf]  ;;  %s36_s0 = smov 24  }
   0x2   :  { %5 = vst [vmem:[#allocation1] sm:$0xf] %v4_v0 }
   0x9   :  { %v10_v1 = vld [vmem:[#allocation1 + $0x3] sm:$0x1]   ;;  %v22_v2 = vld [vmem:[#allocation1 + $0x1] sm:$0x1]   ;;  %v16_v3 = vld [vmem:[#allocation1 + $0x2] sm:$0x1]  }
   0xa   :  { %11 = vrot.lane.b32.xlu0 %v10_v1, %s36_s0  ;;  %23 = vrot.lane.b32.xlu1 %v22_v2, %s37_s8  ;;  %v6_v4 = vld [vmem:[#allocation1] sm:$0x1]  }
   0xb   :  { %8 = vst.msk [vmem:[#allocation0] sm:$0x1] %vm7_vm0, %v6_v4  }
  0x12   :  { %17 = vrot.lane.b32.xlu0 %v16_v3, %s38_s9 }
  0x7c   :  { %v12_v5 = vpop.permute.xlu0 %11   ;;  %v24_v6 = vpop.permute.xlu1 %23  }
  0x7d   :  { %14 = vst.msk [vmem:[#allocation0] sm:$0x1] %vm13_vm1, %v12_v5  }
  0x84   :  { %v18_v7 = vpop.permute.xlu0 %17  }
  0x85   :  { %20 = vst.msk [vmem:[#allocation0] sm:$0x1] %vm19_vm2, %v18_v7  }
  0x86   :  { %26 = vst.msk [vmem:[#allocation0] sm:$0x1] %vm25_vm3, %v24_v6  }
  0x8d   :  { %v29_v8 = vld [vmem:[#allocation0] sm:$0x1] }
  0x8e   :  { %32 = vst [vmem:[%s56_s1] sm:$0x1] %v29_v8 }

// kernel: tokenpose_forward.4
= control target key start
LH: loop header
LB: loop body
LE: loop exit
PB: predicated region body
PF: predicated region fallthrough
CT: control target
= control target key end

     0   :  { %s3080_s21 = smov 0   ;;  %s4422_s0 = inlined_call_operand.vmem [shape: f32[2,17,17,3], index: 0, kind: input, shape index: {}]   ;;  %s4423_s1 = inlined_call_operand.vmem [shape: f32[2,17,17,3], index: 1, kind: input, shape index: {}]   ;;  %s4424_s2 = inlined_call_operand.vmem [shape: f32[2,17,17,3], index: 2, kind: input, shape index: {}]   ;;  %s4425_s3 = inlined_call_operand.vmem [shape: f32[2,17,17,3], index: 3, kind: input, shape index: {}]   ;;  %s4426_s4 = inlined_call_operand.vmem [shape: bf16[27,64], index: 4, kind: input, shape index: {}]   ;;  %s4427_s5 = inlined_call_operand.vmem [shape: f32[1,64], index: 5, kind: input, shape index: {}]   ;;  %s4428_s6 = inlined_call_operand.vmem [shape: f32[2,256,64], index: 6, kind: output, shape index: {}]  }
   0x1 LB: > { %s2227_s22 = sadd.s32 4294967295, %s3034_s21   ;;  %p2231_p0 = scmp.ge.s32.totalorder %s3034_s21, 1  ;;  %s3034_s21 = sphi %s3080_s21, %s16_s21  }
   0x2   : > { %p242_p1 = scmp.lt.s32.totalorder %s3034_s21, 3 }
   0x4   : > { %p243_p2 = pnand %p2231_p0, %p242_p1 }
   0x6   : > { %246 = sbr.rel (%p243_p2) target bundleno = 617 (0x269), region = 44 }
   0xb   : > { %p287_p3 = scmp.lt.s32.totalorder %s2227_s22, 1  ;;  %s3036_s27 = smov 3   ;;  %vm1627_vm0 = vcmask 23552   ;;  %vm1660_vm1 = vcmask 48128   ;;  %vm1693_vm2 = vcmask 72704   ;;  %vm1726_vm3 = vcmask 97280  }
   0xc   : > { %s3037_s7 = smov 6   ;;  %s3038_s11 = smov 9   ;;  %vm1759_vm4 = vcmask 121856   ;;  %vm1792_vm5 = vcmask 146432   ;;  %vm1975_vm6 = vcmask 1044480   ;;  %vm1976_vm7 = vcmask 1045504  }
   0xd   : > { %s4460_s22 = smov (!%p287_p3, %s2227_s22), 1  ;;  %s3039_s15 = smov 12   ;;  %vm1858_vm8 = vcmask 195584   ;;  %vm1825_vm9 = vcmask 171008   ;;  %vm1926_vm10 = vcmask 220160   ;;  %vm2103_vm11 = vcmask 523264  }
   0xe   : > { %s3091_s23 = smul.u32 408, %s4460_s22  ;;  %s3040_s16 = smov 15  }
   0xf   : > { %s3041_s17 = smov 18   ;;  %s3042_s18 = smov 24  }
  0x10   : > { %s3097_s26 = scalar_lea.vmem %s4423_s1, %s3091_s23  ;;  %s3145_s30 = scalar_lea.vmem %s4422_s0, %s3091_s23 }
  0x11   : > { %v353_v0 = vld [vmem:[%s3097_s26 + $0x60] sm:$0xff]  ;;  %v354_v1 = vld [vmem:[%s3097_s26 + $0x68] sm:$0xff]  ;;  %v349_v2 = vld [vmem:[%s3097_s26 + $0x30] sm:$0xff]  ;;  %s3196_s10 = scalar_lea.vmem %s4424_s2, %s3091_s23  ;;  %s3268_s14 = scalar_lea.vmem %s4425_s3, %s3091_s23 }
  0x12   : > { %v2407_v3 = vpack.i.bf16 %v354_v1, %v353_v0  ;;  %v350_v4 = vld [vmem:[%s3097_s26 + $0x38] sm:$0xff]  ;;  %v345_v5 = vld [vmem:[%s3097_s26] sm:$0xff]  ;;  %v346_v6 = vld [vmem:[%s3097_s26 + $0x8] sm:$0xff]  ;;  %s3043_s19 = smov 21  }
  0x13   : > { %v2397_v7 = vpack.i.bf16 %v350_v4, %v349_v2  ;;  %v2387_v8 = vpack.i.bf16 %v346_v6, %v345_v5  ;;  %v355_v9 = vld [vmem:[%s3097_s26 + $0x78] sm:$0xff]  ;;  %v356_v10 = vld [vmem:[%s3097_s26 + $0x80] sm:$0xff]  ;;  %v351_v11 = vld [vmem:[%s3097_s26 + $0x48] sm:$0xff] }
  0x14   : > { %2408 = vrot.lane.b32.xlu2 %v2407_v3, %s3036_s27  ;;  %v352_v12 = vld [vmem:[%s3097_s26 + $0x50] sm:$0xff]  ;;  %v347_v13 = vld [vmem:[%s3097_s26 + $0x18] sm:$0xff]  ;;  %v348_v14 = vld [vmem:[%s3097_s26 + $0x20] sm:$0xff]  ;;  %v2412_v15 = vpack.i.bf16 %v356_v10, %v355_v9 }
  0x15   : > { %2398 = vrot.lane.b32.xlu1 %v2397_v7, %s3036_s27  ;;  %2388 = vrot.lane.b32.xlu0 %v2387_v8, %s3036_s27  ;;  %v2402_v16 = vpack.i.bf16 %v352_v12, %v351_v11  ;;  %v2392_v17 = vpack.i.bf16 %v348_v14, %v347_v13  ;;  %v361_v18 = vld [vmem:[%s3097_s26 + $0xc0] sm:$0xff]  ;;  %v362_v19 = vld [vmem:[%s3097_s26 + $0xc8] sm:$0xff] }
  0x16   : > { %v359_v20 = vld [vmem:[%s3097_s26 + $0xa8] sm:$0xff]  ;;  %v360_v21 = vld [vmem:[%s3097_s26 + $0xb0] sm:$0xff]  ;;  %v358_v23 = vld [vmem:[%s3097_s26 + $0x98] sm:$0xff]  ;;  %v2427_v24 = vpack.i.bf16 %v362_v19, %v361_v18 }
  0x17   : > { %v357_v22 = vld [vmem:[%s3097_s26 + $0x90] sm:$0xff]  ;;  %v2422_v25 = vpack.i.bf16 %v360_v21, %v359_v20  ;;  %v367_v27 = vld [vmem:[%s3097_s26 + $0x108] sm:$0xff]  ;;  %v366_v30 = vld [vmem:[%s3097_s26 + $0xf8] sm:$0xff] }
  0x18   : > { %v2417_v26 = vpack.i.bf16 %v358_v23, %v357_v22  ;;  %v368_v28 = vld [vmem:[%s3097_s26 + $0x110] sm:$0xff]  ;;  %v363_v31 = vld [vmem:[%s3097_s26 + $0xd8] sm:$0xff]  ;;  %v364_v32 = vld [vmem:[%s3097_s26 + $0xe0] sm:$0xff] }
  0x19   : > { %v365_v29 = vld [vmem:[%s3097_s26 + $0xf0] sm:$0xff]  ;;  %v2442_v33 = vpack.i.bf16 %v368_v28, %v367_v27  ;;  %v2432_v35 = vpack.i.bf16 %v364_v32, %v363_v31  ;;  %v374_v37 = vld [vmem:[%s3097_s26 + $0x158] sm:$0xff]  ;;  %v372_v39 = vld [vmem:[%s3097_s26 + $0x140] sm:$0xff] }
  0x1a   : > { %v2437_v34 = vpack.i.bf16 %v366_v30, %v365_v29  ;;  %v373_v36 = vld [vmem:[%s3097_s26 + $0x150] sm:$0xff]  ;;  %v371_v38 = vld [vmem:[%s3097_s26 + $0x138] sm:$0xff]  ;;  %v369_v40 = vld [vmem:[%s3097_s26 + $0x120] sm:$0xff] }
  0x1b   : > { %v370_v41 = vld [vmem:[%s3097_s26 + $0x128] sm:$0xff]  ;;  %v2457_v42 = vpack.i.bf16 %v374_v37, %v373_v36  ;;  %v2452_v43 = vpack.i.bf16 %v372_v39, %v371_v38  ;;  %v379_v46 = vld [vmem:[%s3145_s30 + $0x19] sm:$0xff]  ;;  %v376_v48 = vld [vmem:[%s3097_s26 + $0x170] sm:$0xff] }
  0x1c   : > { %2413 = vrot.lane.b32.xlu2 %v2412_v15, %s3036_s27  ;;  %v2447_v44 = vpack.i.bf16 %v370_v41, %v369_v40  ;;  %v375_v45 = vld [vmem:[%s3097_s26 + $0x168] sm:$0xff]  ;;  %v381_v54 = vld [vmem:[%s3145_s30 + $0x31] sm:$0xff]  ;;  %v382_v57 = vld [vmem:[%s3145_s30 + $0x39] sm:$0xff] }
  0x1d   : > { %2403 = vrot.lane.b32.xlu1 %v2402_v16, %s3036_s27  ;;  %2393 = vrot.lane.b32.xlu0 %v2392_v17, %s3036_s27  ;;  %v380_v47 = vld [vmem:[%s3145_s30 + $0x21] sm:$0xff]  ;;  %v378_v50 = vld [vmem:[%s3145_s30 + $0x9] sm:$0xff]  ;;  %v2462_v52 = vpack.i.bf16 %v376_v48, %v375_v45  ;;  %v2477_v61 = vpack.i.bf16 %v382_v57, %v381_v54 }
  0x1e   : > { %v377_v49 = vld [vmem:[%s3145_s30 + $0x1] sm:$0xff]  ;;  %v2472_v51 = vpack.i.bf16 %v380_v47, %v379_v46  ;;  %v386_v56 = vld [vmem:[%s3145_s30 + $0x69] sm:$0xff]  ;;  %v384_v59 = vld [vmem:[%s3145_s30 + $0x51] sm:$0xff] }
  0x1f   : > { %v2467_v53 = vpack.i.bf16 %v378_v50, %v377_v49  ;;  %v385_v55 = vld [vmem:[%s3145_s30 + $0x61] sm:$0xff]  ;;  %v383_v58 = vld [vmem:[%s3145_s30 + $0x49] sm:$0xff]  ;;  %v387_v63 = vld [vmem:[%s3145_s30 + $0x79] sm:$0xff] }
  0x20   : > { %v2487_v60 = vpack.i.bf16 %v386_v56, %v385_v55  ;;  %v2482_v62 = vpack.i.bf16 %v384_v59, %v383_v58  ;;  %v391_v0 = vld [vmem:[%s3145_s30 + $0xa9] sm:$0xff]  ;;  %v392_v1 = vld [vmem:[%s3145_s30 + $0xb1] sm:$0xff]  ;;  %v388_v2 = vld [vmem:[%s3145_s30 + $0x81] sm:$0xff] }
  0x21   : > { %v389_v3 = vld [vmem:[%s3145_s30 + $0x91] sm:$0xff]  ;;  %v390_v4 = vld [vmem:[%s3145_s30 + $0x99] sm:$0xff]  ;;  %v2502_v5 = vpack.i.bf16 %v392_v1, %v391_v0  ;;  %v2492_v6 = vpack.i.bf16 %v388_v2, %v387_v63  ;;  %v393_v8 = vld [vmem:[%s3145_s30 + $0xc1] sm:$0xff] }
  0x22   : > { %v2497_v7 = vpack.i.bf16 %v390_v4, %v389_v3  ;;  %v397_v9 = vld [vmem:[%s3145_s30 + $0xf1] sm:$0xff]  ;;  %v398_v10 = vld [vmem:[%s3145_s30 + $0xf9] sm:$0xff]  ;;  %v394_v11 = vld [vmem:[%s3145_s30 + $0xc9] sm:$0xff] }
  0x23   : > { %v395_v12 = vld [vmem:[%s3145_s30 + $0xd9] sm:$0xff]  ;;  %v396_v13 = vld [vmem:[%s3145_s30 + $0xe1] sm:$0xff]  ;;  %v2517_v14 = vpack.i.bf16 %v398_v10, %v397_v9  ;;  %v2507_v15 = vpack.i.bf16 %v394_v11, %v393_v8  ;;  %v399_v17 = vld [vmem:[%s3145_s30 + $0x109] sm:$0xff] }
  0x24   : > { %2428 = vrot.lane.b32.xlu2 %v2427_v24, %s3036_s27  ;;  %v2512_v16 = vpack.i.bf16 %v396_v13, %v395_v12  ;;  %v403_v18 = vld [vmem:[%s3145_s30 + $0x139] sm:$0xff]  ;;  %v404_v19 = vld [vmem:[%s3145_s30 + $0x141] sm:$0xff]  ;;  %v400_v20 = vld [vmem:[%s3145_s30 + $0x111] sm:$0xff] }
  0x25   : > { %2423 = vrot.lane.b32.xlu1 %v2422_v25, %s3036_s27  ;;  %2418 = vrot.lane.b32.xlu0 %v2417_v26, %s3036_s27  ;;  %v401_v21 = vld [vmem:[%s3145_s30 + $0x121] sm:$0xff]  ;;  %v402_v22 = vld [vmem:[%s3145_s30 + $0x129] sm:$0xff]  ;;  %v2532_v23 = vpack.i.bf16 %v404_v19, %v403_v18  ;;  %v2522_v24 = vpack.i.bf16 %v400_v20, %v399_v17 }
  0x26   : > { %v2527_v25 = vpack.i.bf16 %v402_v22, %v401_v21  ;;  %v405_v26 = vld [vmem:[%s3145_s30 + $0x151] sm:$0xff]  ;;  %v409_v27 = vld [vmem:[%s3196_s10] sm:$0xff]  ;;  %v410_v28 = vld [vmem:[%s3196_s10 + $0x8] sm:$0xff] }
  0x27   : > { %v406_v29 = vld [vmem:[%s3145_s30 + $0x159] sm:$0xff]  ;;  %v407_v30 = vld [vmem:[%s3145_s30 + $0x169] sm:$0xff]  ;;  %v408_v31 = vld [vmem:[%s3145_s30 + $0x171] sm:$0xff]  ;;  %v2547_v32 = vpack.i.bf16 %v410_v28, %v409_v27 }
  0x28   : > { %v415_v36 = vld [vmem:[%s3196_s10 + $0x48] sm:$0xff]  ;;  %v416_v37 = vld [vmem:[%s3196_s10 + $0x50] sm:$0xff]  ;;  %v412_v38 = vld [vmem:[%s3196_s10 + $0x20] sm:$0xff] }
  0x29   : > { %v413_v39 = vld [vmem:[%s3196_s10 + $0x30] sm:$0xff]  ;;  %v414_v40 = vld [vmem:[%s3196_s10 + $0x38] sm:$0xff]  ;;  %v2562_v41 = vpack.i.bf16 %v416_v37, %v415_v36  ;;  %v418_v48 = vld [vmem:[%s3196_s10 + $0x68] sm:$0xff] }
  0x2a   : > { %v421_v45 = vld [vmem:[%s3196_s10 + $0x90] sm:$0xff]  ;;  %v422_v46 = vld [vmem:[%s3196_s10 + $0x98] sm:$0xff]  ;;  %v420_v50 = vld [vmem:[%s3196_s10 + $0x80] sm:$0xff] }
  0x2b   : > { %v419_v49 = vld [vmem:[%s3196_s10 + $0x78] sm:$0xff]  ;;  %v423_v54 = vld [vmem:[%s3196_s10 + $0xa8] sm:$0xff]  ;;  %v428_v56 = vld [vmem:[%s3196_s10 + $0xe0] sm:$0xff] }
  0x2c   : > { %2443 = vrot.lane.b32.xlu2 %v2442_v33, %s3036_s27  ;;  %v2537_v33 = vpack.i.bf16 %v406_v29, %v405_v26  ;;  %v427_v55 = vld [vmem:[%s3196_s10 + $0xd8] sm:$0xff]  ;;  %v424_v58 = vld [vmem:[%s3196_s10 + $0xb0] sm:$0xff]  ;;  %v425_v59 = vld [vmem:[%s3196_s10 + $0xc0] sm:$0xff] }
  0x2d   : > { %2438 = vrot.lane.b32.xlu1 %v2437_v34, %s3036_s27  ;;  %2433 = vrot.lane.b32.xlu0 %v2432_v35, %s3036_s27  ;;  %v2542_v34 = vpack.i.bf16 %v408_v31, %v407_v30  ;;  %v411_v35 = vld [vmem:[%s3196_s10 + $0x18] sm:$0xff]  ;;  %v429_v0 = vld [vmem:[%s3196_s10 + $0xf0] sm:$0xff] }
  0x2e   : > { %v433_v1 = vld [vmem:[%s3196_s10 + $0x120] sm:$0xff]  ;;  %v434_v2 = vld [vmem:[%s3196_s10 + $0x128] sm:$0xff]  ;;  %v430_v4 = vld [vmem:[%s3196_s10 + $0xf8] sm:$0xff] }
  0x2f   : > { %v2597_v8 = vpack.i.bf16 %v430_v4, %v429_v0  ;;  %v435_v10 = vld [vmem:[%s3196_s10 + $0x138] sm:$0xff]  ;;  %v439_v11 = vld [vmem:[%s3196_s10 + $0x168] sm:$0xff]  ;;  %v440_v12 = vld [vmem:[%s3196_s10 + $0x170] sm:$0xff] }
  0x30   : > { %v2622_v19 = vpack.i.bf16 %v440_v12, %v439_v11  ;;  %v445_v22 = vld [vmem:[%s3268_s14 + $0x30] sm:$0xff]  ;;  %v442_v27 = vld [vmem:[%s3268_s14 + $0x8] sm:$0xff]  ;;  %v443_v28 = vld [vmem:[%s3268_s14 + $0x18] sm:$0xff] }
  0x31   : > { %v444_v29 = vld [vmem:[%s3268_s14 + $0x20] sm:$0xff]  ;;  %v3285_v31 = vld [vmem:[%s3145_s30 + $0x50] sm:$0xff] }
  0x34   : > { %2458 = vrot.lane.b32.xlu2 %v2457_v42, %s3036_s27  ;;  %v2552_v42 = vpack.i.bf16 %v412_v38, %v411_v35 }
  0x35   : > { %2453 = vrot.lane.b32.xlu1 %v2452_v43, %s3036_s27  ;;  %2448 = vrot.lane.b32.xlu0 %v2447_v44, %s3036_s27  ;;  %v2557_v43 = vpack.i.bf16 %v414_v40, %v413_v39  ;;  %v417_v44 = vld [vmem:[%s3196_s10 + $0x60] sm:$0xff] }
  0x3c   : > { %2473 = vrot.lane.b32.xlu2 %v2472_v51, %s3037_s7  ;;  %v2577_v51 = vpack.i.bf16 %v422_v46, %v421_v45  ;;  %v451_v46 = vld [vmem:[%s3268_s14 + $0x78] sm:$0xff] }
  0x3d   : > { %2463 = vrot.lane.b32.xlu0 %v2462_v52, %s3036_s27  ;;  %2468 = vrot.lane.b32.xlu1 %v2467_v53, %s3037_s7  ;;  %v2567_v52 = vpack.i.bf16 %v418_v48, %v417_v44  ;;  %v2572_v53 = vpack.i.bf16 %v420_v50, %v419_v49  ;;  %v452_v48 = vld [vmem:[%s3268_s14 + $0x80] sm:$0xff]  ;;  %v3311_v49 = vld [vmem:[%s3145_s30 + $0xa8] sm:$0xff] }
  0x3e   : > { %v447_v50 = vld [vmem:[%s3268_s14 + $0x48] sm:$0xff] }
  0x44   : > { %2488 = vrot.lane.b32.xlu2 %v2487_v60, %s3037_s7  ;;  %v426_v60 = vld [vmem:[%s3196_s10 + $0xc8] sm:$0xff] }
  0x45   : > { %2478 = vrot.lane.b32.xlu0 %v2477_v61, %s3037_s7  ;;  %2483 = vrot.lane.b32.xlu1 %v2482_v62, %s3037_s7  ;;  %v2592_v61 = vpack.i.bf16 %v428_v56, %v427_v55  ;;  %v2582_v62 = vpack.i.bf16 %v424_v58, %v423_v54  ;;  %v2587_v63 = vpack.i.bf16 %v426_v60, %v425_v59  ;;  %v450_v54 = vld [vmem:[%s3268_s14 + $0x68] sm:$0xff]  ;;  %v3318_v56 = vld [vmem:[%s3145_s30 + $0xb0] sm:$0xff] }
  0x46   : > { %v3321_v59 = vld [vmem:[%s3145_s30 + $0x90] sm:$0xff]  ;;  %v3324_v60 = vld [vmem:[%s3145_s30 + $0x98] sm:$0xff] }
  0x4c   : > { %2503 = vrot.lane.b32.xlu2 %v2502_v5, %s3037_s7  ;;  %v431_v5 = vld [vmem:[%s3196_s10 + $0x108] sm:$0xff] }
  0x4d   : > { %2493 = vrot.lane.b32.xlu0 %v2492_v6, %s3037_s7  ;;  %2498 = vrot.lane.b32.xlu1 %v2497_v7, %s3037_s7  ;;  %v432_v6 = vld [vmem:[%s3196_s10 + $0x110] sm:$0xff]  ;;  %v2607_v7 = vpack.i.bf16 %v434_v2, %v433_v1 }
  0x4e   : > { %v2602_v9 = vpack.i.bf16 %v432_v6, %v431_v5 }
  0x54   : > { %2518 = vrot.lane.b32.xlu2 %v2517_v14, %s3037_s7  ;;  %v436_v14 = vld [vmem:[%s3196_s10 + $0x140] sm:$0xff] }
  0x55   : > { %2508 = vrot.lane.b32.xlu0 %v2507_v15, %s3037_s7  ;;  %2513 = vrot.lane.b32.xlu1 %v2512_v16, %s3037_s7  ;;  %v437_v15 = vld [vmem:[%s3196_s10 + $0x150] sm:$0xff]  ;;  %v438_v16 = vld [vmem:[%s3196_s10 + $0x158] sm:$0xff]  ;;  %v2612_v20 = vpack.i.bf16 %v436_v14, %v435_v10 }
  0x56   : > { %v2617_v21 = vpack.i.bf16 %v438_v16, %v437_v15  ;;  %v3347_v16 = vld [vmem:[%s3145_s30 + $0x60] sm:$0xff] }
  0x5c   : > { %2533 = vrot.lane.b32.xlu2 %v2532_v23, %s3037_s7  ;;  %v446_v23 = vld [vmem:[%s3268_s14 + $0x38] sm:$0xff] }
  0x5d   : > { %2523 = vrot.lane.b32.xlu0 %v2522_v24, %s3037_s7  ;;  %2528 = vrot.lane.b32.xlu1 %v2527_v25, %s3037_s7  ;;  %v3276_v24 = vld [vmem:[%s3145_s30 + $0x48] sm:$0xff]  ;;  %v441_v25 = vld [vmem:[%s3268_s14] sm:$0xff]  ;;  %v2637_v35 = vpack.i.bf16 %v446_v23, %v445_v22 }
  0x5e   : > { %v2627_v40 = vpack.i.bf16 %v442_v27, %v441_v25  ;;  %v458_v22 = vld [vmem:[%s3268_s14 + $0xc8] sm:$0xff]  ;;  %v454_v25 = vld [vmem:[%s3268_s14 + $0x98] sm:$0xff] }
  0x5f   : > { %v455_v27 = vld [vmem:[%s3268_s14 + $0xa8] sm:$0xff] }
  0x64   : > { %2548 = vrot.lane.b32.xlu2 %v2547_v32, %s3038_s11 }
  0x65   : > { %2538 = vrot.lane.b32.xlu0 %v2537_v33, %s3037_s7  ;;  %2543 = vrot.lane.b32.xlu1 %v2542_v34, %s3037_s7  ;;  %v3288_v33 = vld [vmem:[%s3145_s30 + $0x18] sm:$0xff]  ;;  %v3291_v34 = vld [vmem:[%s3145_s30 + $0x20] sm:$0xff] }
  0x6c   : > { %2563 = vrot.lane.b32.xlu2 %v2562_v41, %s3038_s11  ;;  %v2632_v41 = vpack.i.bf16 %v444_v29, %v443_v28  ;;  %v456_v28 = vld [vmem:[%s3268_s14 + $0xb0] sm:$0xff] }
  0x6d   : > { %2553 = vrot.lane.b32.xlu0 %v2552_v42, %s3038_s11  ;;  %2558 = vrot.lane.b32.xlu1 %v2557_v43, %s3038_s11 }
  0x6e   : > { %v3222_v47 = vpop.permute.xlu2 %2408 }
  0x6f   : > { %v2410_v14 = vunpack.i.l.bf16 %v3222_v47  ;;  %v2411_v15 = vunpack.i.h.bf16 %v3222_v47 }
  0x71   : > { %v1636_v47 = vsel %vm1627_vm0, %v3347_v16, %v2410_v14 }
  0x74   : > { %2578 = vrot.lane.b32.xlu2 %v2577_v51, %s3038_s11 }
  0x75   : > { %2568 = vrot.lane.b32.xlu0 %v2567_v52, %s3038_s11  ;;  %2573 = vrot.lane.b32.xlu1 %v2572_v53, %s3038_s11  ;;  %v448_v52 = vld [vmem:[%s3268_s14 + $0x50] sm:$0xff]  ;;  %v449_v53 = vld [vmem:[%s3268_s14 + $0x60] sm:$0xff] }
  0x76   : > { %v3233_v57 = vpop.permute.xlu2 %2413 }
  0x7c   : > { %2593 = vrot.lane.b32.xlu2 %v2592_v61, %s3038_s11 }
  0x7d   : > { %2583 = vrot.lane.b32.xlu0 %v2582_v62, %s3038_s11  ;;  %2588 = vrot.lane.b32.xlu1 %v2587_v63, %s3038_s11  ;;  %v2652_v63 = vpack.i.bf16 %v452_v48, %v451_v46  ;;  %v2662_v48 = vpack.i.bf16 %v456_v28, %v455_v27 }
  0x7e   : > { %v3244_v3 = vpop.permute.xlu2 %2428 }
  0x84   : > { %2608 = vrot.lane.b32.xlu2 %v2607_v7, %s3038_s11  ;;  %v2642_v7 = vpack.i.bf16 %v448_v52, %v447_v50  ;;  %v459_v52 = vld [vmem:[%s3268_s14 + $0xd8] sm:$0xff] }
  0x85   : > { %2598 = vrot.lane.b32.xlu0 %v2597_v8, %s3038_s11  ;;  %2603 = vrot.lane.b32.xlu1 %v2602_v9, %s3038_s11  ;;  %v2647_v8 = vpack.i.bf16 %v450_v54, %v449_v53  ;;  %v463_v53 = vld [vmem:[%s3268_s14 + $0x108] sm:$0xff]  ;;  %v464_v54 = vld [vmem:[%s3268_s14 + $0x110] sm:$0xff] }
  0x86   : > { %v3255_v13 = vpop.permute.xlu2 %2443 }
  0x87   : > { %v3260_v17 = vpop.permute.xlu1 %2398  ;;  %v3262_v18 = vpop.permute.xlu0 %2388 }
  0x8c   : > { %2623 = vrot.lane.b32.xlu2 %v2622_v19, %s3038_s11  ;;  %v3350_v19 = vld [vmem:[%s3145_s30 + $0x68] sm:$0xff] }
  0x8d   : > { %2613 = vrot.lane.b32.xlu0 %v2612_v20, %s3038_s11  ;;  %2618 = vrot.lane.b32.xlu1 %v2617_v21, %s3038_s11  ;;  %v453_v20 = vld [vmem:[%s3268_s14 + $0x90] sm:$0xff]  ;;  %v457_v21 = vld [vmem:[%s3268_s14 + $0xc0] sm:$0xff] }
  0x8e   : > { %v3279_v26 = vpop.permute.xlu2 %2458  ;;  %v2657_v46 = vpack.i.bf16 %v454_v25, %v453_v20  ;;  %v2390_v25 = vunpack.i.l.bf16 %v3262_v18 }
  0x8f   : > { %v2404_v30 = vpop.permute.xlu1 %2403  ;;  %v2394_v32 = vpop.permute.xlu0 %2393 }
  0x90   : > { %v2406_v36 = vunpack.i.h.bf16 %v2404_v30  ;;  %v2405_v37 = vunpack.i.l.bf16 %v2404_v30  ;;  %v2396_v38 = vunpack.i.h.bf16 %v2394_v32  ;;  %v2395_v39 = vunpack.i.l.bf16 %v2394_v32  ;;  %v3366_v32 = vld [vmem:[%s3145_s30 + $0xd8] sm:$0xff] }
  0x92   : > { %v3295_v42 = vsel %vm1627_vm0, %v3276_v24, %v2405_v37  ;;  %v3299_v43 = vsel %vm1627_vm0, %v3285_v31, %v2406_v36  ;;  %v1630_v44 = vsel %vm1627_vm0, %v3288_v33, %v2395_v39  ;;  %v1631_v45 = vsel %vm1627_vm0, %v3291_v34, %v2396_v38 }
  0x93   : > { %v1637_v38 = vsel %vm1627_vm0, %v3350_v19, %v2411_v15  ;;  %v2682_v15 = vpack.i.bf16 %v464_v54, %v463_v53  ;;  %v468_v53 = vld [vmem:[%s3268_s14 + $0x140] sm:$0xff] }
  0x94   : > { %2638 = vrot.lane.b32.xlu2 %v2637_v35, %s3039_s15  ;;  %v3369_v35 = vld [vmem:[%s3145_s30 + $0xe0] sm:$0xff] }
  0x95   : > { %2628 = vrot.lane.b32.xlu0 %v2627_v40, %s3039_s15  ;;  %2633 = vrot.lane.b32.xlu1 %v2632_v41, %s3039_s15  ;;  %v2667_v41 = vpack.i.bf16 %v458_v22, %v457_v21 }
  0x96   : > { %v2474_v51 = vpop.permute.xlu2 %2473 }
  0x97   : > { %v2424_v55 = vpop.permute.xlu1 %2423  ;;  %v2419_v58 = vpop.permute.xlu0 %2418  ;;  %v2476_v61 = vunpack.i.h.bf16 %v2474_v51  ;;  %v2475_v62 = vunpack.i.l.bf16 %v2474_v51 }
  0x98   : > { %v2426_v0 = vunpack.i.h.bf16 %v2424_v55  ;;  %v2425_v1 = vunpack.i.l.bf16 %v2424_v55  ;;  %v2421_v2 = vunpack.i.h.bf16 %v2419_v58  ;;  %v2420_v4 = vunpack.i.l.bf16 %v2419_v58  ;;  %v460_v58 = vld [vmem:[%s3268_s14 + $0xe0] sm:$0xff] }
  0x99   : > { %v3327_v5 = vsel %vm1660_vm1, %v1630_v44, %v2475_v62  ;;  %v3330_v6 = vsel %vm1660_vm1, %v1631_v45, %v2476_v61  ;;  %v461_v61 = vld [vmem:[%s3268_s14 + $0xf0] sm:$0xff]  ;;  %v462_v62 = vld [vmem:[%s3268_s14 + $0xf8] sm:$0xff]  ;;  %v2672_v22 = vpack.i.bf16 %v460_v58, %v459_v52 }
  0x9a   : > { %v1642_v9 = vsel %vm1627_vm0, %v3311_v49, %v2425_v1  ;;  %v1643_v10 = vsel %vm1627_vm0, %v3318_v56, %v2426_v0  ;;  %v3338_v11 = vsel %vm1627_vm0, %v3321_v59, %v2420_v4  ;;  %v3342_v12 = vsel %vm1627_vm0, %v3324_v60, %v2421_v2  ;;  %v3397_v0 = vld [vmem:[%s3145_s30 + $0x138] sm:$0xff]  ;;  %v3400_v1 = vld [vmem:[%s3145_s30 + $0x140] sm:$0xff] }
  0x9b   : > { %v467_v52 = vld [vmem:[%s3268_s14 + $0x138] sm:$0xff] }
  0x9c   : > { %2653 = vrot.lane.b32.xlu2 %v2652_v63, %s3039_s15 }
  0x9d   : > { %2643 = vrot.lane.b32.xlu0 %v2642_v7, %s3039_s15  ;;  %2648 = vrot.lane.b32.xlu1 %v2647_v8, %s3039_s15 }
  0x9e   : > { %v2489_v23 = vpop.permute.xlu2 %2488 }
  0x9f   : > { %v3363_v29 = vpop.permute.xlu1 %2438  ;;  %v2434_v30 = vpop.permute.xlu0 %2433  ;;  %v2491_v36 = vunpack.i.h.bf16 %v2489_v23  ;;  %v2490_v37 = vunpack.i.l.bf16 %v2489_v23  ;;  %v2677_v23 = vpack.i.bf16 %v462_v62, %v461_v61 }
  0xa0   : > { %v2436_v39 = vunpack.i.h.bf16 %v2434_v30  ;;  %v2435_v40 = vunpack.i.l.bf16 %v2434_v30  ;;  %v2441_v30 = vunpack.i.h.bf16 %v3363_v29 }
  0xa1   : > { %v3374_v44 = vsel %vm1660_vm1, %v1636_v47, %v2490_v37  ;;  %v3377_v45 = vsel %vm1660_vm1, %v1637_v38, %v2491_v36  ;;  %v313_v47 = vld [vmem:[%s3145_s30] sm:$0xff]  ;;  %v2440_v36 = vunpack.i.l.bf16 %v3363_v29  ;;  %v3425_v37 = vld [vmem:[%s3145_s30 + $0xf0] sm:$0xff] }
  0xa2   : > { %v3381_v50 = vsel %vm1627_vm0, %v3366_v32, %v2435_v40  ;;  %v3385_v51 = vsel %vm1627_vm0, %v3369_v35, %v2436_v39  ;;  %4433 = vst [vmem:[#allocation2_spill] sm:$0xff] %v3425_v37  ;;  %v469_v38 = vld [vmem:[%s3268_s14 + $0x150] sm:$0xff]  ;;  %v470_v39 = vld [vmem:[%s3268_s14 + $0x158] sm:$0xff] }
  0xa3   : > { %v3431_v40 = vld [vmem:[%s3145_s30 + $0xf8] sm:$0xff]  ;;  %v2697_v62 = vpack.i.bf16 %v470_v39, %v469_v38  ;;  %v476_v39 = vld [vmem:[%s3196_s10 + $0x21] sm:$0xff] }
  0xa4   : > { %2668 = vrot.lane.b32.xlu2 %v2667_v41, %s3039_s15  ;;  %4434 = vst [vmem:[#allocation3_spill] sm:$0xff] %v3431_v40  ;;  %v1628_v41 = vsel %vm1627_vm0, %v313_v47, %v2390_v25  ;;  %v2400_v25 = vunpack.i.l.bf16 %v3260_v17  ;;  %v475_v38 = vld [vmem:[%s3196_s10 + $0x19] sm:$0xff] }
  0xa5   : > { %2658 = vrot.lane.b32.xlu0 %v2657_v46, %s3039_s15  ;;  %2663 = vrot.lane.b32.xlu1 %v2662_v48, %s3039_s15  ;;  %v466_v48 = vld [vmem:[%s3268_s14 + $0x128] sm:$0xff] }
  0xa6   : > { %v2504_v55 = vpop.permute.xlu2 %2503 }
  0xa7   : > { %v2454_v63 = vpop.permute.xlu1 %2453  ;;  %v3402_v2 = vpop.permute.xlu0 %2448  ;;  %v2506_v4 = vunpack.i.h.bf16 %v2504_v55  ;;  %v2505_v7 = vunpack.i.l.bf16 %v2504_v55 }
  0xa8   : > { %v2456_v8 = vunpack.i.h.bf16 %v2454_v63  ;;  %v2455_v14 = vunpack.i.l.bf16 %v2454_v63  ;;  %v1648_v63 = vsel %vm1627_vm0, %v3425_v37, %v2440_v36  ;;  %v3465_v36 = vld [vmem:[%s3145_s30 + $0x38] sm:$0xff] }
  0xa9   : > { %v3405_v20 = vsel %vm1660_vm1, %v1642_v9, %v2505_v7  ;;  %v3408_v21 = vsel %vm1660_vm1, %v1643_v10, %v2506_v4  ;;  %v2391_v9 = vunpack.i.h.bf16 %v3262_v18  ;;  %v314_v10 = vld [vmem:[%s3145_s30 + $0x8] sm:$0xff]  ;;  %v465_v18 = vld [vmem:[%s3268_s14 + $0x120] sm:$0xff]  ;;  %v1649_v4 = vsel %vm1627_vm0, %v3431_v40, %v2441_v30  ;;  %v3462_v30 = vld [vmem:[%s3145_s30 + $0x30] sm:$0xff] }
  0xaa   : > { %v3413_v27 = vsel %vm1627_vm0, %v3397_v0, %v2455_v14  ;;  %v3417_v28 = vsel %vm1627_vm0, %v3400_v1, %v2456_v8 }
  0xab   : > { %v1629_v29 = vsel %vm1627_vm0, %v314_v10, %v2391_v9  ;;  %v2401_v10 = vunpack.i.h.bf16 %v3260_v17  ;;  %v1632_v17 = vsel %vm1627_vm0, %v3462_v30, %v2400_v25 }
  0xac   : > { %2683 = vrot.lane.b32.xlu2 %v2682_v15, %s3039_s15 }
  0xad   : > { %2673 = vrot.lane.b32.xlu0 %v2672_v22, %s3039_s15  ;;  %2678 = vrot.lane.b32.xlu1 %v2677_v23, %s3039_s15  ;;  %v2687_v22 = vpack.i.bf16 %v466_v48, %v465_v18  ;;  %v2692_v23 = vpack.i.bf16 %v468_v53, %v467_v52  ;;  %v471_v18 = vld [vmem:[%s3268_s14 + $0x168] sm:$0xff]  ;;  %v472_v52 = vld [vmem:[%s3268_s14 + $0x170] sm:$0xff] }
  0xae   : > { %v2519_v46 = vpop.permute.xlu2 %2518  ;;  %v473_v53 = vld [vmem:[%s3196_s10 + $0x1] sm:$0xff] }
  0xaf   : > { %v3441_v54 = vpop.permute.xlu0 %2463  ;;  %v2521_v55 = vunpack.i.h.bf16 %v2519_v46  ;;  %v2520_v58 = vunpack.i.l.bf16 %v2519_v46  ;;  %v2469_v61 = vpop.permute.xlu1 %2468  ;;  %v2415_v46 = vunpack.i.l.bf16 %v3233_v57 }
  0xb0   : > { %v2471_v7 = vunpack.i.h.bf16 %v2469_v61  ;;  %v2470_v8 = vunpack.i.l.bf16 %v2469_v61 }
  0xb1   : > { %v3448_v14 = vsel %vm1660_vm1, %v1648_v63, %v2520_v58  ;;  %v3451_v15 = vsel %vm1660_vm1, %v1649_v4, %v2521_v55  ;;  %v1633_v55 = vsel %vm1627_vm0, %v3465_v36, %v2401_v10  ;;  %v2712_v4 = vpack.i.bf16 %v476_v39, %v475_v38 }
  0xb2   : > { %4435 = vst [vmem:[#allocation4_spill] sm:$0xff] %v3448_v14  ;;  %v3455_v9 = vsel %vm1660_vm1, %v1628_v41, %v2470_v8  ;;  %v3458_v47 = vsel %vm1660_vm1, %v1629_v29, %v2471_v7  ;;  %v2416_v41 = vunpack.i.h.bf16 %v3233_v57  ;;  %v474_v29 = vld [vmem:[%s3196_s10 + $0x9] sm:$0xff]  ;;  %v2702_v10 = vpack.i.bf16 %v472_v52, %v471_v18  ;;  %v3508_v18 = vld [vmem:[%s3145_s30 + $0x80] sm:$0xff] }
  0xb3   : > { %4436 = vst [vmem:[#allocation5_spill] sm:$0xff] %v3451_v15  ;;  %v482_v52 = vld [vmem:[%s3196_s10 + $0x69] sm:$0xff] }
  0xb4   : > { %2698 = vrot.lane.b32.xlu2 %v2697_v62, %s3039_s15  ;;  %v335_v14 = vld [vmem:[%s3145_s30 + $0x108] sm:$0xff] }
  0xb5   : > { %2688 = vrot.lane.b32.xlu0 %v2687_v22, %s3039_s15  ;;  %2693 = vrot.lane.b32.xlu1 %v2692_v23, %s3039_s15 }
  0xb6   : > { %v2534_v48 = vpop.permute.xlu2 %2533 }
  0xb7   : > { %v2479_v58 = vpop.permute.xlu0 %2478  ;;  %v2536_v61 = vunpack.i.h.bf16 %v2534_v48  ;;  %v2535_v62 = vunpack.i.l.bf16 %v2534_v48  ;;  %v2484_v63 = vpop.permute.xlu1 %2483  ;;  %v2707_v48 = vpack.i.bf16 %v474_v29, %v473_v53  ;;  %v1639_v53 = vsel %vm1627_vm0, %v3508_v18, %v2416_v41 }
  0xb8   : > { %v2481_v7 = vunpack.i.h.bf16 %v2479_v58  ;;  %v2480_v57 = vunpack.i.l.bf16 %v2479_v58  ;;  %v2486_v8 = vunpack.i.h.bf16 %v2484_v63  ;;  %v2485_v22 = vunpack.i.l.bf16 %v2484_v63  ;;  %v478_v58 = vld [vmem:[%s3196_s10 + $0x39] sm:$0xff] }
  0xb9   : > { %v3484_v23 = vsel %vm1660_vm1, %v3413_v27, %v2535_v62  ;;  %v3488_v25 = vsel %vm1660_vm1, %v3417_v28, %v2536_v61  ;;  %v3505_v28 = vld [vmem:[%s3145_s30 + $0x78] sm:$0xff]  ;;  %v2431_v29 = vunpack.i.h.bf16 %v3244_v3  ;;  %v479_v61 = vld [vmem:[%s3196_s10 + $0x49] sm:$0xff]  ;;  %v2430_v63 = vunpack.i.l.bf16 %v3244_v3 }
  0xba   : > { %4437 = vst [vmem:[#allocation6_spill] sm:$0xff] %v3484_v23  ;;  %v3491_v40 = vsel %vm1660_vm1, %v1632_v17, %v2480_v57  ;;  %v3494_v38 = vsel %vm1660_vm1, %v1633_v55, %v2481_v7  ;;  %v3498_v39 = vsel %vm1660_vm1, %v3295_v42, %v2485_v22  ;;  %v3502_v27 = vsel %vm1660_vm1, %v3299_v43, %v2486_v8  ;;  %v481_v17 = vld [vmem:[%s3196_s10 + $0x61] sm:$0xff]  ;;  %v477_v42 = vld [vmem:[%s3196_s10 + $0x31] sm:$0xff] }
  0xbb   : > { %4438 = vst [vmem:[#allocation7_spill] sm:$0xff] %v3488_v25  ;;  %v1638_v43 = vsel %vm1627_vm0, %v3505_v28, %v2415_v46  ;;  %v480_v62 = vld [vmem:[%s3196_s10 + $0x51] sm:$0xff]  ;;  %v2727_v22 = vpack.i.bf16 %v482_v52, %v481_v17  ;;  %v2717_v25 = vpack.i.bf16 %v478_v58, %v477_v42  ;;  %v3534_v23 = vld [vmem:[%s3145_s30 + $0xc0] sm:$0xff]  ;;  %v3551_v42 = vld [vmem:[%s3145_s30 + $0xc8] sm:$0xff] }
  0xbc   : > { %2713 = vrot.lane.b32.xlu2 %v2712_v4, %s3040_s16  ;;  %v488_v58 = vld [vmem:[%s3196_s10 + $0xb1] sm:$0xff] }
  0xbd   : > { %2703 = vrot.lane.b32.xlu0 %v2702_v10, %s3039_s15  ;;  %2708 = vrot.lane.b32.xlu1 %v2707_v48, %s3040_s16 }
  0xbe   : > { %v2549_v55 = vpop.permute.xlu2 %2548 }
  0xbf   : > { %v2494_v4 = vpop.permute.xlu0 %2493  ;;  %v2551_v7 = vunpack.i.h.bf16 %v2549_v55  ;;  %v2550_v57 = vunpack.i.l.bf16 %v2549_v55  ;;  %v2499_v8 = vpop.permute.xlu1 %2498  ;;  %v2722_v55 = vpack.i.bf16 %v480_v62, %v479_v61  ;;  %v1645_v61 = vsel %vm1627_vm0, %v3551_v42, %v2431_v29 }
  0xc0   : > { %v2496_v46 = vunpack.i.h.bf16 %v2494_v4  ;;  %v2495_v41 = vunpack.i.l.bf16 %v2494_v4  ;;  %v2501_v10 = vunpack.i.h.bf16 %v2499_v8  ;;  %v2500_v48 = vunpack.i.l.bf16 %v2499_v8  ;;  %v485_v8 = vld [vmem:[%s3196_s10 + $0x91] sm:$0xff] }
  0xc1   : > { %v3527_v37 = vsel %vm1693_vm2, %v3455_v9, %v2550_v57  ;;  %v3531_v3 = vsel %vm1693_vm2, %v3458_v47, %v2551_v7  ;;  %v2445_v62 = vunpack.i.l.bf16 %v3255_v13  ;;  %v2451_v4 = vunpack.i.h.bf16 %v3402_v2  ;;  %v484_v57 = vld [vmem:[%s3196_s10 + $0x81] sm:$0xff] }
  0xc2   : > { %4439 = vst [vmem:[#allocation8_spill] sm:$0xff] %v3527_v37  ;;  %v3537_v17 = vsel %vm1660_vm1, %v1638_v43, %v2495_v41  ;;  %v3540_v52 = vsel %vm1660_vm1, %v1639_v53, %v2496_v46  ;;  %v3544_v9 = vsel %vm1660_vm1, %v3338_v11, %v2500_v48  ;;  %v3548_v47 = vsel %vm1660_vm1, %v3342_v12, %v2501_v10  ;;  %v487_v43 = vld [vmem:[%s3196_s10 + $0xa9] sm:$0xff]  ;;  %v483_v11 = vld [vmem:[%s3196_s10 + $0x79] sm:$0xff] }
  0xc3   : > { %4440 = vst [vmem:[#allocation9_spill] sm:$0xff] %v3531_v3  ;;  %v1644_v53 = vsel %vm1627_vm0, %v3534_v23, %v2430_v63  ;;  %v2446_v12 = vunpack.i.h.bf16 %v3255_v13  ;;  %v2742_v29 = vpack.i.bf16 %v488_v58, %v487_v43  ;;  %v2732_v15 = vpack.i.bf16 %v484_v57, %v483_v11  ;;  %v336_v43 = vld [vmem:[%s3145_s30 + $0x110] sm:$0xff]  ;;  %v338_v11 = vld [vmem:[%s3145_s30 + $0x128] sm:$0xff]  ;;  %v494_v57 = vld [vmem:[%s3196_s10 + $0xf9] sm:$0xff] }
  0xc4   : > { %2728 = vrot.lane.b32.xlu2 %v2727_v22, %s3040_s16  ;;  %v486_v22 = vld [vmem:[%s3196_s10 + $0x99] sm:$0xff] }
  0xc5   : > { %2718 = vrot.lane.b32.xlu0 %v2717_v25, %s3040_s16  ;;  %2723 = vrot.lane.b32.xlu1 %v2722_v55, %s3040_s16  ;;  %v2450_v25 = vunpack.i.l.bf16 %v3402_v2 }
  0xc6   : > { %v2564_v7 = vpop.permute.xlu2 %2563 }
  0xc7   : > { %v2509_v63 = vpop.permute.xlu0 %2508  ;;  %v2566_v46 = vunpack.i.h.bf16 %v2564_v7  ;;  %v2565_v41 = vunpack.i.l.bf16 %v2564_v7  ;;  %v2514_v10 = vpop.permute.xlu1 %2513  ;;  %v2737_v7 = vpack.i.bf16 %v486_v22, %v485_v8  ;;  %v1651_v8 = vsel %vm1627_vm0, %v336_v43, %v2446_v12 }
  0xc8   : > { %v2511_v48 = vunpack.i.h.bf16 %v2509_v63  ;;  %v2510_v55 = vunpack.i.l.bf16 %v2509_v63  ;;  %v2516_v13 = vunpack.i.h.bf16 %v2514_v10  ;;  %v2515_v3 = vunpack.i.l.bf16 %v2514_v10 }
  0xc9   : > { %v3572_v37 = vsel %vm1693_vm2, %v3498_v39, %v2565_v41  ;;  %v3576_v2 = vsel %vm1693_vm2, %v3502_v27, %v2566_v46  ;;  %v337_v27 = vld [vmem:[%s3145_s30 + $0x120] sm:$0xff]  ;;  %v1653_v46 = vsel %vm1627_vm0, %v338_v11, %v2451_v4 }
  0xca   : > { %4441 = vst [vmem:[#allocation10_spill] sm:$0xff] %v3576_v2  ;;  %v3581_v58 = vsel %vm1660_vm1, %v1644_v53, %v2510_v55  ;;  %v3584_v63 = vsel %vm1660_vm1, %v1645_v61, %v2511_v48  ;;  %v3588_v10 = vsel %vm1660_vm1, %v3381_v50, %v2515_v3  ;;  %v3592_v39 = vsel %vm1660_vm1, %v3385_v51, %v2516_v13  ;;  %v493_v53 = vld [vmem:[%s3196_s10 + $0xf1] sm:$0xff]  ;;  %v489_v50 = vld [vmem:[%s3196_s10 + $0xc1] sm:$0xff]  ;;  %v491_v48 = vld [vmem:[%s3196_s10 + $0xd9] sm:$0xff] }
  0xcb   : > { %v1650_v61 = vsel %vm1627_vm0, %v335_v14, %v2445_v62  ;;  %v2461_v51 = vunpack.i.h.bf16 %v3279_v26  ;;  %v2460_v3 = vunpack.i.l.bf16 %v3279_v26  ;;  %v1652_v22 = vsel %vm1627_vm0, %v337_v27, %v2450_v25  ;;  %v492_v55 = vld [vmem:[%s3196_s10 + $0xe1] sm:$0xff] }
  0xcc   : > { %2743 = vrot.lane.b32.xlu2 %v2742_v29, %s3040_s16  ;;  %v490_v29 = vld [vmem:[%s3196_s10 + $0xc9] sm:$0xff]  ;;  %v2465_v14 = vunpack.i.l.bf16 %v3441_v54  ;;  %v2752_v2 = vpack.i.bf16 %v492_v55, %v491_v48 }
  0xcd   : > { %2733 = vrot.lane.b32.xlu0 %v2732_v15, %s3040_s16  ;;  %2738 = vrot.lane.b32.xlu1 %v2737_v7, %s3040_s16  ;;  %v2757_v7 = vpack.i.bf16 %v494_v57, %v493_v53 }
  0xce   : > { %v2579_v41 = vpop.permute.xlu2 %2578 }
  0xcf   : > { %v2524_v12 = vpop.permute.xlu0 %2523  ;;  %v2581_v62 = vunpack.i.h.bf16 %v2579_v41  ;;  %v2580_v15 = vunpack.i.l.bf16 %v2579_v41  ;;  %v2529_v13 = vpop.permute.xlu1 %2528  ;;  %v2747_v41 = vpack.i.bf16 %v490_v29, %v489_v50  ;;  %v3636_v50 = vld [vmem:[%s3145_s30 + $0x168] sm:$0xff] }
  0xd0   : > { %v2526_v43 = vunpack.i.h.bf16 %v2524_v12  ;;  %v2525_v26 = vunpack.i.l.bf16 %v2524_v12  ;;  %v2531_v25 = vunpack.i.h.bf16 %v2529_v13  ;;  %v2530_v4 = vunpack.i.l.bf16 %v2529_v13  ;;  %v500_v29 = vld [vmem:[%s3196_s10 + $0x141] sm:$0xff] }
  0xd1   : > { %v3614_v27 = vsel %vm1693_vm2, %v3544_v9, %v2580_v15  ;;  %v3618_v11 = vsel %vm1693_vm2, %v3548_v47, %v2581_v62  ;;  %v3629_v9 = vld [vmem:[%s3145_s30 + $0x150] sm:$0xff]  ;;  %v3632_v15 = vld [vmem:[%s3145_s30 + $0x158] sm:$0xff]  ;;  %v2466_v47 = vunpack.i.h.bf16 %v3441_v54  ;;  %v1658_v54 = vsel %vm1627_vm0, %v3636_v50, %v2465_v14 }
  0xd2   : > { %4442 = vst [vmem:[#allocation11_spill] sm:$0xff] %v3614_v27  ;;  %v3621_v53 = vsel %vm1660_vm1, %v1650_v61, %v2525_v26  ;;  %v3624_v57 = vsel %vm1660_vm1, %v1651_v8, %v2526_v43  ;;  %v1685_v12 = vsel %vm1660_vm1, %v1652_v22, %v2530_v4  ;;  %v1686_v13 = vsel %vm1660_vm1, %v1653_v46, %v2531_v25  ;;  %v3639_v61 = vld [vmem:[%s3145_s30 + $0x170] sm:$0xff]  ;;  %v499_v8 = vld [vmem:[%s3196_s10 + $0x139] sm:$0xff]  ;;  %v497_v43 = vld [vmem:[%s3196_s10 + $0x121] sm:$0xff] }
  0xd3   : > { %4443 = vst [vmem:[#allocation12_spill] sm:$0xff] %v3618_v11  ;;  %v495_v22 = vld [vmem:[%s3196_s10 + $0x109] sm:$0xff]  ;;  %v1656_v46 = vsel %vm1627_vm0, %v3629_v9, %v2460_v3  ;;  %v1657_v48 = vsel %vm1627_vm0, %v3632_v15, %v2461_v51  ;;  %v496_v62 = vld [vmem:[%s3196_s10 + $0x111] sm:$0xff]  ;;  %v1659_v26 = vsel %vm1627_vm0, %v3639_v61, %v2466_v47  ;;  %v2772_v11 = vpack.i.bf16 %v500_v29, %v499_v8 }
  0xd4   : > { %4444 = vst [vmem:[#allocation13_spill] sm:$0xff] %v3632_v15  ;;  %2758 = vrot.lane.b32.xlu2 %v2757_v7, %s3040_s16  ;;  %v498_v7 = vld [vmem:[%s3196_s10 + $0x129] sm:$0xff] }
  0xd5   : > { %4445 = vst [vmem:[#allocation14_spill] sm:$0xff] %v3639_v61  ;;  %2748 = vrot.lane.b32.xlu0 %v2747_v41, %s3040_s16  ;;  %2753 = vrot.lane.b32.xlu1 %v2752_v2, %s3040_s16  ;;  %v2762_v61 = vpack.i.bf16 %v496_v62, %v495_v22  ;;  %v502_v22 = vld [vmem:[%s3196_s10 + $0x159] sm:$0xff]  ;;  %v503_v62 = vld [vmem:[%s3196_s10 + $0x169] sm:$0xff] }
  0xd6   : > { %v2594_v55 = vpop.permute.xlu2 %2593 }
  0xd7   : > { %v2539_v25 = vpop.permute.xlu0 %2538  ;;  %v2596_v4 = vunpack.i.h.bf16 %v2594_v55  ;;  %v2595_v2 = vunpack.i.l.bf16 %v2594_v55  ;;  %v2544_v41 = vpop.permute.xlu1 %2543  ;;  %v2767_v55 = vpack.i.bf16 %v498_v7, %v497_v43  ;;  %v504_v43 = vld [vmem:[%s3196_s10 + $0x171] sm:$0xff] }
  0xd8   : > { %v2541_v3 = vunpack.i.h.bf16 %v2539_v25  ;;  %v2540_v27 = vunpack.i.l.bf16 %v2539_v25  ;;  %v2546_v51 = vunpack.i.h.bf16 %v2544_v41  ;;  %v2545_v15 = vunpack.i.l.bf16 %v2544_v41 }
  0xd9   : > { %v3660_v14 = vsel %vm1693_vm2, %v3588_v10, %v2595_v2  ;;  %v3664_v47 = vsel %vm1693_vm2, %v3592_v39, %v2596_v4  ;;  %v501_v10 = vld [vmem:[%s3196_s10 + $0x151] sm:$0xff] }
  0xda   : > { %v3667_v8 = vsel %vm1660_vm1, %v1656_v46, %v2540_v27  ;;  %v3670_v29 = vsel %vm1660_vm1, %v1657_v48, %v2541_v3  ;;  %v1691_v25 = vsel %vm1660_vm1, %v1658_v54, %v2545_v15  ;;  %v1692_v41 = vsel %vm1660_vm1, %v1659_v26, %v2546_v51 }
  0xdb   : > { %v2787_v15 = vpack.i.bf16 %v3291_v34, %v3288_v33  ;;  %v2777_v3 = vpack.i.bf16 %v502_v22, %v501_v10  ;;  %v2782_v51 = vpack.i.bf16 %v504_v43, %v503_v62 }
  0xdc   : > { %2773 = vrot.lane.b32.xlu2 %v2772_v11, %s3040_s16 }
  0xdd   : > { %2763 = vrot.lane.b32.xlu0 %v2762_v61, %s3040_s16  ;;  %2768 = vrot.lane.b32.xlu1 %v2767_v55, %s3040_s16 }
  0xde   : > { %v2609_v39 = vpop.permute.xlu2 %2608 }
  0xdf   : > { %v2554_v27 = vpop.permute.xlu0 %2553  ;;  %v2611_v46 = vunpack.i.h.bf16 %v2609_v39  ;;  %v2610_v7 = vunpack.i.l.bf16 %v2609_v39  ;;  %v2559_v48 = vpop.permute.xlu1 %2558 }
  0xe0   : > { %v2556_v54 = vunpack.i.h.bf16 %v2554_v27  ;;  %v2555_v26 = vunpack.i.l.bf16 %v2554_v27  ;;  %v2561_v4 = vunpack.i.h.bf16 %v2559_v48  ;;  %v2560_v11 = vunpack.i.l.bf16 %v2559_v48 }
  0xe1   : > { %v3684_v61 = vsel %vm1693_vm2, %v1685_v12, %v2610_v7  ;;  %v3687_v2 = vsel %vm1693_vm2, %v1686_v13, %v2611_v46  ;;  %v2792_v7 = vpack.i.bf16 %v3465_v36, %v3462_v30  ;;  %v2797_v48 = vpack.i.bf16 %v3285_v31, %v3276_v24 }
  0xe2   : > { %v3691_v55 = vsel %vm1693_vm2, %v3327_v5, %v2555_v26  ;;  %v3695_v39 = vsel %vm1693_vm2, %v3330_v6, %v2556_v54  ;;  %v1698_v33 = vsel %vm1693_vm2, %v3491_v40, %v2560_v11  ;;  %v1699_v34 = vsel %vm1693_vm2, %v3494_v38, %v2561_v4 }
  0xe3   : > { %v2802_v6 = vpack.i.bf16 %v3350_v19, %v3347_v16  ;;  %v2807_v11 = vpack.i.bf16 %v3508_v18, %v3505_v28 }
  0xe4   : > { %2788 = vrot.lane.b32.xlu2 %v2787_v15, %s3041_s17 }
  0xe5   : > { %2778 = vrot.lane.b32.xlu0 %v2777_v3, %s3040_s16  ;;  %2783 = vrot.lane.b32.xlu1 %v2782_v51, %s3040_s16  ;;  %v2812_v3 = vpack.i.bf16 %v3324_v60, %v3321_v59 }
  0xe6   : > { %v2624_v12 = vpop.permute.xlu2 %2623 }
  0xe7   : > { %v2569_v5 = vpop.permute.xlu0 %2568  ;;  %v2626_v13 = vunpack.i.h.bf16 %v2624_v12  ;;  %v2625_v10 = vunpack.i.l.bf16 %v2624_v12  ;;  %v2574_v22 = vpop.permute.xlu1 %2573 }
  0xe8   : > { %v2571_v62 = vunpack.i.h.bf16 %v2569_v5  ;;  %v2570_v40 = vunpack.i.l.bf16 %v2569_v5  ;;  %v2576_v43 = vunpack.i.h.bf16 %v2574_v22  ;;  %v2575_v27 = vunpack.i.l.bf16 %v2574_v22 }
  0xe9   : > { %v3707_v38 = vsel %vm1693_vm2, %v1691_v25, %v2625_v10  ;;  %v3710_v46 = vsel %vm1693_vm2, %v1692_v41, %v2626_v13  ;;  %v2822_v10 = vpack.i.bf16 %v3551_v42, %v3534_v23  ;;  %v2318_v23 = vld [vmem:[%s3145_s30 + $0xd9] sm:$0xff]  ;;  %v2319_v42 = vld [vmem:[%s3145_s30 + $0xe1] sm:$0xff] }
  0xea   : > { %v3718_v15 = vsel %vm1693_vm2, %v3374_v44, %v2570_v40  ;;  %v3722_v16 = vsel %vm1693_vm2, %v3377_v45, %v2571_v62  ;;  %v1704_v19 = vsel %vm1693_vm2, %v3537_v17, %v2575_v27  ;;  %v1705_v25 = vsel %vm1693_vm2, %v3540_v52, %v2576_v43  ;;  %v2287_v27 = vld [vmem:[%s3097_s26 + $0xe0] sm:$0xff] }
  0xeb   : > { %v2817_v45 = vpack.i.bf16 %v3318_v56, %v3311_v49 }
  0xec   : > { %2803 = vrot.lane.b32.xlu2 %v2802_v6, %s3041_s17  ;;  %v4447_v6 = vld [vmem:[#allocation5_spill] sm:$0xff] }
  0xed   : > { %2793 = vrot.lane.b32.xlu0 %v2792_v7, %s3041_s17  ;;  %2798 = vrot.lane.b32.xlu1 %v2797_v48, %s3041_s17  ;;  %v2294_v7 = vld [vmem:[%s3097_s26 + $0x138] sm:$0xff]  ;;  %v2295_v48 = vld [vmem:[%s3097_s26 + $0x140] sm:$0xff] }
  0xee   : > { %v2639_v24 = vpop.permute.xlu2 %2638 }
  0xef   : > { %v2584_v31 = vpop.permute.xlu0 %2583  ;;  %v2641_v44 = vunpack.i.h.bf16 %v2639_v24  ;;  %v2640_v30 = vunpack.i.l.bf16 %v2639_v24  ;;  %v2589_v36 = vpop.permute.xlu1 %2588 }
  0xf0   : > { %v2586_v41 = vunpack.i.h.bf16 %v2584_v31  ;;  %v2585_v17 = vunpack.i.l.bf16 %v2584_v31  ;;  %v2591_v54 = vunpack.i.h.bf16 %v2589_v36  ;;  %v2590_v26 = vunpack.i.l.bf16 %v2589_v36 }
  0xf1   : > { %v3734_v52 = vsel %vm1726_vm3, %v1698_v33, %v2640_v30  ;;  %v3737_v4 = vsel %vm1726_vm3, %v1699_v34, %v2641_v44  ;;  %v2847_v31 = vpack.i.bf16 %v2319_v42, %v2318_v23 }
  0xf2   : > { %v3745_v51 = vsel %vm1693_vm2, %v3405_v20, %v2585_v17  ;;  %v3749_v49 = vsel %vm1693_vm2, %v3408_v21, %v2586_v41  ;;  %v1710_v56 = vsel %vm1693_vm2, %v3581_v58, %v2590_v26  ;;  %v1711_v33 = vsel %vm1693_vm2, %v3584_v63, %v2591_v54  ;;  %v4448_v26 = vld [vmem:[#allocation6_spill] sm:$0xff] }
  0xf3   : > { %v2832_v21 = vpack.i.bf16 %v3400_v1, %v3397_v0  ;;  %v2827_v0 = vpack.i.bf16 %v3369_v35, %v3366_v32  ;;  %v4446_v1 = vld [vmem:[#allocation4_spill] sm:$0xff]  ;;  %v2286_v32 = vld [vmem:[%s3097_s26 + $0xd8] sm:$0xff]  ;;  %v2842_v54 = vpack.i.bf16 %v2295_v48, %v2294_v7 }
  0xf4   : > { %2818 = vrot.lane.b32.xlu2 %v2817_v45, %s3041_s17  ;;  %v2837_v17 = vpack.i.bf16 %v2287_v27, %v2286_v32  ;;  %v4450_v7 = vld [vmem:[#allocation8_spill] sm:$0xff] }
  0xf5   : > { %2808 = vrot.lane.b32.xlu0 %v2807_v11, %s3041_s17  ;;  %2813 = vrot.lane.b32.xlu1 %v2812_v3, %s3041_s17  ;;  %v4449_v3 = vld [vmem:[#allocation7_spill] sm:$0xff] }
  0xf6   : > { %v2654_v59 = vpop.permute.xlu2 %2653 }
  0xf7   : > { %v2599_v60 = vpop.permute.xlu0 %2598  ;;  %v2656_v20 = vunpack.i.h.bf16 %v2654_v59  ;;  %v2655_v28 = vunpack.i.l.bf16 %v2654_v59  ;;  %v2604_v18 = vpop.permute.xlu1 %2603 }
  0xf8   : > { %v2601_v58 = vunpack.i.h.bf16 %v2599_v60  ;;  %v2600_v34 = vunpack.i.l.bf16 %v2599_v60  ;;  %v2606_v63 = vunpack.i.h.bf16 %v2604_v18  ;;  %v2605_v12 = vunpack.i.l.bf16 %v2604_v18  ;;  %v2278_v60 = vld [vmem:[%s3097_s26 + $0x78] sm:$0xff] }
  0xf9   : > { %v3761_v5 = vsel %vm1726_vm3, %v1704_v19, %v2655_v28  ;;  %v3764_v13 = vsel %vm1726_vm3, %v1705_v25, %v2656_v20  ;;  %v2279_v20 = vld [vmem:[%s3097_s26 + $0x80] sm:$0xff] }
  0xfa   : > { %v3772_v22 = vsel %vm1693_vm2, %v4446_v1, %v2600_v34  ;;  %v3776_v62 = vsel %vm1693_vm2, %v4447_v6, %v2601_v58  ;;  %v1716_v40 = vsel %vm1693_vm2, %v3621_v53, %v2605_v12  ;;  %v1717_v43 = vsel %vm1693_vm2, %v3624_v57, %v2606_v63  ;;  %v2326_v28 = vld [vmem:[%s3145_s30 + $0x139] sm:$0xff] }
  0xfb   : > { %v2270_v58 = vld [vmem:[%s3097_s26 + $0x18] sm:$0xff]  ;;  %v2271_v34 = vld [vmem:[%s3097_s26 + $0x20] sm:$0xff] }
  0xfc   : > { %2833 = vrot.lane.b32.xlu2 %v2832_v21, %s3041_s17  ;;  %v2327_v21 = vld [vmem:[%s3145_s30 + $0x141] sm:$0xff]  ;;  %v2857_v27 = vpack.i.bf16 %v2271_v34, %v2270_v58 }
  0xfd   : > { %2823 = vrot.lane.b32.xlu0 %v2822_v10, %s3041_s17  ;;  %2828 = vrot.lane.b32.xlu1 %v2827_v0, %s3041_s17 }
  0xfe   : > { %v2669_v35 = vpop.permute.xlu2 %2668 }
  0xff   : > { %v2614_v19 = vpop.permute.xlu0 %2613  ;;  %v2671_v25 = vunpack.i.h.bf16 %v2669_v35  ;;  %v2670_v24 = vunpack.i.l.bf16 %v2669_v35  ;;  %v2619_v53 = vpop.permute.xlu1 %2618  ;;  %v2852_v35 = vpack.i.bf16 %v2327_v21, %v2326_v28 }
 0x100   : > { %v2616_v57 = vunpack.i.h.bf16 %v2614_v19  ;;  %v2615_v44 = vunpack.i.l.bf16 %v2614_v19  ;;  %v2621_v30 = vunpack.i.h.bf16 %v2619_v53  ;;  %v2620_v36 = vunpack.i.l.bf16 %v2619_v53  ;;  %v4451_v19 = vld [vmem:[#allocation9_spill] sm:$0xff] }
 0x101   : > { %v3792_v45 = vsel %vm1726_vm3, %v1710_v56, %v2670_v24  ;;  %v3795_v41 = vsel %vm1726_vm3, %v1711_v33, %v2671_v25 }
 0x102   : > { %v3799_v11 = vsel %vm1693_vm2, %v4448_v26, %v2615_v44  ;;  %v3803_v59 = vsel %vm1693_vm2, %v4449_v3, %v2616_v57  ;;  %v1722_v56 = vsel %vm1693_vm2, %v3667_v8, %v2620_v36  ;;  %v1723_v33 = vsel %vm1693_vm2, %v3670_v29, %v2621_v30  ;;  %v2310_v57 = vld [vmem:[%s3145_s30 + $0x79] sm:$0xff]  ;;  %v2311_v44 = vld [vmem:[%s3145_s30 + $0x81] sm:$0xff] }
 0x103   : > { %v2862_v29 = vpack.i.bf16 %v2279_v20, %v2278_v60  ;;  %v4453_v26 = vld [vmem:[#allocation3_spill] sm:$0xff]  ;;  %v2872_v34 = vpack.i.bf16 %v2311_v44, %v2310_v57  ;;  %v4455_v57 = vld [vmem:[#allocation13_spill] sm:$0xff] }
 0x104   : > { %2848 = vrot.lane.b32.xlu2 %v2847_v31, %s3042_s18  ;;  %v2303_v31 = vld [vmem:[%s3145_s30 + $0x21] sm:$0xff]  ;;  %v2882_v44 = vpack.i.bf16 %v4455_v57, %v3629_v9  ;;  %v2320_v9 = vld [vmem:[%s3145_s30 + $0xf1] sm:$0xff] }
 0x105   : > { %2838 = vrot.lane.b32.xlu0 %v2837_v17, %s3043_s19  ;;  %2843 = vrot.lane.b32.xlu1 %v2842_v54, %s3043_s19  ;;  %v2304_v57 = vld [vmem:[%s3145_s30 + $0x31] sm:$0xff] }
 0x106   : > { %v2684_v18 = vpop.permute.xlu2 %2683 }
 0x107   : > { %v2629_v63 = vpop.permute.xlu0 %2628  ;;  %v2686_v8 = vunpack.i.h.bf16 %v2684_v18  ;;  %v2685_v12 = vunpack.i.l.bf16 %v2684_v18  ;;  %v2634_v10 = vpop.permute.xlu1 %2633 }
 0x108   : > { %v2631_v0 = vunpack.i.h.bf16 %v2629_v63  ;;  %v2630_v1 = vunpack.i.l.bf16 %v2629_v63  ;;  %v2636_v6 = vunpack.i.h.bf16 %v2634_v10  ;;  %v2635_v23 = vunpack.i.l.bf16 %v2634_v10 }
 0x109   : > { %v3819_v42 = vsel %vm1726_vm3, %v1716_v40, %v2685_v12  ;;  %v3822_v32 = vsel %vm1726_vm3, %v1717_v43, %v2686_v8  ;;  %v2302_v43 = vld [vmem:[%s3145_s30 + $0x19] sm:$0xff] }
 0x10a   : > { %v3826_v48 = vsel %vm1726_vm3, %v4450_v7, %v2630_v1  ;;  %v3830_v25 = vsel %vm1726_vm3, %v4451_v19, %v2631_v0  ;;  %v1729_v24 = vsel %vm1726_vm3, %v3691_v55, %v2635_v23  ;;  %v1730_v40 = vsel %vm1726_vm3, %v3695_v39, %v2636_v6  ;;  %v4452_v55 = vld [vmem:[#allocation2_spill] sm:$0xff]  ;;  %v2288_v0 = vld [vmem:[%s3097_s26 + $0xf0] sm:$0xff]  ;;  %v2289_v1 = vld [vmem:[%s3097_s26 + $0xf8] sm:$0xff] }
 0x10b   : > { %v2877_v39 = vpack.i.bf16 %v4453_v26, %v4452_v55  ;;  %v2867_v58 = vpack.i.bf16 %v2303_v31, %v2302_v43  ;;  %v4454_v8 = vld [vmem:[#allocation10_spill] sm:$0xff]  ;;  %v2272_v26 = vld [vmem:[%s3097_s26 + $0x30] sm:$0xff] }
 0x10c   : > { %2863 = vrot.lane.b32.xlu2 %v2862_v29, %s3043_s19  ;;  %v2297_v29 = vld [vmem:[%s3097_s26 + $0x158] sm:$0xff] }
 0x10d   : > { %2853 = vrot.lane.b32.xlu0 %v2852_v35, %s3042_s18  ;;  %2858 = vrot.lane.b32.xlu1 %v2857_v27, %s3043_s19 }
 0x10e   : > { %v2699_v53 = vpop.permute.xlu2 %2698 }
 0x10f   : > { %v2644_v30 = vpop.permute.xlu0 %2643  ;;  %v2701_v36 = vunpack.i.h.bf16 %v2699_v53  ;;  %v2700_v17 = vunpack.i.l.bf16 %v2699_v53  ;;  %v2649_v54 = vpop.permute.xlu1 %2648 }
 0x110   : > { %v2646_v3 = vunpack.i.h.bf16 %v2644_v30  ;;  %v2645_v60 = vunpack.i.l.bf16 %v2644_v30  ;;  %v2651_v20 = vunpack.i.h.bf16 %v2649_v54  ;;  %v2650_v28 = vunpack.i.l.bf16 %v2649_v54  ;;  %v4457_v54 = vld [vmem:[#allocation12_spill] sm:$0xff] }
 0x111   : > { %v3846_v18 = vsel %vm1726_vm3, %v1722_v56, %v2700_v17  ;;  %v3849_v21 = vsel %vm1726_vm3, %v1723_v33, %v2701_v36  ;;  %v2296_v33 = vld [vmem:[%s3097_s26 + $0x150] sm:$0xff]  ;;  %v2887_v30 = vpack.i.bf16 %v2289_v1, %v2288_v0  ;;  %v4456_v36 = vld [vmem:[#allocation11_spill] sm:$0xff] }
 0x112   : > { %v3853_v63 = vsel %vm1726_vm3, %v3572_v37, %v2645_v60  ;;  %v3857_v12 = vsel %vm1726_vm3, %v4454_v8, %v2646_v3  ;;  %v1735_v10 = vsel %vm1726_vm3, %v3718_v15, %v2650_v28  ;;  %v1736_v56 = vsel %vm1726_vm3, %v3722_v16, %v2651_v20  ;;  %v2321_v60 = vld [vmem:[%s3145_s30 + $0xf9] sm:$0xff]  ;;  %v2328_v20 = vld [vmem:[%s3145_s30 + $0x151] sm:$0xff] }
 0x113   : > { %v2892_v27 = vpack.i.bf16 %v2297_v29, %v2296_v33  ;;  %v2329_v28 = vld [vmem:[%s3145_s30 + $0x159] sm:$0xff] }
 0x114   : > { %2878 = vrot.lane.b32.xlu2 %v2877_v39, %s3041_s17  ;;  %v2273_v39 = vld [vmem:[%s3097_s26 + $0x38] sm:$0xff] }
 0x115   : > { %2868 = vrot.lane.b32.xlu0 %v2867_v58, %s3042_s18  ;;  %2873 = vrot.lane.b32.xlu1 %v2872_v34, %s3042_s18 }
 0x116   : > { %v2714_v37 = vpop.permute.xlu2 %2713 }
 0x117   : > { %v2659_v6 = vpop.permute.xlu0 %2658  ;;  %v2716_v23 = vunpack.i.h.bf16 %v2714_v37  ;;  %v2715_v35 = vunpack.i.l.bf16 %v2714_v37  ;;  %v2664_v15 = vpop.permute.xlu1 %2663 }
 0x118   : > { %v2661_v16 = vunpack.i.h.bf16 %v2659_v6  ;;  %v2660_v7 = vunpack.i.l.bf16 %v2659_v6  ;;  %v2666_v19 = vunpack.i.h.bf16 %v2664_v15  ;;  %v2665_v43 = vunpack.i.l.bf16 %v2664_v15 }
 0x119   : > { %v3871_v53 = vsel %vm1759_vm4, %v1729_v24, %v2715_v35  ;;  %v3874_v31 = vsel %vm1759_vm4, %v1730_v40, %v2716_v23  ;;  %v2897_v23 = vpack.i.bf16 %v2321_v60, %v2320_v9  ;;  %v2902_v35 = vpack.i.bf16 %v2329_v28, %v2328_v20 }
 0x11a   : > { %v3880_v17 = vsel %vm1726_vm3, %v4456_v36, %v2660_v7  ;;  %v3884_v55 = vsel %vm1726_vm3, %v4457_v54, %v2661_v16  ;;  %v1741_v24 = vsel %vm1726_vm3, %v3745_v51, %v2665_v43  ;;  %v1742_v40 = vsel %vm1726_vm3, %v3749_v49, %v2666_v19  ;;  %v2313_v7 = vld [vmem:[%s3145_s30 + $0x99] sm:$0xff] }
 0x11b   : > { %v2907_v49 = vpack.i.bf16 %v2273_v39, %v2272_v26  ;;  %v2281_v43 = vld [vmem:[%s3097_s26 + $0x98] sm:$0xff] }
 0x11c   : > { %2893 = vrot.lane.b32.xlu2 %v2892_v27, %s3043_s19 }
 0x11d   : > { %2883 = vrot.lane.b32.xlu0 %v2882_v44, %s3041_s17  ;;  %2888 = vrot.lane.b32.xlu1 %v2887_v30, %s3043_s19 }
 0x11e   : > { %v2729_v3 = vpop.permute.xlu2 %2728 }
 0x11f   : > { %v2674_v58 = vpop.permute.xlu0 %2673  ;;  %v2731_v34 = vunpack.i.h.bf16 %v2729_v3  ;;  %v2730_v8 = vunpack.i.l.bf16 %v2729_v3  ;;  %v2679_v51 = vpop.permute.xlu1 %2678 }
 0x120   : > { %v2676_v33 = vunpack.i.h.bf16 %v2674_v58  ;;  %v2675_v29 = vunpack.i.l.bf16 %v2674_v58  ;;  %v2681_v37 = vunpack.i.h.bf16 %v2679_v51  ;;  %v2680_v0 = vunpack.i.l.bf16 %v2679_v51  ;;  %v2291_v51 = vld [vmem:[%s3097_s26 + $0x110] sm:$0xff] }
 0x121   : > { %v3900_v1 = vsel %vm1759_vm4, %v1735_v10, %v2730_v8  ;;  %v3903_v6 = vsel %vm1759_vm4, %v1736_v56, %v2731_v34  ;;  %v2312_v56 = vld [vmem:[%s3145_s30 + $0x91] sm:$0xff] }
 0x122   : > { %v3907_v15 = vsel %vm1726_vm3, %v3660_v14, %v2675_v29  ;;  %v3911_v27 = vsel %vm1726_vm3, %v3664_v47, %v2676_v33  ;;  %v1747_v16 = vsel %vm1726_vm3, %v3772_v22, %v2680_v0  ;;  %v1748_v10 = vsel %vm1726_vm3, %v3776_v62, %v2681_v37  ;;  %v2280_v14 = vld [vmem:[%s3097_s26 + $0x90] sm:$0xff]  ;;  %v2305_v47 = vld [vmem:[%s3145_s30 + $0x39] sm:$0xff] }
 0x123   : > { %v2922_v62 = vpack.i.bf16 %v2313_v7, %v2312_v56  ;;  %v2912_v20 = vpack.i.bf16 %v2281_v43, %v2280_v14  ;;  %v2917_v28 = vpack.i.bf16 %v2305_v47, %v2304_v57  ;;  %v2259_v33 = vld [vmem:[%s3145_s30 + $0x110] sm:$0xff]  ;;  %v4458_v43 = vld [vmem:[#allocation14_spill] sm:$0xff] }
 0x124   : > { %2908 = vrot.lane.b32.xlu2 %v2907_v49, %s3043_s19  ;;  %v2258_v49 = vld [vmem:[%s3145_s30 + $0x108] sm:$0xff]  ;;  %v2932_v57 = vpack.i.bf16 %v4458_v43, %v3636_v50  ;;  %v2331_v50 = vld [vmem:[%s3145_s30 + $0x171] sm:$0xff] }
 0x125   : > { %2898 = vrot.lane.b32.xlu0 %v2897_v23, %s3042_s18  ;;  %2903 = vrot.lane.b32.xlu1 %v2902_v35, %s3042_s18 }
 0x126   : > { %v2744_v19 = vpop.permute.xlu2 %2743 }
 0x127   : > { %v2689_v44 = vpop.permute.xlu0 %2688  ;;  %v2746_v30 = vunpack.i.h.bf16 %v2744_v19  ;;  %v2745_v36 = vunpack.i.l.bf16 %v2744_v19  ;;  %v2694_v22 = vpop.permute.xlu1 %2693  ;;  %v2927_v19 = vpack.i.bf16 %v2259_v33, %v2258_v49 }
 0x128   : > { %v2691_v54 = vunpack.i.h.bf16 %v2689_v44  ;;  %v2690_v26 = vunpack.i.l.bf16 %v2689_v44  ;;  %v2696_v39 = vunpack.i.h.bf16 %v2694_v22  ;;  %v2695_v9 = vunpack.i.l.bf16 %v2694_v22  ;;  %v2322_v22 = vld [vmem:[%s3145_s30 + $0x109] sm:$0xff] }
 0x129   : > { %v3927_v3 = vsel %vm1759_vm4, %v1741_v24, %v2745_v36  ;;  %v3930_v60 = vsel %vm1759_vm4, %v1742_v40, %v2746_v30  ;;  %v2290_v40 = vld [vmem:[%s3097_s26 + $0x108] sm:$0xff] }
 0x12a   : > { %v3934_v58 = vsel %vm1726_vm3, %v3684_v61, %v2690_v26  ;;  %v3938_v34 = vsel %vm1726_vm3, %v3687_v2, %v2691_v54  ;;  %v1753_v8 = vsel %vm1726_vm3, %v3799_v11, %v2695_v9  ;;  %v1754_v24 = vsel %vm1726_vm3, %v3803_v59, %v2696_v39  ;;  %v2330_v30 = vld [vmem:[%s3145_s30 + $0x169] sm:$0xff] }
 0x12b   : > { %v2937_v11 = vpack.i.bf16 %v2291_v51, %v2290_v40 }
 0x12c   : > { %2923 = vrot.lane.b32.xlu2 %v2922_v62, %s3042_s18  ;;  %v2323_v62 = vld [vmem:[%s3145_s30 + $0x111] sm:$0xff] }
 0x12d   : > { %2913 = vrot.lane.b32.xlu0 %v2912_v20, %s3043_s19  ;;  %2918 = vrot.lane.b32.xlu1 %v2917_v28, %s3042_s18  ;;  %v2947_v33 = vpack.i.bf16 %v2323_v62, %v2322_v22  ;;  %v2314_v62 = vld [vmem:[%s3145_s30 + $0xa9] sm:$0xff] }
 0x12e   : > { %v2759_v61 = vpop.permute.xlu2 %2758 }
 0x12f   : > { %v2704_v29 = vpop.permute.xlu0 %2703  ;;  %v2761_v2 = vunpack.i.h.bf16 %v2759_v61  ;;  %v2760_v37 = vunpack.i.l.bf16 %v2759_v61  ;;  %v2709_v0 = vpop.permute.xlu1 %2708 }
 0x130   : > { %v2706_v23 = vunpack.i.h.bf16 %v2704_v29  ;;  %v2705_v59 = vunpack.i.l.bf16 %v2704_v29  ;;  %v2711_v35 = vunpack.i.h.bf16 %v2709_v0  ;;  %v2710_v56 = vunpack.i.l.bf16 %v2709_v0  ;;  %v2307_v0 = vld [vmem:[%s3145_s30 + $0x51] sm:$0xff] }
 0x131   : > { %v3952_v7 = vsel %vm1759_vm4, %v1747_v16, %v2760_v37  ;;  %v3955_v14 = vsel %vm1759_vm4, %v1748_v10, %v2761_v2 }
 0x132   : > { %v3961_v47 = vsel %vm1726_vm3, %v3707_v38, %v2705_v59  ;;  %v3965_v44 = vsel %vm1726_vm3, %v3710_v46, %v2706_v23  ;;  %v3969_v16 = vsel %vm1759_vm4, %v3826_v48, %v2710_v56  ;;  %v3973_v10 = vsel %vm1759_vm4, %v3830_v25, %v2711_v35  ;;  %v2298_v38 = vld [vmem:[%s3097_s26 + $0x168] sm:$0xff]  ;;  %v2299_v46 = vld [vmem:[%s3097_s26 + $0x170] sm:$0xff] }
 0x133   : > { %v2952_v25 = vpack.i.bf16 %v2331_v50, %v2330_v30  ;;  %v2942_v49 = vpack.i.bf16 %v2299_v46, %v2298_v38  ;;  %v2275_v23 = vld [vmem:[%s3097_s26 + $0x50] sm:$0xff] }
 0x134   : > { %2938 = vrot.lane.b32.xlu2 %v2937_v11, %s3043_s19  ;;  %v2283_v59 = vld [vmem:[%s3097_s26 + $0xb0] sm:$0xff] }
 0x135   : > { %2928 = vrot.lane.b32.xlu0 %v2927_v19, %s3041_s17  ;;  %2933 = vrot.lane.b32.xlu1 %v2932_v57, %s3041_s17 }
 0x136   : > { %v2774_v36 = vpop.permute.xlu2 %2773 }
 0x137   : > { %v2719_v54 = vpop.permute.xlu0 %2718  ;;  %v2776_v48 = vunpack.i.h.bf16 %v2774_v36  ;;  %v2775_v26 = vunpack.i.l.bf16 %v2774_v36  ;;  %v2724_v39 = vpop.permute.xlu1 %2723 }
 0x138   : > { %v2721_v9 = vunpack.i.h.bf16 %v2719_v54  ;;  %v2720_v20 = vunpack.i.l.bf16 %v2719_v54  ;;  %v2726_v28 = vunpack.i.h.bf16 %v2724_v39  ;;  %v2725_v40 = vunpack.i.l.bf16 %v2724_v39  ;;  %v2268_v54 = vld [vmem:[%s3145_s30 + $0x180] sm:$0xff] }
 0x139   : > { %v3985_v51 = vsel %vm1759_vm4, %v1753_v8, %v2775_v26  ;;  %v3988_v61 = vsel %vm1759_vm4, %v1754_v24, %v2776_v48  ;;  %v2306_v24 = vld [vmem:[%s3145_s30 + $0x49] sm:$0xff]  ;;  %v2315_v26 = vld [vmem:[%s3145_s30 + $0xb1] sm:$0xff]  ;;  %v2260_v39 = vld [vmem:[%s3145_s30 + $0x120] sm:$0xff] }
 0x13a   : > { %v3992_v29 = vsel %vm1759_vm4, %v3734_v52, %v2720_v20  ;;  %v3996_v2 = vsel %vm1759_vm4, %v3737_v4, %v2721_v9  ;;  %v1766_v37 = vsel %vm1759_vm4, %v3853_v63, %v2725_v40  ;;  %v1767_v8 = vsel %vm1759_vm4, %v3857_v12, %v2726_v28  ;;  %v2274_v52 = vld [vmem:[%s3097_s26 + $0x48] sm:$0xff] }
 0x13b   : > { %v2282_v4 = vld [vmem:[%s3097_s26 + $0xa8] sm:$0xff]  ;;  %v2967_v56 = vpack.i.bf16 %v2307_v0, %v2306_v24  ;;  %v2957_v30 = vpack.i.bf16 %v2275_v23, %v2274_v52  ;;  %v2972_v24 = vpack.i.bf16 %v2315_v26, %v2314_v62 }
 0x13c   : > { %2953 = vrot.lane.b32.xlu2 %v2952_v25, %s3042_s18  ;;  %v2962_v50 = vpack.i.bf16 %v2283_v59, %v2282_v4  ;;  %v2292_v4 = vld [vmem:[%s3097_s26 + $0x120] sm:$0xff] }
 0x13d   : > { %2943 = vrot.lane.b32.xlu0 %v2942_v49, %s3043_s19  ;;  %2948 = vrot.lane.b32.xlu1 %v2947_v33, %s3042_s18 }
 0x13e   : > { %v4008_v11 = vpop.permute.xlu2 %2788 }
 0x13f   : > { %v2734_v35 = vpop.permute.xlu0 %2733  ;;  %v2739_v63 = vpop.permute.xlu1 %2738 }
 0x140   : > { %v2736_v12 = vunpack.i.h.bf16 %v2734_v35  ;;  %v2735_v19 = vunpack.i.l.bf16 %v2734_v35  ;;  %v2741_v43 = vunpack.i.h.bf16 %v2739_v63  ;;  %v2740_v57 = vunpack.i.l.bf16 %v2739_v63  ;;  %v2293_v35 = vld [vmem:[%s3097_s26 + $0x128] sm:$0xff]  ;;  %v2300_v63 = vld [vmem:[%s3097_s26 + $0x180] sm:$0xff] }
 0x142   : > { %v4015_v38 = vsel %vm1759_vm4, %v3761_v5, %v2735_v19  ;;  %v4019_v36 = vsel %vm1759_vm4, %v3764_v13, %v2736_v12  ;;  %v1772_v46 = vsel %vm1759_vm4, %v3880_v17, %v2740_v57  ;;  %v1773_v22 = vsel %vm1759_vm4, %v3884_v55, %v2741_v43  ;;  %v2269_v5 = vld [vmem:[%s3145_s30 + $0x188] sm:$0xff] }
 0x143   : > { %v2261_v13 = vld [vmem:[%s3145_s30 + $0x128] sm:$0xff]  ;;  %v2982_v40 = vpack.i.bf16 %v2269_v5, %v2268_v54  ;;  %v2987_v54 = vpack.i.bf16 %v2293_v35, %v2292_v4 }
 0x144   : > { %2968 = vrot.lane.b32.xlu2 %v2967_v56, %s3042_s18  ;;  %v2977_v0 = vpack.i.bf16 %v2261_v13, %v2260_v39  ;;  %v2301_v56 = vld [vmem:[%s3097_s26 + $0x188] sm:$0xff] }
 0x145   : > { %2958 = vrot.lane.b32.xlu0 %v2957_v30, %s3043_s19  ;;  %2963 = vrot.lane.b32.xlu1 %v2962_v50, %s3043_s19  ;;  %v2992_v5 = vpack.i.bf16 %v2301_v56, %v2300_v63  ;;  %v2285_v13 = vld [vmem:[%s3097_s26 + $0xc8] sm:$0xff] }
 0x146   : > { %v2804_v48 = vpop.permute.xlu2 %2803 }
 0x147   : > { %v4034_v25 = vpop.permute.xlu0 %2748  ;;  %v2806_v17 = vunpack.i.h.bf16 %v2804_v48  ;;  %v2805_v9 = vunpack.i.l.bf16 %v2804_v48  ;;  %v2754_v55 = vpop.permute.xlu1 %2753 }
 0x148   : > { %v2756_v20 = vunpack.i.h.bf16 %v2754_v55  ;;  %v2755_v28 = vunpack.i.l.bf16 %v2754_v55 }
 0x149   : > { %v4037_v49 = vsel %vm1792_vm5, %v1766_v37, %v2805_v9  ;;  %v4040_v33 = vsel %vm1792_vm5, %v1767_v8, %v2806_v17  ;;  %v2324_v37 = vld [vmem:[%s3145_s30 + $0x121] sm:$0xff]  ;;  %v2325_v8 = vld [vmem:[%s3145_s30 + $0x129] sm:$0xff]  ;;  %v3044_v17 = vmov 65535  }
 0x14a   : > { %v4044_v52 = vsel %vm1759_vm4, %v3907_v15, %v2755_v28  ;;  %v4048_v23 = vsel %vm1759_vm4, %v3911_v27, %v2756_v20  ;;  %v2997_v30 = vpack.i.bf16 %v2325_v8, %v2324_v37  ;;  %v2332_v9 = vld [vmem:[%s3145_s30 + $0x181] sm:$0xff]  ;;  %v2333_v20 = vld [vmem:[%s3145_s30 + $0x189] sm:$0xff] }
 0x14b   : > { %v2276_v28 = vld [vmem:[%s3097_s26 + $0x60] sm:$0xff] }
 0x14c   : > { %2983 = vrot.lane.b32.xlu2 %v2982_v40, %s3041_s17  ;;  %v2277_v40 = vld [vmem:[%s3097_s26 + $0x68] sm:$0xff] }
 0x14d   : > { %2973 = vrot.lane.b32.xlu0 %v2972_v24, %s3042_s18  ;;  %2978 = vrot.lane.b32.xlu1 %v2977_v0, %s3041_s17 }
 0x14e   : > { %v2819_v59 = vpop.permute.xlu2 %2818 }
 0x14f   : > { %v2764_v12 = vpop.permute.xlu0 %2763  ;;  %v2821_v15 = vunpack.i.h.bf16 %v2819_v59  ;;  %v2820_v19 = vunpack.i.l.bf16 %v2819_v59  ;;  %v4059_v43 = vpop.permute.xlu1 %2768 }
 0x150   : > { %v2766_v27 = vunpack.i.h.bf16 %v2764_v12  ;;  %v2765_v57 = vunpack.i.l.bf16 %v2764_v12  ;;  %v3002_v12 = vpack.i.bf16 %v2333_v20, %v2332_v9 }
 0x151   : > { %v4062_v50 = vsel %vm1792_vm5, %v1772_v46, %v2820_v19  ;;  %v4065_v62 = vsel %vm1792_vm5, %v1773_v22, %v2821_v15  ;;  %v2340_v46 = vld [vmem:[%s4426_s4 + $0x8] sm:$0xf]  ;;  %v2362_v22 = vld [vmem:[%s4426_s4 + $0x8] sm:$0x30]  ;;  %v3007_v15 = vpack.i.bf16 %v2277_v40, %v2276_v28  ;;  %v2361_v19 = vld [vmem:[%s4426_s4] sm:$0xff] }
 0x152   : > { %v4069_v48 = vsel %vm1759_vm4, %v3819_v42, %v2765_v57  ;;  %v4073_v26 = vsel %vm1759_vm4, %v3822_v32, %v2766_v27  ;;  %v2341_v39 = vor.u32 %v2362_v22, %v2340_v46  ;;  %v2284_v42 = vld [vmem:[%s3097_s26 + $0xc0] sm:$0xff]  ;;  %v1977_v32 = vsel %vm1975_vm6, 4294967295, %v3044_v17 }
 0x153   : > { %v1978_v55 = vsel %vm1976_vm7, %v1977_v32, 0  ;;  %v3012_v37 = vpack.i.bf16 %v2285_v13, %v2284_v42  ;;  %v2316_v46 = vld [vmem:[%s3145_s30 + $0xc1] sm:$0xff] }
 0x154   : > { %2998 = vrot.lane.b32.xlu2 %v2997_v30, %s3042_s18  ;;  %v1980_v24 = vand.u32 %v2341_v39, %v1978_v55 }
 0x155   : > { %2988 = vrot.lane.b32.xlu0 %v2987_v54, %s3043_s19  ;;  %2993 = vrot.lane.b32.xlu1 %v2992_v5, %s3043_s19  ;;  %v2309_v5 = vld [vmem:[%s3145_s30 + $0x69] sm:$0xff] }
 0x156   : > { %v4090_v35 = vpop.permute.xlu2 %2833  ;;  %2364 = vmatpush.bf16.msra.mxu2 %v1980_v24  ;;  %2365 = vmatpush.bf16.msra.mxu3 %v1980_v24 }
 0x157   : > { %v2779_v0 = vpop.permute.xlu0 %2778  ;;  %v2784_v4 = vpop.permute.xlu1 %2783  ;;  %1988 = vmatpush.bf16.msra.mxu0 %v1980_v24  ;;  %2363 = vmatpush.bf16.msra.mxu1 %v1980_v24 }
 0x158   : > { %v2781_v8 = vunpack.i.h.bf16 %v2779_v0  ;;  %v2780_v59 = vunpack.i.l.bf16 %v2779_v0  ;;  %v2786_v63 = vunpack.i.h.bf16 %v2784_v4  ;;  %v2785_v56 = vunpack.i.l.bf16 %v2784_v4 }
 0x15a   : > { %v4097_v27 = vsel %vm1759_vm4, %v3846_v18, %v2780_v59  ;;  %v4101_v57 = vsel %vm1759_vm4, %v3849_v21, %v2781_v8  ;;  %v4105_v30 = vsel %vm1759_vm4, %v3961_v47, %v2785_v56  ;;  %v4109_v54 = vsel %vm1759_vm4, %v3965_v44, %v2786_v63  ;;  %2367 = vmatpush.bf16.msra.mxu2 %v2361_v19  ;;  %v2308_v18 = vld [vmem:[%s3145_s30 + $0x61] sm:$0xff]  ;;  %v2317_v21 = vld [vmem:[%s3145_s30 + $0xc9] sm:$0xff]  ;;  %s2360_s30 = sshll.u32 %s4460_s22, 8 }
 0x15b   : > { %2368 = vmatpush.bf16.msra.mxu3 %v2361_v19  ;;  %1989 = vmatpush.bf16.msra.mxu0 %v2361_v19  ;;  %v3017_v42 = vpack.i.bf16 %v2309_v5, %v2308_v18  ;;  %v3022_v13 = vpack.i.bf16 %v2317_v21, %v2316_v46  ;;  %v2751_v8 = vunpack.i.h.bf16 %v4034_v25  ;;  %s4322_s9 = scalar_lea.vmem %s4428_s6, %s2360_s30 }
 0x15c   : > { %3013 = vrot.lane.b32.xlu2 %v3012_v37, %s3043_s19  ;;  %2366 = vmatpush.bf16.msra.mxu1 %v2361_v19  ;;  %v2750_v37 = vunpack.i.l.bf16 %v4034_v25 }
 0x15d   : > { %3003 = vrot.lane.b32.xlu0 %v3002_v12, %s3042_s18  ;;  %3008 = vrot.lane.b32.xlu1 %v3007_v15, %s3043_s19  ;;  %v1777_v5 = vsel %vm1759_vm4, %v3795_v41, %v2751_v8 }
 0x15e   : > { %v2849_v17 = vpop.permute.xlu2 %2848  ;;  %v1776_v12 = vsel %vm1759_vm4, %v3792_v45, %v2750_v37 }
 0x15f   : > { %v4118_v22 = vpop.permute.xlu0 %2793  ;;  %v2799_v47 = vpop.permute.xlu1 %2798  ;;  %v2851_v15 = vunpack.i.h.bf16 %v2849_v17  ;;  %v2850_v19 = vunpack.i.l.bf16 %v2849_v17  ;;  %v2835_v17 = vunpack.i.l.bf16 %v4090_v35 }
 0x160   : > { %v2801_v39 = vunpack.i.h.bf16 %v2799_v47  ;;  %v2800_v44 = vunpack.i.l.bf16 %v2799_v47  ;;  %v2771_v47 = vunpack.i.h.bf16 %v4059_v43 }
 0x162   : > { %v4122_v32 = vsel %vm1792_vm5, %v3992_v29, %v2800_v44  ;;  %v4126_v9 = vsel %vm1792_vm5, %v3996_v2, %v2801_v39  ;;  %v2770_v44 = vunpack.i.l.bf16 %v4059_v43  ;;  %v1785_v43 = vsel %vm1759_vm4, %v3938_v34, %v2771_v47 }
 0x165   : > { %3018 = vrot.lane.b32.xlu0 %v3017_v42, %s3042_s18  ;;  %3023 = vrot.lane.b32.xlu1 %v3022_v13, %s3042_s18  ;;  %v2836_v13 = vunpack.i.h.bf16 %v4090_v35 }
 0x166   : > { %v4134_v28 = vpop.permute.xlu2 %2863 }
 0x167   : > { %v4130_v55 = vpop.permute.xlu0 %2808  ;;  %v4132_v20 = vpop.permute.xlu1 %2813  ;;  %v2865_v47 = vunpack.i.l.bf16 %v4134_v28 }
 0x16e   : > { %v4146_v56 = vpop.permute.xlu2 %2878 }
 0x16f   : > { %v2824_v40 = vpop.permute.xlu0 %2823  ;;  %v2829_v24 = vpop.permute.xlu1 %2828 }
 0x170   : > { %v2826_v0 = vunpack.i.h.bf16 %v2824_v40  ;;  %v2825_v4 = vunpack.i.l.bf16 %v2824_v40  ;;  %v2831_v59 = vunpack.i.h.bf16 %v2829_v24  ;;  %v2830_v63 = vunpack.i.l.bf16 %v2829_v24 }
 0x172   : > { %v4138_v29 = vsel %vm1792_vm5, %v3927_v3, %v2825_v4  ;;  %v4142_v2 = vsel %vm1792_vm5, %v3930_v60, %v2826_v0  ;;  %v1809_v25 = vsel %vm1792_vm5, %v1776_v12, %v2830_v63  ;;  %v1810_v21 = vsel %vm1792_vm5, %v1777_v5, %v2831_v59 }
 0x173   : > { %v1784_v4 = vsel %vm1759_vm4, %v3934_v58, %v2770_v44  ;;  %v1818_v63 = vsel %vm1792_vm5, %v1785_v43, %v2836_v13  ;;  %v2810_v58 = vunpack.i.l.bf16 %v4130_v55 }
 0x174   : > { %v1817_v59 = vsel %vm1792_vm5, %v1784_v4, %v2835_v17 }
 0x176   : > { %v4169_v12 = vpop.permute.xlu2 %2893 }
 0x177   : > { %v2839_v18 = vpop.permute.xlu0 %2838  ;;  %v2844_v3 = vpop.permute.xlu1 %2843 }
 0x178   : > { %v2841_v60 = vunpack.i.h.bf16 %v2839_v18  ;;  %v2840_v46 = vunpack.i.l.bf16 %v2839_v18  ;;  %v2846_v24 = vunpack.i.h.bf16 %v2844_v3  ;;  %v2845_v0 = vunpack.i.l.bf16 %v2844_v3 }
 0x179   : > { %v2811_v3 = vunpack.i.h.bf16 %v4130_v55  ;;  %v1801_v55 = vsel %vm1792_vm5, %v3900_v1, %v2810_v58  ;;  %v2880_v58 = vunpack.i.l.bf16 %v4146_v56 }
 0x17a   : > { %v1842_v39 = vsel %vm1825_vm9, %v1809_v25, %v2840_v46  ;;  %v1843_v45 = vsel %vm1825_vm9, %v1810_v21, %v2841_v60  ;;  %v1851_v18 = vsel %vm1825_vm9, %v1818_v63, %v2846_v24  ;;  %v2791_v60 = vunpack.i.h.bf16 %v4008_v11 }
 0x17b   : > { %v1875_v42 = vsel %vm1858_vm8, %v1842_v39, %v2850_v19  ;;  %v1876_v41 = vsel %vm1858_vm8, %v1843_v45, %v2851_v15  ;;  %v1850_v19 = vsel %vm1825_vm9, %v1817_v59, %v2845_v0  ;;  %v2790_v46 = vunpack.i.l.bf16 %v4008_v11 }
 0x17c   : > { %v1899_v40 = vpack.c.bf16 %v1876_v41, %v1875_v42  ;;  %v2866_v21 = vunpack.i.h.bf16 %v4134_v28  ;;  %v1802_v44 = vsel %vm1792_vm5, %v3903_v6, %v2811_v3  ;;  %v1794_v11 = vsel %vm1792_vm5, %v3973_v10, %v2791_v60 }
 0x17d   : > { %v1793_v42 = vsel %vm1792_vm5, %v3969_v16, %v2790_v46  ;;  %v1834_v0 = vsel %vm1825_vm9, %v1801_v55, %v2865_v47  ;;  %v2881_v3 = vunpack.i.h.bf16 %v4146_v56  ;;  %v2895_v60 = vunpack.i.l.bf16 %v4169_v12 }
 0x17e   : > { %2350 = vmatmul.msk.bf16.vlgmr.msra.gmra.mxu2 %vm1926_vm10, %v1899_v40  ;;  %v1835_v4 = vsel %vm1825_vm9, %v1802_v44, %v2866_v21  ;;  %v4194_v43 = vpop.permute.xlu2 %2908 }
 0x17f   : > { %v2854_v37 = vpop.permute.xlu0 %2853  ;;  %v2859_v8 = vpop.permute.xlu1 %2858 }
 0x180   : > { %v2856_v35 = vunpack.i.h.bf16 %v2854_v37  ;;  %v2855_v15 = vunpack.i.l.bf16 %v2854_v37  ;;  %v2861_v39 = vunpack.i.h.bf16 %v2859_v8  ;;  %v2860_v45 = vunpack.i.l.bf16 %v2859_v8 }
 0x182   : > { %v1883_v34 = vsel %vm1858_vm8, %v1850_v19, %v2855_v15  ;;  %v1884_v5 = vsel %vm1858_vm8, %v1851_v18, %v2856_v35  ;;  %v1826_v1 = vsel %vm1825_vm9, %v1793_v42, %v2860_v45  ;;  %v1827_v6 = vsel %vm1825_vm9, %v1794_v11, %v2861_v39 }
 0x183   : > { %v1903_v25 = vpack.c.bf16 %v1884_v5, %v1883_v34  ;;  %v2896_v5 = vunpack.i.h.bf16 %v4169_v12  ;;  %v1811_v39 = vsel %vm1792_vm5, %v4044_v52, %v2880_v58  ;;  %v1812_v45 = vsel %vm1792_vm5, %v4048_v23, %v2881_v3 }
 0x185   : > { %2354 = vmatmul.msk.bf16.vlgmr.msra.gmra.mxu3 %vm1926_vm10, %v1903_v25 }
 0x186   : > { %v2924_v34 = vpop.permute.xlu2 %2923 }
 0x187   : > { %v2869_v41 = vpop.permute.xlu0 %2868  ;;  %v2874_v13 = vpop.permute.xlu1 %2873 }
 0x188   : > { %v2871_v17 = vunpack.i.h.bf16 %v2869_v41  ;;  %v2870_v28 = vunpack.i.l.bf16 %v2869_v41  ;;  %v2876_v40 = vunpack.i.h.bf16 %v2874_v13  ;;  %v2875_v24 = vunpack.i.l.bf16 %v2874_v13 }
 0x18a   : > { %v1859_v16 = vsel %vm1858_vm8, %v1826_v1, %v2870_v28  ;;  %v1860_v10 = vsel %vm1858_vm8, %v1827_v6, %v2871_v17  ;;  %v1867_v37 = vsel %vm1858_vm8, %v1834_v0, %v2875_v24  ;;  %v1868_v8 = vsel %vm1858_vm8, %v1835_v4, %v2876_v40 }
 0x18b   : > { %v1891_v59 = vpack.c.bf16 %v1860_v10, %v1859_v16  ;;  %v1895_v63 = vpack.c.bf16 %v1868_v8, %v1867_v37  ;;  %v2796_v40 = vunpack.i.h.bf16 %v4118_v22  ;;  %v2795_v24 = vunpack.i.l.bf16 %v4118_v22 }
 0x18c   : > { %v2816_v1 = vunpack.i.h.bf16 %v4132_v20  ;;  %v2815_v6 = vunpack.i.l.bf16 %v4132_v20  ;;  %v2911_v16 = vunpack.i.h.bf16 %v4194_v43  ;;  %v2910_v10 = vunpack.i.l.bf16 %v4194_v43 }
 0x18d   : > { %2342 = vmatmul.msk.bf16.vlgmr.msra.gmra.mxu0 %vm1926_vm10, %v1891_v59  ;;  %2346 = vmatmul.msk.bf16.vlgmr.msra.gmra.mxu1 %vm1926_vm10, %v1895_v63  ;;  %v1795_v8 = vsel %vm1792_vm5, %v3871_v53, %v2795_v24  ;;  %v1796_v22 = vsel %vm1792_vm5, %v3874_v31, %v2796_v40  ;;  %v2926_v59 = vunpack.i.h.bf16 %v2924_v34  ;;  %v2925_v63 = vunpack.i.l.bf16 %v2924_v34 }
 0x18e   : > { %v2939_v37 = vpop.permute.xlu2 %2938  ;;  %v1803_v43 = vsel %vm1792_vm5, %v4015_v38, %v2815_v6  ;;  %v1804_v58 = vsel %vm1792_vm5, %v4019_v36, %v2816_v1  ;;  %v1829_v53 = vsel %vm1825_vm9, %v1796_v22, %v2911_v16 }
 0x18f   : > { %v2884_v35 = vpop.permute.xlu0 %2883  ;;  %v2889_v15 = vpop.permute.xlu1 %2888 }
 0x190   : > { %v2886_v19 = vunpack.i.h.bf16 %v2884_v35  ;;  %v2885_v18 = vunpack.i.l.bf16 %v2884_v35  ;;  %v2891_v46 = vunpack.i.h.bf16 %v2889_v15  ;;  %v2890_v25 = vunpack.i.l.bf16 %v2889_v15 }
 0x192   : > { %v1819_v21 = vsel %vm1792_vm5, %v3985_v51, %v2885_v18  ;;  %v1820_v47 = vsel %vm1792_vm5, %v3988_v61, %v2886_v19  ;;  %v1844_v41 = vsel %vm1825_vm9, %v1811_v39, %v2890_v25  ;;  %v1845_v13 = vsel %vm1825_vm9, %v1812_v45, %v2891_v46 }
 0x193   : > { %v1852_v51 = vsel %vm1825_vm9, %v1819_v21, %v2895_v60  ;;  %v1853_v61 = vsel %vm1825_vm9, %v1820_v47, %v2896_v5  ;;  %v1828_v5 = vsel %vm1825_vm9, %v1795_v8, %v2910_v10 }
 0x196   : > { %v2954_v45 = vpop.permute.xlu2 %2953 }
 0x197   : > { %v2899_v56 = vpop.permute.xlu0 %2898  ;;  %v2904_v55 = vpop.permute.xlu1 %2903 }
 0x198   : > { %v2901_v44 = vunpack.i.h.bf16 %v2899_v56  ;;  %v2900_v42 = vunpack.i.l.bf16 %v2899_v56  ;;  %v2906_v11 = vunpack.i.h.bf16 %v2904_v55  ;;  %v2905_v12 = vunpack.i.l.bf16 %v2904_v55 }
 0x19a   : > { %v1877_v17 = vsel %vm1858_vm8, %v1844_v41, %v2900_v42  ;;  %v1878_v52 = vsel %vm1858_vm8, %v1845_v13, %v2901_v44  ;;  %v1885_v23 = vsel %vm1858_vm8, %v1852_v51, %v2905_v12  ;;  %v1886_v28 = vsel %vm1858_vm8, %v1853_v61, %v2906_v11 }
 0x19b   : > { %v1900_v0 = vpack.c.bf16 %v1878_v52, %v1877_v17  ;;  %v1904_v4 = vpack.c.bf16 %v1886_v28, %v1885_v23  ;;  %v2941_v44 = vunpack.i.h.bf16 %v2939_v37  ;;  %v2940_v42 = vunpack.i.l.bf16 %v2939_v37 }
 0x19c   : > { %v2956_v51 = vunpack.i.h.bf16 %v2954_v45  ;;  %v2955_v61 = vunpack.i.l.bf16 %v2954_v45 }
 0x19d   : > { %2351 = vmatmul.msk.bf16.gmra.mxu2 %vm1926_vm10, %v1900_v0  ;;  %2355 = vmatmul.msk.bf16.gmra.mxu3 %vm1926_vm10, %v1904_v4 }
 0x19e   : > { %v2969_v6 = vpop.permute.xlu2 %2968 }
 0x19f   : > { %v2914_v35 = vpop.permute.xlu0 %2913  ;;  %v2919_v15 = vpop.permute.xlu1 %2918 }
 0x1a0   : > { %v2916_v20 = vunpack.i.h.bf16 %v2914_v35  ;;  %v2915_v19 = vunpack.i.l.bf16 %v2914_v35  ;;  %v2921_v18 = vunpack.i.h.bf16 %v2919_v15  ;;  %v2920_v3 = vunpack.i.l.bf16 %v2919_v15 }
 0x1a2   : > { %v1836_v31 = vsel %vm1825_vm9, %v1803_v43, %v2915_v19  ;;  %v1837_v34 = vsel %vm1825_vm9, %v1804_v58, %v2916_v20  ;;  %v1861_v60 = vsel %vm1858_vm8, %v1828_v5, %v2920_v3  ;;  %v1862_v46 = vsel %vm1858_vm8, %v1829_v53, %v2921_v18 }
 0x1a3   : > { %v1892_v25 = vpack.c.bf16 %v1862_v46, %v1861_v60  ;;  %v1869_v21 = vsel %vm1858_vm8, %v1836_v31, %v2925_v63  ;;  %v1870_v38 = vsel %vm1858_vm8, %v1837_v34, %v2926_v59  ;;  %v2970_v63 = vunpack.i.l.bf16 %v2969_v6 }
 0x1a4   : > { %v1896_v47 = vpack.c.bf16 %v1870_v38, %v1869_v21 }
 0x1a5   : > { %2343 = vmatmul.msk.bf16.gmra.mxu0 %vm1926_vm10, %v1892_v25 }
 0x1a6   : > { %2347 = vmatmul.msk.bf16.gmra.mxu1 %vm1926_vm10, %v1896_v47  ;;  %v2984_v5 = vpop.permute.xlu2 %2983 }
 0x1a7   : > { %v2929_v36 = vpop.permute.xlu0 %2928  ;;  %v2934_v39 = vpop.permute.xlu1 %2933 }
 0x1a8   : > { %v2931_v56 = vunpack.i.h.bf16 %v2929_v36  ;;  %v2930_v55 = vunpack.i.l.bf16 %v2929_v36  ;;  %v2936_v11 = vunpack.i.h.bf16 %v2934_v39  ;;  %v2935_v12 = vunpack.i.l.bf16 %v2934_v39 }
 0x1aa   : > { %v1813_v41 = vsel %vm1792_vm5, %v3952_v7, %v2930_v55  ;;  %v1814_v13 = vsel %vm1792_vm5, %v3955_v14, %v2931_v56  ;;  %v1821_v0 = vsel %vm1792_vm5, %v4097_v27, %v2935_v12  ;;  %v1822_v4 = vsel %vm1792_vm5, %v4101_v57, %v2936_v11 }
 0x1ab   : > { %v1846_v1 = vsel %vm1825_vm9, %v1813_v41, %v2940_v42  ;;  %v1847_v7 = vsel %vm1825_vm9, %v1814_v13, %v2941_v44  ;;  %v2971_v57 = vunpack.i.h.bf16 %v2969_v6 }
 0x1ae   : > { %v2999_v56 = vpop.permute.xlu2 %2998 }
 0x1af   : > { %v2944_v17 = vpop.permute.xlu0 %2943  ;;  %v2949_v52 = vpop.permute.xlu1 %2948  ;;  %v3001_v55 = vunpack.i.h.bf16 %v2999_v56  ;;  %v3000_v44 = vunpack.i.l.bf16 %v2999_v56 }
 0x1b0   : > { %v2946_v23 = vunpack.i.h.bf16 %v2944_v17  ;;  %v2945_v28 = vunpack.i.l.bf16 %v2944_v17  ;;  %v2951_v40 = vunpack.i.h.bf16 %v2949_v52  ;;  %v2950_v24 = vunpack.i.l.bf16 %v2949_v52 }
 0x1b1   : > { %v2986_v52 = vunpack.i.h.bf16 %v2984_v5 }
 0x1b2   : > { %v1854_v14 = vsel %vm1825_vm9, %v1821_v0, %v2945_v28  ;;  %v1855_v16 = vsel %vm1825_vm9, %v1822_v4, %v2946_v23  ;;  %v1879_v10 = vsel %vm1858_vm8, %v1846_v1, %v2950_v24  ;;  %v1880_v37 = vsel %vm1858_vm8, %v1847_v7, %v2951_v40 }
 0x1b3   : > { %v1901_v8 = vpack.c.bf16 %v1880_v37, %v1879_v10  ;;  %v1887_v22 = vsel %vm1858_vm8, %v1854_v14, %v2955_v61  ;;  %v1888_v27 = vsel %vm1858_vm8, %v1855_v16, %v2956_v51  ;;  %v2985_v23 = vunpack.i.l.bf16 %v2984_v5 }
 0x1b4   : > { %v1905_v59 = vpack.c.bf16 %v1888_v27, %v1887_v22  ;;  %v1824_v4 = vsel %vm1792_vm5, %v4109_v54, %v2986_v52 }
 0x1b5   : > { %2352 = vmatmul.msk.bf16.gmra.mxu2 %vm1926_vm10, %v1901_v8 }
 0x1b6   : > { %2356 = vmatmul.msk.bf16.gmra.mxu3 %vm1926_vm10, %v1905_v59  ;;  %v3014_v16 = vpop.permute.xlu2 %3013 }
 0x1b7   : > { %v2959_v35 = vpop.permute.xlu0 %2958  ;;  %v2964_v15 = vpop.permute.xlu1 %2963  ;;  %v3016_v22 = vunpack.i.h.bf16 %v3014_v16  ;;  %v3015_v27 = vunpack.i.l.bf16 %v3014_v16 }
 0x1b8   : > { %v2961_v20 = vunpack.i.h.bf16 %v2959_v35  ;;  %v2960_v19 = vunpack.i.l.bf16 %v2959_v35  ;;  %v2966_v31 = vunpack.i.h.bf16 %v2964_v15  ;;  %v2965_v34 = vunpack.i.l.bf16 %v2964_v15 }
 0x1ba   : > { %v1830_v18 = vsel %vm1825_vm9, %v4122_v32, %v2960_v19  ;;  %v1831_v3 = vsel %vm1825_vm9, %v4126_v9, %v2961_v20  ;;  %v1838_v32 = vsel %vm1825_vm9, %v4062_v50, %v2965_v34  ;;  %v1839_v9 = vsel %vm1825_vm9, %v4065_v62, %v2966_v31 }
 0x1bb   : > { %v1863_v43 = vsel %vm1858_vm8, %v1830_v18, %v2970_v63  ;;  %v1864_v58 = vsel %vm1858_vm8, %v1831_v3, %v2971_v57  ;;  %v1840_v19 = vsel %vm1825_vm9, %v4138_v29, %v3015_v27  ;;  %v1841_v18 = vsel %vm1825_vm9, %v4142_v2, %v3016_v22 }
 0x1bc   : > { %v1893_v53 = vpack.c.bf16 %v1864_v58, %v1863_v43 }
 0x1be   : > { %2344 = vmatmul.msk.bf16.gmra.mxu0 %vm1926_vm10, %v1893_v53 }
 0x1bf   : > { %v2974_v60 = vpop.permute.xlu0 %2973  ;;  %v2979_v46 = vpop.permute.xlu1 %2978 }
 0x1c0   : > { %v2976_v25 = vunpack.i.h.bf16 %v2974_v60  ;;  %v2975_v21 = vunpack.i.l.bf16 %v2974_v60  ;;  %v2981_v39 = vunpack.i.h.bf16 %v2979_v46  ;;  %v2980_v45 = vunpack.i.l.bf16 %v2979_v46 }
 0x1c2   : > { %v1871_v38 = vsel %vm1858_vm8, %v1838_v32, %v2975_v21  ;;  %v1872_v47 = vsel %vm1858_vm8, %v1839_v9, %v2976_v25  ;;  %v1815_v50 = vsel %vm1792_vm5, %v4069_v48, %v2980_v45  ;;  %v1816_v62 = vsel %vm1792_vm5, %v4073_v26, %v2981_v39 }
 0x1c3   : > { %v1897_v36 = vpack.c.bf16 %v1872_v47, %v1871_v38  ;;  %v1823_v26 = vsel %vm1792_vm5, %v4105_v30, %v2985_v23 }
 0x1c5   : > { %2348 = vmatmul.msk.bf16.gmra.mxu1 %vm1926_vm10, %v1897_v36 }
 0x1c7   : > { %v2989_v42 = vpop.permute.xlu0 %2988  ;;  %v2994_v11 = vpop.permute.xlu1 %2993 }
 0x1c8   : > { %v2991_v12 = vunpack.i.h.bf16 %v2989_v42  ;;  %v2990_v41 = vunpack.i.l.bf16 %v2989_v42  ;;  %v2996_v40 = vunpack.i.h.bf16 %v2994_v11  ;;  %v2995_v24 = vunpack.i.l.bf16 %v2994_v11 }
 0x1ca   : > { %v1848_v13 = vsel %vm1825_vm9, %v1815_v50, %v2990_v41  ;;  %v1849_v51 = vsel %vm1825_vm9, %v1816_v62, %v2991_v12  ;;  %v1856_v6 = vsel %vm1825_vm9, %v1823_v26, %v2995_v24  ;;  %v1857_v14 = vsel %vm1825_vm9, %v1824_v4, %v2996_v40 }
 0x1cb   : > { %v1881_v61 = vsel %vm1858_vm8, %v1848_v13, %v3000_v44  ;;  %v1882_v17 = vsel %vm1858_vm8, %v1849_v51, %v3001_v55 }
 0x1cc   : > { %v1902_v28 = vpack.c.bf16 %v1882_v17, %v1881_v61 }
 0x1ce   : > { %2353 = vmatmul.msk.bf16.gmra.mxu2 %vm1926_vm10, %v1902_v28 }
 0x1cf   : > { %v3004_v0 = vpop.permute.xlu0 %3003  ;;  %v3009_v48 = vpop.permute.xlu1 %3008 }
 0x1d0   : > { %v3006_v1 = vunpack.i.h.bf16 %v3004_v0  ;;  %v3005_v7 = vunpack.i.l.bf16 %v3004_v0  ;;  %v3011_v59 = vunpack.i.h.bf16 %v3009_v48  ;;  %v3010_v57 = vunpack.i.l.bf16 %v3009_v48 }
 0x1d2   : > { %v1889_v10 = vsel %vm1858_vm8, %v1856_v6, %v3005_v7  ;;  %v1890_v37 = vsel %vm1858_vm8, %v1857_v14, %v3006_v1  ;;  %v1832_v3 = vsel %vm1825_vm9, %v4037_v49, %v3010_v57  ;;  %v1833_v43 = vsel %vm1825_vm9, %v4040_v33, %v3011_v59  ;;  %v4315_v49 = vld [vmem:[%s4427_s5] ss:$0 sm:$0xff] }
 0x1d3   : > { %v1906_v8 = vpack.c.bf16 %v1890_v37, %v1889_v10 }
 0x1d5   : > { %2357 = vmatmul.msk.bf16.gmra.mxu3 %vm1926_vm10, %v1906_v8 }
 0x1d7   : > { %v3019_v30 = vpop.permute.xlu0 %3018  ;;  %v3024_v54 = vpop.permute.xlu1 %3023 }
 0x1d8   : > { %v3021_v63 = vunpack.i.h.bf16 %v3019_v30  ;;  %v3020_v35 = vunpack.i.l.bf16 %v3019_v30  ;;  %v3026_v15 = vunpack.i.h.bf16 %v3024_v54  ;;  %v3025_v20 = vunpack.i.l.bf16 %v3024_v54 }
 0x1da   : > { %v1865_v58 = vsel %vm1858_vm8, %v1832_v3, %v3020_v35  ;;  %v1866_v5 = vsel %vm1858_vm8, %v1833_v43, %v3021_v63  ;;  %v1873_v53 = vsel %vm1858_vm8, %v1840_v19, %v3025_v20  ;;  %v1874_v31 = vsel %vm1858_vm8, %v1841_v18, %v3026_v15 }
 0x1db   : > { %v1894_v34 = vpack.c.bf16 %v1866_v5, %v1865_v58  ;;  %v1898_v60 = vpack.c.bf16 %v1874_v31, %v1873_v53 }
 0x1dd   : > { %2345 = vmatmul.msk.bf16.gmra.mxu0 %vm1926_vm10, %v1894_v34  ;;  %2349 = vmatmul.msk.bf16.gmra.mxu1 %vm1926_vm10, %v1898_v60 }
 0x201   : > { %v2031_v33 = vpop.f32.mrf.mxu2 }
 0x202   : > { %v2032_v29 = vadd.f32 %v4315_v49, %v2031_v33 }
 0x204   : > { %v2087_v2 = vmax.f32 %v2032_v29, 0.0 }
 0x206   : > { %2120 = vst.msk [vmem:[%s4322_s9 + $0x80] sm:$0xff] %vm2103_vm11, %v2087_v2 }
 0x208   : > { %v2051_v46 = vpop.f32.mrf.mxu3 }
 0x209   : > { %v2052_v25 = vadd.f32 %v4315_v49, %v2051_v46  ;;  %v2033_v21 = vpop.f32.mrf.mxu2 }
 0x20a   : > { %v2034_v32 = vadd.f32 %v4315_v49, %v2033_v21  ;;  %v1991_v9 = vpop.f32.mrf.mxu0  ;;  %v2011_v38 = vpop.f32.mrf.mxu1 }
 0x20b   : > { %v2095_v47 = vmax.f32 %v2052_v25, 0.0  ;;  %v1992_v36 = vadd.f32 %v4315_v49, %v1991_v9  ;;  %v2012_v39 = vadd.f32 %v4315_v49, %v2011_v38 }
 0x20c   : > { %v2088_v45 = vmax.f32 %v2034_v32, 0.0 }
 0x20d   : > { %2128 = vst.msk [vmem:[%s4322_s9 + $0xc0] sm:$0xff] %vm2103_vm11, %v2095_v47  ;;  %v2071_v56 = vmax.f32 %v1992_v36, 0.0  ;;  %v2079_v55 = vmax.f32 %v2012_v39, 0.0 }
 0x20e   : > { %2121 = vst.msk [vmem:[%s4322_s9 + $0x88] sm:$0xff] %vm2103_vm11, %v2088_v45 }
 0x20f   : > { %2104 = vst.msk [vmem:[%s4322_s9] sm:$0xff] %vm2103_vm11, %v2071_v56 }
 0x210   : > { %2112 = vst.msk [vmem:[%s4322_s9 + $0x40] sm:$0xff] %vm2103_vm11, %v2079_v55  ;;  %v2053_v44 = vpop.f32.mrf.mxu3 }
 0x211   : > { %v2054_v42 = vadd.f32 %v4315_v49, %v2053_v44 }
 0x212   : > { %v1993_v11 = vpop.f32.mrf.mxu0  ;;  %v2013_v12 = vpop.f32.mrf.mxu1 }
 0x213   : > { %v2096_v41 = vmax.f32 %v2054_v42, 0.0  ;;  %v1994_v50 = vadd.f32 %v4315_v49, %v1993_v11  ;;  %v2014_v62 = vadd.f32 %v4315_v49, %v2013_v12 }
 0x215   : > { %2129 = vst.msk [vmem:[%s4322_s9 + $0xc8] sm:$0xff] %vm2103_vm11, %v2096_v41  ;;  %v2072_v13 = vmax.f32 %v1994_v50, 0.0  ;;  %v2080_v51 = vmax.f32 %v2014_v62, 0.0 }
 0x217   : > { %2105 = vst.msk [vmem:[%s4322_s9 + $0x8] sm:$0xff] %vm2103_vm11, %v2072_v13 }
 0x218   : > { %2113 = vst.msk [vmem:[%s4322_s9 + $0x48] sm:$0xff] %vm2103_vm11, %v2080_v51 }
 0x220   : > { %v2036_v61 = vpop.f32.mrf.mxu2  ;;  %v2056_v17 = vpop.f32.mrf.mxu3 }
 0x221   : > { %v2037_v52 = vadd.f32 %v4315_v49, %v2036_v61  ;;  %v2057_v23 = vadd.f32 %v4315_v49, %v2056_v17 }
 0x222   : > { %v1996_v28 = vpop.f32.mrf.mxu0 }
 0x223   : > { %v2089_v40 = vmax.f32 %v2037_v52, 0.0  ;;  %v2097_v24 = vmax.f32 %v2057_v23, 0.0  ;;  %v1997_v0 = vadd.f32 %v4315_v49, %v1996_v28  ;;  %v2016_v48 = vpop.f32.mrf.mxu1 }
 0x224   : > { %v2017_v26 = vadd.f32 %v4315_v49, %v2016_v48 }
 0x225   : > { %2122 = vst.msk [vmem:[%s4322_s9 + $0x90] sm:$0xff] %vm2103_vm11, %v2089_v40  ;;  %v2073_v4 = vmax.f32 %v1997_v0, 0.0 }
 0x226   : > { %2130 = vst.msk [vmem:[%s4322_s9 + $0xd0] sm:$0xff] %vm2103_vm11, %v2097_v24  ;;  %v2081_v1 = vmax.f32 %v2017_v26, 0.0 }
 0x227   : > { %2106 = vst.msk [vmem:[%s4322_s9 + $0x10] sm:$0xff] %vm2103_vm11, %v2073_v4 }
 0x228   : > { %2114 = vst.msk [vmem:[%s4322_s9 + $0x50] sm:$0xff] %vm2103_vm11, %v2081_v1  ;;  %v2038_v7 = vpop.f32.mrf.mxu2  ;;  %v2058_v6 = vpop.f32.mrf.mxu3 }
 0x229   : > { %v2039_v14 = vadd.f32 %v4315_v49, %v2038_v7  ;;  %v2059_v16 = vadd.f32 %v4315_v49, %v2058_v6 }
 0x22a   : > { %v1998_v10 = vpop.f32.mrf.mxu0 }
 0x22b   : > { %v2090_v37 = vmax.f32 %v2039_v14, 0.0  ;;  %v2098_v8 = vmax.f32 %v2059_v16, 0.0  ;;  %v1999_v22 = vadd.f32 %v4315_v49, %v1998_v10  ;;  %v2018_v27 = vpop.f32.mrf.mxu1 }
 0x22c   : > { %v2019_v59 = vadd.f32 %v4315_v49, %v2018_v27 }
 0x22d   : > { %2123 = vst.msk [vmem:[%s4322_s9 + $0x98] sm:$0xff] %vm2103_vm11, %v2090_v37  ;;  %v2074_v57 = vmax.f32 %v1999_v22, 0.0 }
 0x22e   : > { %2131 = vst.msk [vmem:[%s4322_s9 + $0xd8] sm:$0xff] %vm2103_vm11, %v2098_v8  ;;  %v2082_v30 = vmax.f32 %v2019_v59, 0.0 }
 0x22f   : > { %2107 = vst.msk [vmem:[%s4322_s9 + $0x18] sm:$0xff] %vm2103_vm11, %v2074_v57 }
 0x230   : > { %2115 = vst.msk [vmem:[%s4322_s9 + $0x58] sm:$0xff] %vm2103_vm11, %v2082_v30 }
 0x238   : > { %v2041_v54 = vpop.f32.mrf.mxu2 }
 0x239   : > { %v2042_v63 = vadd.f32 %v4315_v49, %v2041_v54  ;;  %v2061_v35 = vpop.f32.mrf.mxu3 }
 0x23a   : > { %v2062_v15 = vadd.f32 %v4315_v49, %v2061_v35 }
 0x23b   : > { %v2091_v20 = vmax.f32 %v2042_v63, 0.0  ;;  %v2001_v19 = vpop.f32.mrf.mxu0 }
 0x23c   : > { %v2099_v18 = vmax.f32 %v2062_v15, 0.0  ;;  %v2002_v3 = vadd.f32 %v4315_v49, %v2001_v19 }
 0x23d   : > { %2124 = vst.msk [vmem:[%s4322_s9 + $0xa0] sm:$0xff] %vm2103_vm11, %v2091_v20 }
 0x23e   : > { %2132 = vst.msk [vmem:[%s4322_s9 + $0xe0] sm:$0xff] %vm2103_vm11, %v2099_v18  ;;  %v2075_v43 = vmax.f32 %v2002_v3, 0.0 }
 0x240   : > { %2108 = vst.msk [vmem:[%s4322_s9 + $0x20] sm:$0xff] %vm2103_vm11, %v2075_v43  ;;  %v2043_v58 = vpop.f32.mrf.mxu2 }
 0x241   : > { %v2044_v5 = vadd.f32 %v4315_v49, %v2043_v58  ;;  %v2063_v53 = vpop.f32.mrf.mxu3 }
 0x242   : > { %v2064_v31 = vadd.f32 %v4315_v49, %v2063_v53  ;;  %v2021_v34 = vpop.f32.mrf.mxu1 }
 0x243   : > { %v2092_v60 = vmax.f32 %v2044_v5, 0.0  ;;  %v2022_v33 = vadd.f32 %v4315_v49, %v2021_v34  ;;  %v2003_v29 = vpop.f32.mrf.mxu0 }
 0x244   : > { %v2100_v2 = vmax.f32 %v2064_v31, 0.0  ;;  %v2004_v46 = vadd.f32 %v4315_v49, %v2003_v29 }
 0x245   : > { %2125 = vst.msk [vmem:[%s4322_s9 + $0xa8] sm:$0xff] %vm2103_vm11, %v2092_v60  ;;  %v2083_v25 = vmax.f32 %v2022_v33, 0.0 }
 0x246   : > { %2133 = vst.msk [vmem:[%s4322_s9 + $0xe8] sm:$0xff] %vm2103_vm11, %v2100_v2  ;;  %v2076_v21 = vmax.f32 %v2004_v46, 0.0 }
 0x247   : > { %2116 = vst.msk [vmem:[%s4322_s9 + $0x60] sm:$0xff] %vm2103_vm11, %v2083_v25 }
 0x248   : > { %2109 = vst.msk [vmem:[%s4322_s9 + $0x28] sm:$0xff] %vm2103_vm11, %v2076_v21 }
 0x24a   : > { %v2023_v32 = vpop.f32.mrf.mxu1 }
 0x24b   : > { %v2024_v9 = vadd.f32 %v4315_v49, %v2023_v32 }
 0x24d   : > { %v2084_v38 = vmax.f32 %v2024_v9, 0.0 }
 0x24f   : > { %2117 = vst.msk [vmem:[%s4322_s9 + $0x68] sm:$0xff] %vm2103_vm11, %v2084_v38 }
 0x251   : > { %v2046_v47 = vpop.f32.mrf.mxu2 }
 0x252   : > { %v2047_v36 = vadd.f32 %v4315_v49, %v2046_v47 }
 0x254   : > { %v2093_v39 = vmax.f32 %v2047_v36, 0.0 }
 0x256   : > { %2126 = vst.msk [vmem:[%s4322_s9 + $0xb0] sm:$0xff] %vm2103_vm11, %v2093_v39 }
 0x258   : > { %v2066_v45 = vpop.f32.mrf.mxu3 }
 0x259   : > { %v2067_v56 = vadd.f32 %v4315_v49, %v2066_v45  ;;  %v2048_v55 = vpop.f32.mrf.mxu2 }
 0x25a   : > { %v2049_v44 = vadd.f32 %v4315_v49, %v2048_v55  ;;  %v2006_v42 = vpop.f32.mrf.mxu0  ;;  %v2026_v11 = vpop.f32.mrf.mxu1 }
 0x25b   : > { %v2101_v12 = vmax.f32 %v2067_v56, 0.0  ;;  %v2007_v41 = vadd.f32 %v4315_v49, %v2006_v42  ;;  %v2027_v50 = vadd.f32 %v4315_v49, %v2026_v11 }
 0x25c   : > { %v2094_v62 = vmax.f32 %v2049_v44, 0.0 }
 0x25d   : > { %2134 = vst.msk [vmem:[%s4322_s9 + $0xf0] sm:$0xff] %vm2103_vm11, %v2101_v12  ;;  %v2077_v13 = vmax.f32 %v2007_v41, 0.0  ;;  %v2085_v51 = vmax.f32 %v2027_v50, 0.0 }
 0x25e   : > { %2127 = vst.msk [vmem:[%s4322_s9 + $0xb8] sm:$0xff] %vm2103_vm11, %v2094_v62 }
 0x25f   : > { %2110 = vst.msk [vmem:[%s4322_s9 + $0x30] sm:$0xff] %vm2103_vm11, %v2077_v13 }
 0x260   : > { %2118 = vst.msk [vmem:[%s4322_s9 + $0x70] sm:$0xff] %vm2103_vm11, %v2085_v51  ;;  %v2068_v61 = vpop.f32.mrf.mxu3 }
 0x261   : > { %v2069_v17 = vadd.f32 %v4315_v49, %v2068_v61 }
 0x262   : > { %v2008_v52 = vpop.f32.mrf.mxu0  ;;  %v2028_v23 = vpop.f32.mrf.mxu1 }
 0x263   : > { %v2102_v28 = vmax.f32 %v2069_v17, 0.0  ;;  %v2009_v40 = vadd.f32 %v4315_v49, %v2008_v52  ;;  %v2029_v24 = vadd.f32 %v4315_v49, %v2028_v23 }
 0x265   : > { %2135 = vst.msk [vmem:[%s4322_s9 + $0xf8] sm:$0xff] %vm2103_vm11, %v2102_v28  ;;  %v2078_v0 = vmax.f32 %v2009_v40, 0.0  ;;  %v2086_v48 = vmax.f32 %v2029_v24, 0.0 }
 0x267   : > { %2111 = vst.msk [vmem:[%s4322_s9 + $0x38] sm:$0xff] %vm2103_vm11, %v2078_v0 }
 0x268   : > { %2119 = vst.msk [vmem:[%s4322_s9 + $0x78] sm:$0xff] %vm2103_vm11, %v2086_v48 }
 0x269 PF: > { %s16_s21 = sadd.s32 1, %s3034_s21  }
 0x26a   : > { %p13_p4 = scmp.ge.s32.totalorder %s16_s21, 4  }
 0x26c   :  { %15 = sbr.rel (!%p13_p4) target bundleno = 1 (0x1), region = 85 }

// kernel: tokenpose_forward.5
= control target key start
LH: loop header
LB: loop body
LE: loop exit
PB: predicated region body
PF: predicated region fallthrough
CT: control target
= control target key end

     0   :  { %s1789_s21 = smov 0   ;;  %s2492_s0 = inlined_call_operand.vmem [shape: f32[2,9,9,64], index: 0, kind: input, shape index: {}]   ;;  %s2493_s1 = inlined_call_operand.vmem [shape: f32[2,9,9,64], index: 1, kind: input, shape index: {}]   ;;  %s2494_s2 = inlined_call_operand.vmem [shape: f32[2,9,9,64], index: 2, kind: input, shape index: {}]   ;;  %s2495_s3 = inlined_call_operand.vmem [shape: f32[2,9,9,64], index: 3, kind: input, shape index: {}]   ;;  %s2496_s4 = inlined_call_operand.vmem [shape: f32[9,64], index: 4, kind: input, shape index: {}]   ;;  %s2497_s5 = inlined_call_operand.vmem [shape: bf16[64,4], index: 5, kind: input, shape index: {}]   ;;  %s2498_s6 = inlined_call_operand.vmem [shape: f32[1,4], index: 6, kind: input, shape index: {}]   ;;  %s2499_s7 = inlined_call_operand.vmem [shape: bf16[64,4], index: 7, kind: input, shape index: {}]   ;;  %s2500_s8 = inlined_call_operand.vmem [shape: f32[1,4], index: 8, kind: input, shape index: {}]   ;;  %s2501_s9 = inlined_call_operand.vmem [shape: f32[9,4], index: 9, kind: input, shape index: {}]   ;;  %s2502_s10 = inlined_call_operand.vmem [shape: bf16[4,4], index: 10, kind: input, shape index: {}]   ;;  %s2503_s11 = inlined_call_operand.vmem [shape: f32[1,4], index: 11, kind: input, shape index: {}]   ;;  %s2504_s12 = inlined_call_operand.vmem [shape: f32[2,64,8], index: 12, kind: output, shape index: {}]  }
   0x1 LB: > { %s1572_s22 = sadd.s32 4294967295, %s1720_s21   ;;  %p1576_p0 = scmp.ge.s32.totalorder %s1720_s21, 1  ;;  %s1720_s21 = sphi %s1789_s21, %s22_s21  }
   0x2   : > { %p392_p1 = scmp.lt.s32.totalorder %s1720_s21, 3 }
   0x4   : > { %p393_p2 = pnand %p1576_p0, %p392_p1 }
   0x6   : > { %396 = sbr.rel (%p393_p2) target bundleno = 549 (0x225), region = 68 }
   0xb   : > { %v1800_v0 = vld [vmem:[%s2499_s7 + $0x18] sm:$0xff]  ;;  %p449_p3 = scmp.lt.s32.totalorder %s1572_s22, 1  ;;  %v1809_v2 = vld [vmem:[%s2499_s7 + $0x10] sm:$0xff]  ;;  %v475_v3 = vld [vmem:[%s2496_s4] sm:$0xff]  ;;  %vm736_vm0 = vcmask 523264   ;;  %vm786_vm1 = vcmask 31744  }
   0xc   : > { %v1685_v1 = vld [vmem:[%s2497_s5 + $0x18] sm:$0xff]  ;;  %1694 = vmatpush.bf16.msra.mxu3 %v1800_v0  ;;  %901 = vmatpush.bf16.msra.mxu1 %v1800_v0  ;;  %v1684_v4 = vld [vmem:[%s2497_s5 + $0x10] sm:$0xff]  ;;  %v1823_v5 = vld [vmem:[%s2499_s7 + $0x8] sm:$0xff]  ;;  %v1826_v6 = vperm.slane %v475_v3, 0  ;;  %v1828_v7 = vperm.slane %v475_v3, 1  ;;  %v1830_v8 = vperm.slane %v475_v3, 2 }
   0xd   : > { %s2518_s22 = smov (!%p449_p3, %s1572_s22), 1  ;;  %753 = vmatpush.bf16.msra.mxu0 %v1685_v1  ;;  %1690 = vmatpush.bf16.msra.mxu2 %v1685_v1  ;;  %v1683_v9 = vld [vmem:[%s2497_s5 + $0x8] sm:$0xff]  ;;  %v1851_v11 = vperm.slane %v475_v3, 3  ;;  %v1853_v12 = vperm.slane %v475_v3, 6  ;;  %v1873_v16 = vperm.slane %v475_v3, 4  ;;  %v1875_v17 = vperm.slane %v475_v3, 5 }
   0xe   : > { %s1698_s17 = smul.u32 144, %s2518_s22  ;;  %v1838_v10 = vld [vmem:[%s2496_s4 + $0x8] ss:$0 sm:$0xff]  ;;  %v1880_v18 = vld [vmem:[%s2499_s7] sm:$0xff]  ;;  %v1890_v24 = vperm.slane %v475_v3, 7  ;;  %vm788_vm2 = vcmask 24576  }
   0xf   : > { %v1682_v26 = vld [vmem:[%s2497_s5] sm:$0xff]  ;;  %vm1391_vm3 = vcmask 1041408   ;;  %s1723_s16 = smov 4   ;;  %s1681_s20 = sshll.u32 %s2518_s22, 6  ;;  %vm1472_vm4 = vcmask 64512  }
  0x10   : > { %1695 = vmatpush.bf16.msra.mxu3 %v1809_v2  ;;  %s1844_s26 = scalar_lea.vmem %s2492_s0, %s1698_s17  ;;  %s1849_s29 = scalar_lea.vmem %s2493_s1, %s1698_s17  ;;  %902 = vmatpush.bf16.msra.mxu1 %v1809_v2 }
  0x11   : > { %754 = vmatpush.bf16.msra.mxu0 %v1684_v4  ;;  %1691 = vmatpush.bf16.msra.mxu2 %v1684_v4  ;;  %v1857_v13 = vld [vmem:[%s1844_s26 + $0x51] sm:$0xff]  ;;  %v1860_v14 = vld [vmem:[%s1844_s26 + $0x61] sm:$0xff]  ;;  %s1865_s14 = scalar_lea.vmem %s2494_s2, %s1698_s17  ;;  %s1870_s18 = scalar_lea.vmem %s2495_s3, %s1698_s17 }
  0x12   : > { %v477_v15 = vld [vmem:[%s1844_s26] sm:$0xff]  ;;  %v856_v19 = vpack.c.bf16 %v1860_v14, %v1857_v13  ;;  %v478_v20 = vld [vmem:[%s1844_s26 + $0x10] sm:$0xff]  ;;  %v1894_v25 = vmul.f32 %v1857_v13, %v1830_v8  ;;  %v1910_v33 = vmul.f32 %v1838_v10, %v1857_v13  ;;  %s2456_s24 = scalar_lea.vmem %s2504_s12, %s1681_s20 }
  0x13   : > { %v486_v21 = vmul.f32 %v1826_v6, %v477_v15  ;;  %v494_v22 = vld [vmem:[%s1849_s29] sm:$0xff]  ;;  %v1888_v23 = vld [vmem:[%s1849_s29 + $0x10] sm:$0xff]  ;;  %v487_v27 = vmul.f32 %v1826_v6, %v478_v20  ;;  %v1925_v40 = vmul.f32 %v1853_v12, %v478_v20 }
  0x14   : > { %v503_v28 = vmul.f32 %v1828_v7, %v494_v22  ;;  %v504_v29 = vmul.f32 %v1828_v7, %v1888_v23  ;;  %v519_v30 = vld [vmem:[%s1844_s26 + $0x1] sm:$0xff]  ;;  %v1905_v31 = vld [vmem:[%s1844_s26 + $0x11] sm:$0xff]  ;;  %1696 = vmatpush.bf16.msra.mxu3 %v1823_v5  ;;  %v1948_v51 = vmul.f32 %v1890_v24, %v1888_v23  ;;  %903 = vmatpush.bf16.msra.mxu1 %v1823_v5 }
  0x15   : > { %v544_v32 = vld [vmem:[%s1865_s14] sm:$0xff]  ;;  %v528_v34 = vmul.f32 %v1830_v8, %v519_v30  ;;  %v529_v35 = vmul.f32 %v1830_v8, %v1905_v31  ;;  %v545_v36 = vld [vmem:[%s1865_s14 + $0x10] sm:$0xff]  ;;  %755 = vmatpush.bf16.msra.mxu0 %v1683_v9  ;;  %1692 = vmatpush.bf16.msra.mxu2 %v1683_v9  ;;  %v1973_v62 = vmul.f32 %v1838_v10, %v1905_v31 }
  0x16   : > { %v553_v37 = vmul.f32 %v1851_v11, %v544_v32  ;;  %v1919_v38 = vld [vmem:[%s1870_s18] sm:$0xff]  ;;  %v1922_v39 = vld [vmem:[%s1870_s18 + $0x10] sm:$0xff]  ;;  %v511_v41 = vadd.f32 %v503_v28, %v486_v21  ;;  %v512_v42 = vadd.f32 %v504_v29, %v487_v27  ;;  %v554_v43 = vmul.f32 %v1851_v11, %v545_v36 }
  0x17   : > { %v1929_v44 = vld [vmem:[%s1865_s14 + $0x1] sm:$0xff]  ;;  %v1932_v45 = vld [vmem:[%s1865_s14 + $0x11] sm:$0xff]  ;;  %v578_v47 = vmul.f32 %v1873_v16, %v1919_v38  ;;  %v579_v48 = vmul.f32 %v1873_v16, %v1922_v39 }
  0x18   : > { %v1935_v46 = vld [vmem:[%s1844_s26 + $0x20] sm:$0xff]  ;;  %v603_v49 = vmul.f32 %v1875_v17, %v1929_v44  ;;  %v536_v54 = vadd.f32 %v528_v34, %v511_v41  ;;  %v537_v55 = vadd.f32 %v529_v35, %v512_v42  ;;  %v604_v56 = vmul.f32 %v1875_v17, %v1932_v45  ;;  %v482_v58 = vld [vmem:[%s1844_s26 + $0x50] sm:$0xff]  ;;  %1697 = vmatpush.bf16.msra.mxu3 %v1880_v18 }
  0x19   : > { %v1944_v50 = vld [vmem:[%s1849_s29 + $0x20] sm:$0xff]  ;;  %v630_v57 = vmul.f32 %v1935_v46, %v1853_v12  ;;  %v1966_v60 = vld [vmem:[%s1849_s29 + $0x50] sm:$0xff]  ;;  %v491_v1 = vmul.f32 %v1826_v6, %v482_v58  ;;  %756 = vmatpush.bf16.msra.mxu0 %v1682_v26  ;;  %1693 = vmatpush.bf16.msra.mxu2 %v1682_v26 }
  0x1a   : > { %v1951_v52 = vld [vmem:[%s1844_s26 + $0x21] sm:$0xff]  ;;  %v656_v61 = vmul.f32 %v1944_v50, %v1890_v24  ;;  %v549_v9 = vld [vmem:[%s1865_s14 + $0x50] sm:$0xff]  ;;  %v561_v15 = vadd.f32 %v553_v37, %v536_v54  ;;  %v562_v20 = vadd.f32 %v554_v43, %v537_v55  ;;  %v508_v30 = vmul.f32 %v1828_v7, %v1966_v60  ;;  %904 = vmatpush.bf16.msra.mxu1 %v1880_v18 }
  0x1b   : > { %v1954_v53 = vld [vmem:[%s1844_s26 + $0x40] sm:$0xff]  ;;  %v1990_v27 = vld [vmem:[%s1870_s18 + $0x50] sm:$0xff]  ;;  %v681_v29 = vmul.f32 %v1838_v10, %v1951_v52  ;;  %1653 = vmatmul.msk.bf16.vlgmr.msra.gmra.mxu3 %vm736_vm0, %v856_v19  ;;  %v558_v41 = vmul.f32 %v1851_v11, %v549_v9 }
  0x1c   : > { %v1963_v59 = vld [vmem:[%s1849_s29 + $0x40] sm:$0xff]  ;;  %v490_v63 = vmul.f32 %v1826_v6, %v1954_v53  ;;  %1041 = vmatpush.bf16.msrb.mxu3 %v1800_v0  ;;  %2510 = vst [vmem:[#allocation4_spill] sm:$0xff] %v1990_v27  ;;  %v2003_v35 = vld [vmem:[%s1865_s14 + $0x51] sm:$0xff]  ;;  %v586_v26 = vadd.f32 %v578_v47, %v561_v15  ;;  %v587_v36 = vadd.f32 %v579_v48, %v562_v20 }
  0x1d   : > { %v1979_v3 = vld [vmem:[%s1844_s26 + $0x41] sm:$0xff]  ;;  %v507_v21 = vmul.f32 %v1828_v7, %v1963_v59  ;;  %2512 = vst [vmem:[#allocation6_spill] sm:$0xff] %v2003_v35  ;;  %v516_v43 = vadd.f32 %v508_v30, %v491_v1  ;;  %v583_v55 = vmul.f32 %v1873_v16, %v1990_v27  ;;  %971 = vmatpush.bf16.msrb.mxu2 %v1800_v0  ;;  %v480_v1 = vld [vmem:[%s1844_s26 + $0x30] sm:$0xff] }
  0x1e   : > { %v548_v4 = vld [vmem:[%s1865_s14 + $0x40] sm:$0xff]  ;;  %v532_v32 = vmul.f32 %v1830_v8, %v1979_v3  ;;  %v611_v19 = vadd.f32 %v603_v49, %v586_v26  ;;  %v612_v47 = vadd.f32 %v604_v56, %v587_v36  ;;  %v633_v15 = vmul.f32 %v1853_v12, %v482_v58  ;;  %1110 = vmatpush.bf16.msrb.mxu0 %v1800_v0  ;;  %v2041_v58 = vld [vmem:[%s1844_s26 + $0x31] sm:$0xff] }
  0x1f   : > { %v1987_v22 = vld [vmem:[%s1870_s18 + $0x40] sm:$0xff]  ;;  %v557_v34 = vmul.f32 %v1851_v11, %v548_v4  ;;  %v515_v37 = vadd.f32 %v507_v21, %v490_v63  ;;  %v608_v63 = vmul.f32 %v1875_v17, %v2003_v35  ;;  %v541_v9 = vadd.f32 %v1894_v25, %v516_v43  ;;  %v2038_v25 = vld [vmem:[%s1849_s29 + $0x30] sm:$0xff] }
  0x20   : > { %2509 = vst [vmem:[#allocation3_spill] sm:$0xff] %v1987_v22  ;;  %v1993_v28 = vld [vmem:[%s1865_s14 + $0x41] sm:$0xff]  ;;  %v582_v54 = vmul.f32 %v1873_v16, %v1987_v22  ;;  %1042 = vmatpush.bf16.msrb.mxu3 %v1809_v2  ;;  %v659_v21 = vmul.f32 %v1890_v24, %v1966_v60  ;;  %v637_v49 = vadd.f32 %v1925_v40, %v611_v19  ;;  %v547_v19 = vld [vmem:[%s1865_s14 + $0x30] sm:$0xff] }
  0x21   : > { %2511 = vst [vmem:[#allocation5_spill] sm:$0xff] %v1993_v28  ;;  %v2011_v42 = vld [vmem:[%s1844_s26 + $0x60] sm:$0xff]  ;;  %v607_v13 = vmul.f32 %v1875_v17, %v1993_v28  ;;  %v540_v48 = vadd.f32 %v532_v32, %v515_v37  ;;  %v638_v56 = vadd.f32 %v630_v57, %v612_v47  ;;  %v566_v26 = vadd.f32 %v558_v41, %v541_v9  ;;  %v2079_v22 = vld [vmem:[%s1865_s14 + $0x31] sm:$0xff] }
  0x22   : > { %v2020_v4 = vld [vmem:[%s1849_s29 + $0x60] sm:$0xff]  ;;  %v634_v20 = vmul.f32 %v2011_v42, %v1853_v12  ;;  %v685_v36 = vmul.f32 %v1838_v10, %v1860_v14  ;;  %972 = vmatpush.bf16.msrb.mxu2 %v1809_v2  ;;  %v488_v0 = vmul.f32 %v1935_v46, %v1826_v6  ;;  %v489_v40 = vmul.f32 %v1826_v6, %v480_v1 }
  0x23   : > { %v565_v30 = vadd.f32 %v557_v34, %v540_v48  ;;  %v660_v32 = vmul.f32 %v2020_v4, %v1890_v24  ;;  %v663_v57 = vadd.f32 %v1948_v51, %v637_v49  ;;  %v664_v34 = vadd.f32 %v656_v61, %v638_v56  ;;  %v546_v43 = vld [vmem:[%s1865_s14 + $0x20] sm:$0xff]  ;;  %1111 = vmatpush.bf16.msrb.mxu0 %v1809_v2  ;;  %v2071_v56 = vld [vmem:[%s1870_s18 + $0x30] sm:$0xff] }
  0x24   : > { %1043 = vmatpush.bf16.msrb.mxu3 %v1823_v5  ;;  %v505_v41 = vmul.f32 %v1944_v50, %v1828_v7  ;;  %v591_v47 = vadd.f32 %v583_v55, %v566_v26  ;;  %v506_v46 = vmul.f32 %v1828_v7, %v2038_v25  ;;  %v530_v51 = vmul.f32 %v1951_v52, %v1830_v8  ;;  %v2068_v49 = vld [vmem:[%s1844_s26 + $0x81] sm:$0xff] }
  0x25   : > { %v590_v37 = vadd.f32 %v582_v54, %v565_v30  ;;  %v531_v61 = vmul.f32 %v1830_v8, %v2041_v58  ;;  %v2064_v54 = vld [vmem:[%s1870_s18 + $0x20] sm:$0xff]  ;;  %v688_v48 = vadd.f32 %v1973_v62, %v663_v57  ;;  %v689_v9 = vadd.f32 %v681_v29, %v664_v34 }
  0x26   : > { %v513_v2 = vadd.f32 %v505_v41, %v488_v0  ;;  %v616_v30 = vadd.f32 %v608_v63, %v591_v47  ;;  %v514_v26 = vadd.f32 %v506_v46, %v489_v40  ;;  %v555_v35 = vmul.f32 %v1851_v11, %v546_v43  ;;  %v2076_v27 = vld [vmem:[%s1865_s14 + $0x21] sm:$0xff]  ;;  %973 = vmatpush.bf16.msrb.mxu2 %v1823_v5 }
  0x27   : > { %v615_v55 = vadd.f32 %v607_v13, %v590_v37  ;;  %v556_v28 = vmul.f32 %v1851_v11, %v547_v19  ;;  %v696_v62 = vpack.c.bf16 %v689_v9, %v688_v48  ;;  %v2083_v13 = vld [vmem:[%s1844_s26 + $0x71] sm:$0xff]  ;;  %v580_v0 = vmul.f32 %v1873_v16, %v2064_v54  ;;  %1112 = vmatpush.bf16.msrb.mxu0 %v1823_v5 }
  0x28   : > { %v538_v57 = vadd.f32 %v530_v51, %v513_v2  ;;  %1044 = vmatpush.bf16.msrb.mxu3 %v1880_v18  ;;  %v642_v63 = vadd.f32 %v634_v20, %v616_v30  ;;  %v857_v40 = vpack.c.bf16 %v2068_v49, %v2083_v13  ;;  %v539_v34 = vadd.f32 %v531_v61, %v514_v26  ;;  %v484_v61 = vld [vmem:[%s1844_s26 + $0x70] sm:$0xff] }
  0x29   : > { %v641_v29 = vadd.f32 %v633_v15, %v615_v55  ;;  %v581_v37 = vmul.f32 %v1873_v16, %v2071_v56  ;;  %1623 = vmatmul.msk.bf16.vlgmr.msra.gmra.mxu0 %vm736_vm0, %v696_v62  ;;  %v605_v43 = vmul.f32 %v1875_v17, %v2076_v27  ;;  %v606_v19 = vmul.f32 %v1875_v17, %v2079_v22  ;;  %v2103_v5 = vld [vmem:[%s1849_s29 + $0x70] sm:$0xff]  ;;  %v550_v55 = vld [vmem:[%s1865_s14 + $0x60] sm:$0xff] }
  0x2a   : > { %v563_v41 = vadd.f32 %v555_v35, %v538_v57  ;;  %v668_v20 = vadd.f32 %v660_v32, %v642_v63  ;;  %v564_v47 = vadd.f32 %v556_v28, %v539_v34  ;;  %v631_v46 = vmul.f32 %v1853_v12, %v480_v1  ;;  %974 = vmatpush.bf16.msrb.mxu2 %v1880_v18  ;;  %v551_v26 = vld [vmem:[%s1865_s14 + $0x70] sm:$0xff]  ;;  %v2125_v62 = vld [vmem:[%s1870_s18 + $0x60] sm:$0xff] }
  0x2b   : > { %v667_v15 = vadd.f32 %v659_v21, %v641_v29  ;;  %v632_v51 = vmul.f32 %v1853_v12, %v1954_v53  ;;  %v657_v48 = vmul.f32 %v1890_v24, %v2038_v25  ;;  %v658_v28 = vmul.f32 %v1890_v24, %v1963_v59  ;;  %1113 = vmatpush.bf16.msrb.mxu0 %v1880_v18  ;;  %v2136_v34 = vld [vmem:[%s1865_s14 + $0x61] sm:$0xff] }
  0x2c   : > { %v588_v21 = vadd.f32 %v580_v0, %v563_v41  ;;  %v693_v1 = vadd.f32 %v685_v36, %v668_v20  ;;  %v589_v32 = vadd.f32 %v581_v37, %v564_v47  ;;  %v682_v53 = vmul.f32 %v1838_v10, %v2041_v58  ;;  %1654 = vmatmul.msk.bf16.gmra.mxu3 %vm736_vm0, %v857_v40  ;;  %v2132_v0 = vld [vmem:[%s1870_s18 + $0x70] sm:$0xff] }
  0x2d   : > { %v692_v35 = vadd.f32 %v1910_v33, %v667_v15  ;;  %v492_v9 = vmul.f32 %v2011_v42, %v1826_v6  ;;  %v493_v2 = vmul.f32 %v1826_v6, %v484_v61  ;;  %v509_v36 = vmul.f32 %v2020_v4, %v1828_v7  ;;  %v601_v41 = vld [vmem:[%s1865_s14 + $0x71] sm:$0xff] }
  0x2e   : > { %v613_v33 = vadd.f32 %v605_v43, %v588_v21  ;;  %v510_v30 = vmul.f32 %v1828_v7, %v2103_v5  ;;  %v614_v29 = vadd.f32 %v606_v19, %v589_v32  ;;  %v534_v18 = vmul.f32 %v1860_v14, %v1830_v8 }
  0x2f   : > { %v698_v42 = vpack.c.bf16 %v693_v1, %v692_v35  ;;  %v535_v57 = vmul.f32 %v2083_v13, %v1830_v8  ;;  %v517_v63 = vadd.f32 %v509_v36, %v492_v9  ;;  %v559_v7 = vmul.f32 %v1851_v11, %v550_v55  ;;  %v1590_v35 = vld [vmem:[%s1844_s26 + $0x80] sm:$0xff] }
  0x30   : > { %v639_v6 = vadd.f32 %v631_v46, %v613_v33  ;;  %v518_v40 = vadd.f32 %v510_v30, %v493_v2  ;;  %v640_v37 = vadd.f32 %v632_v51, %v614_v29  ;;  %v683_v15 = vmul.f32 %v1838_v10, %v1979_v3  ;;  %v1598_v33 = vld [vmem:[%s1849_s29 + $0x80] sm:$0xff] }
  0x31   : > { %1625 = vmatmul.msk.bf16.vlgmr.msra.gmra.mxu2 %vm736_vm0, %v698_v42  ;;  %v560_v14 = vmul.f32 %v1851_v11, %v551_v26  ;;  %v584_v8 = vmul.f32 %v1873_v16, %v2125_v62  ;;  %v542_v19 = vadd.f32 %v534_v18, %v517_v63  ;;  %v585_v47 = vmul.f32 %v1873_v16, %v2132_v0 }
  0x32   : > { %v665_v43 = vadd.f32 %v657_v48, %v639_v6  ;;  %v543_v20 = vadd.f32 %v535_v57, %v518_v40  ;;  %v666_v46 = vadd.f32 %v658_v28, %v640_v37  ;;  %v609_v51 = vmul.f32 %v1875_v17, %v2136_v34 }
  0x33   : > { %v567_v1 = vadd.f32 %v559_v7, %v542_v19  ;;  %v610_v11 = vmul.f32 %v1875_v17, %v601_v41  ;;  %v635_v55 = vmul.f32 %v1853_v12, %v484_v61  ;;  %v636_v36 = vmul.f32 %v1590_v35, %v1853_v12 }
  0x34   : > { %v690_v21 = vadd.f32 %v682_v53, %v665_v43  ;;  %v568_v32 = vadd.f32 %v560_v14, %v543_v20  ;;  %v691_v9 = vadd.f32 %v683_v15, %v666_v46  ;;  %v854_v16 = vpack.c.bf16 %v1951_v52, %v1905_v31 }
  0x35   : > { %v592_v48 = vadd.f32 %v584_v8, %v567_v1  ;;  %v661_v53 = vmul.f32 %v1890_v24, %v2103_v5  ;;  %v662_v42 = vmul.f32 %v1598_v33, %v1890_v24  ;;  %v686_v17 = vmul.f32 %v1838_v10, %v2083_v13 }
  0x36   : > { %v593_v2 = vadd.f32 %v585_v47, %v568_v32  ;;  %v697_v28 = vpack.c.bf16 %v691_v9, %v690_v21  ;;  %1651 = vmatmul.msk.bf16.vlgmr.msra.gmra.mxu1 %vm736_vm0, %v854_v16  ;;  %v687_v31 = vmul.f32 %v1838_v10, %v2068_v49  ;;  %v1021_v52 = vpack.c.bf16 %v1932_v45, %v1929_v44  ;;  %v2513_v49 = vld [vmem:[#allocation3_spill] sm:$0xff] }
  0x37   : > { %v617_v30 = vadd.f32 %v609_v51, %v592_v48  ;;  %v953_v13 = vpack.c.bf16 %v2020_v4, %v1966_v60  ;;  %v855_v63 = vpack.c.bf16 %v1979_v3, %v2041_v58  ;;  %v1090_v10 = vpack.c.bf16 %v1922_v39, %v1919_v38  ;;  %v2514_v60 = vld [vmem:[#allocation4_spill] sm:$0xff]  ;;  %v2515_v39 = vld [vmem:[#allocation5_spill] sm:$0xff]  ;;  %v2516_v58 = vld [vmem:[#allocation6_spill] sm:$0xff] }
  0x38   : > { %v618_v26 = vadd.f32 %v610_v11, %v593_v2  ;;  %v1022_v44 = vpack.c.bf16 %v2079_v22, %v2076_v27  ;;  %v951_v45 = vpack.c.bf16 %v1944_v50, %v1888_v23  ;;  %v1092_v4 = vpack.c.bf16 %v2514_v60, %v2513_v49  ;;  %v1374_v51 = vld [vmem:[%s2502_s10] sm:$0x3] }
  0x39   : > { %1624 = vmatmul.msk.bf16.gmra.mxu0 %vm736_vm0, %v697_v28  ;;  %v643_v61 = vadd.f32 %v635_v55, %v617_v30  ;;  %v954_v3 = vpack.c.bf16 %v1598_v33, %v2103_v5  ;;  %v1091_v38 = vpack.c.bf16 %v2071_v56, %v2064_v54  ;;  %v1023_v22 = vpack.c.bf16 %v2516_v58, %v2515_v39 }
  0x3a   : > { %v644_v12 = vadd.f32 %v636_v36, %v618_v26  ;;  %v952_v23 = vpack.c.bf16 %v1963_v59, %v2038_v25  ;;  %v1093_v50 = vpack.c.bf16 %v2132_v0, %v2125_v62  ;;  %v1024_v27 = vpack.c.bf16 %v601_v41, %v2136_v34  ;;  %v2218_v25 = vld [vmem:[%s2500_s8] ss:$0 sm:$0xff] }
  0x3b   : > { %v669_v29 = vadd.f32 %v661_v53, %v643_v61  ;;  %v1722_v59 = vmov 0.0   ;;  %v1393_v35 = vsel %vm1391_vm3, %v1374_v51, 0 }
  0x3c   : > { %v670_v18 = vadd.f32 %v662_v42, %v644_v12  ;;  %1667 = vmatmul.msk.bf16.vlgmr.msrb.gmra.mxu3 %vm736_vm0, %v1021_v52  ;;  %787 = vst.msk [vmem:[#allocation2] sm:$0xff] %vm786_vm1, %v1722_v59  ;;  %1402 = vmatpush.bf16.msrb.mxu1 %v1393_v35 }
  0x3d   : > { %v694_v57 = vadd.f32 %v686_v17, %v669_v29  ;;  %789 = vst.msk [vmem:[#allocation2 + $0x8] sm:$0x1] %vm788_vm2, %v1722_v59 }
  0x3e   : > { %v695_v6 = vadd.f32 %v687_v31, %v670_v18  ;;  %790 = vst.msk [vmem:[#allocation2] sm:$0x1] %vm788_vm2, %v1722_v59  ;;  %v2287_v31 = vld [vmem:[%s2501_s9] sm:$0xff] }
  0x3f   : > { %791 = vst.msk [vmem:[#allocation2 + $0x10] sm:$0x1] %vm788_vm2, %v1722_v59  ;;  %v2292_v18 = vperm.slane %v2287_v31, 1  ;;  %v2305_v39 = vperm.slane %v2287_v31, 2  ;;  %v2324_v35 = vperm.slane %v2287_v31, 5 }
  0x40   : > { %v699_v24 = vpack.c.bf16 %v695_v6, %v694_v57  ;;  %792 = vst.msk [vmem:[#allocation2 + $0x20] sm:$0x1] %vm788_vm2, %v1722_v59 }
  0x41   : > { %800 = vst.msk [vmem:[#allocation2 + $0x90] sm:$0xff] %vm786_vm1, %v1722_v59 }
  0x42   : > { %1626 = vmatmul.msk.bf16.gmra.mxu2 %vm736_vm0, %v699_v24  ;;  %815 = vst.msk [vmem:[#allocation2 + $0x120] sm:$0x1] %vm788_vm2, %v1722_v59 }
  0x43   : > { %816 = vst.msk [vmem:[#allocation2 + $0x130] sm:$0x1] %vm788_vm2, %v1722_v59 }
  0x44   : > { %793 = vst.msk [vmem:[#allocation2 + $0x30] sm:$0x1] %vm788_vm2, %v1722_v59 }
  0x45   : > { %794 = vst.msk [vmem:[#allocation2 + $0x40] sm:$0x1] %vm788_vm2, %v1722_v59  ;;  %v1153_v6 = vld [vmem:[#allocation2] sm:$0xff] }
  0x46   : > { %1652 = vmatmul.msk.bf16.gmra.mxu1 %vm736_vm0, %v855_v63  ;;  %795 = vst.msk [vmem:[#allocation2 + $0x50] sm:$0x1] %vm788_vm2, %v1722_v59  ;;  %v2297_v63 = vperm.slane %v2287_v31, 0 }
  0x47   : > { %796 = vst.msk [vmem:[#allocation2 + $0x60] sm:$0x1] %vm788_vm2, %v1722_v59 }
  0x48   : > { %797 = vst.msk [vmem:[#allocation2 + $0x70] sm:$0x1] %vm788_vm2, %v1722_v59  ;;  %v1170_v24 = vld [vmem:[#allocation2 + $0x90] sm:$0xff]  ;;  %v1162_v49 = vmul.f32 %v2297_v63, %v1153_v6 }
  0x49   : > { %1671 = vmatmul.msk.bf16.vlgmr.msrb.gmra.mxu0 %vm736_vm0, %v1090_v10  ;;  %798 = vst.msk [vmem:[#allocation2 + $0x80] sm:$0x1] %vm788_vm2, %v1722_v59  ;;  %v1179_v60 = vmul.f32 %v2292_v18, %v1170_v24 }
  0x4a   : > { %817 = vst.msk [vmem:[#allocation2 + $0x140] sm:$0x1] %vm788_vm2, %v1722_v59 }
  0x4b   : > { %818 = vst.msk [vmem:[#allocation2 + $0x150] sm:$0x1] %vm788_vm2, %v1722_v59 }
  0x4c   : > { %1668 = vmatmul.msk.bf16.gmra.mxu3 %vm736_vm0, %v1022_v44  ;;  %819 = vst.msk [vmem:[#allocation2 + $0x160] sm:$0x1] %vm788_vm2, %v1722_v59 }
  0x4d   : > { %820 = vst.msk [vmem:[#allocation2 + $0x170] sm:$0x1] %vm788_vm2, %v1722_v59 }
  0x4e   : > { %821 = vst.msk [vmem:[#allocation2 + $0x180] sm:$0x1] %vm788_vm2, %v1722_v59 }
  0x4f   : > { %822 = vst.msk [vmem:[#allocation2 + $0x190] sm:$0x1] %vm788_vm2, %v1722_v59 }
  0x52   : > { %1663 = vmatmul.msk.bf16.vlgmr.msrb.gmra.mxu2 %vm736_vm0, %v951_v45 }
  0x59   : > { %1672 = vmatmul.msk.bf16.gmra.mxu0 %vm736_vm0, %v1091_v38  ;;  %v1195_v38 = vld [vmem:[#allocation2 + $0x1] sm:$0xff] }
  0x5c   : > { %1669 = vmatmul.msk.bf16.gmra.mxu3 %vm736_vm0, %v1023_v22 }
  0x62   : > { %1664 = vmatmul.msk.bf16.gmra.mxu2 %vm736_vm0, %v952_v23  ;;  %v1187_v23 = vadd.f32 %v1179_v60, %v1162_v49  ;;  %v2341_v49 = vperm.slane %v2287_v31, 7 }
  0x69   : > { %1673 = vmatmul.msk.bf16.gmra.mxu0 %vm736_vm0, %v1092_v4 }
  0x6c   : > { %1670 = vmatmul.msk.bf16.gmra.mxu3 %vm736_vm0, %v1024_v27  ;;  %v2310_v27 = vperm.slane %v2287_v31, 3 }
  0x72   : > { %1665 = vmatmul.msk.bf16.gmra.mxu2 %vm736_vm0, %v953_v13 }
  0x79   : > { %1674 = vmatmul.msk.bf16.gmra.mxu0 %vm736_vm0, %v1093_v50  ;;  %v1204_v50 = vmul.f32 %v2305_v39, %v1195_v38 }
  0x82   : > { %1666 = vmatmul.msk.bf16.gmra.mxu2 %vm736_vm0, %v954_v3 }
  0x9e   : > { %v916_v54 = vpop.f32.mrf.mxu3 }
  0x9f   : > { %v917_v56 = vadd.f32 %v2218_v25, %v916_v54 }
  0xa1   : > { %v930_v5 = vmax.f32 %v917_v56, 0.0 }
  0xa3   : > { %939 = vst.msk [vmem:[#allocation2 + $0x51] sm:$0xff] %vm786_vm1, %v930_v5 }
  0xa6   : > { %v2222_v62 = vpop.f32.mrf.mxu0  ;;  %v918_v0 = vpop.f32.mrf.mxu3 }
  0xa7   : > { %v919_v40 = vadd.f32 %v2218_v25, %v918_v0 }
  0xa9   : > { %v931_v7 = vmax.f32 %v919_v40, 0.0 }
  0xab   : > { %940 = vst.msk [vmem:[#allocation2 + $0x61] sm:$0xff] %vm786_vm1, %v931_v7  ;;  %v1212_v7 = vadd.f32 %v1204_v50, %v1187_v23 }
  0xae   : > { %v2230_v34 = vpop.f32.mrf.mxu0 }
  0xaf   : > { %v921_v37 = vpop.f32.mrf.mxu3 }
  0xb0   : > { %v922_v15 = vadd.f32 %v2218_v25, %v921_v37 }
  0xb2   : > { %v932_v8 = vmax.f32 %v922_v15, 0.0  ;;  %v2317_v15 = vperm.slane %v2287_v31, 4 }
  0xb3   : > { %v906_v41 = vpop.f32.mrf.mxu1 }
  0xb4   : > { %v2233_v14 = vpop.f32.mrf.mxu2  ;;  %941 = vst.msk [vmem:[#allocation2 + $0x71] sm:$0xff] %vm786_vm1, %v932_v8  ;;  %v907_v43 = vadd.f32 %v2218_v25, %v906_v41 }
  0xb6   : > { %v2237_v19 = vpop.f32.mrf.mxu0  ;;  %v926_v20 = vmax.f32 %v907_v43, 0.0 }
  0xb7   : > { %v923_v47 = vpop.f32.mrf.mxu3 }
  0xb8   : > { %v924_v46 = vadd.f32 %v2218_v25, %v923_v47  ;;  %935 = vst.msk [vmem:[#allocation2 + $0x11] sm:$0xff] %vm786_vm1, %v926_v20 }
  0xba   : > { %v933_v1 = vmax.f32 %v924_v46, 0.0 }
  0xbb   : > { %v908_v32 = vpop.f32.mrf.mxu1 }
  0xbc   : > { %v2248_v21 = vpop.f32.mrf.mxu2  ;;  %942 = vst.msk [vmem:[#allocation2 + $0x81] sm:$0xff] %vm786_vm1, %v933_v1  ;;  %v909_v11 = vadd.f32 %v2218_v25, %v908_v32 }
  0xbe   : > { %v2256_v9 = vpop.f32.mrf.mxu0  ;;  %v927_v55 = vmax.f32 %v909_v11, 0.0 }
  0xbf   : > { %v1046_v33 = vpop.f32.mrf.mxu3 }
  0xc0   : > { %v1047_v48 = vadd.f32 %v2218_v25, %v1046_v33  ;;  %936 = vst.msk [vmem:[#allocation2 + $0x21] sm:$0xff] %vm786_vm1, %v927_v55  ;;  %v1154_v55 = vld [vmem:[#allocation2 + $0x10] sm:$0xff] }
  0xc2   : > { %v1066_v2 = vmax.f32 %v1047_v48, 0.0 }
  0xc3   : > { %v911_v16 = vpop.f32.mrf.mxu1 }
  0xc4   : > { %1074 = vst.msk [vmem:[#allocation2 + $0x121] sm:$0xff] %vm786_vm1, %v1066_v2  ;;  %v912_v28 = vadd.f32 %v2218_v25, %v911_v16  ;;  %v1163_v2 = vmul.f32 %v2297_v63, %v1154_v55 }
  0xc5   : > { %v2270_v36 = vpop.f32.mrf.mxu2 }
  0xc6   : > { %v1115_v30 = vpop.f32.mrf.mxu0  ;;  %v928_v53 = vmax.f32 %v912_v28, 0.0 }
  0xc7   : > { %v1116_v26 = vadd.f32 %v2218_v25, %v1115_v30  ;;  %v1048_v42 = vpop.f32.mrf.mxu3  ;;  %v1196_v30 = vld [vmem:[#allocation2 + $0x11] sm:$0xff] }
  0xc8   : > { %v1049_v61 = vadd.f32 %v2218_v25, %v1048_v42  ;;  %937 = vst.msk [vmem:[#allocation2 + $0x31] sm:$0xff] %vm786_vm1, %v928_v53  ;;  %v1205_v24 = vmul.f32 %v2305_v39, %v1196_v30 }
  0xc9   : > { %v1135_v17 = vmax.f32 %v1116_v26, 0.0 }
  0xca   : > { %v1067_v12 = vmax.f32 %v1049_v61, 0.0 }
  0xcb   : > { %1143 = vst.msk [vmem:[#allocation2 + $0x1b0] sm:$0xff] %vm786_vm1, %v1135_v17  ;;  %v913_v29 = vpop.f32.mrf.mxu1  ;;  %v1220_v54 = vld [vmem:[#allocation2 + $0x120] sm:$0xff] }
  0xcc   : > { %1075 = vst.msk [vmem:[#allocation2 + $0x131] sm:$0xff] %vm786_vm1, %v1067_v12  ;;  %v914_v57 = vadd.f32 %v2218_v25, %v913_v29  ;;  %v1229_v37 = vmul.f32 %v2310_v27, %v1220_v54  ;;  %v1270_v32 = vld [vmem:[#allocation2 + $0x121] sm:$0xff]  ;;  %v2335_v29 = vperm.slane %v2287_v31, 6 }
  0xcd   : > { %v2289_v52 = vpop.f32.mrf.mxu2  ;;  %v1279_v53 = vmul.f32 %v2324_v35, %v1270_v32  ;;  %v1296_v54 = vld [vmem:[#allocation2 + $0x20] sm:$0xff] }
  0xce   : > { %v1117_v13 = vpop.f32.mrf.mxu0  ;;  %v929_v44 = vmax.f32 %v914_v57, 0.0  ;;  %v1237_v46 = vadd.f32 %v1229_v37, %v1212_v7 }
  0xcf   : > { %v1118_v10 = vadd.f32 %v2218_v25, %v1117_v13  ;;  %v1051_v45 = vpop.f32.mrf.mxu3 }
  0xd0   : > { %v1052_v3 = vadd.f32 %v2218_v25, %v1051_v45  ;;  %938 = vst.msk [vmem:[#allocation2 + $0x41] sm:$0xff] %vm786_vm1, %v929_v44  ;;  %v1304_v45 = vmul.f32 %v2335_v29, %v1154_v55 }
  0xd1   : > { %v1136_v4 = vmax.f32 %v1118_v10, 0.0 }
  0xd2   : > { %v1068_v58 = vmax.f32 %v1052_v3, 0.0  ;;  %v1245_v43 = vld [vmem:[#allocation2 + $0x1b0] sm:$0xff] }
  0xd3   : > { %1144 = vst.msk [vmem:[#allocation2 + $0x1c0] sm:$0xff] %vm786_vm1, %v1136_v4  ;;  %v1254_v51 = vmul.f32 %v2317_v15, %v1245_v43  ;;  %v1221_v12 = vld [vmem:[#allocation2 + $0x130] sm:$0xff] }
  0xd4   : > { %1076 = vst.msk [vmem:[#allocation2 + $0x141] sm:$0xff] %vm786_vm1, %v1068_v58  ;;  %v1230_v3 = vmul.f32 %v2310_v27, %v1221_v12  ;;  %v1271_v58 = vld [vmem:[#allocation2 + $0x131] sm:$0xff] }
  0xd5   : > { %v976_v22 = vpop.f32.mrf.mxu2  ;;  %v1262_v26 = vadd.f32 %v1254_v51, %v1237_v46 }
  0xd6   : > { %v977_v59 = vadd.f32 %v2218_v25, %v976_v22  ;;  %v1120_v56 = vpop.f32.mrf.mxu0 }
  0xd7   : > { %v1121_v0 = vadd.f32 %v2218_v25, %v1120_v56  ;;  %v1053_v40 = vpop.f32.mrf.mxu3  ;;  %v1287_v44 = vadd.f32 %v1279_v53, %v1262_v26 }
  0xd8   : > { %v996_v5 = vmax.f32 %v977_v59, 0.0  ;;  %v1054_v41 = vadd.f32 %v2218_v25, %v1053_v40 }
  0xd9   : > { %v1137_v8 = vmax.f32 %v1121_v0, 0.0 }
  0xda   : > { %1005 = vst.msk [vmem:[#allocation2 + $0xa0] sm:$0xff] %vm786_vm1, %v996_v5  ;;  %v1069_v20 = vmax.f32 %v1054_v41, 0.0  ;;  %v1246_v10 = vld [vmem:[#allocation2 + $0x1c0] sm:$0xff]  ;;  %v1312_v5 = vadd.f32 %v1304_v45, %v1287_v44  ;;  %v2371_v45 = vld [vmem:[#allocation2 + $0x31] sm:$0xff] }
  0xdb   : > { %1145 = vst.msk [vmem:[#allocation2 + $0x1d0] sm:$0xff] %vm786_vm1, %v1137_v8  ;;  %v1255_v59 = vmul.f32 %v2317_v15, %v1246_v10  ;;  %v1280_v8 = vmul.f32 %v2324_v35, %v1271_v58  ;;  %v1346_v41 = vld [vmem:[#allocation2 + $0x21] sm:$0xff] }
  0xdc   : > { %1077 = vst.msk [vmem:[#allocation2 + $0x151] sm:$0xff] %vm786_vm1, %v1069_v20  ;;  %v1222_v43 = vld [vmem:[#allocation2 + $0x140] sm:$0xff]  ;;  %v1164_v20 = vmul.f32 %v1296_v54, %v2297_v63 }
  0xdd   : > { %v978_v47 = vpop.f32.mrf.mxu2  ;;  %v1272_v58 = vld [vmem:[#allocation2 + $0x141] sm:$0xff] }
  0xde   : > { %v979_v1 = vadd.f32 %v2218_v25, %v978_v47  ;;  %v1122_v11 = vpop.f32.mrf.mxu0 }
  0xdf   : > { %v1123_v48 = vadd.f32 %v2218_v25, %v1122_v11  ;;  %v1056_v16 = vpop.f32.mrf.mxu3 }
  0xe0   : > { %v997_v33 = vmax.f32 %v979_v1, 0.0  ;;  %v1057_v17 = vadd.f32 %v2218_v25, %v1056_v16  ;;  %v1305_v1 = vmul.f32 %v2335_v29, %v1296_v54  ;;  %v1206_v16 = vmul.f32 %v1346_v41, %v2305_v39 }
  0xe1   : > { %v1171_v28 = vld [vmem:[#allocation2 + $0xa0] sm:$0xff]  ;;  %v1138_v42 = vmax.f32 %v1123_v48, 0.0  ;;  %v1156_v48 = vld [vmem:[#allocation2 + $0x30] sm:$0xff]  ;;  %v1207_v54 = vmul.f32 %v2305_v39, %v2371_v45 }
  0xe2   : > { %1006 = vst.msk [vmem:[#allocation2 + $0xb0] sm:$0xff] %vm786_vm1, %v997_v33  ;;  %v1180_v61 = vmul.f32 %v2292_v18, %v1171_v28  ;;  %v1070_v57 = vmax.f32 %v1057_v17, 0.0  ;;  %v1329_v0 = vmul.f32 %v2341_v49, %v1171_v28  ;;  %v1247_v32 = vld [vmem:[#allocation2 + $0x1d0] sm:$0xff]  ;;  %v2359_v33 = vld [vmem:[%s2501_s9 + $0x8] ss:$0 sm:$0xff]  ;;  %v1231_v28 = vmul.f32 %v2310_v27, %v1222_v43 }
  0xe3   : > { %1146 = vst.msk [vmem:[#allocation2 + $0x1e0] sm:$0xff] %vm786_vm1, %v1138_v42  ;;  %v1354_v17 = vmul.f32 %v2359_v33, %v1196_v30  ;;  %v1165_v44 = vmul.f32 %v2297_v63, %v1156_v48 }
  0xe4   : > { %v1188_v6 = vadd.f32 %v1180_v61, %v1163_v2  ;;  %1078 = vst.msk [vmem:[#allocation2 + $0x161] sm:$0xff] %vm786_vm1, %v1070_v57  ;;  %v1337_v55 = vadd.f32 %v1329_v0, %v1312_v5  ;;  %v1355_v61 = vmul.f32 %v2359_v33, %v1346_v41 }
  0xe5   : > { %v981_v13 = vpop.f32.mrf.mxu2 }
  0xe6   : > { %v982_v60 = vadd.f32 %v2218_v25, %v981_v13  ;;  %v1213_v4 = vadd.f32 %v1205_v24, %v1188_v6  ;;  %v1125_v38 = vpop.f32.mrf.mxu0  ;;  %v1256_v6 = vmul.f32 %v2317_v15, %v1247_v32 }
  0xe7   : > { %v1126_v23 = vadd.f32 %v2218_v25, %v1125_v38  ;;  %v1058_v56 = vpop.f32.mrf.mxu3 }
  0xe8   : > { %v998_v22 = vmax.f32 %v982_v60, 0.0  ;;  %v1238_v50 = vadd.f32 %v1230_v3, %v1213_v4  ;;  %v1059_v7 = vadd.f32 %v2218_v25, %v1058_v56  ;;  %v1362_v60 = vadd.f32 %v1354_v17, %v1337_v55 }
  0xe9   : > { %v1321_v31 = vld [vmem:[#allocation2 + $0xb0] sm:$0xff]  ;;  %v1139_v40 = vmax.f32 %v1126_v23, 0.0 }
  0xea   : > { %1007 = vst.msk [vmem:[#allocation2 + $0xc0] sm:$0xff] %vm786_vm1, %v998_v22  ;;  %v1263_v37 = vadd.f32 %v1255_v59, %v1238_v50  ;;  %v1181_v47 = vmul.f32 %v1321_v31, %v2292_v18  ;;  %v1071_v46 = vmax.f32 %v1059_v7, 0.0  ;;  %v1330_v42 = vmul.f32 %v2341_v49, %v1321_v31  ;;  %v1223_v59 = vld [vmem:[#allocation2 + $0x150] sm:$0xff] }
  0xeb   : > { %1147 = vst.msk [vmem:[#allocation2 + $0x1f0] sm:$0xff] %vm786_vm1, %v1139_v40  ;;  %v1281_v40 = vmul.f32 %v2324_v35, %v1272_v58 }
  0xec   : > { %v1288_v51 = vadd.f32 %v1280_v8, %v1263_v37  ;;  %v1189_v2 = vadd.f32 %v1181_v47, %v1164_v20  ;;  %1079 = vst.msk [vmem:[#allocation2 + $0x171] sm:$0xff] %vm786_vm1, %v1071_v46  ;;  %v1232_v37 = vmul.f32 %v2310_v27, %v1223_v59  ;;  %v1248_v8 = vld [vmem:[#allocation2 + $0x1e0] sm:$0xff]  ;;  %v1273_v20 = vld [vmem:[#allocation2 + $0x151] sm:$0xff] }
  0xed   : > { %v983_v11 = vpop.f32.mrf.mxu2  ;;  %v1257_v55 = vmul.f32 %v2317_v15, %v1248_v8  ;;  %v1274_v8 = vld [vmem:[#allocation2 + $0x161] sm:$0xff] }
  0xee   : > { %v984_v26 = vadd.f32 %v2218_v25, %v983_v11  ;;  %v1313_v53 = vadd.f32 %v1305_v1, %v1288_v51  ;;  %v1127_v12 = vpop.f32.mrf.mxu0  ;;  %v1214_v57 = vadd.f32 %v1206_v16, %v1189_v2  ;;  %v1306_v51 = vmul.f32 %v2335_v29, %v1156_v48  ;;  %v1298_v2 = vld [vmem:[#allocation2 + $0x40] sm:$0xff] }
  0xef   : > { %v1128_v10 = vadd.f32 %v2218_v25, %v1127_v12  ;;  %v1061_v4 = vpop.f32.mrf.mxu3  ;;  %v1348_v12 = vld [vmem:[#allocation2 + $0x41] sm:$0xff] }
  0xf0   : > { %v999_v24 = vmax.f32 %v984_v26, 0.0  ;;  %v1338_v13 = vadd.f32 %v1330_v42, %v1313_v53  ;;  %v1239_v38 = vadd.f32 %v1231_v28, %v1214_v57  ;;  %v1062_v23 = vadd.f32 %v2218_v25, %v1061_v4  ;;  %v1224_v48 = vld [vmem:[#allocation2 + $0x160] sm:$0xff] }
  0xf1   : > { %v1173_v3 = vld [vmem:[#allocation2 + $0xc0] sm:$0xff]  ;;  %v1140_v22 = vmax.f32 %v1128_v10, 0.0  ;;  %v1282_v28 = vmul.f32 %v2324_v35, %v1273_v20  ;;  %v1166_v57 = vmul.f32 %v1298_v2, %v2297_v63  ;;  %v1307_v10 = vmul.f32 %v2335_v29, %v1298_v2  ;;  %v1200_v20 = vld [vmem:[#allocation2 + $0x51] sm:$0xff] }
  0xf2   : > { %1008 = vst.msk [vmem:[#allocation2 + $0xd0] sm:$0xff] %vm786_vm1, %v999_v24  ;;  %v1363_v30 = vadd.f32 %v1355_v61, %v1338_v13  ;;  %v1182_v50 = vmul.f32 %v2292_v18, %v1173_v3  ;;  %v1264_v56 = vadd.f32 %v1256_v6, %v1239_v38  ;;  %v1072_v31 = vmax.f32 %v1062_v23, 0.0 }
  0xf3   : > { %1148 = vst.msk [vmem:[#allocation2 + $0x200] sm:$0xff] %vm786_vm1, %v1140_v22  ;;  %v1208_v58 = vmul.f32 %v1348_v12, %v2305_v39 }
  0xf4   : > { %v1370_v5 = vpack.c.bf16 %v1363_v30, %v1362_v60  ;;  %v1190_v0 = vadd.f32 %v1182_v50, %v1165_v44  ;;  %1080 = vst.msk [vmem:[#allocation2 + $0x181] sm:$0xff] %vm786_vm1, %v1072_v31  ;;  %v1289_v47 = vadd.f32 %v1281_v40, %v1264_v56  ;;  %v1331_v44 = vmul.f32 %v2341_v49, %v1173_v3  ;;  %v1249_v60 = vld [vmem:[#allocation2 + $0x1f0] sm:$0xff] }
  0xf5   : > { %v986_v7 = vpop.f32.mrf.mxu2  ;;  %v1233_v30 = vmul.f32 %v2310_v27, %v1224_v48  ;;  %v1356_v56 = vmul.f32 %v2359_v33, %v2371_v45  ;;  %v1258_v31 = vmul.f32 %v2317_v15, %v1249_v60  ;;  %v1275_v48 = vld [vmem:[#allocation2 + $0x171] sm:$0xff] }
  0xf6   : > { %v987_v41 = vadd.f32 %v2218_v25, %v986_v7  ;;  %1675 = vmatmul.msk.bf16.vlgmr.msrb.gmra.mxu1 %vm786_vm1, %v1370_v5  ;;  %v1215_v43 = vadd.f32 %v1207_v54, %v1190_v0  ;;  %v1130_v46 = vpop.f32.mrf.mxu0  ;;  %v1314_v61 = vadd.f32 %v1306_v51, %v1289_v47  ;;  %v1158_v54 = vld [vmem:[#allocation2 + $0x50] sm:$0xff]  ;;  %v1357_v7 = vmul.f32 %v2359_v33, %v1348_v12 }
  0xf7   : > { %v1131_v32 = vadd.f32 %v2218_v25, %v1130_v46  ;;  %v1063_v16 = vpop.f32.mrf.mxu3 }
  0xf8   : > { %v1000_v1 = vmax.f32 %v987_v41, 0.0  ;;  %v1240_v11 = vadd.f32 %v1232_v37, %v1215_v43  ;;  %v1064_v42 = vadd.f32 %v2218_v25, %v1063_v16  ;;  %v1339_v59 = vadd.f32 %v1331_v44, %v1314_v61  ;;  %v1350_v44 = vld [vmem:[#allocation2 + $0x61] sm:$0xff] }
  0xf9   : > { %v1323_v26 = vld [vmem:[#allocation2 + $0xd0] sm:$0xff]  ;;  %v1141_v53 = vmax.f32 %v1131_v32, 0.0  ;;  %v1167_v41 = vmul.f32 %v2297_v63, %v1158_v54 }
  0xfa   : > { %1009 = vst.msk [vmem:[#allocation2 + $0xe0] sm:$0xff] %vm786_vm1, %v1000_v1  ;;  %v1265_v17 = vadd.f32 %v1257_v55, %v1240_v11  ;;  %v1183_v6 = vmul.f32 %v1323_v26, %v2292_v18  ;;  %v1073_v24 = vmax.f32 %v1064_v42, 0.0  ;;  %v1332_v50 = vmul.f32 %v2341_v49, %v1323_v26  ;;  %v1225_v32 = vld [vmem:[#allocation2 + $0x170] sm:$0xff] }
  0xfb   : > { %1149 = vst.msk [vmem:[#allocation2 + $0x210] sm:$0xff] %vm786_vm1, %v1141_v53  ;;  %v1364_v46 = vadd.f32 %v1356_v56, %v1339_v59  ;;  %v1283_v55 = vmul.f32 %v2324_v35, %v1274_v8  ;;  %v1250_v53 = vld [vmem:[#allocation2 + $0x200] sm:$0xff]  ;;  %v1234_v12 = vmul.f32 %v2310_v27, %v1225_v32 }
  0xfc   : > { %v1290_v13 = vadd.f32 %v1282_v28, %v1265_v17  ;;  %v1191_v38 = vadd.f32 %v1183_v6, %v1166_v57  ;;  %1081 = vst.msk [vmem:[#allocation2 + $0x191] sm:$0xff] %vm786_vm1, %v1073_v24  ;;  %v1209_v28 = vmul.f32 %v2305_v39, %v1200_v20  ;;  %v1300_v57 = vld [vmem:[#allocation2 + $0x60] sm:$0xff]  ;;  %v1308_v6 = vmul.f32 %v2335_v29, %v1158_v54 }
  0xfd   : > { %v988_v4 = vpop.f32.mrf.mxu2  ;;  %v1210_v54 = vmul.f32 %v1350_v44, %v2305_v39 }
  0xfe   : > { %v989_v22 = vadd.f32 %v2218_v25, %v988_v4  ;;  %v1315_v23 = vadd.f32 %v1307_v10, %v1290_v13  ;;  %v1132_v3 = vpop.f32.mrf.mxu0  ;;  %v1216_v5 = vadd.f32 %v1208_v58, %v1191_v38  ;;  %v1259_v10 = vmul.f32 %v2317_v15, %v1250_v53  ;;  %v1226_v38 = vld [vmem:[#allocation2 + $0x180] sm:$0xff] }
  0xff   : > { %v1133_v37 = vadd.f32 %v2218_v25, %v1132_v3  ;;  %v1309_v3 = vmul.f32 %v2335_v29, %v1300_v57 }
 0x100   : > { %v1001_v0 = vmax.f32 %v989_v22, 0.0  ;;  %v1340_v40 = vadd.f32 %v1332_v50, %v1315_v23  ;;  %v1241_v47 = vadd.f32 %v1233_v30, %v1216_v5  ;;  %v1284_v30 = vmul.f32 %v2324_v35, %v1275_v48 }
 0x101   : > { %v1175_v43 = vld [vmem:[#allocation2 + $0xe0] sm:$0xff]  ;;  %v1142_v51 = vmax.f32 %v1133_v37, 0.0  ;;  %v1168_v22 = vmul.f32 %v1300_v57, %v2297_v63 }
 0x102   : > { %1010 = vst.msk [vmem:[#allocation2 + $0xf0] sm:$0xff] %vm786_vm1, %v1001_v0  ;;  %v1365_v45 = vadd.f32 %v1357_v7, %v1340_v40  ;;  %v1184_v1 = vmul.f32 %v2292_v18, %v1175_v43  ;;  %v1266_v11 = vadd.f32 %v1258_v31, %v1241_v47  ;;  %v1251_v50 = vld [vmem:[#allocation2 + $0x210] sm:$0xff]  ;;  %v1333_v59 = vmul.f32 %v2341_v49, %v1175_v43 }
 0x103   : > { %1150 = vst.msk [vmem:[#allocation2 + $0x220] sm:$0xff] %vm786_vm1, %v1142_v51  ;;  %v1235_v31 = vmul.f32 %v2310_v27, %v1226_v38  ;;  %v1260_v7 = vmul.f32 %v2317_v15, %v1251_v50  ;;  %v1160_v47 = vld [vmem:[#allocation2 + $0x70] sm:$0xff]  ;;  %v1358_v43 = vmul.f32 %v2359_v33, %v1200_v20 }
 0x104   : > { %v1371_v2 = vpack.c.bf16 %v1365_v45, %v1364_v46  ;;  %v1192_v16 = vadd.f32 %v1184_v1, %v1167_v41  ;;  %v1291_v42 = vadd.f32 %v1283_v55, %v1266_v11  ;;  %v1359_v1 = vmul.f32 %v2359_v33, %v1350_v44  ;;  %v1302_v44 = vld [vmem:[#allocation2 + $0x80] sm:$0xff] }
 0x105   : > { %v991_v26 = vpop.f32.mrf.mxu2  ;;  %v1169_v11 = vmul.f32 %v2297_v63, %v1160_v47 }
 0x106   : > { %v992_v17 = vadd.f32 %v2218_v25, %v991_v26  ;;  %1676 = vmatmul.msk.bf16.gmra.mxu1 %vm786_vm1, %v1371_v2  ;;  %v1217_v61 = vadd.f32 %v1209_v28, %v1192_v16  ;;  %v1316_v60 = vadd.f32 %v1308_v6, %v1291_v42  ;;  %v1202_v2 = vld [vmem:[#allocation2 + $0x71] sm:$0xff]  ;;  %v1276_v16 = vld [vmem:[#allocation2 + $0x181] sm:$0xff] }
 0x107   : > { %v1227_v42 = vld [vmem:[#allocation2 + $0x190] sm:$0xff] }
 0x108   : > { %v1002_v24 = vmax.f32 %v992_v17, 0.0  ;;  %v1242_v13 = vadd.f32 %v1234_v12, %v1217_v61  ;;  %v1341_v40 = vadd.f32 %v1333_v59, %v1316_v60  ;;  %v1211_v61 = vmul.f32 %v2305_v39, %v1202_v2 }
 0x109   : > { %v1325_v4 = vld [vmem:[#allocation2 + $0xf0] sm:$0xff]  ;;  %v1285_v12 = vmul.f32 %v2324_v35, %v1276_v16  ;;  %v1236_v57 = vmul.f32 %v2310_v27, %v1227_v42  ;;  %v1711_v42 = vld [vmem:[%s2498_s6] ss:$0 sm:$0xff] }
 0x10a   : > { %1011 = vst.msk [vmem:[#allocation2 + $0x100] sm:$0xff] %vm786_vm1, %v1002_v24  ;;  %v1267_v58 = vadd.f32 %v1259_v10, %v1242_v13  ;;  %v1185_v23 = vmul.f32 %v1325_v4, %v2292_v18  ;;  %v1334_v41 = vmul.f32 %v2341_v49, %v1325_v4  ;;  %v1252_v48 = vld [vmem:[#allocation2 + $0x220] sm:$0xff]  ;;  %v1277_v24 = vld [vmem:[#allocation2 + $0x191] sm:$0xff] }
 0x10b   : > { %v1261_v10 = vmul.f32 %v2317_v15, %v1252_v48  ;;  %v1286_v4 = vmul.f32 %v2324_v35, %v1277_v24  ;;  %v1360_v15 = vmul.f32 %v2359_v33, %v1202_v2  ;;  %v769_v48 = vadd.f32 %v1711_v42, %v2233_v14 }
 0x10c   : > { %v1292_v56 = vadd.f32 %v1284_v30, %v1267_v58  ;;  %v1193_v5 = vadd.f32 %v1185_v23, %v1168_v22  ;;  %v1311_v30 = vmul.f32 %v2335_v29, %v1302_v44  ;;  %v1352_v23 = vld [vmem:[#allocation2 + $0x81] sm:$0xff]  ;;  %v764_v44 = vadd.f32 %v1711_v42, %v2237_v19 }
 0x10d   : > { %v993_v0 = vpop.f32.mrf.mxu2 }
 0x10e   : > { %v994_v37 = vadd.f32 %v2218_v25, %v993_v0  ;;  %v1317_v8 = vadd.f32 %v1309_v3, %v1292_v56  ;;  %v1218_v46 = vadd.f32 %v1210_v54, %v1193_v5  ;;  %v1366_v25 = vadd.f32 %v1358_v43, %v1341_v40 }
 0x10f   : > { %v1361_v56 = vmul.f32 %v2359_v33, %v1352_v23  ;;  %v780_v14 = vmax.f32 %v764_v44, 0.0 }
 0x110   : > { %v1003_v45 = vmax.f32 %v994_v37, 0.0  ;;  %v1342_v51 = vadd.f32 %v1334_v41, %v1317_v8  ;;  %v1243_v32 = vadd.f32 %v1235_v31, %v1218_v46 }
 0x111   : > { %v1177_v55 = vld [vmem:[#allocation2 + $0x100] sm:$0xff] }
 0x112   : > { %1012 = vst.msk [vmem:[#allocation2 + $0x110] sm:$0xff] %vm786_vm1, %v1003_v45  ;;  %v1367_v28 = vadd.f32 %v1359_v1, %v1342_v51  ;;  %v1186_v26 = vmul.f32 %v2292_v18, %v1177_v55  ;;  %v1268_v53 = vadd.f32 %v1260_v7, %v1243_v32  ;;  %v1310_v18 = vmul.f32 %v2335_v29, %v1160_v47  ;;  %v1713_v29 = vld [vmem:[%s2503_s11] ss:$0 sm:$0xff] }
 0x113   : > { %v1335_v22 = vmul.f32 %v2341_v49, %v1177_v55 }
 0x114   : > { %v1372_v17 = vpack.c.bf16 %v1367_v28, %v1366_v25  ;;  %v1194_v20 = vadd.f32 %v1186_v26, %v1169_v11  ;;  %v1293_v6 = vadd.f32 %v1285_v12, %v1268_v53 }
 0x116   : > { %1677 = vmatmul.msk.bf16.gmra.mxu1 %vm786_vm1, %v1372_v17  ;;  %v1219_v63 = vadd.f32 %v1211_v61, %v1194_v20  ;;  %v1318_v39 = vadd.f32 %v1310_v18, %v1293_v6  ;;  %v759_v17 = vadd.f32 %v1711_v42, %v2222_v62  ;;  %v761_v62 = vadd.f32 %v1711_v42, %v2230_v34 }
 0x117   : > { %v771_v18 = vadd.f32 %v1711_v42, %v2248_v21 }
 0x118   : > { %v1244_v13 = vadd.f32 %v1236_v57, %v1219_v63  ;;  %v1343_v59 = vadd.f32 %v1335_v22, %v1318_v39  ;;  %v778_v20 = vmax.f32 %v759_v17, 0.0  ;;  %v782_v63 = vmax.f32 %v769_v48, 0.0 }
 0x119   : > { %v1327_v38 = vld [vmem:[#allocation2 + $0x110] sm:$0xff]  ;;  %v779_v57 = vmax.f32 %v761_v62, 0.0  ;;  %v783_v34 = vmax.f32 %v771_v18, 0.0  ;;  %v774_v22 = vadd.f32 %v1711_v42, %v2270_v36 }
 0x11a   : > { %v1269_v60 = vadd.f32 %v1261_v10, %v1244_v13  ;;  %v1336_v50 = vmul.f32 %v2341_v49, %v1327_v38  ;;  %v1368_v3 = vadd.f32 %v1360_v15, %v1343_v59  ;;  %v776_v59 = vadd.f32 %v1711_v42, %v2289_v52 }
 0x11b   : > { %v784_v23 = vmax.f32 %v774_v22, 0.0 }
 0x11c   : > { %v1294_v58 = vadd.f32 %v1286_v4, %v1269_v60 }
 0x11e   : > { %v1319_v27 = vadd.f32 %v1311_v30, %v1294_v58  ;;  %v766_v58 = vadd.f32 %v1711_v42, %v2256_v9 }
 0x120   : > { %v1344_v54 = vadd.f32 %v1336_v50, %v1319_v27  ;;  %v781_v21 = vmax.f32 %v766_v58, 0.0 }
 0x122   : > { %v1369_v5 = vadd.f32 %v1361_v56, %v1344_v54  ;;  %v785_v54 = vmax.f32 %v776_v59, 0.0 }
 0x124   : > { %v1373_v35 = vpack.c.bf16 %v1369_v5, %v1368_v3 }
 0x126   : > { %1678 = vmatmul.msk.bf16.gmra.mxu1 %vm786_vm1, %v1373_v35 }
 0x173   : > { %v1404_v31 = vpop.f32.mrf.mxu1 }
 0x174   : > { %v1405_v0 = vadd.f32 %v1713_v29, %v1404_v31 }
 0x176   : > { %v1424_v40 = vmax.f32 %v1405_v0, 0.0 }
 0x178   : > { %1440 = vrot.lane.b32.xlu0 %v1424_v40, %s1723_s16 }
 0x17b   : > { %v1406_v49 = vpop.f32.mrf.mxu1 }
 0x17c   : > { %v1407_v7 = vadd.f32 %v1713_v29, %v1406_v49 }
 0x17e   : > { %v1425_v37 = vmax.f32 %v1407_v7, 0.0 }
 0x180   : > { %1442 = vrot.lane.b32.xlu0 %v1425_v37, %s1723_s16 }
 0x183   : > { %v1409_v8 = vpop.f32.mrf.mxu1 }
 0x184   : > { %v1410_v33 = vadd.f32 %v1713_v29, %v1409_v8 }
 0x186   : > { %v1426_v41 = vmax.f32 %v1410_v33, 0.0 }
 0x188   : > { %1444 = vrot.lane.b32.xlu1 %v1426_v41, %s1723_s16 }
 0x18b   : > { %v1411_v47 = vpop.f32.mrf.mxu1 }
 0x18c   : > { %v1412_v46 = vadd.f32 %v1713_v29, %v1411_v47 }
 0x18e   : > { %v1427_v43 = vmax.f32 %v1412_v46, 0.0 }
 0x190   : > { %1446 = vrot.lane.b32.xlu1 %v1427_v43, %s1723_s16 }
 0x193   : > { %v1414_v45 = vpop.f32.mrf.mxu1 }
 0x194   : > { %v1415_v51 = vadd.f32 %v1713_v29, %v1414_v45 }
 0x196   : > { %v1428_v1 = vmax.f32 %v1415_v51, 0.0 }
 0x198   : > { %1448 = vrot.lane.b32.xlu2 %v1428_v1, %s1723_s16 }
 0x19b   : > { %v1416_v32 = vpop.f32.mrf.mxu1 }
 0x19c   : > { %v1417_v11 = vadd.f32 %v1713_v29, %v1416_v32 }
 0x19e   : > { %v1429_v55 = vmax.f32 %v1417_v11, 0.0 }
 0x1a0   : > { %1450 = vrot.lane.b32.xlu2 %v1429_v55, %s1723_s16 }
 0x1a3   : > { %v1419_v2 = vpop.f32.mrf.mxu1 }
 0x1a4   : > { %v1420_v16 = vadd.f32 %v1713_v29, %v1419_v2 }
 0x1a6   : > { %v1430_v25 = vmax.f32 %v1420_v16, 0.0 }
 0x1a8   : > { %1452 = vrot.lane.b32.xlu0 %v1430_v25, %s1723_s16 }
 0x1ab   : > { %v1421_v28 = vpop.f32.mrf.mxu1 }
 0x1ac   : > { %v1422_v26 = vadd.f32 %v1713_v29, %v1421_v28 }
 0x1ae   : > { %v1431_v53 = vmax.f32 %v1422_v26, 0.0 }
 0x1b0   : > { %1454 = vrot.lane.b32.xlu1 %v1431_v53, %s1723_s16 }
 0x1ea   : > { %v1441_v61 = vpop.permute.xlu0 %1440 }
 0x1eb   : > { %v1464_v12 = vsel %vm786_vm1, %v778_v20, %v1441_v61 }
 0x1ec   : > { %1473 = vst.msk [vmem:[%s2456_s24] sm:$0xff] %vm1472_vm4, %v1464_v12 }
 0x1f2   : > { %v1449_v6 = vpop.permute.xlu2 %1448  ;;  %v1443_v24 = vpop.permute.xlu0 %1442 }
 0x1f3   : > { %v1468_v13 = vsel %vm786_vm1, %v782_v63, %v1449_v6  ;;  %v1465_v10 = vsel %vm786_vm1, %v779_v57, %v1443_v24 }
 0x1f4   : > { %1477 = vst.msk [vmem:[%s2456_s24 + $0x20] sm:$0xff] %vm1472_vm4, %v1468_v13 }
 0x1f5   : > { %1474 = vst.msk [vmem:[%s2456_s24 + $0x8] sm:$0xff] %vm1472_vm4, %v1465_v10 }
 0x1fa   : > { %v1451_v60 = vpop.permute.xlu2 %1450  ;;  %v1445_v4 = vpop.permute.xlu1 %1444 }
 0x1fb   : > { %v1469_v39 = vsel %vm786_vm1, %v783_v34, %v1451_v60  ;;  %v1466_v38 = vsel %vm786_vm1, %v780_v14, %v1445_v4 }
 0x1fc   : > { %1478 = vst.msk [vmem:[%s2456_s24 + $0x28] sm:$0xff] %vm1472_vm4, %v1469_v39 }
 0x1fd   : > { %1475 = vst.msk [vmem:[%s2456_s24 + $0x10] sm:$0xff] %vm1472_vm4, %v1466_v38 }
 0x202   : > { %v1447_v19 = vpop.permute.xlu1 %1446 }
 0x203   : > { %v1467_v30 = vsel %vm786_vm1, %v781_v21, %v1447_v19 }
 0x204   : > { %1476 = vst.msk [vmem:[%s2456_s24 + $0x18] sm:$0xff] %vm1472_vm4, %v1467_v30 }
 0x21a   : > { %v1453_v27 = vpop.permute.xlu0 %1452 }
 0x21b   : > { %v1470_v50 = vsel %vm786_vm1, %v784_v23, %v1453_v27 }
 0x21c   : > { %1479 = vst.msk [vmem:[%s2456_s24 + $0x30] sm:$0xff] %vm1472_vm4, %v1470_v50 }
 0x222   : > { %v1455_v9 = vpop.permute.xlu1 %1454 }
 0x223   : > { %v1471_v15 = vsel %vm786_vm1, %v785_v54, %v1455_v9 }
 0x224   : > { %1480 = vst.msk [vmem:[%s2456_s24 + $0x38] sm:$0xff] %vm1472_vm4, %v1471_v15 }
 0x225 PF: > { %s22_s21 = sadd.s32 1, %s1720_s21  }
 0x226   : > { %p19_p4 = scmp.ge.s32.totalorder %s22_s21, 4  }
 0x228   :  { %21 = sbr.rel (!%p19_p4) target bundleno = 1 (0x1), region = 116 }

// kernel: tokenpose_forward.7
= control target key start
LH: loop header
LB: loop body
LE: loop exit
PB: predicated region body
PF: predicated region fallthrough
CT: control target
= control target key end

     0   :  { %s411_s18 = smov 0   ;;  %s449_s0 = inlined_call_operand.vmem [shape: f32[2,16,32], index: 0, kind: input, shape index: {}]   ;;  %s450_s1 = inlined_call_operand.vmem [shape: bf16[32,32], index: 1, kind: input, shape index: {}]   ;;  %s451_s2 = inlined_call_operand.vmem [shape: f32[1,32], index: 2, kind: input, shape index: {}]   ;;  %s452_s3 = inlined_call_operand.vmem [shape: f32[16,32], index: 3, kind: input, shape index: {}]   ;;  %s453_s4 = inlined_call_operand.vmem [shape: f32[1,32], index: 4, kind: input, shape index: {}]   ;;  %s454_s5 = inlined_call_operand.vmem [shape: f32[2,17,32], index: 5, kind: output, shape index: {}]  }
   0x1 LB: > { %s341_s19 = sadd.s32 4294967295, %s379_s18   ;;  %p345_p0 = scmp.ge.s32.totalorder %s379_s18, 1  ;;  %s379_s18 = sphi %s411_s18, %s15_s18  }
   0x2   : > { %p187_p1 = scmp.lt.s32.totalorder %s379_s18, 3 }
   0x4   : > { %p188_p2 = pnand %p345_p0, %p187_p1 }
   0x5   : > { %p215_p3 = scmp.lt.s32.totalorder (!%p188_p2), %s341_s19, 1 }
   0x6   : > { %191 = sbr.rel (%p188_p2) target bundleno = 161 (0xa1), region = 40 }
   0xb   : > { %v362_v0 = vld [vmem:[%s450_s1 + $0x8] sm:$0xff]  ;;  %v361_v1 = vld [vmem:[%s450_s1] sm:$0xff]  ;;  %s456_s19 = smov (!%p215_p3, %s341_s19), 1  ;;  %vm249_vm0 = vcmask 261120   ;;  %vm274_vm1 = vcmask 1040384   ;;  %vm284_vm2 = vcmask 253952  }
   0xc   : > { %259 = vmatpush.bf16.msra.mxu0 %v362_v0  ;;  %s360_s24 = sshll.u32 %s456_s19, 4  ;;  %v372_v5 = vld [vmem:[%s451_s2] ss:$0 sm:$0xff]  ;;  %s363_s7 = smul.u32 24, %s456_s19  ;;  %v268_v14 = vld [vmem:[%s452_s3 + $0x8] sm:$0xff] }
   0xd   : > { %s219_s27 = scalar_lea.vmem %s449_s0, %s360_s24  ;;  %v267_v7 = vld [vmem:[%s452_s3] sm:$0xff] }
   0xe   : > { %v226_v2 = vld [vmem:[%s219_s27] sm:$0xff]  ;;  %v227_v3 = vld [vmem:[%s219_s27 + $0x8] sm:$0xff]  ;;  %s224_s12 = scalar_lea.vmem %s454_s5, %s363_s7 }
   0xf   : > { %v228_v4 = vpack.c.bf16 %v227_v3, %v226_v2  ;;  %v271_v10 = vld [vmem:[%s453_s4] sm:$0x1] }
  0x10   : > { %260 = vmatpush.bf16.msra.mxu0 %v361_v1 }
  0x13   : > { %357 = vmatmul.msk.bf16.vlgmr.msra.gmra.mxu0 %vm249_vm0, %v228_v4 }
  0x90   : > { %v262_v6 = vpop.f32.mrf.mxu0 }
  0x91   : > { %v263_v8 = vadd.f32 %v372_v5, %v262_v6 }
  0x93   : > { %v269_v9 = vadd.f32 %v267_v7, %v263_v8 }
  0x95   : > { %v275_v11 = vrot.slane %v269_v9, 7 }
  0x97   : > { %v281_v12 = vsel %vm274_vm1, %v271_v10, %v275_v11 }
  0x98   : > { %282 = vst.msk [vmem:[%s224_s12] sm:$0xff] %vm249_vm0, %v281_v12  ;;  %v264_v13 = vpop.f32.mrf.mxu0 }
  0x99   : > { %v265_v15 = vadd.f32 %v372_v5, %v264_v13 }
  0x9b   : > { %v270_v16 = vadd.f32 %v268_v14, %v265_v15 }
  0x9d   : > { %v276_v17 = vrot.slane %v270_v16, 7 }
  0x9f   : > { %v277_v18 = vsel %vm274_vm1, %v275_v11, %v276_v17  ;;  %285 = vst.msk [vmem:[%s224_s12 + $0x10] sm:$0x1] %vm284_vm2, %v276_v17 }
  0xa0   : > { %283 = vst.msk [vmem:[%s224_s12 + $0x8] sm:$0xff] %vm249_vm0, %v277_v18 }
  0xa1 PF: > { %s15_s18 = sadd.s32 1, %s379_s18  }
  0xa2   : > { %p12_p4 = scmp.ge.s32.totalorder %s15_s18, 4  }
  0xa4   :  { %14 = sbr.rel (!%p12_p4) target bundleno = 1 (0x1), region = 70 }

// kernel: tokenpose_forward.6
= control target key start
LH: loop header
LB: loop body
LE: loop exit
PB: predicated region body
PF: predicated region fallthrough
CT: control target
= control target key end

     0   :  { %s2146_s21 = smov 0   ;;  %s2896_s0 = inlined_call_operand.vmem [shape: f32[2,64,8], index: 0, kind: input, shape index: {}]   ;;  %s2897_s1 = inlined_call_operand.vmem [shape: bf16[4,4], index: 1, kind: input, shape index: {}]   ;;  %s2898_s2 = inlined_call_operand.vmem [shape: f32[1,4], index: 2, kind: input, shape index: {}]   ;;  %s2899_s3 = inlined_call_operand.vmem [shape: f32[9,4], index: 3, kind: input, shape index: {}]   ;;  %s2900_s4 = inlined_call_operand.vmem [shape: bf16[4,4], index: 4, kind: input, shape index: {}]   ;;  %s2901_s5 = inlined_call_operand.vmem [shape: f32[1,4], index: 5, kind: input, shape index: {}]   ;;  %s2902_s6 = inlined_call_operand.vmem [shape: bf16[4,4], index: 6, kind: input, shape index: {}]   ;;  %s2903_s7 = inlined_call_operand.vmem [shape: f32[1,4], index: 7, kind: input, shape index: {}]   ;;  %s2904_s8 = inlined_call_operand.vmem [shape: f32[9,4], index: 8, kind: input, shape index: {}]   ;;  %s2905_s9 = inlined_call_operand.vmem [shape: bf16[4,4], index: 9, kind: input, shape index: {}]   ;;  %s2906_s10 = inlined_call_operand.vmem [shape: f32[1,4], index: 10, kind: input, shape index: {}]   ;;  %s2907_s11 = inlined_call_operand.vmem [shape: bf16[4,4], index: 11, kind: input, shape index: {}]   ;;  %s2908_s12 = inlined_call_operand.vmem [shape: f32[1,4], index: 12, kind: input, shape index: {}]   ;;  %s2909_s13 = inlined_call_operand.vmem [shape: f32[9,4], index: 13, kind: input, shape index: {}]   ;;  %s2910_s14 = inlined_call_operand.vmem [shape: bf16[4,4], index: 14, kind: input, shape index: {}]   ;;  %s2911_s15 = inlined_call_operand.vmem [shape: f32[1,4], index: 15, kind: input, shape index: {}]   ;;  %s2912_s16 = inlined_call_operand.vmem [shape: f32[2,64,8], index: 16, kind: output, shape index: {}]  }
   0x1   :  { %2913 = sst [smem:[#allocation3_spill]] %s2896_s0 }
   0x2 LB: > { %s1915_s22 = sadd.s32 4294967295, %s2052_s21   ;;  %p1919_p0 = scmp.ge.s32.totalorder %s2052_s21, 1  ;;  %s2052_s21 = sphi %s2146_s21, %s26_s21  }
   0x3   : > { %p462_p1 = scmp.lt.s32.totalorder %s2052_s21, 3 }
   0x5   : > { %p463_p2 = pnand %p1919_p0, %p462_p1 }
   0x6   : > { %p512_p3 = scmp.lt.s32.totalorder (!%p463_p2), %s1915_s22, 1  ;;  %s2914_s26 = sld [smem:[#allocation3_spill]] (!%p463_p2) }
   0x7   : > { %466 = sbr.rel (%p463_p2) target bundleno = 1228 (0x4cc), region = 84  ;;  %s2054_s28 = smov (!%p463_p2), 126  }
   0x8   : > { %s2055_s29 = smov (!%p463_p2), 124   ;;  %s2056_s30 = smov (!%p463_p2), 127  }
   0x9   : > { %s2058_s19 = smov (!%p463_p2), 1   ;;  %s2059_s24 = smov (!%p463_p2), 2  }
   0xc   : > { %s2916_s22 = smov (!%p512_p3, %s1915_s22), 1  ;;  %v559_v12 = vld [vmem:[%s2897_s1] sm:$0x3]  ;;  %vm649_vm0 = vcmask 1041408   ;;  %vm621_vm1 = vcmask 15360   ;;  %vm523_vm2 = vcmask 31744  }
   0xd   : > { %s1950_s23 = sshll.u32 %s2916_s22, 6  ;;  %v651_v13 = vsel %vm649_vm0, %v559_v12, 0  ;;  %v2057_v50 = vmov 0.0   ;;  %vm525_vm3 = vcmask 25600   ;;  %vm530_vm4 = vcmask 24576   ;;  %v2250_v60 = vld [vmem:[%s2899_s3] sm:$0xff] }
   0xe   : > { %s2162_s27 = scalar_lea.vmem %s2914_s26, %s1950_s23  ;;  %1952 = vmatpush.bf16.msra.mxu2 %v651_v13  ;;  %660 = vmatpush.bf16.msra.mxu0 %v651_v13  ;;  %524 = vst.msk [vmem:[#allocation2] sm:$0xff] %vm523_vm2, %v2057_v50  ;;  %v2226_v51 = vld [vmem:[%s2898_s2] ss:$0 sm:$0xff]  ;;  %v2254_v63 = vperm.slane %v2250_v60, 0  ;;  %v2277_v12 = vperm.slane %v2250_v60, 3  ;;  %vm1006_vm5 = vcmask 7168  }
   0xf   : > { %v553_v0 = vld [vmem:[%s2162_s27 + $0x10] sm:$0xff]  ;;  %v554_v1 = vld [vmem:[%s2162_s27 + $0x18] sm:$0xff]  ;;  %v551_v2 = vld [vmem:[%s2162_s27] sm:$0xff]  ;;  %526 = vst.msk [vmem:[#allocation2 + $0x8] sm:$0x3] %vm525_vm3, %v2057_v50  ;;  %vm1851_vm6 = vcmask 64512  }
  0x10   : > { %v1979_v3 = vpack.i.bf16 %v554_v1, %v553_v0  ;;  %v552_v4 = vld [vmem:[%s2162_s27 + $0x8] sm:$0xff]  ;;  %v555_v5 = vld [vmem:[%s2162_s27 + $0x20] sm:$0xff]  ;;  %v557_v9 = vld [vmem:[%s2162_s27 + $0x30] sm:$0xff]  ;;  %531 = vst.msk [vmem:[#allocation2] sm:$0x1] %vm530_vm4, %v2057_v50  ;;  %v2257_v0 = vperm.slane %v2250_v60, 1 }
  0x11   : > { %v556_v6 = vld [vmem:[%s2162_s27 + $0x28] sm:$0xff]  ;;  %v1969_v7 = vpack.i.bf16 %v552_v4, %v551_v2  ;;  %v558_v10 = vld [vmem:[%s2162_s27 + $0x38] sm:$0xff]  ;;  %532 = vst.msk [vmem:[#allocation2 + $0x10] sm:$0x1] %vm530_vm4, %v2057_v50  ;;  %v563_v58 = vld [vmem:[%s2900_s4] sm:$0x3] }
  0x12   : > { %v1989_v8 = vpack.i.bf16 %v556_v6, %v555_v5  ;;  %1980 = vrot.lane.b32.xlu1 %v1979_v3, %s2054_s28  ;;  %v2004_v11 = vpack.i.bf16 %v558_v10, %v557_v9  ;;  %533 = vst.msk [vmem:[#allocation2 + $0x20] sm:$0x1] %vm530_vm4, %v2057_v50  ;;  %v937_v59 = vsel %vm649_vm0, %v563_v58, 0  ;;  %v2269_v6 = vperm.slane %v2250_v60, 2 }
  0x13   : > { %1970 = vrot.lane.b32.xlu0 %v1969_v7, %s2054_s28  ;;  %534 = vst.msk [vmem:[#allocation2 + $0x30] sm:$0x1] %vm530_vm4, %v2057_v50  ;;  %946 = vmatpush.bf16.msra.mxu1 %v937_v59 }
  0x14   : > { %1990 = vrot.lane.b32.xlu2 %v1989_v8, %s2054_s28  ;;  %541 = vst.msk [vmem:[#allocation2 + $0x9] sm:$0x1] %vm530_vm4, %v2057_v50  ;;  %1953 = vmatpush.bf16.msra.mxu3 %v937_v59 }
  0x15   : > { %542 = vst.msk [vmem:[#allocation2 + $0x19] sm:$0x1] %vm530_vm4, %v2057_v50 }
  0x16   : > { %543 = vst.msk [vmem:[#allocation2 + $0x29] sm:$0x1] %vm530_vm4, %v2057_v50  ;;  %v2261_v2 = vld [vmem:[#allocation2 + $0x1] sm:$0xff] }
  0x17   : > { %544 = vst.msk [vmem:[#allocation2 + $0x39] sm:$0x1] %vm530_vm4, %v2057_v50  ;;  %v2259_v1 = vld [vmem:[#allocation2] sm:$0xff]  ;;  %v725_v5 = vmul.f32 %v2257_v0, %v2261_v2 }
  0x18   : > { %528 = vst.msk [vmem:[#allocation2 + $0x90] sm:$0xff] %vm523_vm2, %v2057_v50  ;;  %v708_v4 = vmul.f32 %v2254_v63, %v2259_v1 }
  0x19   : > { %529 = vst.msk [vmem:[#allocation2 + $0x98] sm:$0x3] %vm525_vm3, %v2057_v50 }
  0x1a   : > { %1985 = vrot.lane.b32.xlu1 %v1979_v3, %s2055_s29  ;;  %535 = vst.msk [vmem:[#allocation2 + $0x40] sm:$0x1] %vm530_vm4, %v2057_v50  ;;  %v733_v10 = vadd.f32 %v725_v5, %v708_v4  ;;  %v2316_v4 = vperm.slane %v2250_v60, 7 }
  0x1b   : > { %1975 = vrot.lane.b32.xlu0 %v1969_v7, %s2055_s29  ;;  %536 = vst.msk [vmem:[#allocation2 + $0x50] sm:$0x1] %vm530_vm4, %v2057_v50 }
  0x1c   : > { %1995 = vrot.lane.b32.xlu2 %v1989_v8, %s2055_s29  ;;  %537 = vst.msk [vmem:[#allocation2 + $0x60] sm:$0x1] %vm530_vm4, %v2057_v50 }
  0x1d   : > { %538 = vst.msk [vmem:[#allocation2 + $0x70] sm:$0x1] %vm530_vm4, %v2057_v50 }
  0x1e   : > { %539 = vst.msk [vmem:[#allocation2 + $0x80] sm:$0x1] %vm530_vm4, %v2057_v50 }
  0x1f   : > { %545 = vst.msk [vmem:[#allocation2 + $0x49] sm:$0x1] %vm530_vm4, %v2057_v50 }
  0x20   : > { %546 = vst.msk [vmem:[#allocation2 + $0x59] sm:$0x1] %vm530_vm4, %v2057_v50 }
  0x21   : > { %547 = vst.msk [vmem:[#allocation2 + $0x69] sm:$0x1] %vm530_vm4, %v2057_v50 }
  0x22   : > { %2005 = vrot.lane.b32.xlu1 %v2004_v11, %s2055_s29  ;;  %548 = vst.msk [vmem:[#allocation2 + $0x79] sm:$0x1] %vm530_vm4, %v2057_v50 }
  0x23   : > { %2000 = vrot.lane.b32.xlu0 %v2004_v11, %s2054_s28  ;;  %549 = vst.msk [vmem:[#allocation2 + $0x89] sm:$0x1] %vm530_vm4, %v2057_v50  ;;  %s2841_s28 = scalar_lea.vmem %s2912_s16, %s1950_s23 }
  0x24   : > { %2010 = vrot.lane.b32.xlu2 %v1969_v7, %s2056_s30  ;;  %540 = vst.msk [vmem:[#allocation2 + $0x90] sm:$0x1] %vm530_vm4, %v2057_v50  ;;  %v2271_v7 = vld [vmem:[#allocation2 + $0x2] sm:$0xff] }
  0x25   : > { %550 = vst.msk [vmem:[#allocation2 + $0x99] sm:$0x1] %vm530_vm4, %v2057_v50 }
  0x2a   : > { %2020 = vrot.lane.b32.xlu1 %v1989_v8, %s2056_s30 }
  0x2b   : > { %2015 = vrot.lane.b32.xlu0 %v1979_v3, %s2056_s30 }
  0x2c   : > { %2025 = vrot.lane.b32.xlu2 %v2004_v11, %s2056_s30  ;;  %v750_v11 = vmul.f32 %v2269_v6, %v2271_v7 }
  0x6e   : > { %v1991_v14 = vpop.permute.xlu2 %1990 }
  0x6f   : > { %v1993_v15 = vunpack.i.h.bf16 %v1991_v14  ;;  %v1992_v16 = vunpack.i.l.bf16 %v1991_v14 }
  0x76   : > { %v1996_v17 = vpop.permute.xlu2 %1995 }
  0x77   : > { %v2176_v18 = vunpack.i.h.bf16 %v1996_v17  ;;  %v2178_v19 = vunpack.i.l.bf16 %v1996_v17 }
  0x79   : > { %v626_v20 = vsel %vm621_vm1, %v1992_v16, %v2178_v19  ;;  %v627_v21 = vsel %vm621_vm1, %v1993_v15, %v2176_v18 }
  0x7a   : > { %v632_v22 = vpack.c.bf16 %v627_v21, %v626_v20  ;;  %v758_v20 = vadd.f32 %v750_v11, %v733_v10 }
  0x7c   : > { %1926 = vmatmul.msk.bf16.vlgmr.msra.gmra.mxu2 %vm523_vm2, %v632_v22 }
  0x84   : > { %v1981_v23 = vpop.permute.xlu1 %1980 }
  0x85   : > { %v1971_v24 = vpop.permute.xlu0 %1970  ;;  %v1983_v43 = vunpack.i.h.bf16 %v1981_v23  ;;  %v1982_v44 = vunpack.i.l.bf16 %v1981_v23 }
  0x86   : > { %v1973_v27 = vunpack.i.h.bf16 %v1971_v24  ;;  %v1972_v28 = vunpack.i.l.bf16 %v1971_v24  ;;  %v2285_v24 = vperm.slane %v2250_v60, 4 }
  0x8c   : > { %v1986_v25 = vpop.permute.xlu1 %1985 }
  0x8d   : > { %v1976_v26 = vpop.permute.xlu0 %1975  ;;  %v2202_v45 = vunpack.i.h.bf16 %v1986_v25  ;;  %v2204_v46 = vunpack.i.l.bf16 %v1986_v25 }
  0x8e   : > { %v2185_v29 = vunpack.i.h.bf16 %v1976_v26  ;;  %v2187_v30 = vunpack.i.l.bf16 %v1976_v26 }
  0x8f   : > { %v624_v47 = vsel %vm621_vm1, %v1982_v44, %v2204_v46  ;;  %v625_v48 = vsel %vm621_vm1, %v1983_v43, %v2202_v45 }
  0x90   : > { %v622_v31 = vsel %vm621_vm1, %v1972_v28, %v2187_v30  ;;  %v623_v32 = vsel %vm621_vm1, %v1973_v27, %v2185_v29  ;;  %v631_v49 = vpack.c.bf16 %v625_v48, %v624_v47 }
  0x91   : > { %v630_v33 = vpack.c.bf16 %v623_v32, %v622_v31 }
  0x93   : > { %1924 = vmatmul.msk.bf16.vlgmr.msra.gmra.mxu0 %vm523_vm2, %v630_v33 }
  0x94   : > { %v2006_v34 = vpop.permute.xlu1 %2005 }
  0x95   : > { %v2194_v35 = vunpack.i.h.bf16 %v2006_v34  ;;  %v2196_v36 = vunpack.i.l.bf16 %v2006_v34  ;;  %v2001_v37 = vpop.permute.xlu0 %2000 }
  0x96   : > { %v2003_v38 = vunpack.i.h.bf16 %v2001_v37  ;;  %v2002_v39 = vunpack.i.l.bf16 %v2001_v37  ;;  %v2293_v37 = vperm.slane %v2250_v60, 5 }
  0x98   : > { %v628_v40 = vsel %vm621_vm1, %v2002_v39, %v2196_v36  ;;  %v629_v41 = vsel %vm621_vm1, %v2003_v38, %v2194_v35 }
  0x99   : > { %v633_v42 = vpack.c.bf16 %v629_v41, %v628_v40  ;;  %v2299_v41 = vperm.slane %v2250_v60, 6 }
  0x9b   : > { %1927 = vmatmul.msk.bf16.gmra.mxu2 %vm523_vm2, %v633_v42 }
  0xa3   : > { %1925 = vmatmul.msk.bf16.gmra.mxu0 %vm523_vm2, %v631_v49 }
  0xff   : > { %v672_v52 = vpop.f32.mrf.mxu2 }
 0x100   : > { %v673_v53 = vadd.f32 %v2226_v51, %v672_v52 }
 0x102   : > { %v686_v54 = vmax.f32 %v673_v53, 0.0 }
 0x104   : > { %695 = vst.msk [vmem:[#allocation2 + $0x51] sm:$0xff] %vm523_vm2, %v686_v54 }
 0x107   : > { %v674_v55 = vpop.f32.mrf.mxu2 }
 0x108   : > { %v675_v56 = vadd.f32 %v2226_v51, %v674_v55 }
 0x10a   : > { %v687_v57 = vmax.f32 %v675_v56, 0.0 }
 0x10b   : > { %v2288_v33 = vld [vmem:[#allocation2 + $0x50] sm:$0xff] }
 0x10c   : > { %696 = vst.msk [vmem:[#allocation2 + $0x61] sm:$0xff] %vm523_vm2, %v687_v57  ;;  %v2290_v34 = vld [vmem:[#allocation2 + $0x51] sm:$0xff]  ;;  %v713_v44 = vmul.f32 %v2288_v33, %v2254_v63 }
 0x10d   : > { %v730_v47 = vmul.f32 %v2290_v34, %v2257_v0  ;;  %v2307_v52 = vld [vmem:[#allocation2 + $0x52] sm:$0xff] }
 0x10f   : > { %v738_v5 = vadd.f32 %v730_v47, %v713_v44 }
 0x110   : > { %v662_v61 = vpop.f32.mrf.mxu0 }
 0x111   : > { %v663_v62 = vadd.f32 %v2226_v51, %v662_v61 }
 0x113   : > { %v682_v3 = vmax.f32 %v663_v62, 0.0  ;;  %v2340_v47 = vld [vmem:[#allocation2 + $0x61] sm:$0xff] }
 0x115   : > { %691 = vst.msk [vmem:[#allocation2 + $0x11] sm:$0xff] %vm523_vm2, %v682_v3 }
 0x118   : > { %v664_v8 = vpop.f32.mrf.mxu0 }
 0x119   : > { %v665_v9 = vadd.f32 %v2226_v51, %v664_v8  ;;  %v755_v8 = vmul.f32 %v2307_v52, %v2269_v6 }
 0x11b   : > { %v683_v13 = vmax.f32 %v665_v9, 0.0 }
 0x11c   : > { %v700_v14 = vld [vmem:[#allocation2 + $0x10] sm:$0xff] }
 0x11d   : > { %v717_v15 = vld [vmem:[#allocation2 + $0x11] sm:$0xff]  ;;  %692 = vst.msk [vmem:[#allocation2 + $0x21] sm:$0xff] %vm523_vm2, %v683_v13  ;;  %v709_v16 = vmul.f32 %v2254_v63, %v700_v14  ;;  %v775_v21 = vmul.f32 %v2277_v12, %v700_v14 }
 0x11e   : > { %v726_v17 = vmul.f32 %v2257_v0, %v717_v15  ;;  %v677_v22 = vpop.f32.mrf.mxu2  ;;  %v742_v26 = vld [vmem:[#allocation2 + $0x12] sm:$0xff]  ;;  %v800_v40 = vmul.f32 %v2285_v24, %v717_v15 }
 0x11f   : > { %v678_v23 = vadd.f32 %v2226_v51, %v677_v22  ;;  %v783_v32 = vadd.f32 %v775_v21, %v758_v20  ;;  %v751_v39 = vmul.f32 %v2269_v6, %v742_v26  ;;  %v825_v54 = vmul.f32 %v2293_v37, %v742_v26  ;;  %v2323_v20 = vld [vmem:[#allocation2 + $0x60] sm:$0xff] }
 0x120   : > { %v667_v25 = vpop.f32.mrf.mxu0  ;;  %v734_v31 = vadd.f32 %v726_v17, %v709_v16 }
 0x121   : > { %v688_v27 = vmax.f32 %v678_v23, 0.0  ;;  %v668_v28 = vadd.f32 %v2226_v51, %v667_v25  ;;  %v808_v50 = vadd.f32 %v800_v40, %v783_v32  ;;  %v763_v23 = vadd.f32 %v755_v8, %v738_v5 }
 0x122   : > { %v759_v48 = vadd.f32 %v751_v39, %v734_v31  ;;  %v780_v40 = vmul.f32 %v2277_v12, %v2323_v20 }
 0x123   : > { %697 = vst.msk [vmem:[#allocation2 + $0x71] sm:$0xff] %vm523_vm2, %v688_v27  ;;  %v684_v38 = vmax.f32 %v668_v28, 0.0  ;;  %v833_v13 = vadd.f32 %v825_v54, %v808_v50  ;;  %v2332_v27 = vld [vmem:[%s2899_s3 + $0x8] ss:$0 sm:$0xff] }
 0x124   : > { %v767_v42 = vld [vmem:[#allocation2 + $0x20] sm:$0xff] }
 0x125   : > { %v792_v43 = vld [vmem:[#allocation2 + $0x21] sm:$0xff]  ;;  %693 = vst.msk [vmem:[#allocation2 + $0x31] sm:$0xff] %vm523_vm2, %v684_v38  ;;  %v776_v49 = vmul.f32 %v2277_v12, %v767_v42  ;;  %v710_v55 = vmul.f32 %v767_v42, %v2254_v63  ;;  %v851_v61 = vmul.f32 %v2299_v41, %v767_v42 }
 0x126   : > { %v679_v53 = vpop.f32.mrf.mxu2  ;;  %v727_v56 = vmul.f32 %v792_v43, %v2257_v0  ;;  %v801_v59 = vmul.f32 %v2285_v24, %v792_v43  ;;  %v817_v3 = vld [vmem:[#allocation2 + $0x22] sm:$0xff]  ;;  %v876_v26 = vmul.f32 %v2316_v4, %v792_v43 }
 0x127   : > { %v680_v57 = vadd.f32 %v2226_v51, %v679_v53  ;;  %v784_v58 = vadd.f32 %v776_v49, %v759_v48  ;;  %v826_v16 = vmul.f32 %v2293_v37, %v817_v3  ;;  %v859_v17 = vadd.f32 %v851_v61, %v833_v13 }
 0x128   : > { %v669_v62 = vpop.f32.mrf.mxu0  ;;  %v735_v14 = vadd.f32 %v727_v56, %v710_v55  ;;  %v752_v22 = vmul.f32 %v817_v3, %v2269_v6  ;;  %v901_v50 = vmul.f32 %v2332_v27, %v817_v3  ;;  %v2344_v55 = vld [vmem:[#allocation2 + $0x62] sm:$0xff]  ;;  %v805_v61 = vmul.f32 %v2285_v24, %v2340_v47 }
 0x129   : > { %v689_v9 = vmax.f32 %v680_v57, 0.0  ;;  %v670_v10 = vadd.f32 %v2226_v51, %v669_v62  ;;  %v809_v11 = vadd.f32 %v801_v59, %v784_v58  ;;  %v884_v43 = vadd.f32 %v876_v26, %v859_v17 }
 0x12a   : > { %v760_v38 = vadd.f32 %v752_v22, %v735_v14  ;;  %v2346_v56 = vld [vmem:[#allocation2 + $0x70] sm:$0xff]  ;;  %v788_v59 = vadd.f32 %v780_v40, %v763_v23  ;;  %v854_v3 = vmul.f32 %v2299_v41, %v2288_v33  ;;  %v830_v13 = vmul.f32 %v2293_v37, %v2344_v55 }
 0x12b   : > { %698 = vst.msk [vmem:[#allocation2 + $0x81] sm:$0xff] %vm523_vm2, %v689_v9  ;;  %v685_v15 = vmax.f32 %v670_v10, 0.0  ;;  %v834_v25 = vadd.f32 %v826_v16, %v809_v11  ;;  %v2348_v57 = vld [vmem:[#allocation2 + $0x71] sm:$0xff]  ;;  %v909_v62 = vadd.f32 %v901_v50, %v884_v43  ;;  %v715_v14 = vmul.f32 %v2346_v56, %v2254_v63 }
 0x12c   : > { %v843_v60 = vld [vmem:[#allocation2 + $0x30] sm:$0xff]  ;;  %v714_v22 = vmul.f32 %v2323_v20, %v2254_v63  ;;  %v813_v26 = vadd.f32 %v805_v61, %v788_v59 }
 0x12d   : > { %v868_v21 = vld [vmem:[#allocation2 + $0x31] sm:$0xff]  ;;  %694 = vst.msk [vmem:[#allocation2 + $0x41] sm:$0xff] %vm523_vm2, %v685_v15  ;;  %v852_v51 = vmul.f32 %v2299_v41, %v843_v60  ;;  %v711_v28 = vmul.f32 %v843_v60, %v2254_v63  ;;  %v777_v39 = vmul.f32 %v843_v60, %v2277_v12  ;;  %v732_v15 = vmul.f32 %v2348_v57, %v2257_v0 }
 0x12e   : > { %v893_v31 = vld [vmem:[#allocation2 + $0x32] sm:$0xff]  ;;  %v728_v32 = vmul.f32 %v868_v21, %v2257_v0  ;;  %v877_v44 = vmul.f32 %v2316_v4, %v868_v21  ;;  %v802_v58 = vmul.f32 %v868_v21, %v2285_v24 }
 0x12f   : > { %v860_v42 = vadd.f32 %v852_v51, %v834_v25  ;;  %v785_v48 = vadd.f32 %v777_v39, %v760_v38  ;;  %v902_v53 = vmul.f32 %v2332_v27, %v893_v31  ;;  %v753_v8 = vmul.f32 %v893_v31, %v2269_v6  ;;  %v2363_v21 = vld [vmem:[#allocation2 + $0x72] sm:$0xff] }
 0x130   : > { %v736_v54 = vadd.f32 %v728_v32, %v711_v28  ;;  %v827_v25 = vmul.f32 %v893_v31, %v2293_v37  ;;  %v731_v28 = vmul.f32 %v2340_v47, %v2257_v0  ;;  %v740_v31 = vadd.f32 %v732_v15, %v715_v14 }
 0x131   : > { %v885_v49 = vadd.f32 %v877_v44, %v860_v42  ;;  %v810_v11 = vadd.f32 %v802_v58, %v785_v48  ;;  %v879_v44 = vmul.f32 %v2316_v4, %v2290_v34 }
 0x132   : > { %v761_v17 = vadd.f32 %v753_v8, %v736_v54  ;;  %v856_v54 = vmul.f32 %v2299_v41, %v2346_v56  ;;  %v739_v58 = vadd.f32 %v731_v28, %v714_v22  ;;  %v773_v59 = vld [vmem:[#allocation2 + $0x80] sm:$0xff]  ;;  %v779_v8 = vmul.f32 %v2288_v33, %v2277_v12 }
 0x133   : > { %v910_v5 = vadd.f32 %v902_v53, %v885_v49  ;;  %v835_v42 = vadd.f32 %v827_v25, %v810_v11  ;;  %v838_v53 = vadd.f32 %v830_v13, %v813_v26  ;;  %v904_v11 = vmul.f32 %v2332_v27, %v2307_v52  ;;  %v798_v33 = vld [vmem:[#allocation2 + $0x81] sm:$0xff] }
 0x134   : > { %v769_v9 = vld [vmem:[#allocation2 + $0x40] sm:$0xff]  ;;  %v804_v13 = vmul.f32 %v2290_v34, %v2285_v24  ;;  %v829_v22 = vmul.f32 %v2307_v52, %v2293_v37 }
 0x135   : > { %v794_v10 = vld [vmem:[#allocation2 + $0x41] sm:$0xff]  ;;  %v917_v16 = vpack.c.bf16 %v910_v5, %v909_v62  ;;  %v778_v60 = vmul.f32 %v2277_v12, %v769_v9  ;;  %v712_v51 = vmul.f32 %v769_v9, %v2254_v63  ;;  %v853_v39 = vmul.f32 %v2299_v41, %v769_v9 }
 0x136   : > { %v819_v23 = vld [vmem:[#allocation2 + $0x42] sm:$0xff]  ;;  %v803_v38 = vmul.f32 %v2285_v24, %v794_v10  ;;  %v729_v40 = vmul.f32 %v794_v10, %v2257_v0  ;;  %v757_v63 = vmul.f32 %v2363_v21, %v2269_v6  ;;  %v756_v0 = vmul.f32 %v2344_v55, %v2269_v6  ;;  %v976_v9 = vld [vmem:[%s2902_s6] sm:$0x3] }
 0x137   : > { %1928 = vmatmul.msk.bf16.vlgmr.msra.gmra.mxu1 %vm523_vm2, %v917_v16  ;;  %v786_v32 = vadd.f32 %v778_v60, %v761_v17  ;;  %v828_v48 = vmul.f32 %v2293_v37, %v819_v23  ;;  %v754_v50 = vmul.f32 %v819_v23, %v2269_v6  ;;  %v861_v62 = vadd.f32 %v853_v39, %v835_v42 }
 0x138   : > { %v737_v49 = vadd.f32 %v729_v40, %v712_v51  ;;  %v765_v14 = vadd.f32 %v757_v63, %v740_v31  ;;  %v1043_v6 = vsel %vm649_vm0, %v976_v9, 0  ;;  %v878_v16 = vmul.f32 %v2316_v4, %v794_v10 }
 0x139   : > { %v811_v43 = vadd.f32 %v803_v38, %v786_v32  ;;  %v782_v60 = vmul.f32 %v2277_v12, %v773_v59  ;;  %1052 = vmatpush.bf16.msrb.mxu2 %v1043_v6  ;;  %v864_v25 = vadd.f32 %v856_v54, %v838_v53  ;;  %v881_v51 = vmul.f32 %v2316_v4, %v2348_v57 }
 0x13a   : > { %v762_v5 = vadd.f32 %v754_v50, %v737_v49  ;;  %v764_v26 = vadd.f32 %v756_v0, %v739_v58  ;;  %v886_v34 = vadd.f32 %v878_v16, %v861_v62  ;;  %v855_v10 = vmul.f32 %v2299_v41, %v2323_v20 }
 0x13b   : > { %v836_v61 = vadd.f32 %v828_v48, %v811_v43  ;;  %v807_v38 = vmul.f32 %v2285_v24, %v798_v33  ;;  %v903_v39 = vmul.f32 %v2332_v27, %v819_v23  ;;  %v790_v42 = vadd.f32 %v782_v60, %v765_v14  ;;  %v823_v43 = vld [vmem:[#allocation2 + $0x82] sm:$0xff]  ;;  %v2429_v14 = vld [vmem:[#allocation2 + $0x92] sm:$0xff] }
 0x13c   : > { %v787_v17 = vadd.f32 %v779_v8, %v762_v5  ;;  %v880_v31 = vmul.f32 %v2316_v4, %v2340_v47  ;;  %v889_v63 = vadd.f32 %v881_v51, %v864_v25  ;;  %v806_v20 = vmul.f32 %v2348_v57, %v2285_v24  ;;  %v2416_v47 = vld [vmem:[#allocation2 + $0x90] sm:$0xff] }
 0x13d   : > { %v862_v15 = vadd.f32 %v854_v3, %v836_v61  ;;  %v781_v3 = vmul.f32 %v2346_v56, %v2277_v12  ;;  %v911_v48 = vadd.f32 %v903_v39, %v886_v34  ;;  %v905_v23 = vmul.f32 %v2332_v27, %v2344_v55  ;;  %v2423_v57 = vld [vmem:[#allocation2 + $0x91] sm:$0xff] }
 0x13e   : > { %v812_v32 = vadd.f32 %v804_v13, %v787_v17  ;;  %v815_v53 = vadd.f32 %v807_v38, %v790_v42  ;;  %v832_v54 = vmul.f32 %v2293_v37, %v823_v43  ;;  %v831_v62 = vmul.f32 %v2363_v21, %v2293_v37 }
 0x13f   : > { %v887_v28 = vadd.f32 %v879_v44, %v862_v15  ;;  %v906_v44 = vmul.f32 %v2332_v27, %v2363_v21  ;;  %v789_v56 = vadd.f32 %v781_v3, %v764_v26  ;;  %v858_v55 = vmul.f32 %v2299_v41, %v2416_v47 }
 0x140   : > { %v837_v52 = vadd.f32 %v829_v22, %v812_v32  ;;  %v840_v24 = vadd.f32 %v832_v54, %v815_v53  ;;  %v857_v9 = vmul.f32 %v2299_v41, %v773_v59  ;;  %v883_v13 = vmul.f32 %v2316_v4, %v2423_v57  ;;  %v2031_v41 = vld [vmem:[%s2901_s5] ss:$0 sm:$0xff] }
 0x141   : > { %v912_v40 = vadd.f32 %v904_v11, %v887_v28  ;;  %v914_v0 = vadd.f32 %v906_v44, %v889_v63  ;;  %v814_v61 = vadd.f32 %v806_v20, %v789_v56  ;;  %v882_v37 = vmul.f32 %v2316_v4, %v798_v33  ;;  %v2011_v4 = vpop.permute.xlu2 %2010  ;;  %v2016_v63 = vpop.permute.xlu0 %2015 }
 0x142   : > { %v863_v12 = vadd.f32 %v855_v10, %v837_v52  ;;  %v866_v11 = vadd.f32 %v858_v55, %v840_v24  ;;  %v908_v15 = vmul.f32 %v2332_v27, %v2429_v14  ;;  %v907_v17 = vmul.f32 %v2332_v27, %v823_v43 }
 0x143   : > { %v918_v49 = vpack.c.bf16 %v912_v40, %v911_v48  ;;  %v839_v8 = vadd.f32 %v831_v62, %v814_v61  ;;  %v2013_v33 = vunpack.i.h.bf16 %v2011_v4  ;;  %v2012_v27 = vunpack.i.l.bf16 %v2011_v4  ;;  %v2021_v62 = vpop.permute.xlu1 %2020 }
 0x144   : > { %v888_v50 = vadd.f32 %v880_v31, %v863_v12  ;;  %v891_v21 = vadd.f32 %v883_v13, %v866_v11  ;;  %v2018_v44 = vunpack.i.h.bf16 %v2016_v63  ;;  %v2017_v43 = vunpack.i.l.bf16 %v2016_v63 }
 0x145   : > { %v865_v6 = vadd.f32 %v857_v9, %v839_v8  ;;  %v1008_v3 = vsel %vm1006_vm5, %v2013_v33, %v2185_v29  ;;  %v1007_v10 = vsel %vm1006_vm5, %v2012_v27, %v2187_v30  ;;  %v2023_v55 = vunpack.i.h.bf16 %v2021_v62 }
 0x146   : > { %v913_v58 = vadd.f32 %v905_v23, %v888_v50  ;;  %v916_v60 = vadd.f32 %v908_v15, %v891_v21  ;;  %v1009_v50 = vsel %vm1006_vm5, %v2017_v43, %v2204_v46  ;;  %v2022_v8 = vunpack.i.l.bf16 %v2021_v62 }
 0x147   : > { %1929 = vmatmul.msk.bf16.gmra.mxu1 %vm523_vm2, %v918_v49  ;;  %v890_v16 = vadd.f32 %v882_v37, %v865_v6  ;;  %v1010_v49 = vsel %vm1006_vm5, %v2018_v44, %v2202_v45  ;;  %v1012_v9 = vsel %vm1006_vm5, %v2023_v55, %v2176_v18 }
 0x148   : > { %v919_v5 = vpack.c.bf16 %v914_v0, %v913_v58  ;;  %v1011_v37 = vsel %vm1006_vm5, %v2022_v8, %v2178_v19 }
 0x149   : > { %v915_v22 = vadd.f32 %v907_v17, %v890_v16 }
 0x14a   : > { %1930 = vmatmul.msk.bf16.vlgmr.msra.gmra.mxu3 %vm523_vm2, %v919_v5 }
 0x14b   : > { %v920_v25 = vpack.c.bf16 %v916_v60, %v915_v22  ;;  %v2026_v60 = vpop.permute.xlu2 %2025 }
 0x15a   : > { %1931 = vmatmul.msk.bf16.gmra.mxu3 %vm523_vm2, %v920_v25 }
 0x1b4   : > { %v948_v59 = vpop.f32.mrf.mxu1 }
 0x1b5   : > { %v949_v51 = vadd.f32 %v2031_v41, %v948_v59  ;;  %v2028_v59 = vunpack.i.h.bf16 %v2026_v60 }
 0x1b7   : > { %v2439_v26 = vmax.f32 %v949_v51, 0.0  ;;  %v2027_v51 = vunpack.i.l.bf16 %v2026_v60  ;;  %v1014_v4 = vsel %vm1006_vm5, %v2028_v59, %v2194_v35 }
 0x1b9   : > { %1739 = vrot.lane.b32.xlu0 %v2439_v26, %s2058_s19  ;;  %v1015_v38 = vsel %vm621_vm1, %v1007_v10, %v2439_v26  ;;  %v1013_v27 = vsel %vm1006_vm5, %v2027_v51, %v2196_v36  ;;  %v2514_v10 = vld [vmem:[%s2903_s7] ss:$0 sm:$0xff] }
 0x1bc   : > { %v950_v34 = vpop.f32.mrf.mxu1 }
 0x1bd   : > { %v951_v28 = vadd.f32 %v2031_v41, %v950_v34 }
 0x1bf   : > { %v2443_v32 = vmax.f32 %v951_v28, 0.0  ;;  %v980_v28 = vld [vmem:[%s2905_s9] sm:$0x3] }
 0x1c1   : > { %v1016_v39 = vsel %vm621_vm1, %v1008_v3, %v2443_v32  ;;  %1741 = vrot.lane.b32.xlu1 %v2443_v32, %s2058_s19  ;;  %v1327_v3 = vsel %vm649_vm0, %v980_v28, 0 }
 0x1c2   : > { %v1023_v40 = vpack.c.bf16 %v1016_v39, %v1015_v38  ;;  %1336 = vmatpush.bf16.msrb.mxu3 %v1327_v3  ;;  %v978_v38 = vld [vmem:[%s2904_s8] sm:$0xff] }
 0x1c4   : > { %v953_v52 = vpop.f32.mrf.mxu1  ;;  %1932 = vmatmul.msk.bf16.vlgmr.msrb.gmra.mxu2 %vm523_vm2, %v1023_v40 }
 0x1c5   : > { %v954_v42 = vadd.f32 %v2031_v41, %v953_v52  ;;  %v2520_v52 = vperm.slane %v978_v38, 0 }
 0x1c7   : > { %v2456_v31 = vmax.f32 %v954_v42, 0.0  ;;  %v2522_v42 = vperm.slane %v978_v38, 1  ;;  %v1099_v44 = vmul.f32 %v2520_v52, %v2259_v1 }
 0x1c9   : > { %1743 = vrot.lane.b32.xlu2 %v2456_v31, %s2058_s19  ;;  %v1017_v54 = vsel %vm621_vm1, %v1009_v50, %v2456_v31  ;;  %v1116_v43 = vmul.f32 %v2522_v42, %v2261_v2  ;;  %v2534_v50 = vperm.slane %v978_v38, 3 }
 0x1cc   : > { %v955_v48 = vpop.f32.mrf.mxu1 }
 0x1cd   : > { %v956_v12 = vadd.f32 %v2031_v41, %v955_v48  ;;  %v958_v56 = vpop.f32.mrf.mxu3  ;;  %v2529_v48 = vperm.slane %v978_v38, 2 }
 0x1ce   : > { %v959_v23 = vadd.f32 %v2031_v41, %v958_v56 }
 0x1cf   : > { %v2460_v20 = vmax.f32 %v956_v12, 0.0 }
 0x1d0   : > { %v2466_v53 = vmax.f32 %v959_v23, 0.0  ;;  %v1124_v23 = vadd.f32 %v1116_v43, %v1099_v44  ;;  %v2557_v43 = vperm.slane %v978_v38, 7 }
 0x1d1   : > { %1745 = vrot.lane.b32.xlu0 %v2460_v20, %s2058_s19  ;;  %v1018_v58 = vsel %vm621_vm1, %v1010_v49, %v2460_v20  ;;  %v1141_v49 = vmul.f32 %v2529_v48, %v2271_v7 }
 0x1d2   : > { %v1024_v0 = vpack.c.bf16 %v1018_v58, %v1017_v54  ;;  %1747 = vrot.lane.b32.xlu1 %v2466_v53, %s2058_s19  ;;  %v1019_v15 = vsel %vm621_vm1, %v1011_v37, %v2466_v53 }
 0x1d4   : > { %1933 = vmatmul.msk.bf16.gmra.mxu2 %vm523_vm2, %v1024_v0 }
 0x1d5   : > { %v960_v61 = vpop.f32.mrf.mxu3 }
 0x1d6   : > { %v961_v5 = vadd.f32 %v2031_v41, %v960_v61  ;;  %v1149_v61 = vadd.f32 %v1141_v49, %v1124_v23 }
 0x1d8   : > { %v2477_v24 = vmax.f32 %v961_v5, 0.0  ;;  %v2540_v5 = vperm.slane %v978_v38, 4 }
 0x1da   : > { %1749 = vrot.lane.b32.xlu2 %v2477_v24, %s2058_s19  ;;  %v1020_v6 = vsel %vm621_vm1, %v1012_v9, %v2477_v24 }
 0x1db   : > { %v1025_v16 = vpack.c.bf16 %v1020_v6, %v1019_v15 }
 0x1dd   : > { %v963_v11 = vpop.f32.mrf.mxu3 }
 0x1de   : > { %v964_v13 = vadd.f32 %v2031_v41, %v963_v11 }
 0x1e0   : > { %v2487_v21 = vmax.f32 %v964_v13, 0.0  ;;  %v2543_v13 = vperm.slane %v978_v38, 5 }
 0x1e2   : > { %1751 = vrot.lane.b32.xlu0 %v2487_v21, %s2058_s19  ;;  %v1021_v34 = vsel %vm621_vm1, %v1013_v27, %v2487_v21 }
 0x1e4   : > { %1934 = vmatmul.msk.bf16.gmra.mxu2 %vm523_vm2, %v1025_v16  ;;  %v2547_v16 = vperm.slane %v978_v38, 6 }
 0x1e5   : > { %v965_v17 = vpop.f32.mrf.mxu3 }
 0x1e6   : > { %v966_v22 = vadd.f32 %v2031_v41, %v965_v17 }
 0x1e8   : > { %v2494_v25 = vmax.f32 %v966_v22, 0.0 }
 0x1ea   : > { %1753 = vrot.lane.b32.xlu1 %v2494_v25, %s2058_s19  ;;  %v1022_v33 = vsel %vm621_vm1, %v1014_v4, %v2494_v25 }
 0x1eb   : > { %v1026_v41 = vpack.c.bf16 %v1022_v33, %v1021_v34 }
 0x1f4   : > { %1935 = vmatmul.msk.bf16.gmra.mxu2 %vm523_vm2, %v1026_v41 }
 0x247   : > { %v1054_v39 = vpop.f32.mrf.mxu2 }
 0x248   : > { %v1055_v40 = vadd.f32 %v2514_v10, %v1054_v39 }
 0x24a   : > { %v1074_v63 = vmax.f32 %v1055_v40, 0.0 }
 0x24c   : > { %1082 = vst.msk [vmem:[#allocation2 + $0x11] sm:$0xff] %vm523_vm2, %v1074_v63 }
 0x24f   : > { %v1056_v12 = vpop.f32.mrf.mxu2 }
 0x250   : > { %v1057_v56 = vadd.f32 %v2514_v10, %v1056_v12 }
 0x252   : > { %v1075_v54 = vmax.f32 %v1057_v56, 0.0 }
 0x253   : > { %v1091_v58 = vld [vmem:[#allocation2 + $0x10] sm:$0xff] }
 0x254   : > { %v1108_v0 = vld [vmem:[#allocation2 + $0x11] sm:$0xff]  ;;  %1083 = vst.msk [vmem:[#allocation2 + $0x21] sm:$0xff] %vm523_vm2, %v1075_v54  ;;  %v1100_v1 = vmul.f32 %v2520_v52, %v1091_v58  ;;  %v1166_v62 = vmul.f32 %v2534_v50, %v1091_v58 }
 0x255   : > { %v1117_v2 = vmul.f32 %v2522_v42, %v1108_v0  ;;  %v1133_v8 = vld [vmem:[#allocation2 + $0x12] sm:$0xff]  ;;  %v1191_v15 = vmul.f32 %v2540_v5, %v1108_v0  ;;  %v2563_v0 = vld [vmem:[%s2904_s8 + $0x8] ss:$0 sm:$0xff] }
 0x256   : > { %v1174_v11 = vadd.f32 %v1166_v62, %v1149_v61  ;;  %v1142_v37 = vmul.f32 %v2529_v48, %v1133_v8  ;;  %v1216_v41 = vmul.f32 %v2543_v13, %v1133_v8 }
 0x257   : > { %v1059_v55 = vpop.f32.mrf.mxu2  ;;  %v1125_v9 = vadd.f32 %v1117_v2, %v1100_v1 }
 0x258   : > { %v1060_v7 = vadd.f32 %v2514_v10, %v1059_v55  ;;  %v1199_v51 = vadd.f32 %v1191_v15, %v1174_v11 }
 0x259   : > { %v1150_v22 = vadd.f32 %v1142_v37, %v1125_v9 }
 0x25a   : > { %v1076_v6 = vmax.f32 %v1060_v7, 0.0  ;;  %v1224_v44 = vadd.f32 %v1216_v41, %v1199_v51 }
 0x25b   : > { %v1158_v17 = vld [vmem:[#allocation2 + $0x20] sm:$0xff] }
 0x25c   : > { %v1183_v60 = vld [vmem:[#allocation2 + $0x21] sm:$0xff]  ;;  %1084 = vst.msk [vmem:[#allocation2 + $0x31] sm:$0xff] %vm523_vm2, %v1076_v6  ;;  %v1167_v59 = vmul.f32 %v2534_v50, %v1158_v17  ;;  %v1101_v4 = vmul.f32 %v1158_v17, %v2520_v52  ;;  %v1241_v28 = vmul.f32 %v2547_v16, %v1158_v17 }
 0x25d   : > { %v1118_v33 = vmul.f32 %v1183_v60, %v2522_v42  ;;  %v1192_v34 = vmul.f32 %v2540_v5, %v1183_v60  ;;  %v1208_v39 = vld [vmem:[#allocation2 + $0x22] sm:$0xff]  ;;  %v1266_v61 = vmul.f32 %v2557_v43, %v1183_v60 }
 0x25e   : > { %v1175_v27 = vadd.f32 %v1167_v59, %v1150_v22  ;;  %v1217_v23 = vmul.f32 %v2543_v13, %v1208_v39  ;;  %v1249_v49 = vadd.f32 %v1241_v28, %v1224_v44  ;;  %v1143_v1 = vmul.f32 %v1208_v39, %v2529_v48 }
 0x25f   : > { %v1061_v3 = vpop.f32.mrf.mxu2  ;;  %v1126_v12 = vadd.f32 %v1118_v33, %v1101_v4  ;;  %v1291_v17 = vmul.f32 %v2563_v0, %v1208_v39 }
 0x260   : > { %v1062_v40 = vadd.f32 %v2514_v10, %v1061_v3  ;;  %v1200_v63 = vadd.f32 %v1192_v34, %v1175_v27  ;;  %v1274_v37 = vadd.f32 %v1266_v61, %v1249_v49 }
 0x261   : > { %v1151_v7 = vadd.f32 %v1143_v1, %v1126_v12 }
 0x262   : > { %v1077_v56 = vmax.f32 %v1062_v40, 0.0  ;;  %v1225_v2 = vadd.f32 %v1217_v23, %v1200_v63  ;;  %v1299_v34 = vadd.f32 %v1291_v17, %v1274_v37 }
 0x263   : > { %v1233_v54 = vld [vmem:[#allocation2 + $0x30] sm:$0xff] }
 0x264   : > { %v1258_v58 = vld [vmem:[#allocation2 + $0x31] sm:$0xff]  ;;  %1085 = vst.msk [vmem:[#allocation2 + $0x41] sm:$0xff] %vm523_vm2, %v1077_v56  ;;  %v1242_v38 = vmul.f32 %v2547_v16, %v1233_v54  ;;  %v1102_v62 = vmul.f32 %v1233_v54, %v2520_v52  ;;  %v1168_v9 = vmul.f32 %v1233_v54, %v2534_v50 }
 0x265   : > { %v1283_v55 = vld [vmem:[#allocation2 + $0x32] sm:$0xff]  ;;  %v1119_v8 = vmul.f32 %v1258_v58, %v2522_v42  ;;  %v1267_v6 = vmul.f32 %v2557_v43, %v1258_v58  ;;  %v1193_v33 = vmul.f32 %v1258_v58, %v2540_v5 }
 0x266   : > { %v1250_v11 = vadd.f32 %v1242_v38, %v1225_v2  ;;  %v1176_v22 = vadd.f32 %v1168_v9, %v1151_v7  ;;  %v1292_v60 = vmul.f32 %v2563_v0, %v1283_v55  ;;  %v1144_v28 = vmul.f32 %v1283_v55, %v2529_v48 }
 0x267   : > { %v1064_v15 = vpop.f32.mrf.mxu2  ;;  %v1127_v4 = vadd.f32 %v1119_v8, %v1102_v62  ;;  %v1218_v56 = vmul.f32 %v1283_v55, %v2543_v13 }
 0x268   : > { %v1065_v59 = vadd.f32 %v2514_v10, %v1064_v15  ;;  %v1275_v51 = vadd.f32 %v1267_v6, %v1250_v11  ;;  %v1201_v63 = vadd.f32 %v1193_v33, %v1176_v22 }
 0x269   : > { %v1152_v44 = vadd.f32 %v1144_v28, %v1127_v4 }
 0x26a   : > { %v1078_v27 = vmax.f32 %v1065_v59, 0.0  ;;  %v1300_v41 = vadd.f32 %v1292_v60, %v1275_v51  ;;  %v1226_v61 = vadd.f32 %v1218_v56, %v1201_v63 }
 0x26b   : > { %v1160_v3 = vld [vmem:[#allocation2 + $0x40] sm:$0xff] }
 0x26c   : > { %v1185_v40 = vld [vmem:[#allocation2 + $0x41] sm:$0xff]  ;;  %1086 = vst.msk [vmem:[#allocation2 + $0x51] sm:$0xff] %vm523_vm2, %v1078_v27  ;;  %v1307_v39 = vpack.c.bf16 %v1300_v41, %v1299_v34  ;;  %v1169_v12 = vmul.f32 %v2534_v50, %v1160_v3  ;;  %v1243_v23 = vmul.f32 %v2547_v16, %v1160_v3  ;;  %v1103_v58 = vmul.f32 %v1160_v3, %v2520_v52 }
 0x26d   : > { %v1194_v54 = vmul.f32 %v2540_v5, %v1185_v40  ;;  %v1120_v1 = vmul.f32 %v1185_v40, %v2522_v42  ;;  %v1210_v38 = vld [vmem:[#allocation2 + $0x42] sm:$0xff]  ;;  %v1268_v15 = vmul.f32 %v2557_v43, %v1185_v40 }
 0x26e   : > { %1936 = vmatmul.msk.bf16.vlgmr.msrb.gmra.mxu3 %vm523_vm2, %v1307_v39  ;;  %v1177_v49 = vadd.f32 %v1169_v12, %v1152_v44  ;;  %v1251_v7 = vadd.f32 %v1243_v23, %v1226_v61  ;;  %v1219_v55 = vmul.f32 %v2543_v13, %v1210_v38  ;;  %v1145_v60 = vmul.f32 %v1210_v38, %v2529_v48 }
 0x26f   : > { %v1066_v2 = vpop.f32.mrf.mxu2  ;;  %v1128_v11 = vadd.f32 %v1120_v1, %v1103_v58  ;;  %v1293_v40 = vmul.f32 %v2563_v0, %v1210_v38 }
 0x270   : > { %v1067_v62 = vadd.f32 %v2514_v10, %v1066_v2  ;;  %v1202_v8 = vadd.f32 %v1194_v54, %v1177_v49  ;;  %v1276_v4 = vadd.f32 %v1268_v15, %v1251_v7 }
 0x271   : > { %v1153_v28 = vadd.f32 %v1145_v60, %v1128_v11 }
 0x272   : > { %v1079_v9 = vmax.f32 %v1067_v62, 0.0  ;;  %v1227_v17 = vadd.f32 %v1219_v55, %v1202_v8  ;;  %v1301_v23 = vadd.f32 %v1293_v40, %v1276_v4 }
 0x273   : > { %v1235_v6 = vld [vmem:[#allocation2 + $0x50] sm:$0xff] }
 0x274   : > { %v1260_v37 = vld [vmem:[#allocation2 + $0x51] sm:$0xff]  ;;  %1087 = vst.msk [vmem:[#allocation2 + $0x61] sm:$0xff] %vm523_vm2, %v1079_v9  ;;  %v1244_v22 = vmul.f32 %v2547_v16, %v1235_v6  ;;  %v1104_v51 = vmul.f32 %v1235_v6, %v2520_v52  ;;  %v1170_v27 = vmul.f32 %v1235_v6, %v2534_v50 }
 0x275   : > { %v1285_v59 = vld [vmem:[#allocation2 + $0x52] sm:$0xff]  ;;  %v1121_v33 = vmul.f32 %v1260_v37, %v2522_v42  ;;  %v1269_v41 = vmul.f32 %v2557_v43, %v1260_v37  ;;  %v1195_v1 = vmul.f32 %v1260_v37, %v2540_v5 }
 0x276   : > { %v1252_v34 = vadd.f32 %v1244_v22, %v1227_v17  ;;  %v1294_v63 = vmul.f32 %v2563_v0, %v1285_v59  ;;  %v1178_v56 = vadd.f32 %v1170_v27, %v1153_v28  ;;  %v1146_v58 = vmul.f32 %v1285_v59, %v2529_v48  ;;  %v1366_v17 = vld [vmem:[%s2907_s11] sm:$0x3] }
 0x277   : > { %v1069_v3 = vpop.f32.mrf.mxu2  ;;  %v1129_v12 = vadd.f32 %v1121_v33, %v1104_v51  ;;  %v1220_v55 = vmul.f32 %v1285_v59, %v2543_v13  ;;  %v1408_v60 = vsel %vm649_vm0, %v1366_v17, 0 }
 0x278   : > { %v1070_v39 = vadd.f32 %v2514_v10, %v1069_v3  ;;  %v1277_v44 = vadd.f32 %v1269_v41, %v1252_v34  ;;  %v1203_v7 = vadd.f32 %v1195_v1, %v1178_v56  ;;  %1417 = vmatpush.bf16.msrb.mxu0 %v1408_v60 }
 0x279   : > { %v1154_v38 = vadd.f32 %v1146_v58, %v1129_v12 }
 0x27a   : > { %v1080_v49 = vmax.f32 %v1070_v39, 0.0  ;;  %v1302_v54 = vadd.f32 %v1294_v63, %v1277_v44  ;;  %v1228_v33 = vadd.f32 %v1220_v55, %v1203_v7 }
 0x27b   : > { %v1162_v2 = vld [vmem:[#allocation2 + $0x60] sm:$0xff] }
 0x27c   : > { %v1187_v61 = vld [vmem:[#allocation2 + $0x61] sm:$0xff]  ;;  %1088 = vst.msk [vmem:[#allocation2 + $0x71] sm:$0xff] %vm523_vm2, %v1080_v49  ;;  %v1308_v62 = vpack.c.bf16 %v1302_v54, %v1301_v23  ;;  %v1171_v8 = vmul.f32 %v2534_v50, %v1162_v2  ;;  %v1245_v6 = vmul.f32 %v2547_v16, %v1162_v2  ;;  %v1105_v37 = vmul.f32 %v1162_v2, %v2520_v52 }
 0x27d   : > { %v1196_v9 = vmul.f32 %v2540_v5, %v1187_v61  ;;  %v1122_v15 = vmul.f32 %v1187_v61, %v2522_v42  ;;  %v1212_v51 = vld [vmem:[#allocation2 + $0x62] sm:$0xff]  ;;  %v1270_v63 = vmul.f32 %v2557_v43, %v1187_v61 }
 0x27e   : > { %1937 = vmatmul.msk.bf16.gmra.mxu3 %vm523_vm2, %v1308_v62  ;;  %v1179_v11 = vadd.f32 %v1171_v8, %v1154_v38  ;;  %v1221_v34 = vmul.f32 %v2543_v13, %v1212_v51  ;;  %v1253_v41 = vadd.f32 %v1245_v6, %v1228_v33  ;;  %v1295_v61 = vmul.f32 %v2563_v0, %v1212_v51 }
 0x27f   : > { %v1071_v22 = vpop.f32.mrf.mxu2  ;;  %v1130_v28 = vadd.f32 %v1122_v15, %v1105_v37 }
 0x280   : > { %v1072_v4 = vadd.f32 %v2514_v10, %v1071_v22  ;;  %v1204_v59 = vadd.f32 %v1196_v9, %v1179_v11  ;;  %v1147_v10 = vmul.f32 %v1212_v51, %v2529_v48  ;;  %v1278_v1 = vadd.f32 %v1270_v63, %v1253_v41 }
 0x281   : > { %v1248_v41 = vmul.f32 %v2547_v16, %v2416_v47  ;;  %v2034_v47 = vld [vmem:[%s2906_s10] ss:$0 sm:$0xff] }
 0x282   : > { %v1081_v27 = vmax.f32 %v1072_v4, 0.0  ;;  %v1229_v39 = vadd.f32 %v1221_v34, %v1204_v59  ;;  %v1155_v2 = vadd.f32 %v1147_v10, %v1130_v28 }
 0x283   : > { %v1237_v3 = vld [vmem:[#allocation2 + $0x70] sm:$0xff] }
 0x284   : > { %v1262_v40 = vld [vmem:[#allocation2 + $0x71] sm:$0xff]  ;;  %1089 = vst.msk [vmem:[#allocation2 + $0x81] sm:$0xff] %vm523_vm2, %v1081_v27  ;;  %v1246_v44 = vmul.f32 %v2547_v16, %v1237_v3  ;;  %v1106_v12 = vmul.f32 %v1237_v3, %v2520_v52  ;;  %v1172_v49 = vmul.f32 %v1237_v3, %v2534_v50  ;;  %v1303_v52 = vadd.f32 %v1295_v61, %v1278_v1 }
 0x285   : > { %v1287_v56 = vld [vmem:[#allocation2 + $0x72] sm:$0xff]  ;;  %v1123_v23 = vmul.f32 %v1262_v40, %v2522_v42  ;;  %v1271_v58 = vmul.f32 %v2557_v43, %v1262_v40  ;;  %v1197_v42 = vmul.f32 %v1262_v40, %v2540_v5  ;;  %v1273_v3 = vmul.f32 %v2557_v43, %v2423_v57 }
 0x286   : > { %v1254_v54 = vadd.f32 %v1246_v44, %v1229_v39  ;;  %v1296_v38 = vmul.f32 %v2563_v0, %v1287_v56  ;;  %v1180_v7 = vadd.f32 %v1172_v49, %v1155_v2  ;;  %v1148_v55 = vmul.f32 %v1287_v56, %v2529_v48 }
 0x287   : > { %v1131_v8 = vadd.f32 %v1123_v23, %v1106_v12  ;;  %v1222_v59 = vmul.f32 %v1287_v56, %v2543_v13 }
 0x288   : > { %v1279_v62 = vadd.f32 %v1271_v58, %v1254_v54  ;;  %v1205_v22 = vadd.f32 %v1197_v42, %v1180_v7  ;;  %v1373_v54 = vsel %vm1006_vm5, %v2185_v29, %v2443_v32  ;;  %v1374_v29 = vsel %vm1006_vm5, %v2204_v46, %v2456_v31 }
 0x289   : > { %v1156_v15 = vadd.f32 %v1148_v55, %v1131_v8  ;;  %v1375_v32 = vsel %vm1006_vm5, %v2202_v45, %v2460_v20  ;;  %v1376_v45 = vsel %vm1006_vm5, %v2178_v19, %v2466_v53  ;;  %v1377_v20 = vsel %vm1006_vm5, %v2176_v18, %v2477_v24 }
 0x28a   : > { %v1304_v9 = vadd.f32 %v1296_v38, %v1279_v62  ;;  %v1230_v34 = vadd.f32 %v1222_v59, %v1205_v22  ;;  %v1378_v18 = vsel %vm1006_vm5, %v2196_v36, %v2487_v21  ;;  %v1379_v24 = vsel %vm1006_vm5, %v2194_v35, %v2494_v25  ;;  %v1370_v36 = vld [vmem:[%s2910_s14] sm:$0x3]  ;;  %v2697_v25 = vpop.permute.xlu0 %1739 }
 0x28b   : > { %v1164_v11 = vld [vmem:[#allocation2 + $0x80] sm:$0xff]  ;;  %v1692_v21 = vsel %vm649_vm0, %v1370_v36, 0 }
 0x28c   : > { %v1189_v6 = vld [vmem:[#allocation2 + $0x81] sm:$0xff]  ;;  %v1309_v37 = vpack.c.bf16 %v1304_v9, %v1303_v52  ;;  %v1173_v17 = vmul.f32 %v2534_v50, %v1164_v11  ;;  %v1247_v33 = vmul.f32 %v2547_v16, %v1164_v11  ;;  %1701 = vmatpush.bf16.msrb.mxu1 %v1692_v21 }
 0x28d   : > { %v1214_v60 = vld [vmem:[#allocation2 + $0x82] sm:$0xff]  ;;  %v1198_v4 = vmul.f32 %v2540_v5, %v1189_v6  ;;  %v1272_v63 = vmul.f32 %v2557_v43, %v1189_v6  ;;  %v1298_v5 = vmul.f32 %v2563_v0, %v2429_v14 }
 0x28e   : > { %1938 = vmatmul.msk.bf16.gmra.mxu3 %vm523_vm2, %v1309_v37  ;;  %v1181_v51 = vadd.f32 %v1173_v17, %v1156_v15  ;;  %v1223_v27 = vmul.f32 %v2543_v13, %v1214_v60  ;;  %v1255_v50 = vadd.f32 %v1247_v33, %v1230_v34  ;;  %v1297_v12 = vmul.f32 %v2563_v0, %v1214_v60 }
 0x28f   : > { %v1372_v0 = vsel %vm1006_vm5, %v2187_v30, %v2439_v26 }
 0x290   : > { %v1206_v48 = vadd.f32 %v1198_v4, %v1181_v51  ;;  %v1280_v39 = vadd.f32 %v1272_v63, %v1255_v50  ;;  %v2708_v50 = vld [vmem:[%s2908_s12] ss:$0 sm:$0xff] }
 0x292   : > { %v1231_v28 = vadd.f32 %v1223_v27, %v1206_v48  ;;  %v1305_v10 = vadd.f32 %v1297_v12, %v1280_v39  ;;  %v2689_v27 = vpop.permute.xlu2 %1743  ;;  %v2038_v12 = vld [vmem:[%s2162_s27 + $0x30] sm:$0xff] }
 0x294   : > { %v1256_v40 = vadd.f32 %v1248_v41, %v1231_v28  ;;  %v2701_v41 = vpop.permute.xlu0 %1745 }
 0x296   : > { %v1281_v44 = vadd.f32 %v1273_v3, %v1256_v40  ;;  %v1368_v3 = vld [vmem:[%s2909_s13] sm:$0xff] }
 0x297   : > { %v2714_v39 = vperm.slane %v1368_v3, 0  ;;  %v2753_v21 = vperm.slane %v1368_v3, 7 }
 0x298   : > { %v1306_v13 = vadd.f32 %v1298_v5, %v1281_v44  ;;  %v2716_v44 = vperm.slane %v1368_v3, 1 }
 0x29a   : > { %v1310_v56 = vpack.c.bf16 %v1306_v13, %v1305_v10  ;;  %v2695_v35 = vpop.permute.xlu2 %1749 }
 0x29c   : > { %v1752_v40 = vpop.permute.xlu0 %1751 }
 0x29d   : > { %v1833_v13 = vsel %vm1006_vm5, %v2038_v12, %v1752_v40 }
 0x29e   : > { %1939 = vmatmul.msk.bf16.gmra.mxu3 %vm523_vm2, %v1310_v56  ;;  %v1455_v56 = vld [vmem:[#allocation2] sm:$0xff] }
 0x2f1   : > { %v1338_v57 = vpop.f32.mrf.mxu3 }
 0x2f2   : > { %v1339_v16 = vadd.f32 %v2034_v47, %v1338_v57 }
 0x2f4   : > { %v1358_v23 = vmax.f32 %v1339_v16, 0.0 }
 0x2f6   : > { %1771 = vrot.lane.b32.xlu2 %v1358_v23, %s2059_s24  ;;  %v1380_v58 = vsel %vm621_vm1, %v1372_v0, %v1358_v23  ;;  %v1464_v23 = vmul.f32 %v2714_v39, %v1455_v56  ;;  %v2759_v56 = vld [vmem:[%s2909_s13 + $0x8] ss:$0 sm:$0xff] }
 0x2f9   : > { %v1340_v14 = vpop.f32.mrf.mxu3 }
 0x2fa   : > { %v1341_v43 = vadd.f32 %v2034_v47, %v1340_v14 }
 0x2fc   : > { %v1359_v49 = vmax.f32 %v1341_v43, 0.0  ;;  %v2726_v43 = vperm.slane %v1368_v3, 2 }
 0x2fe   : > { %v1381_v1 = vsel %vm621_vm1, %v1373_v54, %v1359_v49  ;;  %1773 = vrot.lane.b32.xlu0 %v1359_v49, %s2059_s24  ;;  %v1497_v49 = vld [vmem:[#allocation2 + $0x2] sm:$0xff] }
 0x2ff   : > { %v1388_v2 = vpack.c.bf16 %v1381_v1, %v1380_v58  ;;  %v1506_v1 = vmul.f32 %v2726_v43, %v1497_v49 }
 0x301   : > { %v1343_v61 = vpop.f32.mrf.mxu3  ;;  %1940 = vmatmul.msk.bf16.vlgmr.msrb.gmra.mxu0 %vm523_vm2, %v1388_v2  ;;  %v2730_v2 = vperm.slane %v1368_v3, 3 }
 0x302   : > { %v1344_v62 = vadd.f32 %v2034_v47, %v1343_v61 }
 0x304   : > { %v1360_v38 = vmax.f32 %v1344_v62, 0.0 }
 0x306   : > { %1775 = vrot.lane.b32.xlu1 %v1360_v38, %s2059_s24  ;;  %v1382_v7 = vsel %vm621_vm1, %v1374_v29, %v1360_v38 }
 0x309   : > { %v1345_v8 = vpop.f32.mrf.mxu3 }
 0x30a   : > { %v1346_v30 = vadd.f32 %v2034_v47, %v1345_v8 }
 0x30c   : > { %v1361_v26 = vmax.f32 %v1346_v30, 0.0 }
 0x30e   : > { %1777 = vrot.lane.b32.xlu2 %v1361_v26, %s2059_s24  ;;  %v1383_v52 = vsel %vm621_vm1, %v1375_v32, %v1361_v26  ;;  %v2736_v32 = vperm.slane %v1368_v3, 4 }
 0x30f   : > { %v1389_v9 = vpack.c.bf16 %v1383_v52, %v1382_v7 }
 0x311   : > { %v1348_v55 = vpop.f32.mrf.mxu3  ;;  %1941 = vmatmul.msk.bf16.gmra.mxu0 %vm523_vm2, %v1389_v9 }
 0x312   : > { %v1349_v42 = vadd.f32 %v2034_v47, %v1348_v55 }
 0x314   : > { %v1362_v11 = vmax.f32 %v1349_v42, 0.0 }
 0x316   : > { %1779 = vrot.lane.b32.xlu0 %v1362_v11, %s2059_s24  ;;  %v1384_v37 = vsel %vm621_vm1, %v1376_v45, %v1362_v11  ;;  %v2739_v11 = vperm.slane %v1368_v3, 5  ;;  %v2743_v45 = vperm.slane %v1368_v3, 6 }
 0x319   : > { %v1350_v6 = vpop.f32.mrf.mxu3 }
 0x31a   : > { %v1351_v46 = vadd.f32 %v2034_v47, %v1350_v6 }
 0x31c   : > { %v1363_v31 = vmax.f32 %v1351_v46, 0.0 }
 0x31e   : > { %1781 = vrot.lane.b32.xlu1 %v1363_v31, %s2059_s24  ;;  %v1385_v15 = vsel %vm621_vm1, %v1377_v20, %v1363_v31 }
 0x31f   : > { %v1390_v17 = vpack.c.bf16 %v1385_v15, %v1384_v37 }
 0x321   : > { %v1353_v22 = vpop.f32.mrf.mxu3  ;;  %1942 = vmatmul.msk.bf16.gmra.mxu0 %vm523_vm2, %v1390_v17 }
 0x322   : > { %v1354_v60 = vadd.f32 %v2034_v47, %v1353_v22 }
 0x324   : > { %v1364_v51 = vmax.f32 %v1354_v60, 0.0 }
 0x326   : > { %1783 = vrot.lane.b32.xlu2 %v1364_v51, %s2059_s24  ;;  %v1386_v59 = vsel %vm621_vm1, %v1378_v18, %v1364_v51 }
 0x329   : > { %v1355_v4 = vpop.f32.mrf.mxu3 }
 0x32a   : > { %v1356_v19 = vadd.f32 %v2034_v47, %v1355_v4  ;;  %v1472_v47 = vld [vmem:[#allocation2 + $0x1] sm:$0xff] }
 0x32b   : > { %v1481_v14 = vmul.f32 %v2716_v44, %v1472_v47 }
 0x32c   : > { %v1365_v53 = vmax.f32 %v1356_v19, 0.0 }
 0x32d   : > { %v1489_v58 = vadd.f32 %v1481_v14, %v1464_v23 }
 0x32e   : > { %1785 = vrot.lane.b32.xlu0 %v1365_v53, %s2059_s24  ;;  %v1387_v33 = vsel %vm621_vm1, %v1379_v24, %v1365_v53  ;;  %s2060_s24 = smov 4  }
 0x32f   : > { %v1391_v48 = vpack.c.bf16 %v1387_v33, %v1386_v59  ;;  %v1514_v26 = vadd.f32 %v1506_v1, %v1489_v58 }
 0x331   : > { %1943 = vmatmul.msk.bf16.gmra.mxu0 %vm523_vm2, %v1391_v48 }
 0x350   : > { %v2699_v34 = vpop.permute.xlu2 %1771 }
 0x368   : > { %v2703_v28 = vpop.permute.xlu2 %1777 }
 0x37e   : > { %v1419_v63 = vpop.f32.mrf.mxu0 }
 0x37f   : > { %v1420_v5 = vadd.f32 %v2708_v50, %v1419_v63 }
 0x380   : > { %v1784_v10 = vpop.permute.xlu2 %1783 }
 0x381   : > { %v1439_v57 = vmax.f32 %v1420_v5, 0.0  ;;  %v2721_v16 = vsel %vm621_vm1, %v1833_v13, %v1784_v10 }
 0x383   : > { %1447 = vst.msk [vmem:[#allocation2 + $0x11] sm:$0xff] %vm523_vm2, %v1439_v57 }
 0x386   : > { %v1421_v0 = vpop.f32.mrf.mxu0 }
 0x387   : > { %v1422_v54 = vadd.f32 %v2708_v50, %v1421_v0 }
 0x389   : > { %v1440_v61 = vmax.f32 %v1422_v54, 0.0 }
 0x38a   : > { %v1456_v62 = vld [vmem:[#allocation2 + $0x10] sm:$0xff] }
 0x38b   : > { %v1473_v38 = vld [vmem:[#allocation2 + $0x11] sm:$0xff]  ;;  %1448 = vst.msk [vmem:[#allocation2 + $0x21] sm:$0xff] %vm523_vm2, %v1440_v61  ;;  %v1465_v8 = vmul.f32 %v2714_v39, %v1456_v62  ;;  %v1531_v29 = vmul.f32 %v2730_v2, %v1456_v62 }
 0x38c   : > { %v1482_v30 = vmul.f32 %v2716_v44, %v1473_v38  ;;  %v1498_v52 = vld [vmem:[#allocation2 + $0x12] sm:$0xff]  ;;  %v1556_v31 = vmul.f32 %v2736_v32, %v1473_v38 }
 0x38d   : > { %v1539_v42 = vadd.f32 %v1531_v29, %v1514_v26  ;;  %v1507_v46 = vmul.f32 %v2726_v43, %v1498_v52  ;;  %v1581_v53 = vmul.f32 %v2739_v11, %v1498_v52 }
 0x38e   : > { %v1424_v7 = vpop.f32.mrf.mxu0  ;;  %v1490_v55 = vadd.f32 %v1482_v30, %v1465_v8 }
 0x38f   : > { %v1425_v9 = vadd.f32 %v2708_v50, %v1424_v7  ;;  %v1564_v22 = vadd.f32 %v1556_v31, %v1539_v42 }
 0x390   : > { %v1515_v15 = vadd.f32 %v1507_v46, %v1490_v55 }
 0x391   : > { %v1441_v6 = vmax.f32 %v1425_v9, 0.0  ;;  %v1589_v36 = vadd.f32 %v1581_v53, %v1564_v22 }
 0x392   : > { %v1523_v20 = vld [vmem:[#allocation2 + $0x20] sm:$0xff] }
 0x393   : > { %v1548_v37 = vld [vmem:[#allocation2 + $0x21] sm:$0xff]  ;;  %1449 = vst.msk [vmem:[#allocation2 + $0x31] sm:$0xff] %vm523_vm2, %v1441_v6  ;;  %v1532_v17 = vmul.f32 %v2730_v2, %v1523_v20  ;;  %v1466_v60 = vmul.f32 %v1523_v20, %v2714_v39  ;;  %v1606_v18 = vmul.f32 %v2743_v45, %v1523_v20 }
 0x394   : > { %v1483_v51 = vmul.f32 %v1548_v37, %v2716_v44  ;;  %v1557_v19 = vmul.f32 %v2736_v32, %v1548_v37  ;;  %v1573_v59 = vld [vmem:[#allocation2 + $0x22] sm:$0xff]  ;;  %v1631_v23 = vmul.f32 %v2753_v21, %v1548_v37 }
 0x395   : > { %v1540_v4 = vadd.f32 %v1532_v17, %v1515_v15  ;;  %v1582_v5 = vmul.f32 %v2739_v11, %v1573_v59  ;;  %v1614_v12 = vadd.f32 %v1606_v18, %v1589_v36  ;;  %v1508_v47 = vmul.f32 %v1573_v59, %v2726_v43 }
 0x396   : > { %v1426_v24 = vpop.f32.mrf.mxu0  ;;  %v1491_v40 = vadd.f32 %v1483_v51, %v1466_v60  ;;  %v1656_v8 = vmul.f32 %v2759_v56, %v1573_v59 }
 0x397   : > { %v1427_v33 = vadd.f32 %v2708_v50, %v1426_v24  ;;  %v1565_v48 = vadd.f32 %v1557_v19, %v1540_v4  ;;  %v1639_v62 = vadd.f32 %v1631_v23, %v1614_v12 }
 0x398   : > { %v1516_v54 = vadd.f32 %v1508_v47, %v1491_v40 }
 0x399   : > { %v1442_v63 = vmax.f32 %v1427_v33, 0.0  ;;  %v1590_v57 = vadd.f32 %v1582_v5, %v1565_v48  ;;  %v1664_v42 = vadd.f32 %v1656_v8, %v1639_v62 }
 0x39a   : > { %v1598_v13 = vld [vmem:[#allocation2 + $0x30] sm:$0xff] }
 0x39b   : > { %v1623_v10 = vld [vmem:[#allocation2 + $0x31] sm:$0xff]  ;;  %1450 = vst.msk [vmem:[#allocation2 + $0x41] sm:$0xff] %vm523_vm2, %v1442_v63  ;;  %v1607_v3 = vmul.f32 %v2743_v45, %v1598_v13  ;;  %v1467_v14 = vmul.f32 %v1598_v13, %v2714_v39  ;;  %v1533_v58 = vmul.f32 %v1598_v13, %v2730_v2 }
 0x39c   : > { %v1648_v49 = vld [vmem:[#allocation2 + $0x32] sm:$0xff]  ;;  %v1484_v0 = vmul.f32 %v1623_v10, %v2716_v44  ;;  %v1632_v61 = vmul.f32 %v2753_v21, %v1623_v10  ;;  %v1558_v9 = vmul.f32 %v1623_v10, %v2736_v32 }
 0x39d   : > { %v1615_v1 = vadd.f32 %v1607_v3, %v1590_v57  ;;  %v1541_v30 = vadd.f32 %v1533_v58, %v1516_v54  ;;  %v1657_v7 = vmul.f32 %v2759_v56, %v1648_v49  ;;  %v1509_v46 = vmul.f32 %v1648_v49, %v2726_v43 }
 0x39e   : > { %v1429_v38 = vpop.f32.mrf.mxu0  ;;  %v1492_v52 = vadd.f32 %v1484_v0, %v1467_v14  ;;  %v1583_v60 = vmul.f32 %v1648_v49, %v2739_v11 }
 0x39f   : > { %v1430_v26 = vadd.f32 %v2708_v50, %v1429_v38  ;;  %v1640_v29 = vadd.f32 %v1632_v61, %v1615_v1  ;;  %v1566_v37 = vadd.f32 %v1558_v9, %v1541_v30 }
 0x3a0   : > { %v1517_v17 = vadd.f32 %v1509_v46, %v1492_v52 }
 0x3a1   : > { %v1443_v55 = vmax.f32 %v1430_v26, 0.0  ;;  %v1665_v6 = vadd.f32 %v1657_v7, %v1640_v29  ;;  %v1591_v33 = vadd.f32 %v1583_v60, %v1566_v37 }
 0x3a2   : > { %v1525_v31 = vld [vmem:[#allocation2 + $0x40] sm:$0xff] }
 0x3a3   : > { %v1550_v20 = vld [vmem:[#allocation2 + $0x41] sm:$0xff]  ;;  %1451 = vst.msk [vmem:[#allocation2 + $0x51] sm:$0xff] %vm523_vm2, %v1443_v55  ;;  %v1672_v15 = vpack.c.bf16 %v1665_v6, %v1664_v42  ;;  %v1534_v22 = vmul.f32 %v2730_v2, %v1525_v31  ;;  %v1608_v51 = vmul.f32 %v2743_v45, %v1525_v31  ;;  %v1468_v53 = vmul.f32 %v1525_v31, %v2714_v39 }
 0x3a4   : > { %v1559_v19 = vmul.f32 %v2736_v32, %v1550_v20  ;;  %v1485_v18 = vmul.f32 %v1550_v20, %v2716_v44  ;;  %v1575_v59 = vld [vmem:[#allocation2 + $0x42] sm:$0xff]  ;;  %v1633_v47 = vmul.f32 %v2753_v21, %v1550_v20 }
 0x3a5   : > { %1944 = vmatmul.msk.bf16.vlgmr.msrb.gmra.mxu1 %vm523_vm2, %v1672_v15  ;;  %v1542_v4 = vadd.f32 %v1534_v22, %v1517_v17  ;;  %v1616_v40 = vadd.f32 %v1608_v51, %v1591_v33  ;;  %v1584_v5 = vmul.f32 %v2739_v11, %v1575_v59  ;;  %v1510_v49 = vmul.f32 %v1575_v59, %v2726_v43 }
 0x3a6   : > { %v1431_v24 = vpop.f32.mrf.mxu0  ;;  %v1493_v12 = vadd.f32 %v1485_v18, %v1468_v53  ;;  %v1658_v8 = vmul.f32 %v2759_v56, %v1575_v59 }
 0x3a7   : > { %v1432_v48 = vadd.f32 %v2708_v50, %v1431_v24  ;;  %v1567_v36 = vadd.f32 %v1559_v19, %v1542_v4  ;;  %v1641_v0 = vadd.f32 %v1633_v47, %v1616_v40 }
 0x3a8   : > { %v1518_v62 = vadd.f32 %v1510_v49, %v1493_v12 }
 0x3a9   : > { %v1444_v63 = vmax.f32 %v1432_v48, 0.0  ;;  %v1592_v57 = vadd.f32 %v1584_v5, %v1567_v36  ;;  %v1666_v9 = vadd.f32 %v1658_v8, %v1641_v0 }
 0x3aa   : > { %v1600_v13 = vld [vmem:[#allocation2 + $0x50] sm:$0xff] }
 0x3ab   : > { %v1625_v10 = vld [vmem:[#allocation2 + $0x51] sm:$0xff]  ;;  %1452 = vst.msk [vmem:[#allocation2 + $0x61] sm:$0xff] %vm523_vm2, %v1444_v63  ;;  %v1609_v3 = vmul.f32 %v2743_v45, %v1600_v13  ;;  %v1469_v14 = vmul.f32 %v1600_v13, %v2714_v39  ;;  %v1535_v58 = vmul.f32 %v1600_v13, %v2730_v2 }
 0x3ac   : > { %v1650_v23 = vld [vmem:[#allocation2 + $0x52] sm:$0xff]  ;;  %v1486_v54 = vmul.f32 %v1625_v10, %v2716_v44  ;;  %v1634_v61 = vmul.f32 %v2753_v21, %v1625_v10  ;;  %v1560_v46 = vmul.f32 %v1625_v10, %v2736_v32 }
 0x3ad   : > { %v1617_v1 = vadd.f32 %v1609_v3, %v1592_v57  ;;  %v1659_v30 = vmul.f32 %v2759_v56, %v1650_v23  ;;  %v1543_v52 = vadd.f32 %v1535_v58, %v1518_v62  ;;  %v1511_v6 = vmul.f32 %v1650_v23, %v2726_v43 }
 0x3ae   : > { %v1434_v38 = vpop.f32.mrf.mxu0  ;;  %v1494_v7 = vadd.f32 %v1486_v54, %v1469_v14  ;;  %v1585_v51 = vmul.f32 %v1650_v23, %v2739_v11 }
 0x3af   : > { %v1435_v26 = vadd.f32 %v2708_v50, %v1434_v38  ;;  %v1642_v29 = vadd.f32 %v1634_v61, %v1617_v1  ;;  %v1568_v22 = vadd.f32 %v1560_v46, %v1543_v52 }
 0x3b0   : > { %v1519_v15 = vadd.f32 %v1511_v6, %v1494_v7 }
 0x3b1   : > { %v1445_v55 = vmax.f32 %v1435_v26, 0.0  ;;  %v1667_v42 = vadd.f32 %v1659_v30, %v1642_v29  ;;  %v1593_v36 = vadd.f32 %v1585_v51, %v1568_v22  ;;  %v1629_v22 = vld [vmem:[#allocation2 + $0x91] sm:$0xff] }
 0x3b2   : > { %v1527_v31 = vld [vmem:[#allocation2 + $0x60] sm:$0xff] }
 0x3b3   : > { %v1552_v20 = vld [vmem:[#allocation2 + $0x61] sm:$0xff]  ;;  %1453 = vst.msk [vmem:[#allocation2 + $0x71] sm:$0xff] %vm523_vm2, %v1445_v55  ;;  %v1673_v37 = vpack.c.bf16 %v1667_v42, %v1666_v9  ;;  %v1536_v17 = vmul.f32 %v2730_v2, %v1527_v31  ;;  %v1610_v19 = vmul.f32 %v2743_v45, %v1527_v31  ;;  %v1470_v53 = vmul.f32 %v1527_v31, %v2714_v39 }
 0x3b4   : > { %v1561_v60 = vmul.f32 %v2736_v32, %v1552_v20  ;;  %v1487_v18 = vmul.f32 %v1552_v20, %v2716_v44  ;;  %v1577_v59 = vld [vmem:[#allocation2 + $0x62] sm:$0xff]  ;;  %v1635_v47 = vmul.f32 %v2753_v21, %v1552_v20  ;;  %v1604_v20 = vld [vmem:[#allocation2 + $0x90] sm:$0xff] }
 0x3b5   : > { %1945 = vmatmul.msk.bf16.gmra.mxu1 %vm523_vm2, %v1673_v37  ;;  %v1544_v4 = vadd.f32 %v1536_v17, %v1519_v15  ;;  %v1586_v63 = vmul.f32 %v2739_v11, %v1577_v59  ;;  %v1618_v5 = vadd.f32 %v1610_v19, %v1593_v36  ;;  %v1660_v62 = vmul.f32 %v2759_v56, %v1577_v59 }
 0x3b6   : > { %v1436_v24 = vpop.f32.mrf.mxu0  ;;  %v1495_v12 = vadd.f32 %v1487_v18, %v1470_v53  ;;  %v1613_v19 = vmul.f32 %v2743_v45, %v1604_v20 }
 0x3b7   : > { %v1437_v33 = vadd.f32 %v2708_v50, %v1436_v24  ;;  %v1569_v48 = vadd.f32 %v1561_v60, %v1544_v4  ;;  %v1512_v50 = vmul.f32 %v1577_v59, %v2726_v43  ;;  %v1643_v1 = vadd.f32 %v1635_v47, %v1618_v5 }
 0x3b8   : > { %v1638_v24 = vmul.f32 %v2753_v21, %v1629_v22 }
 0x3b9   : > { %v1446_v40 = vmax.f32 %v1437_v33, 0.0  ;;  %v1594_v57 = vadd.f32 %v1586_v63, %v1569_v48  ;;  %v1520_v61 = vadd.f32 %v1512_v50, %v1495_v12 }
 0x3ba   : > { %v1602_v13 = vld [vmem:[#allocation2 + $0x70] sm:$0xff] }
 0x3bb   : > { %v1627_v10 = vld [vmem:[#allocation2 + $0x71] sm:$0xff]  ;;  %1454 = vst.msk [vmem:[#allocation2 + $0x81] sm:$0xff] %vm523_vm2, %v1446_v40  ;;  %v1611_v3 = vmul.f32 %v2743_v45, %v1602_v13  ;;  %v1471_v23 = vmul.f32 %v1602_v13, %v2714_v39  ;;  %v1537_v0 = vmul.f32 %v1602_v13, %v2730_v2  ;;  %v1668_v39 = vadd.f32 %v1660_v62, %v1643_v1 }
 0x3bc   : > { %v1652_v14 = vld [vmem:[#allocation2 + $0x72] sm:$0xff]  ;;  %v1488_v49 = vmul.f32 %v1627_v10, %v2716_v44  ;;  %v1636_v58 = vmul.f32 %v2753_v21, %v1627_v10  ;;  %v1562_v44 = vmul.f32 %v1627_v10, %v2736_v32 }
 0x3bd   : > { %v1619_v54 = vadd.f32 %v1611_v3, %v1594_v57  ;;  %v1661_v8 = vmul.f32 %v2759_v56, %v1652_v14  ;;  %v1545_v26 = vadd.f32 %v1537_v0, %v1520_v61  ;;  %v1513_v7 = vmul.f32 %v1652_v14, %v2726_v43 }
 0x3be   : > { %v1496_v30 = vadd.f32 %v1488_v49, %v1471_v23  ;;  %v1587_v17 = vmul.f32 %v1652_v14, %v2739_v11 }
 0x3bf   : > { %v1644_v38 = vadd.f32 %v1636_v58, %v1619_v54  ;;  %v1570_v46 = vadd.f32 %v1562_v44, %v1545_v26 }
 0x3c0   : > { %v1521_v42 = vadd.f32 %v1513_v7, %v1496_v30  ;;  %v1742_v7 = vpop.permute.xlu1 %1741 }
 0x3c1   : > { %v1669_v29 = vadd.f32 %v1661_v8, %v1644_v38  ;;  %v1595_v4 = vadd.f32 %v1587_v17, %v1570_v46 }
 0x3c2   : > { %v1529_v52 = vld [vmem:[#allocation2 + $0x80] sm:$0xff] }
 0x3c3   : > { %v1554_v9 = vld [vmem:[#allocation2 + $0x81] sm:$0xff]  ;;  %v1674_v55 = vpack.c.bf16 %v1669_v29, %v1668_v39  ;;  %v1538_v6 = vmul.f32 %v2730_v2, %v1529_v52  ;;  %v1612_v43 = vmul.f32 %v2743_v45, %v1529_v52  ;;  %v1654_v2 = vld [vmem:[#allocation2 + $0x92] sm:$0xff]  ;;  %v2037_v45 = vld [vmem:[%s2911_s15] ss:$0 sm:$0xff] }
 0x3c4   : > { %v1579_v31 = vld [vmem:[#allocation2 + $0x82] sm:$0xff]  ;;  %v1563_v15 = vmul.f32 %v2736_v32, %v1554_v9  ;;  %v1637_v33 = vmul.f32 %v2753_v21, %v1554_v9  ;;  %v1663_v32 = vmul.f32 %v2759_v56, %v1654_v2  ;;  %v1774_v9 = vpop.permute.xlu0 %1773 }
 0x3c5   : > { %1946 = vmatmul.msk.bf16.gmra.mxu1 %vm523_vm2, %v1674_v55  ;;  %v1546_v37 = vadd.f32 %v1538_v6, %v1521_v42  ;;  %v1588_v51 = vmul.f32 %v2739_v11, %v1579_v31  ;;  %v1620_v18 = vadd.f32 %v1612_v43, %v1595_v4  ;;  %v1662_v40 = vmul.f32 %v2759_v56, %v1579_v31  ;;  %v2039_v55 = vld [vmem:[%s2162_s27 + $0x8] sm:$0xff]  ;;  %v2041_v4 = vld [vmem:[%s2162_s27 + $0x20] sm:$0xff] }
 0x3c6   : > { %v1828_v42 = vsel %vm1006_vm5, %v2039_v55, %v1742_v7 }
 0x3c7   : > { %v1571_v60 = vadd.f32 %v1563_v15, %v1546_v37  ;;  %v1645_v48 = vadd.f32 %v1637_v33, %v1620_v18  ;;  %v1836_v6 = vsel %vm621_vm1, %v1828_v42, %v1774_v9  ;;  %v2040_v15 = vld [vmem:[%s2162_s27] sm:$0xff] }
 0x3c8   : > { %v1748_v44 = vpop.permute.xlu1 %1747  ;;  %v1827_v17 = vsel %vm1006_vm5, %v2040_v15, %v2697_v25 }
 0x3c9   : > { %v1596_v53 = vadd.f32 %v1588_v51, %v1571_v60  ;;  %v1670_v5 = vadd.f32 %v1662_v40, %v1645_v48  ;;  %v1835_v43 = vsel %vm621_vm1, %v1827_v17, %v2699_v34  ;;  %v2042_v34 = vld [vmem:[%s2162_s27 + $0x10] sm:$0xff]  ;;  %v2043_v48 = vld [vmem:[%s2162_s27 + $0x18] sm:$0xff] }
 0x3cb   : > { %v1621_v59 = vadd.f32 %v1613_v19, %v1596_v53  ;;  %v1831_v19 = vsel %vm1006_vm5, %v2041_v4, %v1748_v44 }
 0x3cc   : > { %v1780_v22 = vpop.permute.xlu0 %1779 }
 0x3cd   : > { %v1646_v36 = vadd.f32 %v1638_v24, %v1621_v59  ;;  %v1839_v2 = vsel %vm621_vm1, %v1831_v19, %v1780_v22  ;;  %v1829_v24 = vsel %vm1006_vm5, %v2042_v34, %v2689_v27 }
 0x3cf   : > { %v1671_v63 = vadd.f32 %v1663_v32, %v1646_v36  ;;  %v1830_v36 = vsel %vm1006_vm5, %v2043_v48, %v2701_v41  ;;  %v2045_v41 = vld [vmem:[%s2162_s27 + $0x28] sm:$0xff] }
 0x3d0   : > { %v1754_v52 = vpop.permute.xlu1 %1753  ;;  %v1838_v40 = vsel %vm621_vm1, %v1830_v36, %v2703_v28  ;;  %v1832_v28 = vsel %vm1006_vm5, %v2045_v41, %v2695_v35 }
 0x3d1   : > { %v1675_v11 = vpack.c.bf16 %v1671_v63, %v1670_v5  ;;  %v2044_v5 = vld [vmem:[%s2162_s27 + $0x38] sm:$0xff] }
 0x3d4   : > { %v1786_v53 = vpop.permute.xlu0 %1785 }
 0x3d5   : > { %1947 = vmatmul.msk.bf16.gmra.mxu1 %vm523_vm2, %v1675_v11  ;;  %v1834_v11 = vsel %vm1006_vm5, %v2044_v5, %v1754_v52 }
 0x3d8   : > { %v1776_v46 = vpop.permute.xlu1 %1775 }
 0x3d9   : > { %v1837_v59 = vsel %vm621_vm1, %v1829_v24, %v1776_v46 }
 0x3e0   : > { %v1782_v37 = vpop.permute.xlu1 %1781 }
 0x422   : > { %v1703_v12 = vpop.f32.mrf.mxu1 }
 0x423   : > { %v1704_v13 = vadd.f32 %v2037_v45, %v1703_v12 }
 0x425   : > { %v1723_v10 = vmax.f32 %v1704_v13, 0.0 }
 0x427   : > { %1803 = vrot.lane.b32.xlu1 %v1723_v10, %s2060_s24  ;;  %v1840_v10 = vsel %vm621_vm1, %v1832_v28, %v1782_v37 }
 0x42a   : > { %v1705_v21 = vpop.f32.mrf.mxu1 }
 0x42b   : > { %v1706_v47 = vadd.f32 %v2037_v45, %v1705_v21 }
 0x42d   : > { %v1724_v57 = vmax.f32 %v1706_v47, 0.0 }
 0x42f   : > { %1805 = vrot.lane.b32.xlu2 %v1724_v57, %s2060_s24 }
 0x432   : > { %v1708_v3 = vpop.f32.mrf.mxu1 }
 0x433   : > { %v1709_v56 = vadd.f32 %v2037_v45, %v1708_v3 }
 0x435   : > { %v1725_v23 = vmax.f32 %v1709_v56, 0.0 }
 0x437   : > { %1807 = vrot.lane.b32.xlu0 %v1725_v23, %s2060_s24 }
 0x43a   : > { %v1710_v50 = vpop.f32.mrf.mxu1 }
 0x43b   : > { %v1711_v14 = vadd.f32 %v2037_v45, %v1710_v50 }
 0x43d   : > { %v1726_v49 = vmax.f32 %v1711_v14, 0.0 }
 0x43f   : > { %1809 = vrot.lane.b32.xlu1 %v1726_v49, %s2060_s24 }
 0x442   : > { %v1713_v0 = vpop.f32.mrf.mxu1 }
 0x443   : > { %v1714_v54 = vadd.f32 %v2037_v45, %v1713_v0 }
 0x445   : > { %v1727_v58 = vmax.f32 %v1714_v54, 0.0 }
 0x447   : > { %1811 = vrot.lane.b32.xlu2 %v1727_v58, %s2060_s24 }
 0x44a   : > { %v1715_v1 = vpop.f32.mrf.mxu1 }
 0x44b   : > { %v1716_v61 = vadd.f32 %v2037_v45, %v1715_v1 }
 0x44d   : > { %v1728_v62 = vmax.f32 %v1716_v61, 0.0 }
 0x44f   : > { %1813 = vrot.lane.b32.xlu0 %v1728_v62, %s2060_s24 }
 0x452   : > { %v1718_v38 = vpop.f32.mrf.mxu1 }
 0x453   : > { %v1719_v8 = vadd.f32 %v2037_v45, %v1718_v38 }
 0x455   : > { %v1729_v30 = vmax.f32 %v1719_v8, 0.0 }
 0x457   : > { %1815 = vrot.lane.b32.xlu1 %v1729_v30, %s2060_s24 }
 0x45a   : > { %v1720_v26 = vpop.f32.mrf.mxu1 }
 0x45b   : > { %v1721_v39 = vadd.f32 %v2037_v45, %v1720_v26  ;;  %v1842_v45 = vsel %vm621_vm1, %v1834_v11, %v1786_v53 }
 0x45d   : > { %v1730_v29 = vmax.f32 %v1721_v39, 0.0 }
 0x45f   : > { %1817 = vrot.lane.b32.xlu2 %v1730_v29, %s2060_s24 }
 0x489   : > { %v1806_v31 = vpop.permute.xlu2 %1805 }
 0x48a   : > { %v1844_v20 = vsel %vm523_vm2, %v1836_v6, %v1806_v31 }
 0x48b   : > { %1853 = vst.msk [vmem:[%s2841_s28 + $0x8] sm:$0xff] %vm1851_vm6, %v1844_v20 }
 0x499   : > { %v1804_v60 = vpop.permute.xlu1 %1803 }
 0x49a   : > { %v1843_v51 = vsel %vm523_vm2, %v1835_v43, %v1804_v60 }
 0x49b   : > { %1852 = vst.msk [vmem:[%s2841_s28] sm:$0xff] %vm1851_vm6, %v1843_v51 }
 0x4a1   : > { %v1812_v25 = vpop.permute.xlu2 %1811 }
 0x4a2   : > { %v1847_v18 = vsel %vm523_vm2, %v1839_v2, %v1812_v25 }
 0x4a3   : > { %1856 = vst.msk [vmem:[%s2841_s28 + $0x20] sm:$0xff] %vm1851_vm6, %v1847_v18 }
 0x4a9   : > { %v1808_v33 = vpop.permute.xlu0 %1807 }
 0x4aa   : > { %v1845_v32 = vsel %vm523_vm2, %v1837_v59, %v1808_v33 }
 0x4ab   : > { %1854 = vst.msk [vmem:[%s2841_s28 + $0x10] sm:$0xff] %vm1851_vm6, %v1845_v32 }
 0x4b1   : > { %v1810_v63 = vpop.permute.xlu1 %1809 }
 0x4b2   : > { %v1846_v27 = vsel %vm523_vm2, %v1838_v40, %v1810_v63 }
 0x4b3   : > { %1855 = vst.msk [vmem:[%s2841_s28 + $0x18] sm:$0xff] %vm1851_vm6, %v1846_v27 }
 0x4b9   : > { %v1818_v12 = vpop.permute.xlu2 %1817 }
 0x4ba   : > { %v1850_v13 = vsel %vm523_vm2, %v1842_v45, %v1818_v12 }
 0x4bb   : > { %1859 = vst.msk [vmem:[%s2841_s28 + $0x38] sm:$0xff] %vm1851_vm6, %v1850_v13 }
 0x4c1   : > { %v1814_v21 = vpop.permute.xlu0 %1813 }
 0x4c2   : > { %v1848_v47 = vsel %vm523_vm2, %v1840_v10, %v1814_v21 }
 0x4c3   : > { %1857 = vst.msk [vmem:[%s2841_s28 + $0x28] sm:$0xff] %vm1851_vm6, %v1848_v47 }
 0x4c9   : > { %v1816_v57 = vpop.permute.xlu1 %1815 }
 0x4ca   : > { %v1849_v3 = vsel %vm523_vm2, %v2721_v16, %v1816_v57 }
 0x4cb   : > { %1858 = vst.msk [vmem:[%s2841_s28 + $0x30] sm:$0xff] %vm1851_vm6, %v1849_v3 }
 0x4cc PF: > { %s26_s21 = sadd.s32 1, %s2052_s21  }
 0x4cd   : > { %p23_p4 = scmp.ge.s32.totalorder %s26_s21, 4  }
 0x4cf   :  { %25 = sbr.rel (!%p23_p4) target bundleno = 2 (0x2), region = 117 }

</bundles_post_ra>
